<compile_context>
chip_gen: v5e
topology: v5e:2x2
jax: 0.10.0
libtpu: 0.0.40
codegen_flags: <defaults>
</compile_context>

<pallas_src>
import math
import functools

import jax
import jax.numpy as jnp
from jax.experimental import pallas as pl
from jax.experimental.pallas import tpu as pltpu


def _round_up(x, m):
    return ((x + m - 1) // m) * m


# ----------------------------------------------------------------------------
# Fused kernel: one grid step == B_TILE images, everything VMEM-resident.
# ----------------------------------------------------------------------------
def _fused_se_bottleneck_kernel(x_ref, w1_ref, b1_ref, w2_ref, b2_ref,
                                w3_ref, b3_ref, fc1w_ref, fc1b_ref,
                                fc2w_ref, fc2b_ref, o_ref,
                                pad_ref, col_ref, *, H, W, pad_off):
    # x_ref:   (B, H*W, Cin)            bf16
    # w1_ref:  (Cin, DC)                bf16 (BN1 scale folded)
    # w2_ref:  (9*DC, DC)               bf16 (block-diag grouped 3x3, BN2 folded)
    # w3_ref:  (DC, Cout)               bf16 (BN3 scale folded)
    # b*_ref:  (1, ch)                  f32
    # fc*w:    SE weights               bf16 ; fc*b biases f32
    # o_ref:   (B, H*W, Cout)           bf16
    # pad_ref: (B, H+2, WP, DC)         bf16 VMEM scratch (zero-halo buffer)
    # col_ref: (B*H*W, 9*DC)            bf16 VMEM scratch (im2col buffer)
    B = x_ref.shape[0]
    Cin = x_ref.shape[2]
    M = H * W
    BM = B * M
    DC = w1_ref.shape[1]
    Cout = w3_ref.shape[1]

    x2d = x_ref[...].reshape(BM, Cin)                              # (BM, Cin) bf16

    # --- conv1 (1x1) + folded bn1 + relu: one batched MXU matmul --------------
    y1 = jnp.dot(x2d, w1_ref[...], preferred_element_type=jnp.float32)
    y1 = jnp.maximum(y1 + b1_ref[...], 0.0)                        # (BM, DC) f32

    # --- zero ONLY the halo of the pad scratch (interior fully overwritten) ---
    # Column zeroes are 2 wide and start at even offsets so every bf16 store is
    # 32-bit-container aligned (no packed partial stores).
    zcol = jnp.zeros((B, H + 2, 2, DC), pad_ref.dtype)
    pad_ref[:, :, pad_off - 2:pad_off, :] = zcol
    pad_ref[:, :, pad_off + W:pad_off + W + 2, :] = zcol
    zrow = jnp.zeros((B, 1, W, DC), pad_ref.dtype)
    pad_ref[:, 0:1, pad_off:pad_off + W, :] = zrow
    pad_ref[:, H + 1:H + 2, pad_off:pad_off + W, :] = zrow

    # Interior store (bf16), starting at sublane column pad_off (multiple of 16).
    pad_ref[:, 1:H + 1, pad_off:pad_off + W, :] = (
        y1.astype(pad_ref.dtype).reshape(B, H, W, DC))

    # --- im2col into a bf16 scratch, then ONE K=9*DC grouped-conv matmul ------
    for t in range(9):
        dy, dx = t // 3, t % 3
        c0 = pad_off - 1 + dx
        col_ref[:, t * DC:(t + 1) * DC] = (
            pad_ref[:, dy:dy + H, c0:c0 + W, :].reshape(BM, DC))

    y2 = jnp.dot(col_ref[...], w2_ref[...], preferred_element_type=jnp.float32)
    y2 = jnp.maximum(y2 + b2_ref[...], 0.0)                        # (BM, DC) f32

    # --- conv3 (1x1) + folded bn3 (no relu yet) -------------------------------
    pre = jnp.dot(y2.astype(w3_ref.dtype), w3_ref[...],
                  preferred_element_type=jnp.float32) + b3_ref[...]  # (BM, Cout)

    # --- SE block: per-image avg pool -> fc1 -> relu -> fc2 -> sigmoid --------
    pre3 = pre.reshape(B, M, Cout)
    pooled = jnp.mean(pre3, axis=1)                                # (B, Cout) f32
    h = jnp.dot(pooled.astype(fc1w_ref.dtype), fc1w_ref[...],
                preferred_element_type=jnp.float32) + fc1b_ref[...]
    h = jnp.maximum(h, 0.0)
    s = jnp.dot(h.astype(fc2w_ref.dtype), fc2w_ref[...],
                preferred_element_type=jnp.float32) + fc2b_ref[...]
    s = jax.nn.sigmoid(s)                                          # (B, Cout) f32

    # --- SE scale + residual (downsample=None -> residual = x) + final relu ---
    res = x_ref[...].astype(jnp.float32)                           # Cin == Cout
    out = jnp.maximum(pre3 * s.reshape(B, 1, Cout) + res, 0.0)
    o_ref[...] = out.astype(o_ref.dtype)


def se_bottleneck_fused(x_flat, p, *, H, W, b_tile=4):
    N, M, Cin = x_flat.shape
    assert M == H * W
    assert N % b_tile == 0, "batch must be a multiple of b_tile"
    DC = p["w1"].shape[1]
    Cout = p["w3"].shape[1]
    mid = p["fc1_w"].shape[1]

    pad_off = 16                                    # bf16 (16,128)-aligned interior start
    WP = _round_up(pad_off + W + 2, 16)             # room for 2-col right halo zero

    kernel = functools.partial(_fused_se_bottleneck_kernel,
                               H=H, W=W, pad_off=pad_off)
    return pl.pallas_call(
        kernel,
        out_shape=jax.ShapeDtypeStruct((N, M, Cout), jnp.bfloat16),
        grid=(N // b_tile,),
        in_specs=[
            pl.BlockSpec((b_tile, M, Cin), lambda n: (n, 0, 0)),
            pl.BlockSpec((Cin, DC), lambda n: (0, 0)),
            pl.BlockSpec((1, DC), lambda n: (0, 0)),
            pl.BlockSpec((9 * DC, DC), lambda n: (0, 0)),
            pl.BlockSpec((1, DC), lambda n: (0, 0)),
            pl.BlockSpec((DC, Cout), lambda n: (0, 0)),
            pl.BlockSpec((1, Cout), lambda n: (0, 0)),
            pl.BlockSpec((Cout, mid), lambda n: (0, 0)),
            pl.BlockSpec((1, mid), lambda n: (0, 0)),
            pl.BlockSpec((mid, Cout), lambda n: (0, 0)),
            pl.BlockSpec((1, Cout), lambda n: (0, 0)),
        ],
        out_specs=pl.BlockSpec((b_tile, M, Cout), lambda n: (n, 0, 0)),
        scratch_shapes=[
            pltpu.VMEM((b_tile, H + 2, WP, DC), jnp.bfloat16),       # halo buffer
            pltpu.VMEM((b_tile * M, 9 * DC), jnp.bfloat16),          # im2col buffer
        ],
        compiler_params=pltpu.CompilerParams(
            dimension_semantics=("parallel",),
            vmem_limit_bytes=32 * 1024 * 1024),
    )(x_flat, p["w1"], p["b1"], p["w2"], p["b2"], p["w3"], p["b3"],
      p["fc1_w"], p["fc1_b"], p["fc2_w"], p["fc2_b"])


# ----------------------------------------------------------------------------
# Parameter construction (BN scales folded into conv weights, bf16 storage)
# ----------------------------------------------------------------------------
def fold_bn(gamma, beta, mean, var, eps=1e-5):
    scale = gamma / jnp.sqrt(var + eps)
    bias = beta - mean * scale
    return scale.reshape(1, -1), bias.reshape(1, -1)


def make_params(key, inplanes, planes, baseWidth, cardinality, reduction):
    D = int(math.floor(planes * (baseWidth / 64)))
    C = cardinality
    DC = D * C
    Cout = planes * 4
    mid = Cout // reduction

    ks = jax.random.split(key, 20)

    # conv1: 1x1, inplanes -> DC (stored as (Cin, Cout))
    w1 = jax.random.normal(ks[0], (inplanes, DC), jnp.float32) * 0.05
    # conv2: grouped 3x3, PyTorch weight (DC_out, D_in, 3, 3) -> block-diagonal
    # dense (3,3,DC,DC) -> im2col form (9*DC, DC), rows in (dy,dx)-major tap order.
    w2_torch = jax.random.normal(ks[1], (DC, D, 3, 3), jnp.float32) * 0.05
    w2_dense = jnp.zeros((3, 3, DC, DC), jnp.float32)
    for g in range(C):
        blk = jnp.transpose(w2_torch[g * D:(g + 1) * D], (2, 3, 1, 0))  # (3,3,Din,Dout)
        w2_dense = w2_dense.at[:, :, g * D:(g + 1) * D, g * D:(g + 1) * D].set(blk)
    # conv3: 1x1, DC -> Cout
    w3 = jax.random.normal(ks[2], (DC, Cout), jnp.float32) * 0.05

    # folded batchnorms (inference form)
    sc, bi = {}, {}
    for i, ch in zip((1, 2, 3), (DC, DC, Cout)):
        g = 1.0 + 0.1 * jax.random.normal(ks[3 + i], (ch,), jnp.float32)
        b = 0.1 * jax.random.normal(ks[6 + i], (ch,), jnp.float32)
        m = 0.1 * jax.random.normal(ks[9 + i], (ch,), jnp.float32)
        v = 0.5 + jnp.abs(jax.random.normal(ks[12 + i], (ch,), jnp.float32)) * 0.5
        sc[i], bi[i] = fold_bn(g, b, m, v)

    p = {}
    p["w1"] = (w1 * sc[1]).astype(jnp.bfloat16)
    p["b1"] = bi[1]
    p["w2"] = (w2_dense.reshape(9 * DC, DC) * sc[2]).astype(jnp.bfloat16)
    p["b2"] = bi[2]
    p["w3"] = (w3 * sc[3]).astype(jnp.bfloat16)
    p["b3"] = bi[3]

    # SE block FC layers (tiny; bf16 weights, f32 biases).
    p["fc1_w"] = (jax.random.normal(ks[16], (Cout, mid), jnp.float32) * 0.1).astype(jnp.bfloat16)
    p["fc1_b"] = jax.random.normal(ks[17], (1, mid), jnp.float32) * 0.1
    p["fc2_w"] = (jax.random.normal(ks[18], (mid, Cout), jnp.float32) * 0.1).astype(jnp.bfloat16)
    p["fc2_b"] = jax.random.normal(ks[19], (1, Cout), jnp.float32) * 0.1
    return p, DC, Cout


# ----------------------------------------------------------------------------
# Forward (wrapper: NCHW <-> NHWC, bf16 boundary) + pure-JAX reference
# ----------------------------------------------------------------------------
def se_bottleneck_forward(x_nchw, p, b_tile=4):
    N, Cin, H, W = x_nchw.shape
    Cout = p["w3"].shape[1]
    assert Cin == Cout, "downsample=None requires inplanes == planes * 4"
    xh = jnp.transpose(x_nchw, (0, 2, 3, 1)).astype(jnp.bfloat16)      # NCHW -> NHWC
    y = se_bottleneck_fused(xh.reshape(N, H * W, Cin), p, H=H, W=W,
                            b_tile=b_tile)                              # (N,H*W,Cout) bf16
    return jnp.transpose(y.reshape(N, H, W, Cout), (0, 3, 1, 2))        # -> NCHW bf16


def se_bottleneck_reference(x_nchw, p):
    """Pure-JAX reference mirroring the kernel's bf16 cast points (f32 output)."""
    f32 = lambda a: a.astype(jnp.float32)
    b16 = lambda a: a.astype(jnp.bfloat16)
    N, Cin, H, W = x_nchw.shape
    DC = p["w1"].shape[1]
    Cout = p["w3"].shape[1]
    xh = f32(b16(jnp.transpose(x_nchw, (0, 2, 3, 1))))
    x2d = xh.reshape(N, H * W, Cin)
    y1 = jnp.maximum(x2d @ f32(p["w1"]) + p["b1"], 0.0)
    y1 = f32(b16(y1))                                  # kernel stores y1 as bf16
    yp = jnp.pad(y1.reshape(N, H, W, DC), ((0, 0), (1, 1), (1, 1), (0, 0)))
    cols = [yp[:, dy:dy + H, dx:dx + W, :].reshape(N, H * W, DC)
            for dy in range(3) for dx in range(3)]
    x2 = jnp.concatenate(cols, axis=-1)
    y2 = jnp.maximum(x2 @ f32(p["w2"]) + p["b2"], 0.0)
    pre = f32(b16(y2)) @ f32(p["w3"]) + p["b3"]
    pooled = jnp.mean(pre, axis=1, keepdims=True)
    h = jnp.maximum(f32(b16(pooled)) @ f32(p["fc1_w"]) + p["fc1_b"], 0.0)
    s = jax.nn.sigmoid(f32(b16(h)) @ f32(p["fc2_w"]) + p["fc2_b"])
    out = jnp.maximum(pre * s + x2d, 0.0)
    return jnp.transpose(out.reshape(N, H, W, Cout), (0, 3, 1, 2))


if __name__ == "__main__":
    # SEBottleneck(inplanes=128, planes=32, baseWidth=64, cardinality=4,
    #              stride=1, downsample=None, reduction=16)
    inplanes, planes, baseWidth, cardinality, reduction = 128, 32, 64, 4, 16
    # N=8 with B_TILE=4 -> 256 matmul rows per step and a grid of 2 (even, so both
    # v7x TensorCores are used; also fine on single-TC v5e/v6e).
    N, H, W = 8, 8, 8

    key = jax.random.PRNGKey(0)
    kx, kp = jax.random.split(key)
    x = jax.random.normal(kx, (N, inplanes, H, W), jnp.float32)   # NCHW like PyTorch

    params, DC, Cout = make_params(kp, inplanes, planes, baseWidth,
                                   cardinality, reduction)

    out = jax.block_until_ready(se_bottleneck_forward(x, params, b_tile=4))
    assert out.shape == (N, planes * 4, H, W)
    assert bool(jnp.all(out >= 0.0))                              # final ReLU

    ref = jax.block_until_ready(se_bottleneck_reference(x, params))
    assert bool(jnp.allclose(out.astype(jnp.float32), ref, rtol=2e-2, atol=2e-2))

    print("KERNEL_OK")
</pallas_src>

<mosaic_0001>
module attributes {stable_mosaic.version = 11 : i64} {
  func.func @_fused_se_bottleneck_kernel(%arg0: i32, %arg1: memref<4x64x128xbf16, #tpu.memory_space<vmem>>, %arg2: memref<128x128xbf16, #tpu.memory_space<vmem>>, %arg3: memref<1x128xf32, #tpu.memory_space<vmem>>, %arg4: memref<1152x128xbf16, #tpu.memory_space<vmem>>, %arg5: memref<1x128xf32, #tpu.memory_space<vmem>>, %arg6: memref<128x128xbf16, #tpu.memory_space<vmem>>, %arg7: memref<1x128xf32, #tpu.memory_space<vmem>>, %arg8: memref<128x8xbf16, #tpu.memory_space<vmem>>, %arg9: memref<1x8xf32, #tpu.memory_space<vmem>>, %arg10: memref<8x128xbf16, #tpu.memory_space<vmem>>, %arg11: memref<1x128xf32, #tpu.memory_space<vmem>>, %arg12: memref<4x64x128xbf16, #tpu.memory_space<vmem>>, %arg13: memref<4x10x32x128xbf16, #tpu.memory_space<vmem>>, %arg14: memref<256x1152xbf16, #tpu.memory_space<vmem>>) attributes {dimension_semantics = [#tpu.dimension_semantics<parallel>], iteration_bounds = array<i64: 2>, scalar_prefetch = 0 : i64, scratch_operands = 2 : i64, tpu.core_type = #tpu.core_type<tc>, window_params = [{transform_indices = @transform_0, window_bounds = array<i64: 4, 64, 128>}, {pipeline_mode = #tpu.pipeline_mode<synchronous>, transform_indices = @transform_1, window_bounds = array<i64: 128, 128>}, {pipeline_mode = #tpu.pipeline_mode<synchronous>, transform_indices = @transform_2, window_bounds = array<i64: 1, 128>}, {pipeline_mode = #tpu.pipeline_mode<synchronous>, transform_indices = @transform_3, window_bounds = array<i64: 1152, 128>}, {pipeline_mode = #tpu.pipeline_mode<synchronous>, transform_indices = @transform_4, window_bounds = array<i64: 1, 128>}, {pipeline_mode = #tpu.pipeline_mode<synchronous>, transform_indices = @transform_5, window_bounds = array<i64: 128, 128>}, {pipeline_mode = #tpu.pipeline_mode<synchronous>, transform_indices = @transform_6, window_bounds = array<i64: 1, 128>}, {pipeline_mode = #tpu.pipeline_mode<synchronous>, transform_indices = @transform_7, window_bounds = array<i64: 128, 8>}, {pipeline_mode = #tpu.pipeline_mode<synchronous>, transform_indices = @transform_8, window_bounds = array<i64: 1, 8>}, {pipeline_mode = #tpu.pipeline_mode<synchronous>, transform_indices = @transform_9, window_bounds = array<i64: 8, 128>}, {pipeline_mode = #tpu.pipeline_mode<synchronous>, transform_indices = @transform_10, window_bounds = array<i64: 1, 128>}, {transform_indices = @transform_11, window_bounds = array<i64: 4, 64, 128>}]} {
    %c0 = arith.constant 0 : index
    %c0_0 = arith.constant 0 : index
    %c0_1 = arith.constant 0 : index
    %0 = vector.load %arg1[%c0, %c0_0, %c0_1] : memref<4x64x128xbf16, #tpu.memory_space<vmem>>, vector<4x64x128xbf16>
    %1 = vector.shape_cast %0 : vector<4x64x128xbf16> to vector<256x128xbf16>
    %c0_2 = arith.constant 0 : index
    %c0_3 = arith.constant 0 : index
    %2 = vector.load %arg2[%c0_2, %c0_3] : memref<128x128xbf16, #tpu.memory_space<vmem>>, vector<128x128xbf16>
    %cst = arith.constant dense<0.000000e+00> : vector<256x128xf32>
    %3 = tpu.matmul %1, %2, %cst {dimension_numbers = #tpu.dot_dimension_numbers<[1], [0], [0], [1], [0, 0, 1, 1], [], []>} : vector<256x128xbf16>, vector<128x128xbf16>, vector<256x128xf32> -> vector<256x128xf32>
    %c0_4 = arith.constant 0 : index
    %c0_5 = arith.constant 0 : index
    %4 = vector.load %arg3[%c0_4, %c0_5] : memref<1x128xf32, #tpu.memory_space<vmem>>, vector<1x128xf32>
    %5 = vector.broadcast %4 : vector<1x128xf32> to vector<256x128xf32>
    %6 = arith.addf %3, %5 : vector<256x128xf32>
    %cst_6 = arith.constant 0.000000e+00 : f32
    %7 = vector.broadcast %cst_6 : f32 to vector<256x128xf32>
    %8 = arith.maximumf %6, %7 : vector<256x128xf32>
    %cst_7 = arith.constant 0.000000e+00 : bf16
    %9 = vector.broadcast %cst_7 : bf16 to vector<4x10x2x128xbf16>
    %c0_8 = arith.constant 0 : index
    %c0_9 = arith.constant 0 : index
    %c14 = arith.constant 14 : index
    %c0_10 = arith.constant 0 : index
    %10 = vector.load %arg13[%c0_8, %c0_9, %c14, %c0_10] : memref<4x10x32x128xbf16, #tpu.memory_space<vmem>>, vector<4x10x2x128xbf16>
    tpu.vector_store %arg13[%c0_8, %c0_9, %c14, %c0_10], %9 {strides = array<i32>} : memref<4x10x32x128xbf16, #tpu.memory_space<vmem>>, vector<4x10x2x128xbf16>,
    %c0_11 = arith.constant 0 : index
    %c0_12 = arith.constant 0 : index
    %c24 = arith.constant 24 : index
    %c0_13 = arith.constant 0 : index
    %11 = vector.load %arg13[%c0_11, %c0_12, %c24, %c0_13] : memref<4x10x32x128xbf16, #tpu.memory_space<vmem>>, vector<4x10x2x128xbf16>
    tpu.vector_store %arg13[%c0_11, %c0_12, %c24, %c0_13], %9 {strides = array<i32>} : memref<4x10x32x128xbf16, #tpu.memory_space<vmem>>, vector<4x10x2x128xbf16>,
    %cst_14 = arith.constant 0.000000e+00 : bf16
    %12 = vector.broadcast %cst_14 : bf16 to vector<4x1x8x128xbf16>
    %c0_15 = arith.constant 0 : index
    %c0_16 = arith.constant 0 : index
    %c16 = arith.constant 16 : index
    %c0_17 = arith.constant 0 : index
    %13 = vector.load %arg13[%c0_15, %c0_16, %c16, %c0_17] : memref<4x10x32x128xbf16, #tpu.memory_space<vmem>>, vector<4x1x8x128xbf16>
    tpu.vector_store %arg13[%c0_15, %c0_16, %c16, %c0_17], %12 {strides = array<i32>} : memref<4x10x32x128xbf16, #tpu.memory_space<vmem>>, vector<4x1x8x128xbf16>,
    %c0_18 = arith.constant 0 : index
    %c9 = arith.constant 9 : index
    %c16_19 = arith.constant 16 : index
    %c0_20 = arith.constant 0 : index
    %14 = vector.load %arg13[%c0_18, %c9, %c16_19, %c0_20] : memref<4x10x32x128xbf16, #tpu.memory_space<vmem>>, vector<4x1x8x128xbf16>
    tpu.vector_store %arg13[%c0_18, %c9, %c16_19, %c0_20], %12 {strides = array<i32>} : memref<4x10x32x128xbf16, #tpu.memory_space<vmem>>, vector<4x1x8x128xbf16>,
    %15 = arith.truncf %8 : vector<256x128xf32> to vector<256x128xbf16>
    %16 = vector.shape_cast %15 : vector<256x128xbf16> to vector<4x8x8x128xbf16>
    %c0_21 = arith.constant 0 : index
    %c1 = arith.constant 1 : index
    %c16_22 = arith.constant 16 : index
    %c0_23 = arith.constant 0 : index
    %17 = vector.load %arg13[%c0_21, %c1, %c16_22, %c0_23] : memref<4x10x32x128xbf16, #tpu.memory_space<vmem>>, vector<4x8x8x128xbf16>
    tpu.vector_store %arg13[%c0_21, %c1, %c16_22, %c0_23], %16 {strides = array<i32>} : memref<4x10x32x128xbf16, #tpu.memory_space<vmem>>, vector<4x8x8x128xbf16>,
    %c0_24 = arith.constant 0 : index
    %c0_25 = arith.constant 0 : index
    %c15 = arith.constant 15 : index
    %c0_26 = arith.constant 0 : index
    %18 = vector.load %arg13[%c0_24, %c0_25, %c15, %c0_26] : memref<4x10x32x128xbf16, #tpu.memory_space<vmem>>, vector<4x8x8x128xbf16>
    %19 = vector.shape_cast %18 : vector<4x8x8x128xbf16> to vector<256x128xbf16>
    %c0_27 = arith.constant 0 : index
    %c0_28 = arith.constant 0 : index
    %20 = vector.load %arg14[%c0_27, %c0_28] : memref<256x1152xbf16, #tpu.memory_space<vmem>>, vector<256x128xbf16>
    tpu.vector_store %arg14[%c0_27, %c0_28], %19 {strides = array<i32>} : memref<256x1152xbf16, #tpu.memory_space<vmem>>, vector<256x128xbf16>,
    %c0_29 = arith.constant 0 : index
    %c0_30 = arith.constant 0 : index
    %c16_31 = arith.constant 16 : index
    %c0_32 = arith.constant 0 : index
    %21 = vector.load %arg13[%c0_29, %c0_30, %c16_31, %c0_32] : memref<4x10x32x128xbf16, #tpu.memory_space<vmem>>, vector<4x8x8x128xbf16>
    %22 = vector.shape_cast %21 : vector<4x8x8x128xbf16> to vector<256x128xbf16>
    %c0_33 = arith.constant 0 : index
    %c128 = arith.constant 128 : index
    %23 = vector.load %arg14[%c0_33, %c128] : memref<256x1152xbf16, #tpu.memory_space<vmem>>, vector<256x128xbf16>
    tpu.vector_store %arg14[%c0_33, %c128], %22 {strides = array<i32>} : memref<256x1152xbf16, #tpu.memory_space<vmem>>, vector<256x128xbf16>,
    %c0_34 = arith.constant 0 : index
    %c0_35 = arith.constant 0 : index
    %c17 = arith.constant 17 : index
    %c0_36 = arith.constant 0 : index
    %24 = vector.load %arg13[%c0_34, %c0_35, %c17, %c0_36] : memref<4x10x32x128xbf16, #tpu.memory_space<vmem>>, vector<4x8x8x128xbf16>
    %25 = vector.shape_cast %24 : vector<4x8x8x128xbf16> to vector<256x128xbf16>
    %c0_37 = arith.constant 0 : index
    %c256 = arith.constant 256 : index
    %26 = vector.load %arg14[%c0_37, %c256] : memref<256x1152xbf16, #tpu.memory_space<vmem>>, vector<256x128xbf16>
    tpu.vector_store %arg14[%c0_37, %c256], %25 {strides = array<i32>} : memref<256x1152xbf16, #tpu.memory_space<vmem>>, vector<256x128xbf16>,
    %c0_38 = arith.constant 0 : index
    %c1_39 = arith.constant 1 : index
    %c15_40 = arith.constant 15 : index
    %c0_41 = arith.constant 0 : index
    %27 = vector.load %arg13[%c0_38, %c1_39, %c15_40, %c0_41] : memref<4x10x32x128xbf16, #tpu.memory_space<vmem>>, vector<4x8x8x128xbf16>
    %28 = vector.shape_cast %27 : vector<4x8x8x128xbf16> to vector<256x128xbf16>
    %c0_42 = arith.constant 0 : index
    %c384 = arith.constant 384 : index
    %29 = vector.load %arg14[%c0_42, %c384] : memref<256x1152xbf16, #tpu.memory_space<vmem>>, vector<256x128xbf16>
    tpu.vector_store %arg14[%c0_42, %c384], %28 {strides = array<i32>} : memref<256x1152xbf16, #tpu.memory_space<vmem>>, vector<256x128xbf16>,
    %c0_43 = arith.constant 0 : index
    %c1_44 = arith.constant 1 : index
    %c16_45 = arith.constant 16 : index
    %c0_46 = arith.constant 0 : index
    %30 = vector.load %arg13[%c0_43, %c1_44, %c16_45, %c0_46] : memref<4x10x32x128xbf16, #tpu.memory_space<vmem>>, vector<4x8x8x128xbf16>
    %31 = vector.shape_cast %30 : vector<4x8x8x128xbf16> to vector<256x128xbf16>
    %c0_47 = arith.constant 0 : index
    %c512 = arith.constant 512 : index
    %32 = vector.load %arg14[%c0_47, %c512] : memref<256x1152xbf16, #tpu.memory_space<vmem>>, vector<256x128xbf16>
    tpu.vector_store %arg14[%c0_47, %c512], %31 {strides = array<i32>} : memref<256x1152xbf16, #tpu.memory_space<vmem>>, vector<256x128xbf16>,
    %c0_48 = arith.constant 0 : index
    %c1_49 = arith.constant 1 : index
    %c17_50 = arith.constant 17 : index
    %c0_51 = arith.constant 0 : index
    %33 = vector.load %arg13[%c0_48, %c1_49, %c17_50, %c0_51] : memref<4x10x32x128xbf16, #tpu.memory_space<vmem>>, vector<4x8x8x128xbf16>
    %34 = vector.shape_cast %33 : vector<4x8x8x128xbf16> to vector<256x128xbf16>
    %c0_52 = arith.constant 0 : index
    %c640 = arith.constant 640 : index
    %35 = vector.load %arg14[%c0_52, %c640] : memref<256x1152xbf16, #tpu.memory_space<vmem>>, vector<256x128xbf16>
    tpu.vector_store %arg14[%c0_52, %c640], %34 {strides = array<i32>} : memref<256x1152xbf16, #tpu.memory_space<vmem>>, vector<256x128xbf16>,
    %c0_53 = arith.constant 0 : index
    %c2 = arith.constant 2 : index
    %c15_54 = arith.constant 15 : index
    %c0_55 = arith.constant 0 : index
    %36 = vector.load %arg13[%c0_53, %c2, %c15_54, %c0_55] : memref<4x10x32x128xbf16, #tpu.memory_space<vmem>>, vector<4x8x8x128xbf16>
    %37 = vector.shape_cast %36 : vector<4x8x8x128xbf16> to vector<256x128xbf16>
    %c0_56 = arith.constant 0 : index
    %c768 = arith.constant 768 : index
    %38 = vector.load %arg14[%c0_56, %c768] : memref<256x1152xbf16, #tpu.memory_space<vmem>>, vector<256x128xbf16>
    tpu.vector_store %arg14[%c0_56, %c768], %37 {strides = array<i32>} : memref<256x1152xbf16, #tpu.memory_space<vmem>>, vector<256x128xbf16>,
    %c0_57 = arith.constant 0 : index
    %c2_58 = arith.constant 2 : index
    %c16_59 = arith.constant 16 : index
    %c0_60 = arith.constant 0 : index
    %39 = vector.load %arg13[%c0_57, %c2_58, %c16_59, %c0_60] : memref<4x10x32x128xbf16, #tpu.memory_space<vmem>>, vector<4x8x8x128xbf16>
    %40 = vector.shape_cast %39 : vector<4x8x8x128xbf16> to vector<256x128xbf16>
    %c0_61 = arith.constant 0 : index
    %c896 = arith.constant 896 : index
    %41 = vector.load %arg14[%c0_61, %c896] : memref<256x1152xbf16, #tpu.memory_space<vmem>>, vector<256x128xbf16>
    tpu.vector_store %arg14[%c0_61, %c896], %40 {strides = array<i32>} : memref<256x1152xbf16, #tpu.memory_space<vmem>>, vector<256x128xbf16>,
    %c0_62 = arith.constant 0 : index
    %c2_63 = arith.constant 2 : index
    %c17_64 = arith.constant 17 : index
    %c0_65 = arith.constant 0 : index
    %42 = vector.load %arg13[%c0_62, %c2_63, %c17_64, %c0_65] : memref<4x10x32x128xbf16, #tpu.memory_space<vmem>>, vector<4x8x8x128xbf16>
    %43 = vector.shape_cast %42 : vector<4x8x8x128xbf16> to vector<256x128xbf16>
    %c0_66 = arith.constant 0 : index
    %c1024 = arith.constant 1024 : index
    %44 = vector.load %arg14[%c0_66, %c1024] : memref<256x1152xbf16, #tpu.memory_space<vmem>>, vector<256x128xbf16>
    tpu.vector_store %arg14[%c0_66, %c1024], %43 {strides = array<i32>} : memref<256x1152xbf16, #tpu.memory_space<vmem>>, vector<256x128xbf16>,
    %c0_67 = arith.constant 0 : index
    %c0_68 = arith.constant 0 : index
    %45 = vector.load %arg14[%c0_67, %c0_68] : memref<256x1152xbf16, #tpu.memory_space<vmem>>, vector<256x1152xbf16>
    %c0_69 = arith.constant 0 : index
    %c0_70 = arith.constant 0 : index
    %46 = vector.load %arg4[%c0_69, %c0_70] : memref<1152x128xbf16, #tpu.memory_space<vmem>>, vector<1152x128xbf16>
    %cst_71 = arith.constant dense<0.000000e+00> : vector<256x128xf32>
    %47 = tpu.matmul %45, %46, %cst_71 {dimension_numbers = #tpu.dot_dimension_numbers<[1], [0], [0], [1], [0, 0, 1, 1], [], []>} : vector<256x1152xbf16>, vector<1152x128xbf16>, vector<256x128xf32> -> vector<256x128xf32>
    %c0_72 = arith.constant 0 : index
    %c0_73 = arith.constant 0 : index
    %48 = vector.load %arg5[%c0_72, %c0_73] : memref<1x128xf32, #tpu.memory_space<vmem>>, vector<1x128xf32>
    %49 = vector.broadcast %48 : vector<1x128xf32> to vector<256x128xf32>
    %50 = arith.addf %47, %49 : vector<256x128xf32>
    %cst_74 = arith.constant 0.000000e+00 : f32
    %51 = vector.broadcast %cst_74 : f32 to vector<256x128xf32>
    %52 = arith.maximumf %50, %51 : vector<256x128xf32>
    %53 = arith.truncf %52 : vector<256x128xf32> to vector<256x128xbf16>
    %c0_75 = arith.constant 0 : index
    %c0_76 = arith.constant 0 : index
    %54 = vector.load %arg6[%c0_75, %c0_76] : memref<128x128xbf16, #tpu.memory_space<vmem>>, vector<128x128xbf16>
    %cst_77 = arith.constant dense<0.000000e+00> : vector<256x128xf32>
    %55 = tpu.matmul %53, %54, %cst_77 {dimension_numbers = #tpu.dot_dimension_numbers<[1], [0], [0], [1], [0, 0, 1, 1], [], []>} : vector<256x128xbf16>, vector<128x128xbf16>, vector<256x128xf32> -> vector<256x128xf32>
    %c0_78 = arith.constant 0 : index
    %c0_79 = arith.constant 0 : index
    %56 = vector.load %arg7[%c0_78, %c0_79] : memref<1x128xf32, #tpu.memory_space<vmem>>, vector<1x128xf32>
    %57 = vector.broadcast %56 : vector<1x128xf32> to vector<256x128xf32>
    %58 = arith.addf %55, %57 : vector<256x128xf32>
    %59 = vector.shape_cast %58 : vector<256x128xf32> to vector<4x64x128xf32>
    %cst_80 = arith.constant dense<0.000000e+00> : vector<4x128xf32>
    %60 = vector.multi_reduction <add>, %59, %cst_80 [1] : vector<4x64x128xf32> to vector<4x128xf32>
    %cst_81 = arith.constant 6.400000e+01 : f32
    %61 = vector.broadcast %cst_81 : f32 to vector<4x128xf32>
    %62 = arith.divf %60, %61 : vector<4x128xf32>
    %63 = arith.truncf %62 : vector<4x128xf32> to vector<4x128xbf16>
    %c0_82 = arith.constant 0 : index
    %c0_83 = arith.constant 0 : index
    %64 = vector.load %arg8[%c0_82, %c0_83] : memref<128x8xbf16, #tpu.memory_space<vmem>>, vector<128x8xbf16>
    %cst_84 = arith.constant dense<0.000000e+00> : vector<4x8xf32>
    %65 = tpu.matmul %63, %64, %cst_84 {dimension_numbers = #tpu.dot_dimension_numbers<[1], [0], [0], [1], [0, 0, 1, 1], [], []>} : vector<4x128xbf16>, vector<128x8xbf16>, vector<4x8xf32> -> vector<4x8xf32>
    %c0_85 = arith.constant 0 : index
    %c0_86 = arith.constant 0 : index
    %66 = vector.load %arg9[%c0_85, %c0_86] : memref<1x8xf32, #tpu.memory_space<vmem>>, vector<1x8xf32>
    %67 = vector.broadcast %66 : vector<1x8xf32> to vector<4x8xf32>
    %68 = arith.addf %65, %67 : vector<4x8xf32>
    %cst_87 = arith.constant 0.000000e+00 : f32
    %69 = vector.broadcast %cst_87 : f32 to vector<4x8xf32>
    %70 = arith.maximumf %68, %69 : vector<4x8xf32>
    %71 = arith.truncf %70 : vector<4x8xf32> to vector<4x8xbf16>
    %c0_88 = arith.constant 0 : index
    %c0_89 = arith.constant 0 : index
    %72 = vector.load %arg10[%c0_88, %c0_89] : memref<8x128xbf16, #tpu.memory_space<vmem>>, vector<8x128xbf16>
    %cst_90 = arith.constant dense<0.000000e+00> : vector<4x128xf32>
    %73 = tpu.matmul %71, %72, %cst_90 {dimension_numbers = #tpu.dot_dimension_numbers<[1], [0], [0], [1], [0, 0, 1, 1], [], []>} : vector<4x8xbf16>, vector<8x128xbf16>, vector<4x128xf32> -> vector<4x128xf32>
    %c0_91 = arith.constant 0 : index
    %c0_92 = arith.constant 0 : index
    %74 = vector.load %arg11[%c0_91, %c0_92] : memref<1x128xf32, #tpu.memory_space<vmem>>, vector<1x128xf32>
    %75 = vector.broadcast %74 : vector<1x128xf32> to vector<4x128xf32>
    %76 = arith.addf %73, %75 : vector<4x128xf32>
    %77 = arith.negf %76 : vector<4x128xf32>
    %78 = math.exp %77 : vector<4x128xf32>
    %cst_93 = arith.constant 1.000000e+00 : f32
    %79 = vector.broadcast %cst_93 : f32 to vector<4x128xf32>
    %80 = arith.addf %79, %78 : vector<4x128xf32>
    %81 = arith.divf %79, %80 : vector<4x128xf32>
    %c0_94 = arith.constant 0 : index
    %c0_95 = arith.constant 0 : index
    %c0_96 = arith.constant 0 : index
    %82 = vector.load %arg1[%c0_94, %c0_95, %c0_96] : memref<4x64x128xbf16, #tpu.memory_space<vmem>>, vector<4x64x128xbf16>
    %83 = arith.extf %82 : vector<4x64x128xbf16> to vector<4x64x128xf32>
    %84 = vector.shape_cast %81 : vector<4x128xf32> to vector<4x1x128xf32>
    %85 = vector.broadcast %84 : vector<4x1x128xf32> to vector<4x64x128xf32>
    %86 = arith.mulf %59, %85 : vector<4x64x128xf32>
    %87 = arith.addf %86, %83 : vector<4x64x128xf32>
    %cst_97 = arith.constant 0.000000e+00 : f32
    %88 = vector.broadcast %cst_97 : f32 to vector<4x64x128xf32>
    %89 = arith.maximumf %87, %88 : vector<4x64x128xf32>
    %90 = arith.truncf %89 : vector<4x64x128xf32> to vector<4x64x128xbf16>
    %c0_98 = arith.constant 0 : index
    %c0_99 = arith.constant 0 : index
    %c0_100 = arith.constant 0 : index
    %91 = vector.load %arg12[%c0_98, %c0_99, %c0_100] : memref<4x64x128xbf16, #tpu.memory_space<vmem>>, vector<4x64x128xbf16>
    tpu.vector_store %arg12[%c0_98, %c0_99, %c0_100], %90 {strides = array<i32>} : memref<4x64x128xbf16, #tpu.memory_space<vmem>>, vector<4x64x128xbf16>,
    return
  }
  func.func @transform_0(%arg0: i32) -> (i32, i32, i32) {
    %c0_i32 = arith.constant 0 : i32
    %c0_i32_0 = arith.constant 0 : i32
    %c0_i32_1 = arith.constant 0 : i32
    return %arg0, %c0_i32, %c0_i32_0 : i32, i32, i32
  }
  func.func @transform_1(%arg0: i32) -> (i32, i32) {
    %c0_i32 = arith.constant 0 : i32
    %c0_i32_0 = arith.constant 0 : i32
    %c0_i32_1 = arith.constant 0 : i32
    return %c0_i32, %c0_i32_0 : i32, i32
  }
  func.func @transform_2(%arg0: i32) -> (i32, i32) {
    %c0_i32 = arith.constant 0 : i32
    %c0_i32_0 = arith.constant 0 : i32
    %c0_i32_1 = arith.constant 0 : i32
    return %c0_i32, %c0_i32_0 : i32, i32
  }
  func.func @transform_3(%arg0: i32) -> (i32, i32) {
    %c0_i32 = arith.constant 0 : i32
    %c0_i32_0 = arith.constant 0 : i32
    %c0_i32_1 = arith.constant 0 : i32
    return %c0_i32, %c0_i32_0 : i32, i32
  }
  func.func @transform_4(%arg0: i32) -> (i32, i32) {
    %c0_i32 = arith.constant 0 : i32
    %c0_i32_0 = arith.constant 0 : i32
    %c0_i32_1 = arith.constant 0 : i32
    return %c0_i32, %c0_i32_0 : i32, i32
  }
  func.func @transform_5(%arg0: i32) -> (i32, i32) {
    %c0_i32 = arith.constant 0 : i32
    %c0_i32_0 = arith.constant 0 : i32
    %c0_i32_1 = arith.constant 0 : i32
    return %c0_i32, %c0_i32_0 : i32, i32
  }
  func.func @transform_6(%arg0: i32) -> (i32, i32) {
    %c0_i32 = arith.constant 0 : i32
    %c0_i32_0 = arith.constant 0 : i32
    %c0_i32_1 = arith.constant 0 : i32
    return %c0_i32, %c0_i32_0 : i32, i32
  }
  func.func @transform_7(%arg0: i32) -> (i32, i32) {
    %c0_i32 = arith.constant 0 : i32
    %c0_i32_0 = arith.constant 0 : i32
    %c0_i32_1 = arith.constant 0 : i32
    return %c0_i32, %c0_i32_0 : i32, i32
  }
  func.func @transform_8(%arg0: i32) -> (i32, i32) {
    %c0_i32 = arith.constant 0 : i32
    %c0_i32_0 = arith.constant 0 : i32
    %c0_i32_1 = arith.constant 0 : i32
    return %c0_i32, %c0_i32_0 : i32, i32
  }
  func.func @transform_9(%arg0: i32) -> (i32, i32) {
    %c0_i32 = arith.constant 0 : i32
    %c0_i32_0 = arith.constant 0 : i32
    %c0_i32_1 = arith.constant 0 : i32
    return %c0_i32, %c0_i32_0 : i32, i32
  }
  func.func @transform_10(%arg0: i32) -> (i32, i32) {
    %c0_i32 = arith.constant 0 : i32
    %c0_i32_0 = arith.constant 0 : i32
    %c0_i32_1 = arith.constant 0 : i32
    return %c0_i32, %c0_i32_0 : i32, i32
  }
  func.func @transform_11(%arg0: i32) -> (i32, i32, i32) {
    %c0_i32 = arith.constant 0 : i32
    %c0_i32_0 = arith.constant 0 : i32
    %c0_i32_1 = arith.constant 0 : i32
    return %arg0, %c0_i32, %c0_i32_0 : i32, i32, i32
  }
}

</mosaic_0001>

<bundles_post_ra>
// kernel: tpu_custom_call.1
= control target key start
LH: loop header
LB: loop body
LE: loop exit
PB: predicated region body
PF: predicated region fallthrough
CT: control target
= control target key end

     0   :  { %s12364_s0 = inlined_call_operand.hbm [shape: bf16[8,64,128], index: 0, kind: input, shape index: {}]   ;;  %s12365_s1 = inlined_call_operand.vmem [shape: bf16[128,128], index: 1, kind: input, shape index: {}]   ;;  %s12366_s2 = inlined_call_operand.vmem [shape: f32[1,128], index: 2, kind: input, shape index: {}]   ;;  %s12367_s3 = inlined_call_operand.hbm [shape: bf16[1152,128], index: 3, kind: input, shape index: {}]   ;;  %s12368_s4 = inlined_call_operand.vmem [shape: f32[1,128], index: 4, kind: input, shape index: {}]   ;;  %s12369_s5 = inlined_call_operand.hbm [shape: bf16[128,128], index: 5, kind: input, shape index: {}]   ;;  %s12370_s6 = inlined_call_operand.hbm [shape: f32[1,128], index: 6, kind: input, shape index: {}]   ;;  %s12371_s7 = inlined_call_operand.vmem [shape: bf16[128,8], index: 7, kind: input, shape index: {}]   ;;  %s12372_s8 = inlined_call_operand.vmem [shape: f32[1,8], index: 8, kind: input, shape index: {}]   ;;  %s12373_s9 = inlined_call_operand.vmem [shape: bf16[8,128], index: 9, kind: input, shape index: {}]   ;;  %s12374_s10 = inlined_call_operand.vmem [shape: f32[1,128], index: 10, kind: input, shape index: {}]   ;;  %s12375_s11 = inlined_call_operand.hbm [shape: bf16[8,64,128], index: 11, kind: output, shape index: {}]  }
   0x1   :  { %12397 = sst [smem:[#allocation127_spill]] %s12367_s3 }
   0x2   :  { %12398 = sst [smem:[#allocation128_spill]] %s12369_s5 }
   0x3   :  { %12399 = sst [smem:[#allocation129_spill]] %s12370_s6 }
   0x4   :  { %16 = vsyncpa [#allocation5], 0 }
   0x5   :  { %18 = vsyncpa [#allocation5 + $0x1], 0 }
   0x6   :  { %19 = vsyncpa [#allocation8], 0 }
   0x7   :  { %20 = vsyncpa [#allocation11], 0 }
   0x8   :  { %21 = vsyncpa [#allocation6], 0 }
   0x9   :  { %23 = vsyncpa [#allocation6 + $0x1], 0  ;;  %s9501_s17 = smov 0   ;;  %s9503_s18 = smov 0  }
   0xa   :  { %s9505_s19 = smov 0   ;;  %s9507_s20 = smov 0  }
   0xb LB: > { %12400 = sst [smem:[#allocation17_spill]] %s9426_s19  ;;  %s9522_s21 = sadd.s32 4294967295, %s9430_s20   ;;  %s9430_s20 = sphi %s9507_s20, %s12910_s20   ;;  %s9426_s19 = sphi %s9505_s19, %s12907_s19   ;;  %s9422_s18 = sphi %s9503_s18, %s12909_s18   ;;  %s9418_s17 = sphi %s9501_s17, %s12908_s17  }
   0xc   : > { %s7537_s22 = sadd.s32 4294967294, %s9430_s20   ;;  %p49_p0 = scmp.ne.s32.totalorder %s9422_s18, %s9418_s17 }
   0xd   : > { %p50_p1 = scmp.eq.s32.totalorder %s9522_s21, 0  ;;  %p283_p2 = scmp.eq.s32.totalorder %s9522_s21, 1 }
   0xe   : > { %p289_p3 = scmp.eq.s32.totalorder %s7537_s22, 1  ;;  %p7538_p5 = scmp.ge.s32.totalorder %s9430_s20, 1 }
   0xf   : > { %p9531_p4 = por %p50_p1, %p49_p0  ;;  %p296_p7 = scmp.lt.s32.totalorder %s9430_s20, 3 }
  0x10   : > { %p9536_p6 = por %p289_p3, %p49_p0  ;;  %s12403_s3 = sld [smem:[#allocation127_spill]] }
  0x11   : > { %p9544_p8 = pnand %p7538_p5, %p296_p7  ;;  %s9432_s29 = smov [#allocation7]  }
  0x12   : > { %s315_s30 = sshll.u32 %s9432_s29, 4  ;;  %s12406_s5 = sld [smem:[#allocation128_spill]]  ;;  %s316_s30 = int_to_ptr.vmem [resolvable:$true] %s315_s30 }
  0x13   : > { %p9155_p9 = pneg %p9544_p8  ;;  %s12376_s16 = smov 64  }
  0x14   : > { %s12377_s22 = smov 4   ;;  %s9435_s25 = smov [#allocation9]  }
  0x15   : > { %p9552_p10 = pnand %p9155_p9, %p50_p1  ;;  %s332_s26 = sshll.u32 %s9435_s25, 4  ;;  %s333_s26 = int_to_ptr.vmem [resolvable:$true] %s332_s26 }
  0x16   : > { %s313_s27 = sshll.u32 %s12403_s3, 4  ;;  %s12407_s6 = sld [smem:[#allocation129_spill]]  ;;  %s314_s27 = int_to_ptr.hbm [resolvable:$true] %s313_s27 }
  0x17   : > { %9158 = dma.hbm_to_vmem [thread:$0]  (!%p9552_p10), %s314_s27, 9216, %s316_s30, [#allocation8], %s12376_s16, %s12376_s16, %s12377_s22  }
  0x18   : > { %s330_s15 = sshll.u32 %s12406_s5, 4  ;;  %s9436_s27 = smov [#allocation10]   ;;  %s331_s15 = int_to_ptr.hbm [resolvable:$true] %s330_s15 }
  0x19   : > { %9161 = dma.hbm_to_vmem [thread:$0]  (!%p9552_p10), %s331_s15, 1024, %s333_s26, [#allocation8], %s12376_s16, %s12376_s16, %s12377_s22  }
  0x1a   : > { %s347_s30 = sshll.u32 %s9436_s27, 4  ;;  %s9574_s3 = sadd.s32 1, %s9430_s20   ;;  %s348_s30 = int_to_ptr.vmem [resolvable:$true] %s347_s30 }
  0x1b   : > { %s33_s25 = ssub.s32 %s9430_s20, %s9574_s3  ;;  %s36_s29 = sadd.s32 1, %s9426_s19 }
  0x1c   : > { %s345_s14 = sshll.u32 %s12407_s6, 4  ;;  %p34_p12 = scmp.eq.s32.totalorder %s33_s25, 0  ;;  %s346_s14 = int_to_ptr.hbm [resolvable:$true] %s345_s14 }
  0x1d   : > { %9164 = dma.hbm_to_vmem [thread:$0]  (!%p9552_p10), %s346_s14, 16, %s348_s30, [#allocation11]  }
  0x1e   : > { %p43_p13 = scmp.ne.s32.totalorder %s9426_s19, %s9422_s18  ;;  %p44_p0 = scmp.eq.s32.totalorder %s9430_s20, 0 }
  0x1f   : > { %s9585_s13 = scalar_select %p34_p12, %s9426_s19, %s36_s29  }
  0x20   : > { %p9589_p3 = por %p283_p2, %p43_p13  ;;  %p9176_p5 = scmp.lt.s32.totalorder %s9430_s20, 2 }
  0x21   : > { %12408 = sst [smem:[#allocation18_spill]] %s9585_s13  ;;  %s370_s15 = sand.u32 1, %s9426_s19  }
  0x22   : > { %s8682_s26 = sshll.u32 %s9430_s20, 7  ;;  %p45_p7 = por %p44_p0, %p43_p13 }
  0x23   : > { %s7543_s27 = sshll.u32 %s370_s15, 7  ;;  %s380_s14 = scalar_lea.hbm %s12364_s0, %s8682_s26 }
  0x24   : > { %s381_s30 = sshll.u32 %s380_s14, 4  ;;  %s374_s25 = scalar_lea.vmem [#allocation4], %s7543_s27  ;;  %s382_s30 = int_to_ptr.hbm [resolvable:$true] %s381_s30 }
  0x25   : > { %s383_s22 = sshll.u32 %s374_s25, 4  ;;  %p9599_p9 = pnand %p9176_p5, %p45_p7  ;;  %s384_s22 = int_to_ptr.vmem [resolvable:$true] %s383_s22 }
  0x26   : > { %s371_s6 = scalar_lea.sflag [#allocation5], %s370_s15  ;;  %s9326_s13 = sshra.s32 %s382_s30, 4  ;;  %s9327_s13 = int_to_ptr.hbm [resolvable:$true] %s9326_s13 }
  0x27   : > { %s9328_s19 = scalar_lea.hbm %s9327_s13, 128  ;;  %p9330_p10 = pneg %p9599_p9 }
  0x28   : > { %p9329_p2 = scmp.ne.s32.totalorder %s9327_s13, %s9328_s19  ;;  %s9333_s27 = scalar_lea.hbm %s12364_s0, 256 }
  0x29   : > { %p9334_p0 = scmp.lt.s32.totalorder %s9327_s13, %s12364_s0  ;;  %p9335_p5 = scmp.lt.s32.totalorder %s9333_s27, %s9328_s19 }
  0x2a   : > { %p9331_p12 = pnand %p9330_p10, %p9329_p2 }
  0x2b   : > { %p9336_p7 = por %p9335_p5, %p9334_p0 }
  0x2c   : > { %p9332_p13 = pneg %p9331_p12 }
  0x2e   : > { %p9337_p11 = pnand %p9336_p7, %p9332_p13 }
  0x30   : > { %9340 = shalt.err (!%p9337_p11)
}
  0x31   : > { %s12411_s15 = smov 4   ;;  %s12412_s25 = smov 64  }
  0x32   : > { %9168 = dma.hbm_to_vmem [thread:$0]  (!%p9599_p9), %s382_s30, 2048, %s384_s22, %s371_s6, %s12412_s25, %s12412_s25, %s12411_s15  }
  0x33   : > { %395 = sbr.rel (%p9544_p8) target bundleno = 1838 (0x72e), region = 64 }
  0x38   : > { %s9619_s16 = sand.u32 1, %s9422_s18  }
  0x39   : > { %s7548_s19 = sshll.u32 %s9619_s16, 7  ;;  %s398_s13 = scalar_lea.sflag [#allocation5], %s9619_s16 }
  0x3a   : > { %s9625_s26 = scalar_lea.vmem [#allocation4], %s7548_s19 }
  0x3b   : > { %9401 = dma.done.wait (%p9531_p4), %s398_s13, 2048  }
  0x3c   : > { %9403 = vsyncadd (%p9531_p4), %s398_s13, 4294965248 }
  0x3d   : > { %9405 = dma.done.wait (%p50_p1), [#allocation8], 10240  }
  0x3e   : > { %9407 = vsyncadd (%p50_p1), [#allocation8], 4294957056 }
  0x3f   : > { %9409 = dma.done.wait (%p50_p1), [#allocation11], 16  }
  0x40   : > { %9411 = vsyncadd (%p50_p1), [#allocation11], 4294967280  ;;  %v8706_v0 = vld [vmem:[%s12365_s1 + $0x38] sm:$0xff]  ;;  %v8705_v1 = vld [vmem:[%s12365_s1 + $0x30] sm:$0xff]  ;;  %v9437_v21 = vmov 0   ;;  %vm7146_vm6 = vcmask 1043456  }
  0x41   : > { %655 = vmatpush.bf16.msra.mxu0 %v8706_v0  ;;  %9115 = vmatpush.bf16.msra.mxu3 %v8706_v0  ;;  %v8704_v2 = vld [vmem:[%s12365_s1 + $0x28] sm:$0xff]  ;;  %v8703_v3 = vld [vmem:[%s12365_s1 + $0x20] sm:$0xff]  ;;  %v8702_v4 = vld [vmem:[%s12365_s1 + $0x18] sm:$0xff]  ;;  %778 = vst [vmem:[#allocation2 + $0x24] sm:$0x8] %v9437_v21  ;;  %vm7066_vm8 = vcmask 1041409  }
  0x42   : > { %v8701_v5 = vld [vmem:[%s12365_s1 + $0x10] sm:$0xff]  ;;  %v8700_v6 = vld [vmem:[%s12365_s1 + $0x8] sm:$0xff]  ;;  %v8699_v7 = vld [vmem:[%s12365_s1] sm:$0xff]  ;;  %818 = vst [vmem:[#allocation2 + $0x2c] sm:$0x1] %v9437_v21  ;;  %vm7068_vm9 = vcmask 1042434  }
  0x43   : > { %v8683_v8 = vld [vmem:[%s9625_s26] sm:$0xff]  ;;  %v8684_v9 = vld [vmem:[%s9625_s26 + $0x8] sm:$0xff]  ;;  %v8685_v10 = vld [vmem:[%s9625_s26 + $0x10] sm:$0xff]  ;;  %776 = vst [vmem:[#allocation2 + $0x4] sm:$0x8] %v9437_v21  ;;  %vm7070_vm10 = vcmask 1043459  }
  0x44   : > { %v8686_v11 = vld [vmem:[%s9625_s26 + $0x18] sm:$0xff]  ;;  %v8687_v12 = vld [vmem:[%s9625_s26 + $0x20] sm:$0xff]  ;;  %v8688_v13 = vld [vmem:[%s9625_s26 + $0x28] sm:$0xff]  ;;  %777 = vst [vmem:[#allocation2 + $0x14] sm:$0x8] %v9437_v21  ;;  %vm7142_vm11 = vcmask 64512  }
  0x45   : > { %656 = vmatpush.bf16.msra.mxu0 %v8705_v1  ;;  %9116 = vmatpush.bf16.msra.mxu3 %v8705_v1  ;;  %v9669_v14 = vld [vmem:[#allocation7 + $0x78] sm:$0xff]  ;;  %v9672_v15 = vld [vmem:[#allocation7 + $0x70] sm:$0xff]  ;;  %v9676_v18 = vld [vmem:[#allocation7 + $0x68] sm:$0xff]  ;;  %779 = vst [vmem:[#allocation2 + $0x34] sm:$0x8] %v9437_v21  ;;  %s7419_s30 = scalar_lea.sflag [#allocation6], %s9619_s16 }
  0x46   : > { %6054 = vmatpush.bf16.msra.mxu2 %v9669_v14  ;;  %v8689_v16 = vld [vmem:[%s9625_s26 + $0x30] sm:$0xff]  ;;  %v8858_v17 = vld [vmem:[#allocation7 + $0x38] sm:$0xff]  ;;  %v9679_v20 = vld [vmem:[#allocation7 + $0x60] sm:$0xff]  ;;  %780 = vst [vmem:[#allocation2 + $0x44] sm:$0x8] %v9437_v21  ;;  %s9376_s15 = scalar_lea.hbm %s12375_s11, 256 }
  0x47   : > { %5965 = vmatpush.bf16.msra.mxu1 %v8858_v17  ;;  %v8857_v19 = vld [vmem:[#allocation7 + $0x30] sm:$0xff]  ;;  %v8690_v22 = vld [vmem:[%s9625_s26 + $0x38] sm:$0xff]  ;;  %781 = vst [vmem:[#allocation2 + $0x54] sm:$0x8] %v9437_v21  ;;  %v9705_v23 = vld [vmem:[%s12366_s2] ss:$0 sm:$0xff] }
  0x48   : > { %782 = vst [vmem:[#allocation2 + $0x64] sm:$0x8] %v9437_v21  ;;  %v8691_v24 = vld [vmem:[%s9625_s26 + $0x40] sm:$0xff]  ;;  %v8856_v36 = vld [vmem:[#allocation7 + $0x28] sm:$0xff]  ;;  %v9741_v37 = vld [vmem:[#allocation7 + $0x58] sm:$0xff] }
  0x49   : > { %657 = vmatpush.bf16.msra.mxu0 %v8704_v2  ;;  %9117 = vmatpush.bf16.msra.mxu3 %v8704_v2  ;;  %783 = vst [vmem:[#allocation2 + $0x74] sm:$0x8] %v9437_v21  ;;  %v8855_v38 = vld [vmem:[#allocation7 + $0x20] sm:$0xff]  ;;  %v9748_v39 = vld [vmem:[#allocation7 + $0x50] sm:$0xff]  ;;  %v8854_v40 = vld [vmem:[#allocation7 + $0x18] sm:$0xff] }
  0x4a   : > { %6055 = vmatpush.bf16.msra.mxu2 %v9672_v15  ;;  %784 = vst [vmem:[#allocation2 + $0x84] sm:$0x8] %v9437_v21  ;;  %v9755_v41 = vld [vmem:[#allocation7 + $0x48] sm:$0xff]  ;;  %v8853_v43 = vld [vmem:[#allocation7 + $0x10] sm:$0xff]  ;;  %v9763_v44 = vld [vmem:[#allocation7 + $0x40] sm:$0xff] }
  0x4b   : > { %5966 = vmatpush.bf16.msra.mxu1 %v8857_v19  ;;  %785 = vst [vmem:[#allocation2 + $0x94] sm:$0x8] %v9437_v21  ;;  %v8692_v42 = vld [vmem:[%s9625_s26 + $0x48] sm:$0xff]  ;;  %v3305_v51 = vld [vmem:[#allocation2 + $0x24] sm:$0x8] }
  0x4c   : > { %786 = vst [vmem:[#allocation2 + $0xa4] sm:$0x8] %v9437_v21  ;;  %v8852_v45 = vld [vmem:[#allocation7 + $0x8] sm:$0xff]  ;;  %v3370_v57 = vshrl.u32 %v3305_v51, 16  ;;  %vm994_vm0 = vsmask.f32 256 }
  0x4d   : > { %658 = vmatpush.bf16.msra.mxu0 %v8703_v3  ;;  %9118 = vmatpush.bf16.msra.mxu3 %v8703_v3  ;;  %787 = vst [vmem:[#allocation2 + $0xb4] sm:$0x8] %v9437_v21  ;;  %v3914_v53 = vld [vmem:[#allocation2 + $0x2c] sm:$0x1]  ;;  %vm995_vm1 = vsmask.f32 4368 }
  0x4e   : > { %6056 = vmatpush.bf16.msra.mxu2 %v9676_v18  ;;  %788 = vst [vmem:[#allocation2 + $0xc4] sm:$0x8] %v9437_v21  ;;  %v3987_v59 = vshll.u32 %v3914_v53, 16  ;;  %vm1605_vm2 = vsmask.f32 3328  ;;  %v7713_v2 = vrot.slane %v3370_v57, 11  ;;  %vm9792_vm4 = vmor %vm994_vm0, %vm995_vm1 }
  0x4f   : > { %789 = vst [vmem:[#allocation2 + $0xd4] sm:$0x8] %v9437_v21  ;;  %5967 = vmatpush.bf16.msra.mxu1 %v8856_v36  ;;  %vm1606_vm3 = vsmask.f32 7440 }
  0x50   : > { %790 = vst [vmem:[#allocation2 + $0xe4] sm:$0x8] %v9437_v21  ;;  %vm9799_vm5 = vmor %vm1605_vm2, %vm1606_vm3 }
  0x51   : > { %659 = vmatpush.bf16.msra.mxu0 %v8702_v4  ;;  %9119 = vmatpush.bf16.msra.mxu3 %v8702_v4  ;;  %791 = vst [vmem:[#allocation2 + $0xf4] sm:$0x8] %v9437_v21  ;;  %v3989_v4 = vrot.slane %v3987_v59, 5 }
  0x52   : > { %6057 = vmatpush.bf16.msra.mxu2 %v9679_v20  ;;  %792 = vst [vmem:[#allocation2 + $0x104] sm:$0x8] %v9437_v21 }
  0x53   : > { %793 = vst [vmem:[#allocation2 + $0x114] sm:$0x8] %v9437_v21  ;;  %5968 = vmatpush.bf16.msra.mxu1 %v8855_v38 }
  0x54   : > { %794 = vst [vmem:[#allocation2 + $0x124] sm:$0x8] %v9437_v21 }
  0x55   : > { %660 = vmatpush.bf16.msra.mxu0 %v8701_v5  ;;  %9120 = vmatpush.bf16.msra.mxu3 %v8701_v5  ;;  %795 = vst [vmem:[#allocation2 + $0x134] sm:$0x8] %v9437_v21 }
  0x56   : > { %796 = vst [vmem:[#allocation2 + $0x144] sm:$0x8] %v9437_v21  ;;  %6058 = vmatpush.bf16.msra.mxu2 %v9741_v37 }
  0x57   : > { %797 = vst [vmem:[#allocation2 + $0x154] sm:$0x8] %v9437_v21  ;;  %5969 = vmatpush.bf16.msra.mxu1 %v8854_v40 }
  0x58   : > { %798 = vst [vmem:[#allocation2 + $0x164] sm:$0x8] %v9437_v21 }
  0x59   : > { %661 = vmatpush.bf16.msra.mxu0 %v8700_v6  ;;  %9121 = vmatpush.bf16.msra.mxu3 %v8700_v6  ;;  %799 = vst [vmem:[#allocation2 + $0x174] sm:$0x8] %v9437_v21 }
  0x5a   : > { %800 = vst [vmem:[#allocation2 + $0x184] sm:$0x8] %v9437_v21  ;;  %6059 = vmatpush.bf16.msra.mxu2 %v9748_v39 }
  0x5b   : > { %801 = vst [vmem:[#allocation2 + $0x194] sm:$0x8] %v9437_v21  ;;  %5970 = vmatpush.bf16.msra.mxu1 %v8853_v43 }
  0x5c   : > { %802 = vst [vmem:[#allocation2 + $0x1a4] sm:$0x8] %v9437_v21 }
  0x5d   : > { %662 = vmatpush.bf16.msra.mxu0 %v8699_v7  ;;  %9122 = vmatpush.bf16.msra.mxu3 %v8699_v7  ;;  %803 = vst [vmem:[#allocation2 + $0x1b4] sm:$0x8] %v9437_v21  ;;  %v932_v7 = vld [vmem:[#allocation2 + $0x14] sm:$0x8] }
  0x5e   : > { %804 = vst [vmem:[#allocation2 + $0x1c4] sm:$0x8] %v9437_v21  ;;  %6060 = vmatpush.bf16.msra.mxu2 %v9755_v41 }
  0x5f   : > { %805 = vst [vmem:[#allocation2 + $0x1d4] sm:$0x8] %v9437_v21  ;;  %5971 = vmatpush.bf16.msra.mxu1 %v8852_v45 }
  0x60   : > { %663 = vmatmul.bf16.vlgmr.msra.gmra.mxu0 %v8683_v8  ;;  %806 = vst [vmem:[#allocation2 + $0x1e4] sm:$0x8] %v9437_v21 }
  0x61   : > { %9123 = vmatpush.bf16.msrb.mxu3 %v8858_v17  ;;  %807 = vst [vmem:[#allocation2 + $0x1f4] sm:$0x8] %v9437_v21 }
  0x62   : > { %808 = vst [vmem:[#allocation2 + $0x204] sm:$0x8] %v9437_v21  ;;  %6061 = vmatpush.bf16.msra.mxu2 %v9763_v44 }
  0x63   : > { %809 = vst [vmem:[#allocation2 + $0x214] sm:$0x8] %v9437_v21 }
  0x64   : > { %810 = vst [vmem:[#allocation2 + $0x224] sm:$0x8] %v9437_v21 }
  0x65   : > { %9124 = vmatpush.bf16.msrb.mxu3 %v8857_v19  ;;  %811 = vst [vmem:[#allocation2 + $0x234] sm:$0x8] %v9437_v21  ;;  %v1011_v19 = vshrl.u32 %v932_v7, 16 }
  0x66   : > { %812 = vst [vmem:[#allocation2 + $0x244] sm:$0x8] %v9437_v21 }
  0x67   : > { %813 = vst [vmem:[#allocation2 + $0x254] sm:$0x8] %v9437_v21 }
  0x68   : > { %814 = vst [vmem:[#allocation2 + $0x264] sm:$0x8] %v9437_v21 }
  0x69   : > { %815 = vst [vmem:[#allocation2 + $0x274] sm:$0x8] %v9437_v21  ;;  %9125 = vmatpush.bf16.msrb.mxu3 %v8856_v36 }
  0x6a   : > { %816 = vst [vmem:[#allocation2 + $0xc] sm:$0x1] %v9437_v21 }
  0x6b   : > { %817 = vst [vmem:[#allocation2 + $0x1c] sm:$0x1] %v9437_v21 }
  0x6c   : > { %819 = vst [vmem:[#allocation2 + $0x3c] sm:$0x1] %v9437_v21 }
  0x6d   : > { %820 = vst [vmem:[#allocation2 + $0x4c] sm:$0x1] %v9437_v21  ;;  %9126 = vmatpush.bf16.msrb.mxu3 %v8855_v38 }
  0x6e   : > { %821 = vst [vmem:[#allocation2 + $0x5c] sm:$0x1] %v9437_v21 }
  0x6f   : > { %822 = vst [vmem:[#allocation2 + $0x6c] sm:$0x1] %v9437_v21 }
  0x70   : > { %668 = vmatmul.bf16.gmra.mxu0 %v8684_v9  ;;  %823 = vst [vmem:[#allocation2 + $0x7c] sm:$0x1] %v9437_v21  ;;  %v930_v9 = vld [vmem:[#allocation2 + $0x4] sm:$0x8] }
  0x71   : > { %824 = vst [vmem:[#allocation2 + $0x8c] sm:$0x1] %v9437_v21  ;;  %9127 = vmatpush.bf16.msrb.mxu3 %v8854_v40 }
  0x72   : > { %825 = vst [vmem:[#allocation2 + $0x9c] sm:$0x1] %v9437_v21 }
  0x73   : > { %826 = vst [vmem:[#allocation2 + $0xac] sm:$0x1] %v9437_v21 }
  0x74   : > { %827 = vst [vmem:[#allocation2 + $0xbc] sm:$0x1] %v9437_v21 }
  0x75   : > { %828 = vst [vmem:[#allocation2 + $0xcc] sm:$0x1] %v9437_v21  ;;  %9128 = vmatpush.bf16.msrb.mxu3 %v8853_v43 }
  0x76   : > { %829 = vst [vmem:[#allocation2 + $0xdc] sm:$0x1] %v9437_v21 }
  0x77   : > { %830 = vst [vmem:[#allocation2 + $0xec] sm:$0x1] %v9437_v21 }
  0x78   : > { %831 = vst [vmem:[#allocation2 + $0xfc] sm:$0x1] %v9437_v21 }
  0x79   : > { %832 = vst [vmem:[#allocation2 + $0x10c] sm:$0x1] %v9437_v21  ;;  %9129 = vmatpush.bf16.msrb.mxu3 %v8852_v45  ;;  %v8693_v45 = vld [vmem:[%s9625_s26 + $0x50] sm:$0xff] }
  0x7a   : > { %833 = vst [vmem:[#allocation2 + $0x11c] sm:$0x1] %v9437_v21 }
  0x7b   : > { %834 = vst [vmem:[#allocation2 + $0x12c] sm:$0x1] %v9437_v21 }
  0x7c   : > { %835 = vst [vmem:[#allocation2 + $0x13c] sm:$0x1] %v9437_v21 }
  0x7d   : > { %836 = vst [vmem:[#allocation2 + $0x14c] sm:$0x1] %v9437_v21 }
  0x7e   : > { %837 = vst [vmem:[#allocation2 + $0x15c] sm:$0x1] %v9437_v21 }
  0x7f   : > { %838 = vst [vmem:[#allocation2 + $0x16c] sm:$0x1] %v9437_v21 }
  0x80   : > { %673 = vmatmul.bf16.gmra.mxu0 %v8685_v10  ;;  %839 = vst [vmem:[#allocation2 + $0x17c] sm:$0x1] %v9437_v21 }
  0x81   : > { %840 = vst [vmem:[#allocation2 + $0x18c] sm:$0x1] %v9437_v21 }
  0x82   : > { %841 = vst [vmem:[#allocation2 + $0x19c] sm:$0x1] %v9437_v21 }
  0x83   : > { %842 = vst [vmem:[#allocation2 + $0x1ac] sm:$0x1] %v9437_v21 }
  0x84   : > { %843 = vst [vmem:[#allocation2 + $0x1bc] sm:$0x1] %v9437_v21 }
  0x85   : > { %844 = vst [vmem:[#allocation2 + $0x1cc] sm:$0x1] %v9437_v21 }
  0x86   : > { %845 = vst [vmem:[#allocation2 + $0x1dc] sm:$0x1] %v9437_v21 }
  0x87   : > { %846 = vst [vmem:[#allocation2 + $0x1ec] sm:$0x1] %v9437_v21 }
  0x88   : > { %847 = vst [vmem:[#allocation2 + $0x1fc] sm:$0x1] %v9437_v21 }
  0x89   : > { %848 = vst [vmem:[#allocation2 + $0x20c] sm:$0x1] %v9437_v21 }
  0x8a   : > { %849 = vst [vmem:[#allocation2 + $0x21c] sm:$0x1] %v9437_v21 }
  0x8b   : > { %850 = vst [vmem:[#allocation2 + $0x22c] sm:$0x1] %v9437_v21 }
  0x8c   : > { %851 = vst [vmem:[#allocation2 + $0x23c] sm:$0x1] %v9437_v21 }
  0x8d   : > { %852 = vst [vmem:[#allocation2 + $0x24c] sm:$0x1] %v9437_v21 }
  0x8e   : > { %853 = vst [vmem:[#allocation2 + $0x25c] sm:$0x1] %v9437_v21 }
  0x8f   : > { %854 = vst [vmem:[#allocation2 + $0x26c] sm:$0x1] %v9437_v21 }
  0x90   : > { %678 = vmatmul.bf16.gmra.mxu0 %v8686_v11  ;;  %855 = vst [vmem:[#allocation2 + $0x27c] sm:$0x1] %v9437_v21 }
  0x91   : > { %856 = vst [vmem:[#allocation2 + $0x8] sm:$0xf] %v9437_v21 }
  0x92   : > { %857 = vst [vmem:[#allocation2 + $0xa8] sm:$0xf] %v9437_v21 }
  0x93   : > { %858 = vst [vmem:[#allocation2 + $0x148] sm:$0xf] %v9437_v21 }
  0x94   : > { %859 = vst [vmem:[#allocation2 + $0x1e8] sm:$0xf] %v9437_v21 }
  0x95   : > { %861 = vst [vmem:[#allocation2 + $0x98] sm:$0xf] %v9437_v21 }
  0x96   : > { %862 = vst [vmem:[#allocation2 + $0x138] sm:$0xf] %v9437_v21 }
  0x97   : > { %863 = vst [vmem:[#allocation2 + $0x1d8] sm:$0xf] %v9437_v21 }
  0x98   : > { %864 = vst [vmem:[#allocation2 + $0x278] sm:$0xf] %v9437_v21 }
  0xa0   : > { %683 = vmatmul.bf16.gmra.mxu0 %v8687_v12 }
  0xb0   : > { %688 = vmatmul.bf16.gmra.mxu0 %v8688_v13 }
  0xc0   : > { %693 = vmatmul.bf16.gmra.mxu0 %v8689_v16  ;;  %v8851_v16 = vld [vmem:[#allocation7] sm:$0xff] }
  0xc1   : > { %5972 = vmatpush.bf16.msra.mxu1 %v8851_v16  ;;  %9130 = vmatpush.bf16.msrb.mxu3 %v8851_v16 }
  0xd0   : > { %698 = vmatmul.bf16.gmra.mxu0 %v8690_v22 }
  0xdd   : > { %v664_v25 = vpop.f32.mrf.mxu0 }
  0xde   : > { %v665_v26 = vadd.f32 %v9705_v23, %v664_v25 }
  0xe0   : > { %v744_v27 = vmax.f32 %v665_v26, 0.0  ;;  %703 = vmatmul.bf16.gmra.mxu0 %v8691_v24  ;;  %v998_v26 = vshrl.u32 %v930_v9, 16 }
  0xe2   : > { %v865_v28 = vpack.c.bf16 %v744_v27, %v744_v27  ;;  %v7649_v40 = vrot.slane %v998_v26, 11  ;;  %v934_v26 = vld [vmem:[#allocation2 + $0x24] sm:$0x8] }
  0xe4   : > { %898 = vst [vmem:[#allocation2 + $0x18] sm:$0xf] %v865_v28 }
  0xe5   : > { %v666_v29 = vpop.f32.mrf.mxu0 }
  0xe6   : > { %v667_v30 = vadd.f32 %v9705_v23, %v666_v29  ;;  %v931_v29 = vld [vmem:[#allocation2 + $0x8] sm:$0xf] }
  0xe8   : > { %v745_v31 = vmax.f32 %v667_v30, 0.0 }
  0xea   : > { %v866_v32 = vpack.c.bf16 %v745_v31, %v745_v31  ;;  %v1003_v31 = vshrl.u32 %v931_v29, 16 }
  0xeb   : > { %v2664_v33 = vld [vmem:[#allocation2 + $0x18] sm:$0xf] }
  0xec   : > { %2696 = vst [vmem:[#allocation3 + $0x10] sm:$0xf] %v2664_v33  ;;  %v933_v60 = vld [vmem:[#allocation2 + $0x18] sm:$0xf] }
  0xed   : > { %899 = vst [vmem:[#allocation2 + $0x28] sm:$0xf] %v866_v32  ;;  %v669_v46 = vpop.f32.mrf.mxu0  ;;  %v1016_v1 = vshrl.u32 %v933_v60, 16  ;;  %v1019_v27 = vshll.u32 %v933_v60, 16  ;;  %v1006_v32 = vshll.u32 %v931_v29, 16 }
  0xee   : > { %v670_v62 = vadd.f32 %v9705_v23, %v669_v46  ;;  %v1478_v36 = vld [vmem:[#allocation2 + $0x18] sm:$0xf] }
  0xef   : > { %v1018_v11 = vrot.slane %v1016_v1, 7  ;;  %1510 = vst [vmem:[#allocation3 + $0x28] sm:$0xf] %v1478_v36 }
  0xf0   : > { %708 = vmatmul.bf16.gmra.mxu0 %v8692_v42  ;;  %v746_v6 = vmax.f32 %v670_v62, 0.0  ;;  %v1005_v42 = vrot.slane %v1003_v31, 7 }
  0xf1   : > { %v1021_v33 = vor.u32 %v1019_v27, %v1018_v11 }
  0xf2   : > { %v867_v24 = vpack.c.bf16 %v746_v6, %v746_v6  ;;  %v1008_v21 = vor.u32 %v1006_v32, %v1005_v42  ;;  %v1024_v32 = vshrl.u32 %v934_v26, 16  ;;  %v8695_v26 = vld [vmem:[%s9625_s26 + $0x60] sm:$0xff] }
  0xf4   : > { %v2665_v34 = vld [vmem:[#allocation2 + $0x28] sm:$0xf]  ;;  %900 = vst [vmem:[#allocation2 + $0x38] sm:$0xf] %v867_v24  ;;  %v1009_v46 = vsel %vm9792_vm4, %v7649_v40, %v1008_v21  ;;  %v7651_v21 = vrot.slane %v1024_v32, 11 }
  0xf5   : > { %2697 = vst [vmem:[#allocation3 + $0x34] sm:$0xf] %v2665_v34  ;;  %v3849_v35 = vld [vmem:[#allocation2 + $0x28] sm:$0xf]  ;;  %v671_v56 = vpop.f32.mrf.mxu0 }
  0xf6   : > { %3881 = vst [vmem:[#allocation3 + $0x1c] sm:$0xf] %v3849_v35  ;;  %v3913_v47 = vld [vmem:[#allocation2 + $0x28] sm:$0xf]  ;;  %v672_v0 = vadd.f32 %v9705_v23, %v671_v56  ;;  %v7650_v35 = vrot.slane %v1011_v19, 11 }
  0xf7   : > { %v3306_v48 = vld [vmem:[#allocation2 + $0x28] sm:$0xf]  ;;  %v3978_v49 = vshrl.u32 %v3913_v47, 16  ;;  %v3981_v50 = vshll.u32 %v3913_v47, 16  ;;  %1445 = vst [vmem:[#allocation3] sm:$0xf] %v1009_v46 }
  0xf8   : > { %v3375_v52 = vshrl.u32 %v3306_v48, 16  ;;  %v3378_v63 = vshll.u32 %v3306_v48, 16  ;;  %v747_v8 = vmax.f32 %v672_v0, 0.0  ;;  %v1477_v34 = vld [vmem:[#allocation2 + $0x8] sm:$0xf]  ;;  %v1022_v43 = vsel %vm9792_vm4, %v7650_v35, %v1021_v33 }
  0xf9   : > { %v3980_v54 = vrot.slane %v3978_v49, 4  ;;  %v3983_v55 = vrot.slane %v3981_v50, 5  ;;  %1509 = vst [vmem:[#allocation3 + $0x4] sm:$0xf] %v1477_v34  ;;  %v3307_v47 = vld [vmem:[#allocation2 + $0x34] sm:$0x8] }
  0xfa   : > { %v3377_v58 = vrot.slane %v3375_v52, 7  ;;  %v868_v28 = vpack.c.bf16 %v747_v8, %v747_v8  ;;  %1446 = vst [vmem:[#allocation3 + $0x24] sm:$0xf] %v1022_v43  ;;  %v3383_v49 = vshrl.u32 %v3307_v47, 16  ;;  %v935_v6 = vld [vmem:[#allocation2 + $0x28] sm:$0xf] }
  0xfb   : > { %v3984_v61 = vor.u32 %v3983_v55, %v3980_v54  ;;  %v2666_v48 = vld [vmem:[#allocation2 + $0x38] sm:$0xf]  ;;  %v3916_v54 = vld [vmem:[#allocation2 + $0x3c] sm:$0x1]  ;;  %v1479_v33 = vld [vmem:[#allocation2 + $0x28] sm:$0xf] }
  0xfc   : > { %v3380_v3 = vor.u32 %v3378_v63, %v3377_v58  ;;  %901 = vst [vmem:[#allocation2 + $0x48] sm:$0xf] %v868_v28  ;;  %v3308_v50 = vld [vmem:[#allocation2 + $0x38] sm:$0xf]  ;;  %v7714_v56 = vrot.slane %v3383_v49, 11  ;;  %v8696_v46 = vld [vmem:[%s9625_s26 + $0x68] sm:$0xff] }
  0xfd   : > { %v3985_v5 = vrot.slane %v3984_v61, 4  ;;  %v674_v17 = vpop.f32.mrf.mxu0  ;;  %2698 = vst [vmem:[#allocation3 + $0x58] sm:$0xf] %v2666_v48  ;;  %v3388_v52 = vshrl.u32 %v3308_v50, 16  ;;  %v3850_v53 = vld [vmem:[#allocation2 + $0x38] sm:$0xf]  ;;  %728 = vmatmul.bf16.vlgmr.msra.gmra.mxu3 %v8696_v46 }
  0xfe   : > { %v3381_v13 = vsel %vm9792_vm4, %v7713_v2, %v3380_v3  ;;  %v675_v25 = vadd.f32 %v9705_v23, %v674_v17  ;;  %3882 = vst [vmem:[#allocation3 + $0x40] sm:$0xf] %v3850_v53  ;;  %v3915_v55 = vld [vmem:[#allocation2 + $0x38] sm:$0xf]  ;;  %v3391_v58 = vshll.u32 %v3308_v50, 16  ;;  %v4001_v61 = vshll.u32 %v3916_v54, 16  ;;  %9131 = vmatpush.bf16.msra.mxu3 %v9669_v14 }
  0xff   : > { %v3990_v22 = vsel %vm9799_vm5, %v3985_v5, %v3989_v4  ;;  %3817 = vst [vmem:[#allocation3 + $0x18] sm:$0xf] %v3381_v13  ;;  %v3390_v57 = vrot.slane %v3388_v52, 7  ;;  %v3992_v59 = vshrl.u32 %v3915_v55, 16  ;;  %v3995_v60 = vshll.u32 %v3915_v55, 16  ;;  %v8882_v49 = vld [vmem:[#allocation7 + $0xf8] sm:$0xff] }
 0x100   : > { %v748_v30 = vmax.f32 %v675_v25, 0.0  ;;  %4457 = vst [vmem:[#allocation3 + $0x20] sm:$0xf] %v3990_v22  ;;  %713 = vmatmul.bf16.gmra.mxu0 %v8693_v45  ;;  %v4003_v4 = vrot.slane %v4001_v61, 5  ;;  %v8707_v9 = vld [vmem:[#allocation3 + $0x4] sm:$0xf] }
 0x101   : > { %v3393_v62 = vor.u32 %v3391_v58, %v3390_v57  ;;  %v3994_v63 = vrot.slane %v3992_v59, 4  ;;  %v3997_v0 = vrot.slane %v3995_v60, 5  ;;  %v1029_v13 = vshrl.u32 %v935_v6, 16  ;;  %v7749_v17 = vld [vmem:[#allocation3 + $0x24] sm:$0xf0]  ;;  %v8694_v45 = vld [vmem:[%s9625_s26 + $0x58] sm:$0xff]  ;;  %6232 = vmatpush.bf16.msrb.mxu0 %v8882_v49 }
 0x102   : > { %v869_v38 = vpack.c.bf16 %v748_v30, %v748_v30  ;;  %v7752_v19 = vor.u32 %v8707_v9, %v7749_v17  ;;  %v1032_v30 = vshll.u32 %v935_v6, 16  ;;  %v7747_v35 = vld [vmem:[#allocation3] sm:$0xf]  ;;  %v8711_v36 = vld [vmem:[#allocation3 + $0x20] sm:$0xf0]  ;;  %9132 = vmatpush.bf16.msra.mxu3 %v9672_v15  ;;  %v8880_v6 = vld [vmem:[#allocation7 + $0xe8] sm:$0xff] }
 0x103   : > { %v3394_v1 = vsel %vm9792_vm4, %v7714_v56, %v3393_v62  ;;  %v2667_v2 = vld [vmem:[#allocation2 + $0x48] sm:$0xf]  ;;  %v3998_v3 = vor.u32 %v3997_v0, %v3994_v63  ;;  %v1031_v27 = vrot.slane %v1029_v13, 7  ;;  %v7748_v40 = vor.u32 %v8711_v36, %v7747_v35  ;;  %v1480_v42 = vld [vmem:[#allocation2 + $0x38] sm:$0xf]  ;;  %v8881_v63 = vld [vmem:[#allocation7 + $0xf0] sm:$0xff] }
 0x104   : > { %902 = vst [vmem:[#allocation2 + $0x58] sm:$0xf] %v869_v38  ;;  %v3851_v5 = vld [vmem:[#allocation2 + $0x48] sm:$0xf]  ;;  %6062 = vmatmul.bf16.vlgmr.msra.gmra.mxu2 %v7752_v19  ;;  %v937_v47 = vld [vmem:[#allocation2 + $0x38] sm:$0xf] }
 0x105   : > { %v676_v51 = vpop.f32.mrf.mxu0  ;;  %3818 = vst [vmem:[#allocation3 + $0x3c] sm:$0xf] %v3394_v1  ;;  %v3999_v8 = vrot.slane %v3998_v3, 4  ;;  %v1034_v34 = vor.u32 %v1032_v30, %v1031_v27  ;;  %5973 = vmatmul.bf16.vlgmr.msra.gmra.mxu1 %v7748_v40  ;;  %v1481_v50 = vld [vmem:[#allocation2 + $0x48] sm:$0xf]  ;;  %v1042_v52 = vshrl.u32 %v937_v47, 16  ;;  %6233 = vmatpush.bf16.msrb.mxu0 %v8881_v63 }
 0x106   : > { %v677_v7 = vadd.f32 %v9705_v23, %v676_v51  ;;  %2699 = vst [vmem:[#allocation3 + $0x7c] sm:$0xf] %v2667_v2  ;;  %v936_v53 = vld [vmem:[#allocation2 + $0x34] sm:$0x8]  ;;  %v1045_v60 = vshll.u32 %v937_v47, 16  ;;  %9133 = vmatpush.bf16.msra.mxu3 %v9676_v18  ;;  %v8878_v35 = vld [vmem:[#allocation7 + $0xd8] sm:$0xff] }
 0x107   : > { %3883 = vst [vmem:[#allocation3 + $0x64] sm:$0xf] %v3851_v5  ;;  %v4004_v16 = vsel %vm9799_vm5, %v3999_v8, %v4003_v4  ;;  %v1035_v48 = vsel %vm9792_vm4, %v7651_v21, %v1034_v34  ;;  %v1044_v55 = vrot.slane %v1042_v52, 7  ;;  %v1037_v57 = vshrl.u32 %v936_v53, 16  ;;  %v939_v61 = vld [vmem:[#allocation2 + $0x48] sm:$0xf] }
 0x108   : > { %4458 = vst [vmem:[#allocation3 + $0x44] sm:$0xf] %v4004_v16  ;;  %v749_v22 = vmax.f32 %v677_v7, 0.0  ;;  %v1055_v15 = vshrl.u32 %v939_v61, 16  ;;  %v8879_v16 = vld [vmem:[#allocation7 + $0xe0] sm:$0xff] }
 0x109   : > { %1511 = vst [vmem:[#allocation3 + $0x4c] sm:$0xf] %v1479_v33  ;;  %v1047_v14 = vor.u32 %v1045_v60, %v1044_v55  ;;  %v7652_v4 = vrot.slane %v1037_v57, 11  ;;  %6234 = vmatpush.bf16.msrb.mxu0 %v8880_v6  ;;  %v8875_v63 = vld [vmem:[#allocation7 + $0xc0] sm:$0xff]  ;;  %v2123_v6 = vld [vmem:[#allocation2 + $0x28] sm:$0xf] }
 0x10a   : > { %v870_v28 = vpack.c.bf16 %v749_v22, %v749_v22  ;;  %1512 = vst [vmem:[#allocation3 + $0x70] sm:$0xf] %v1480_v42  ;;  %9134 = vmatpush.bf16.msra.mxu3 %v9679_v20  ;;  %v1057_v18 = vrot.slane %v1055_v15, 7  ;;  %v938_v22 = vld [vmem:[#allocation2 + $0x44] sm:$0x8]  ;;  %v8877_v42 = vld [vmem:[#allocation7 + $0xd0] sm:$0xff] }
 0x10b   : > { %v2668_v25 = vld [vmem:[#allocation2 + $0x58] sm:$0xf]  ;;  %1447 = vst [vmem:[#allocation3 + $0x48] sm:$0xf] %v1035_v48  ;;  %v1050_v30 = vshrl.u32 %v938_v22, 16 }
 0x10c   : > { %2700 = vst [vmem:[#allocation3 + $0xa0] sm:$0xf] %v2668_v25  ;;  %v3852_v31 = vld [vmem:[#allocation2 + $0x58] sm:$0xf]  ;;  %v940_v25 = vld [vmem:[#allocation2 + $0x54] sm:$0x8] }
 0x10d   : > { %v679_v11 = vpop.f32.mrf.mxu0  ;;  %3884 = vst [vmem:[#allocation3 + $0x88] sm:$0xf] %v3852_v31  ;;  %v1482_v51 = vld [vmem:[#allocation2 + $0x58] sm:$0xf]  ;;  %6235 = vmatpush.bf16.msrb.mxu0 %v8879_v16  ;;  %v1063_v32 = vshrl.u32 %v940_v25, 16  ;;  %v7653_v34 = vrot.slane %v1050_v30, 11 }
 0x10e   : > { %v680_v24 = vadd.f32 %v9705_v23, %v679_v11  ;;  %903 = vst [vmem:[#allocation2 + $0x68] sm:$0xf] %v870_v28  ;;  %v941_v62 = vld [vmem:[#allocation2 + $0x58] sm:$0xf]  ;;  %v1048_v11 = vsel %vm9792_vm4, %v7652_v4, %v1047_v14  ;;  %9135 = vmatpush.bf16.msra.mxu3 %v9741_v37  ;;  %v8697_v28 = vld [vmem:[%s9625_s26 + $0x70] sm:$0xff]  ;;  %v2203_v16 = vshrl.u32 %v2123_v6, 16 }
 0x10f   : > { %1513 = vst [vmem:[#allocation3 + $0x94] sm:$0xf] %v1481_v50  ;;  %v1068_v7 = vshrl.u32 %v941_v62, 16  ;;  %v1071_v27 = vshll.u32 %v941_v62, 16  ;;  %733 = vmatmul.bf16.gmra.mxu3 %v8697_v28  ;;  %v7654_v37 = vrot.slane %v1063_v32, 11 }
 0x110   : > { %v750_v29 = vmax.f32 %v680_v24, 0.0  ;;  %718 = vmatmul.bf16.gmra.mxu0 %v8694_v45  ;;  %1514 = vst [vmem:[#allocation3 + $0xb8] sm:$0xf] %v1482_v51  ;;  %v8716_v0 = vld [vmem:[#allocation3 + $0x4c] sm:$0xf]  ;;  %v1058_v24 = vshll.u32 %v939_v61, 16 }
 0x111   : > { %v7785_v1 = vld [vmem:[#allocation3 + $0x6c] sm:$0xf0]  ;;  %v1070_v17 = vrot.slane %v1068_v7, 7  ;;  %1448 = vst [vmem:[#allocation3 + $0x6c] sm:$0xf] %v1048_v11  ;;  %6236 = vmatpush.bf16.msrb.mxu0 %v8878_v35  ;;  %v8876_v51 = vld [vmem:[#allocation7 + $0xc8] sm:$0xff] }
 0x112   : > { %v871_v38 = vpack.c.bf16 %v750_v29, %v750_v29  ;;  %v7788_v3 = vor.u32 %v8716_v0, %v7785_v1  ;;  %v1060_v29 = vor.u32 %v1058_v24, %v1057_v18  ;;  %9136 = vmatpush.bf16.msra.mxu3 %v9748_v39  ;;  %v7783_v47 = vld [vmem:[#allocation3 + $0x48] sm:$0xf]  ;;  %v8698_v1 = vld [vmem:[%s9625_s26 + $0x78] sm:$0xff]  ;;  %v2205_v32 = vrot.slane %v2203_v16, 7 }
 0x113   : > { %v1073_v31 = vor.u32 %v1071_v27, %v1070_v17  ;;  %v1543_v18 = vld [vmem:[#allocation2 + $0x18] sm:$0xf]  ;;  %v944_v17 = vld [vmem:[#allocation2 + $0x74] sm:$0x8] }
 0x114   : > { %904 = vst [vmem:[#allocation2 + $0x78] sm:$0xf] %v871_v38  ;;  %6067 = vmatmul.bf16.gmra.mxu2 %v7788_v3  ;;  %v1061_v40 = vsel %vm9792_vm4, %v7653_v34, %v1060_v29  ;;  %v1623_v22 = vshrl.u32 %v1543_v18, 16  ;;  %v1626_v24 = vshll.u32 %v1543_v18, 16  ;;  %v2728_v27 = vld [vmem:[#allocation2 + $0x18] sm:$0xf] }
 0x115   : > { %v681_v43 = vpop.f32.mrf.mxu0  ;;  %v2669_v54 = vld [vmem:[#allocation2 + $0x68] sm:$0xf]  ;;  %v1074_v45 = vsel %vm9792_vm4, %v7654_v37, %v1073_v31  ;;  %1449 = vst [vmem:[#allocation3 + $0x90] sm:$0xf] %v1061_v40  ;;  %6237 = vmatpush.bf16.msrb.mxu0 %v8877_v42  ;;  %v1089_v29 = vshrl.u32 %v944_v17, 16  ;;  %v2796_v40 = vshll.u32 %v2728_v27, 16 }
 0x116   : > { %v3853_v56 = vld [vmem:[#allocation2 + $0x68] sm:$0xf]  ;;  %v682_v58 = vadd.f32 %v9705_v23, %v681_v43  ;;  %2701 = vst [vmem:[#allocation3 + $0xc4] sm:$0xf] %v2669_v54  ;;  %v8725_v43 = vld [vmem:[#allocation3 + $0x94] sm:$0xf]  ;;  %9137 = vmatpush.bf16.msra.mxu3 %v9755_v41 }
 0x117   : > { %3885 = vst [vmem:[#allocation3 + $0xac] sm:$0xf] %v3853_v56  ;;  %v7821_v36 = vld [vmem:[#allocation3 + $0xb4] sm:$0xf0]  ;;  %v1483_v38 = vld [vmem:[#allocation2 + $0x68] sm:$0xf] }
 0x118   : > { %v751_v5 = vmax.f32 %v682_v58, 0.0  ;;  %1515 = vst [vmem:[#allocation3 + $0xdc] sm:$0xf] %v1483_v38  ;;  %v943_v21 = vld [vmem:[#allocation2 + $0x68] sm:$0xf]  ;;  %v7824_v39 = vor.u32 %v8725_v43, %v7821_v36  ;;  %v2793_v38 = vshrl.u32 %v2728_v27, 16 }
 0x119   : > { %v8720_v48 = vld [vmem:[#allocation3 + $0x68] sm:$0xf0]  ;;  %1450 = vst [vmem:[#allocation3 + $0xb4] sm:$0xf] %v1074_v45  ;;  %v1081_v52 = vshrl.u32 %v943_v21, 16  ;;  %6238 = vmatpush.bf16.msrb.mxu0 %v8876_v51  ;;  %v1084_v60 = vshll.u32 %v943_v21, 16 }
 0x11a   : > { %v872_v13 = vpack.c.bf16 %v751_v5, %v751_v5  ;;  %v7784_v49 = vor.u32 %v8720_v48, %v7783_v47  ;;  %9138 = vmatpush.bf16.msra.mxu3 %v9763_v44  ;;  %v942_v56 = vld [vmem:[#allocation2 + $0x64] sm:$0x8]  ;;  %v2121_v5 = vld [vmem:[#allocation2 + $0x18] sm:$0xf]  ;;  %v2206_v21 = vshll.u32 %v2123_v6, 16  ;;  %v7656_v47 = vrot.slane %v1089_v29, 11 }
 0x11b   : > { %v2670_v8 = vld [vmem:[#allocation2 + $0x78] sm:$0xf]  ;;  %v1083_v57 = vrot.slane %v1081_v52, 7  ;;  %v1076_v62 = vshrl.u32 %v942_v56, 16  ;;  %v2193_v31 = vshll.u32 %v2121_v5, 16  ;;  %v1625_v51 = vrot.slane %v1623_v22, 4 }
 0x11c   : > { %2702 = vst [vmem:[#allocation3 + $0xe8] sm:$0xf] %v2670_v8  ;;  %v3854_v19 = vld [vmem:[#allocation2 + $0x78] sm:$0xf]  ;;  %5978 = vmatmul.bf16.gmra.mxu1 %v7784_v49  ;;  %v7819_v3 = vld [vmem:[#allocation3 + $0x90] sm:$0xf]  ;;  %v2208_v52 = vor.u32 %v2206_v21, %v2205_v32 }
 0x11d   : > { %v684_v59 = vpop.f32.mrf.mxu0  ;;  %3886 = vst [vmem:[#allocation3 + $0xd0] sm:$0xf] %v3854_v19  ;;  %v1484_v61 = vld [vmem:[#allocation2 + $0x78] sm:$0xf]  ;;  %v1086_v14 = vor.u32 %v1084_v60, %v1083_v57  ;;  %6239 = vmatpush.bf16.msrb.mxu0 %v8875_v63  ;;  %v2120_v19 = vld [vmem:[#allocation2 + $0x14] sm:$0x8] }
 0x11e   : > { %v685_v2 = vadd.f32 %v9705_v23, %v684_v59  ;;  %905 = vst [vmem:[#allocation2 + $0x88] sm:$0xf] %v872_v13  ;;  %v945_v15 = vld [vmem:[#allocation2 + $0x78] sm:$0xf]  ;;  %v2190_v13 = vshrl.u32 %v2121_v5, 16  ;;  %v2795_v56 = vrot.slane %v2793_v38, 4 }
 0x11f   : > { %1516 = vst [vmem:[#allocation3 + $0x100] sm:$0xf] %v1484_v61  ;;  %738 = vmatmul.bf16.gmra.mxu3 %v8698_v1  ;;  %v1094_v11 = vshrl.u32 %v945_v15, 16  ;;  %v1097_v34 = vshll.u32 %v945_v15, 16  ;;  %v8734_v42 = vld [vmem:[#allocation3 + $0xdc] sm:$0xf] }
 0x120   : > { %v752_v9 = vmax.f32 %v685_v2, 0.0  ;;  %723 = vmatmul.bf16.gmra.mxu0 %v8695_v26  ;;  %v8729_v0 = vld [vmem:[#allocation3 + $0xb0] sm:$0xf0]  ;;  %v7655_v2 = vrot.slane %v1076_v62, 11  ;;  %v2122_v26 = vld [vmem:[#allocation2 + $0x24] sm:$0x8] }
 0x121   : > { %v7820_v7 = vor.u32 %v8729_v0, %v7819_v3  ;;  %v2192_v30 = vrot.slane %v2190_v13, 7  ;;  %v2198_v36 = vshrl.u32 %v2122_v26, 16  ;;  %v2125_v43 = vld [vmem:[#allocation2 + $0x38] sm:$0xf]  ;;  %v2798_v57 = vrot.slane %v2796_v40, 5 }
 0x122   : > { %v873_v20 = vpack.c.bf16 %v752_v9, %v752_v9  ;;  %v1087_v8 = vsel %vm9792_vm4, %v7655_v2, %v1086_v14  ;;  %v2730_v61 = vld [vmem:[#allocation2 + $0x28] sm:$0xf]  ;;  %v1547_v18 = vld [vmem:[#allocation2 + $0x38] sm:$0xf] }
 0x123   : > { %1451 = vst [vmem:[#allocation3 + $0xd8] sm:$0xf] %v1087_v8  ;;  %v2195_v48 = vor.u32 %v2193_v31, %v2192_v30  ;;  %v2799_v2 = vor.u32 %v2798_v57, %v2795_v56  ;;  %v2807_v5 = vshrl.u32 %v2730_v61, 16  ;;  %v2810_v6 = vshll.u32 %v2730_v61, 16  ;;  %v1485_v8 = vld [vmem:[#allocation2 + $0xa8] sm:$0xf] }
 0x124   : > { %906 = vst [vmem:[#allocation2 + $0xb8] sm:$0xf] %v873_v20  ;;  %6072 = vmatmul.bf16.gmra.mxu2 %v7824_v39  ;;  %v1096_v20 = vrot.slane %v1094_v11, 7  ;;  %v1651_v27 = vshrl.u32 %v1547_v18, 16  ;;  %v947_v31 = vld [vmem:[#allocation2 + $0xa8] sm:$0xf] }
 0x125   : > { %v686_v33 = vpop.f32.mrf.mxu0  ;;  %v2671_v50 = vld [vmem:[#allocation2 + $0x88] sm:$0xf]  ;;  %1517 = vst [vmem:[#allocation3 + $0x124] sm:$0xf] %v1485_v8  ;;  %v9867_v26 = vrot.slane %v2810_v6, 5 }
 0x126   : > { %v687_v46 = vadd.f32 %v9705_v23, %v686_v33  ;;  %v3855_v53 = vld [vmem:[#allocation2 + $0x88] sm:$0xf]  ;;  %2703 = vst [vmem:[#allocation3 + $0x10c] sm:$0xf] %v2671_v50  ;;  %v2185_v33 = vshrl.u32 %v2120_v19, 16  ;;  %v1099_v45 = vor.u32 %v1097_v34, %v1096_v20  ;;  %v9859_v19 = vrot.slane %v2799_v2, 4 }
 0x127   : > { %3887 = vst [vmem:[#allocation3 + $0xf4] sm:$0xf] %v3855_v53  ;;  %v7857_v35 = vld [vmem:[#allocation3 + $0xfc] sm:$0xf0]  ;;  %v7682_v53 = vrot.slane %v2198_v36, 11  ;;  %v1654_v20 = vshll.u32 %v1547_v18, 16 }
 0x128   : > { %v753_v54 = vmax.f32 %v687_v46, 0.0  ;;  %v7860_v46 = vor.u32 %v8734_v42, %v7857_v35  ;;  %v7681_v49 = vrot.slane %v2185_v33, 11  ;;  %v2732_v32 = vld [vmem:[#allocation2 + $0x38] sm:$0xf]  ;;  %v2127_v33 = vld [vmem:[#allocation2 + $0x48] sm:$0xf] }
 0x129   : > { %v2209_v14 = vsel %vm9792_vm4, %v7682_v53, %v2208_v52  ;;  %v9871_v42 = vrot.slane %v1651_v27, 4  ;;  %v9873_v21 = vrot.slane %v1654_v20, 5  ;;  %v948_v52 = vld [vmem:[#allocation2 + $0xb4] sm:$0x8]  ;;  %v3917_v53 = vld [vmem:[#allocation2 + $0x48] sm:$0xf] }
 0x12a   : > { %v874_v41 = vpack.c.bf16 %v753_v54, %v753_v54  ;;  %v2196_v63 = vsel %vm9792_vm4, %v7681_v49, %v2195_v48  ;;  %2633 = vst [vmem:[#allocation3 + $0x30] sm:$0xf] %v2209_v14  ;;  %v7855_v29 = vld [vmem:[#allocation3 + $0xd8] sm:$0xf]  ;;  %v2229_v48 = vshrl.u32 %v2127_v33, 16  ;;  %v2232_v56 = vshll.u32 %v2127_v33, 16 }
 0x12b   : > { %v2672_v58 = vld [vmem:[#allocation2 + $0xb8] sm:$0xf]  ;;  %2632 = vst [vmem:[#allocation3 + $0xc] sm:$0xf] %v2196_v63  ;;  %v946_v49 = vld [vmem:[#allocation2 + $0xa4] sm:$0x8] }
 0x12c   : > { %2704 = vst [vmem:[#allocation3 + $0x130] sm:$0xf] %v2672_v58  ;;  %5983 = vmatmul.bf16.gmra.mxu1 %v7820_v7  ;;  %v2216_v58 = vshrl.u32 %v2125_v43, 16  ;;  %v2219_v7 = vshll.u32 %v2125_v43, 16  ;;  %v1486_v11 = vld [vmem:[#allocation2 + $0xb8] sm:$0xf] }
 0x12d   : > { %v689_v55 = vpop.f32.mrf.mxu0  ;;  %907 = vst [vmem:[#allocation2 + $0xc8] sm:$0xf] %v874_v41  ;;  %v1545_v41 = vld [vmem:[#allocation2 + $0x28] sm:$0xf]  ;;  %v949_v34 = vld [vmem:[#allocation2 + $0xb8] sm:$0xf] }
 0x12e   : > { %v690_v59 = vadd.f32 %v9705_v23, %v689_v55  ;;  %v1628_v55 = vrot.slane %v1626_v24, 5  ;;  %v1637_v15 = vshrl.u32 %v1545_v41, 16  ;;  %v2218_v3 = vrot.slane %v2216_v58, 7  ;;  %1518 = vst [vmem:[#allocation3 + $0x148] sm:$0xf] %v1486_v11 }
 0x12f   : > { %v1102_v57 = vshrl.u32 %v946_v49, 16  ;;  %v8743_v61 = vld [vmem:[#allocation3 + $0x124] sm:$0xf]  ;;  %v2231_v63 = vrot.slane %v2229_v48, 7  ;;  %v4006_v2 = vshrl.u32 %v3917_v53, 16  ;;  %v4009_v6 = vshll.u32 %v3917_v53, 16 }
 0x130   : > { %v754_v44 = vmax.f32 %v690_v59, 0.0  ;;  %v1100_v59 = vsel %vm9792_vm4, %v7656_v47, %v1099_v45  ;;  %v1629_v1 = vor.u32 %v1628_v55, %v1625_v51  ;;  %v2221_v17 = vor.u32 %v2219_v7, %v2218_v3 }
 0x131   : > { %1452 = vst [vmem:[#allocation3 + $0xfc] sm:$0xf] %v1100_v59  ;;  %v9861_v22 = vrot.slane %v1637_v15, 4  ;;  %v7757_v38 = vld [vmem:[#allocation3 + $0x2c] sm:$0xf0]  ;;  %v1107_v45 = vshrl.u32 %v947_v31, 16 }
 0x132   : > { %v875_v4 = vpack.c.bf16 %v754_v44, %v754_v44  ;;  %v2124_v44 = vld [vmem:[#allocation2 + $0x34] sm:$0x8]  ;;  %v9857_v16 = vrot.slane %v1629_v1, 4  ;;  %v2824_v47 = vshll.u32 %v2732_v32, 16  ;;  %v2126_v59 = vld [vmem:[#allocation2 + $0x44] sm:$0x8] }
 0x133   : > { %v1109_v58 = vrot.slane %v1107_v45, 7  ;;  %v1123_v3 = vshll.u32 %v949_v34, 16  ;;  %v7657_v7 = vrot.slane %v1102_v57, 11 }
 0x134   : > { %908 = vst [vmem:[#allocation2 + $0xd8] sm:$0xf] %v875_v4  ;;  %v2673_v25 = vld [vmem:[#allocation2 + $0xc8] sm:$0xf]  ;;  %6077 = vmatmul.bf16.gmra.mxu2 %v7860_v46  ;;  %v1640_v4 = vshll.u32 %v1545_v41, 16  ;;  %v2821_v46 = vshrl.u32 %v2732_v32, 16 }
 0x135   : > { %v691_v9 = vpop.f32.mrf.mxu0  ;;  %v3857_v28 = vld [vmem:[#allocation2 + $0xc8] sm:$0xf]  ;;  %2705 = vst [vmem:[#allocation3 + $0x154] sm:$0xf] %v2673_v25  ;;  %v9865_v25 = vrot.slane %v2807_v5, 4  ;;  %v1110_v41 = vshll.u32 %v947_v31, 16 }
 0x136   : > { %v692_v37 = vadd.f32 %v9705_v23, %v691_v9  ;;  %3889 = vst [vmem:[#allocation3 + $0x13c] sm:$0xf] %v3857_v28  ;;  %v2211_v9 = vshrl.u32 %v2124_v44, 16  ;;  %v9863_v24 = vrot.slane %v1640_v4, 5  ;;  %v9880_v44 = vld [vmem:[%s12366_s2] ss:$0 sm:$0xff] }
 0x137   : > { %v7893_v4 = vld [vmem:[#allocation3 + $0x144] sm:$0xf0]  ;;  %v2224_v5 = vshrl.u32 %v2126_v59, 16  ;;  %v1112_v8 = vor.u32 %v1110_v41, %v1109_v58  ;;  %v2826_v18 = vrot.slane %v2824_v47, 5  ;;  %v2813_v20 = vor.u32 %v9867_v26, %v9865_v25  ;;  %v2128_v31 = vld [vmem:[#allocation2 + $0x54] sm:$0x8] }
 0x138   : > { %v755_v54 = vmax.f32 %v692_v37, 0.0  ;;  %v7683_v28 = vrot.slane %v2211_v9, 11  ;;  %v8738_v30 = vld [vmem:[#allocation3 + $0xf8] sm:$0xf0]  ;;  %v8708_v37 = vld [vmem:[#allocation3 + $0xc] sm:$0xf] }
 0x139   : > { %v7856_v35 = vor.u32 %v8738_v30, %v7855_v29  ;;  %v7760_v43 = vor.u32 %v8708_v37, %v7757_v38  ;;  %v2823_v9 = vrot.slane %v2821_v46, 4  ;;  %v2234_v29 = vor.u32 %v2232_v56, %v2231_v63  ;;  %v1549_v32 = vld [vmem:[#allocation2 + $0x48] sm:$0xf] }
 0x13a   : > { %v876_v0 = vpack.c.bf16 %v755_v54, %v755_v54  ;;  %v2222_v36 = vsel %vm9792_vm4, %v7683_v28, %v2221_v17  ;;  %v9875_v54 = vld [vmem:[#allocation2 + $0x58] sm:$0xf]  ;;  %v1657_v28 = vor.u32 %v9873_v21, %v9871_v42  ;;  %v9888_v37 = vld [vmem:[#allocation2 + $0x48] sm:$0xf]  ;;  %v4008_v38 = vrot.slane %v4006_v2, 4 }
 0x13b   : > { %v2674_v39 = vld [vmem:[#allocation2 + $0xd8] sm:$0xf]  ;;  %2634 = vst [vmem:[#allocation3 + $0x54] sm:$0xf] %v2222_v36  ;;  %6240 = vmatmul.bf16.vlgmr.msrb.gmra.mxu0 %v7760_v43  ;;  %v2242_v15 = vshrl.u32 %v9875_v54, 16  ;;  %v7684_v36 = vrot.slane %v2224_v5, 11  ;;  %v1113_v25 = vsel %vm9792_vm4, %v7657_v7, %v1112_v8  ;;  %v2827_v42 = vor.u32 %v2826_v18, %v2823_v9 }
 0x13c   : > { %2706 = vst [vmem:[#allocation3 + $0x178] sm:$0xf] %v2674_v39  ;;  %v3858_v62 = vld [vmem:[#allocation2 + $0xd8] sm:$0xf]  ;;  %5988 = vmatmul.bf16.gmra.mxu1 %v7856_v35  ;;  %v1120_v39 = vshrl.u32 %v949_v34, 16  ;;  %v2245_v43 = vshll.u32 %v9875_v54, 16 }
 0x13d   : > { %v694_v50 = vpop.f32.mrf.mxu0  ;;  %3890 = vst [vmem:[#allocation3 + $0x160] sm:$0xf] %v3858_v62  ;;  %v1115_v62 = vshrl.u32 %v948_v52, 16  ;;  %v2244_v35 = vrot.slane %v2242_v15, 7  ;;  %v1551_v21 = vld [vmem:[#allocation2 + $0x58] sm:$0xf]  ;;  %v2235_v54 = vsel %vm9792_vm4, %v7684_v36, %v2234_v29 }
 0x13e   : > { %v695_v60 = vadd.f32 %v9705_v23, %v694_v50  ;;  %909 = vst [vmem:[#allocation2 + $0xe8] sm:$0xf] %v876_v0  ;;  %v2734_v50 = vld [vmem:[#allocation2 + $0x48] sm:$0xf]  ;;  %v2237_v47 = vshrl.u32 %v2128_v31, 16  ;;  %v9896_v48 = vrot.slane %v2813_v20, 4 }
 0x13f   : > { %v2835_v14 = vshrl.u32 %v2734_v50, 16  ;;  %v2838_v0 = vshll.u32 %v2734_v50, 16  ;;  %v7658_v17 = vrot.slane %v1115_v62, 11  ;;  %12417 = vst [vmem:[#allocation19_spill] sm:$0xff] %v9888_v37  ;;  %v1665_v49 = vshrl.u32 %v1549_v32, 16 }
 0x140   : > { %v756_v23 = vmax.f32 %v695_v60, 0.0  ;;  %v1122_v60 = vrot.slane %v1120_v39, 7  ;;  %v9898_v39 = vrot.slane %v1657_v28, 4  ;;  %v3401_v52 = vshrl.u32 %v9888_v37, 16  ;;  %1453 = vst [vmem:[#allocation3 + $0x120] sm:$0xf] %v1113_v25 }
 0x141   : > { %v2837_v33 = vrot.slane %v2835_v14, 4  ;;  %v2840_v34 = vrot.slane %v2838_v0, 5  ;;  %v2247_v53 = vor.u32 %v2245_v43, %v2244_v35  ;;  %v1679_v56 = vshrl.u32 %v1551_v21, 16  ;;  %2635 = vst [vmem:[#allocation3 + $0x78] sm:$0xf] %v2235_v54 }
 0x142   : > { %v877_v13 = vpack.c.bf16 %v756_v23, %v756_v23  ;;  %v7896_v23 = vor.u32 %v8743_v61, %v7893_v4  ;;  %v1125_v11 = vor.u32 %v1123_v3, %v1122_v60  ;;  %v1682_v57 = vshll.u32 %v1551_v21, 16  ;;  %v1487_v60 = vld [vmem:[#allocation2 + $0xc8] sm:$0xf]  ;;  %v9905_v62 = vld [vmem:[#allocation2 + $0x58] sm:$0xf] }
 0x143   : > { %v9903_v41 = vrot.slane %v2827_v42, 4  ;;  %v7685_v61 = vrot.slane %v2237_v47, 11  ;;  %v1488_v63 = vld [vmem:[#allocation2 + $0xd8] sm:$0xf]  ;;  %v9907_v0 = vrot.slane %v1665_v49, 4  ;;  %v9916_v4 = vrot.slane %v3401_v52, 7 }
 0x144   : > { %910 = vst [vmem:[#allocation2 + $0xf8] sm:$0xf] %v877_v13  ;;  %6082 = vmatmul.bf16.gmra.mxu2 %v7896_v23  ;;  %v1126_v46 = vsel %vm9792_vm4, %v7658_v17, %v1125_v11  ;;  %v1681_v5 = vrot.slane %v1679_v56, 4  ;;  %v2849_v8 = vshrl.u32 %v9905_v62, 16  ;;  %v9921_v9 = vld [vmem:[#allocation2 + $0x58] sm:$0xf] }
 0x145   : > { %v696_v40 = vpop.f32.mrf.mxu0  ;;  %v2675_v51 = vld [vmem:[#allocation2 + $0xe8] sm:$0xf]  ;;  %1454 = vst [vmem:[#allocation3 + $0x144] sm:$0xf] %v1126_v46  ;;  %v2248_v15 = vsel %vm9792_vm4, %v7685_v61, %v2247_v53  ;;  %v953_v17 = vld [vmem:[#allocation2 + $0xd8] sm:$0xf] }
 0x146   : > { %v3859_v55 = vld [vmem:[#allocation2 + $0xe8] sm:$0xf]  ;;  %2707 = vst [vmem:[#allocation3 + $0x19c] sm:$0xf] %v2675_v51  ;;  %v697_v1 = vadd.f32 %v9880_v44, %v696_v40  ;;  %v4011_v40 = vrot.slane %v4009_v6, 5  ;;  %v1668_v51 = vshll.u32 %v1549_v32, 16 }
 0x147   : > { %3891 = vst [vmem:[#allocation3 + $0x184] sm:$0xf] %v3859_v55  ;;  %v2841_v55 = vor.u32 %v2840_v34, %v2837_v33  ;;  %v1684_v6 = vrot.slane %v1682_v57, 5  ;;  %v951_v18 = vld [vmem:[#allocation2 + $0xc8] sm:$0xf]  ;;  %v2852_v32 = vshll.u32 %v9905_v62, 16 }
 0x148   : > { %v757_v30 = vmax.f32 %v697_v1, 0.0  ;;  %v4012_v59 = vor.u32 %v4011_v40, %v4008_v38  ;;  %v9909_v1 = vrot.slane %v1668_v51, 5  ;;  %1519 = vst [vmem:[#allocation3 + $0x16c] sm:$0xf] %v1487_v60  ;;  %v7891_v11 = vld [vmem:[#allocation3 + $0x120] sm:$0xf] }
 0x149   : > { %v9914_v3 = vrot.slane %v2841_v55, 4  ;;  %12418 = vst [vmem:[#allocation20_spill] sm:$0xff] %v9916_v4  ;;  %v1685_v20 = vor.u32 %v1684_v6, %v1681_v5  ;;  %v3919_v28 = vld [vmem:[#allocation2 + $0x58] sm:$0xf]  ;;  %v3414_v33 = vshrl.u32 %v9921_v9, 16  ;;  %v1133_v34 = vshrl.u32 %v951_v18, 16 }
 0x14a   : > { %v878_v50 = vpack.c.bf16 %v757_v30, %v757_v30  ;;  %1520 = vst [vmem:[#allocation3 + $0x190] sm:$0xf] %v1488_v63  ;;  %v9918_v7 = vrot.slane %v4012_v59, 4  ;;  %v8717_v30 = vld [vmem:[#allocation3 + $0x54] sm:$0xf]  ;;  %v1146_v40 = vshrl.u32 %v953_v17, 16 }
 0x14b   : > { %v2676_v13 = vld [vmem:[#allocation2 + $0xf8] sm:$0xf]  ;;  %12420 = vst [vmem:[#allocation22_spill] sm:$0xff] %v9921_v9  ;;  %v1553_v36 = vld [vmem:[#allocation2 + $0x68] sm:$0xf]  ;;  %v4020_v42 = vshrl.u32 %v3919_v28, 16 }
 0x14c   : > { %2708 = vst [vmem:[#allocation3 + $0x1c0] sm:$0xf] %v2676_v13  ;;  %v3860_v45 = vld [vmem:[#allocation2 + $0xf8] sm:$0xf]  ;;  %v2131_v13 = vld [vmem:[#allocation2 + $0x68] sm:$0xf] }
 0x14d   : > { %v699_v27 = vpop.f32.mrf.mxu0  ;;  %3892 = vst [vmem:[#allocation3 + $0x1a8] sm:$0xf] %v3860_v45  ;;  %v7793_v31 = vld [vmem:[#allocation3 + $0x74] sm:$0xf0]  ;;  %v2255_v38 = vshrl.u32 %v2131_v13, 16  ;;  %v9926_v45 = vrot.slane %v1685_v20, 4 }
 0x14e   : > { %v700_v26 = vadd.f32 %v9880_v44, %v699_v27  ;;  %911 = vst [vmem:[#allocation2 + $0x108] sm:$0xf] %v878_v50  ;;  %v8747_v27 = vld [vmem:[#allocation3 + $0x140] sm:$0xf0]  ;;  %v7796_v35 = vor.u32 %v8717_v30, %v7793_v31  ;;  %v952_v43 = vld [vmem:[#allocation2 + $0xd4] sm:$0x8] }
 0x14f   : > { %12419 = vst [vmem:[#allocation21_spill] sm:$0xff] %v9918_v7  ;;  %v7892_v29 = vor.u32 %v8747_v27, %v7891_v11  ;;  %v950_v25 = vld [vmem:[#allocation2 + $0xc4] sm:$0x8]  ;;  %v9928_v46 = vrot.slane %v2849_v8, 4  ;;  %v4023_v51 = vshll.u32 %v3919_v28, 16  ;;  %v1693_v52 = vshrl.u32 %v1553_v36, 16 }
 0x150   : > { %v758_v58 = vmax.f32 %v700_v26, 0.0  ;;  %2636 = vst [vmem:[#allocation3 + $0x9c] sm:$0xf] %v2248_v15  ;;  %6245 = vmatmul.bf16.gmra.mxu0 %v7796_v35  ;;  %v2130_v49 = vld [vmem:[#allocation2 + $0x64] sm:$0x8]  ;;  %v1135_v54 = vrot.slane %v1133_v34, 7 }
 0x151   : > { %5993 = vmatmul.bf16.gmra.mxu1 %v7892_v29  ;;  %v2133_v53 = vld [vmem:[#allocation2 + $0x78] sm:$0xf]  ;;  %v1128_v55 = vshrl.u32 %v950_v25, 16  ;;  %v1696_v56 = vshll.u32 %v1553_v36, 16  ;;  %v2257_v57 = vrot.slane %v2255_v38, 7  ;;  %v1141_v59 = vshrl.u32 %v952_v43, 16 }
 0x152   : > { %v879_v14 = vpack.c.bf16 %v758_v58, %v758_v58  ;;  %v1148_v58 = vrot.slane %v1146_v40, 7  ;;  %v9930_v60 = vld [vmem:[#allocation2 + $0x88] sm:$0xf]  ;;  %v1136_v61 = vshll.u32 %v951_v18, 16  ;;  %v2250_v62 = vshrl.u32 %v2130_v49, 16 }
 0x153   : > { %v1149_v15 = vshll.u32 %v953_v17, 16  ;;  %v8752_v5 = vld [vmem:[#allocation3 + $0x16c] sm:$0xf]  ;;  %v7929_v6 = vld [vmem:[#allocation3 + $0x18c] sm:$0xf0]  ;;  %v2258_v8 = vshll.u32 %v2131_v13, 16 }
 0x154   : > { %912 = vst [vmem:[#allocation2 + $0x118] sm:$0xf] %v879_v14  ;;  %v2268_v14 = vshrl.u32 %v2133_v53, 16  ;;  %v9933_v11 = vld [vmem:[#allocation2 + $0x68] sm:$0xf]  ;;  %v1138_v27 = vor.u32 %v1136_v61, %v1135_v54  ;;  %v7932_v20 = vor.u32 %v8752_v5, %v7929_v6  ;;  %v7659_v28 = vrot.slane %v1128_v55, 11 }
 0x155   : > { %v701_v23 = vpop.f32.mrf.mxu0  ;;  %v2677_v21 = vld [vmem:[#allocation2 + $0x108] sm:$0xf]  ;;  %v9935_v29 = vrot.slane %v2852_v32, 5  ;;  %v1151_v30 = vor.u32 %v1149_v15, %v1148_v58  ;;  %v7660_v34 = vrot.slane %v1141_v59, 11  ;;  %v2132_v35 = vld [vmem:[#allocation2 + $0x74] sm:$0x8]  ;;  %v2260_v36 = vor.u32 %v2258_v8, %v2257_v57 }
 0x156   : > { %v3861_v47 = vld [vmem:[#allocation2 + $0x108] sm:$0xf]  ;;  %2709 = vst [vmem:[#allocation3 + $0x1e4] sm:$0xf] %v2677_v21  ;;  %v702_v63 = vadd.f32 %v9880_v44, %v701_v23  ;;  %v2281_v23 = vshrl.u32 %v9930_v60, 16  ;;  %6087 = vmatmul.bf16.gmra.mxu2 %v7932_v20  ;;  %v7686_v17 = vrot.slane %v2250_v62, 11  ;;  %v1139_v49 = vsel %vm9792_vm4, %v7659_v28, %v1138_v27 }
 0x157   : > { %3893 = vst [vmem:[#allocation3 + $0x1cc] sm:$0xf] %v3861_v47  ;;  %v9939_v38 = vrot.slane %v3414_v33, 7  ;;  %v9941_v40 = vrot.slane %v4020_v42, 4  ;;  %v9943_v25 = vrot.slane %v4023_v51, 5  ;;  %v2270_v32 = vrot.slane %v2268_v14, 7 }
 0x158   : > { %v759_v13 = vmax.f32 %v702_v63, 0.0  ;;  %v9945_v21 = vrot.slane %v1693_v52, 4  ;;  %v9947_v43 = vrot.slane %v1696_v56, 5  ;;  %v3921_v47 = vld [vmem:[#allocation2 + $0x68] sm:$0xf]  ;;  %v2863_v54 = vshrl.u32 %v9933_v11, 16 }
 0x159   : > { %12421 = vst [vmem:[#allocation23_spill] sm:$0xff] %v9939_v38  ;;  %v2271_v55 = vshll.u32 %v2133_v53, 16  ;;  %v1152_v33 = vsel %vm9792_vm4, %v7660_v34, %v1151_v30  ;;  %v9954_v58 = vld [vmem:[#allocation2 + $0x68] sm:$0xf]  ;;  %v2283_v52 = vrot.slane %v2281_v23, 7  ;;  %v2261_v56 = vsel %vm9792_vm4, %v7686_v17, %v2260_v36  ;;  %v8890_v61 = vld [vmem:[#allocation7 + $0x138] sm:$0xff] }
 0x15a   : > { %12422 = vst [vmem:[#allocation24_spill] sm:$0xff] %v9954_v58  ;;  %v880_v59 = vpack.c.bf16 %v759_v13, %v759_v13  ;;  %v2134_v62 = vld [vmem:[#allocation2 + $0x84] sm:$0x8]  ;;  %v2866_v63 = vshll.u32 %v9933_v11, 16  ;;  %v4034_v14 = vshrl.u32 %v3921_v47, 16  ;;  %v2284_v5 = vshll.u32 %v9930_v60, 16  ;;  %6321 = vmatpush.bf16.msrb.mxu1 %v8890_v61 }
 0x15b   : > { %v2678_v31 = vld [vmem:[#allocation2 + $0x118] sm:$0xf]  ;;  %v2273_v53 = vor.u32 %v2271_v55, %v2270_v32  ;;  %v9959_v15 = vld [vmem:[#allocation2 + $0xe8] sm:$0xf]  ;;  %1455 = vst [vmem:[#allocation3 + $0x168] sm:$0xf] %v1139_v49  ;;  %v4026_v55 = vor.u32 %v9943_v25, %v9941_v40 }
 0x15c   : > { %2710 = vst [vmem:[#allocation3 + $0x208] sm:$0xf] %v2678_v31  ;;  %v3862_v57 = vld [vmem:[#allocation2 + $0x118] sm:$0xf]  ;;  %v4037_v20 = vshll.u32 %v3921_v47, 16  ;;  %v2276_v31 = vshrl.u32 %v2134_v62, 16  ;;  %v2286_v11 = vor.u32 %v2284_v5, %v2283_v52 }
 0x15d   : > { %v704_v50 = vpop.f32.mrf.mxu0  ;;  %3894 = vst [vmem:[#allocation3 + $0x1f0] sm:$0xf] %v3862_v57  ;;  %v9962_v6 = vld [vmem:[#allocation2 + $0xf8] sm:$0xf]  ;;  %v1489_v28 = vld [vmem:[#allocation2 + $0xe8] sm:$0xf] }
 0x15e   : > { %v705_v18 = vadd.f32 %v9880_v44, %v704_v50  ;;  %v2263_v50 = vshrl.u32 %v2132_v35, 16  ;;  %1456 = vst [vmem:[#allocation3 + $0x18c] sm:$0xf] %v1152_v33  ;;  %v1159_v34 = vshrl.u32 %v9959_v15, 16  ;;  %v2865_v36 = vrot.slane %v2863_v54, 4 }
 0x15f   : > { %2637 = vst [vmem:[#allocation3 + $0xc0] sm:$0xf] %v2261_v56  ;;  %v3427_v60 = vshrl.u32 %v9954_v58, 16  ;;  %v954_v23 = vld [vmem:[#allocation2 + $0xe4] sm:$0x8]  ;;  %v2868_v13 = vrot.slane %v2866_v63, 5 }
 0x160   : > { %v760_v42 = vmax.f32 %v705_v18, 0.0  ;;  %v7687_v8 = vrot.slane %v2263_v50, 11  ;;  %913 = vst [vmem:[#allocation2 + $0x128] sm:$0xf] %v880_v59  ;;  %v1490_v18 = vld [vmem:[#allocation2 + $0xf8] sm:$0xf]  ;;  %v2855_v50 = vor.u32 %v9935_v29, %v9928_v46 }
 0x161   : > { %1521 = vst [vmem:[#allocation3 + $0x1b4] sm:$0xf] %v1489_v28  ;;  %v1172_v32 = vshrl.u32 %v9962_v6, 16  ;;  %v7688_v47 = vrot.slane %v2276_v31, 11  ;;  %v4036_v54 = vrot.slane %v4034_v14, 4  ;;  %v4039_v57 = vrot.slane %v4037_v20, 5 }
 0x162   : > { %v881_v30 = vpack.c.bf16 %v760_v42, %v760_v42  ;;  %v2274_v17 = vsel %vm9792_vm4, %v7687_v8, %v2273_v53  ;;  %1522 = vst [vmem:[#allocation3 + $0x1d8] sm:$0xf] %v1490_v18  ;;  %v956_v33 = vld [vmem:[#allocation2 + $0xf4] sm:$0x8]  ;;  %v1699_v42 = vor.u32 %v9947_v43, %v9945_v21  ;;  %v1161_v52 = vrot.slane %v1159_v34, 7 }
 0x163   : > { %v8726_v56 = vld [vmem:[#allocation3 + $0x9c] sm:$0xf]  ;;  %v1154_v59 = vshrl.u32 %v954_v23, 16  ;;  %v2287_v61 = vsel %vm9792_vm4, %v7688_v47, %v2286_v11  ;;  %2638 = vst [vmem:[#allocation3 + $0xe4] sm:$0xf] %v2274_v17  ;;  %v2869_v29 = vor.u32 %v2868_v13, %v2865_v36  ;;  %v1174_v40 = vrot.slane %v1172_v32, 7 }
 0x164   : > { %914 = vst [vmem:[#allocation2 + $0x158] sm:$0xf] %v881_v30  ;;  %v7927_v62 = vld [vmem:[#allocation3 + $0x168] sm:$0xf]  ;;  %v1167_v14 = vshrl.u32 %v956_v33, 16  ;;  %v9978_v53 = vrot.slane %v2855_v50, 4 }
 0x165   : > { %v706_v51 = vpop.f32.mrf.mxu0  ;;  %v8756_v46 = vld [vmem:[#allocation3 + $0x188] sm:$0xf0]  ;;  %2639 = vst [vmem:[#allocation3 + $0x108] sm:$0xf] %v2287_v61  ;;  %v9980_v21 = vrot.slane %v4026_v55, 4  ;;  %v1162_v43 = vshll.u32 %v9959_v15, 16  ;;  %v4040_v15 = vor.u32 %v4039_v57, %v4036_v54 }
 0x166   : > { %v707_v27 = vadd.f32 %v9880_v44, %v706_v51  ;;  %v1555_v51 = vld [vmem:[#allocation2 + $0x78] sm:$0xf]  ;;  %v7928_v25 = vor.u32 %v8756_v46, %v7927_v62  ;;  %v7829_v63 = vld [vmem:[#allocation3 + $0xbc] sm:$0xf0]  ;;  %v9985_v20 = vrot.slane %v3427_v60, 7  ;;  %v1175_v30 = vshll.u32 %v9962_v6, 16 }
 0x167   : > { %12423 = vst [vmem:[#allocation25_spill] sm:$0xff] %v9980_v21  ;;  %v7832_v5 = vor.u32 %v8726_v56, %v7829_v63  ;;  %v2679_v8 = vld [vmem:[#allocation2 + $0x128] sm:$0xf]  ;;  %v1707_v31 = vshrl.u32 %v1555_v51, 16  ;;  %v1710_v11 = vshll.u32 %v1555_v51, 16  ;;  %v1164_v34 = vor.u32 %v1162_v43, %v1161_v52 }
 0x168   : > { %v761_v35 = vmax.f32 %v707_v27, 0.0  ;;  %v9983_v27 = vrot.slane %v1699_v42, 4  ;;  %12425 = vst [vmem:[#allocation27_spill] sm:$0xff] %v9985_v20  ;;  %5998 = vmatmul.bf16.gmra.mxu1 %v7928_v25  ;;  %v3863_v18 = vld [vmem:[#allocation2 + $0x128] sm:$0xf]  ;;  %v9989_v36 = vrot.slane %v2869_v29, 4  ;;  %v1177_v23 = vor.u32 %v1175_v30, %v1174_v40 }
 0x169   : > { %6250 = vmatmul.bf16.gmra.mxu0 %v7832_v5  ;;  %2711 = vst [vmem:[#allocation3 + $0x22c] sm:$0xf] %v2679_v8  ;;  %v7662_v17 = vrot.slane %v1167_v14, 11  ;;  %v2740_v13 = vld [vmem:[#allocation2 + $0x78] sm:$0xf]  ;;  %v9995_v50 = vrot.slane %v1710_v11, 5 }
 0x16a   : > { %v882_v49 = vpack.c.bf16 %v761_v35, %v761_v35  ;;  %12424 = vst [vmem:[#allocation26_spill] sm:$0xff] %v9983_v27  ;;  %v7661_v35 = vrot.slane %v1154_v59, 11  ;;  %v9991_v60 = vld [vmem:[#allocation2 + $0x78] sm:$0xf]  ;;  %v8761_v47 = vld [vmem:[#allocation3 + $0x1b4] sm:$0xf] }
 0x16b   : > { %12426 = vst [vmem:[#allocation28_spill] sm:$0xff] %v9991_v60  ;;  %v3923_v32 = vld [vmem:[#allocation2 + $0x78] sm:$0xf]  ;;  %v2742_v55 = vld [vmem:[#allocation2 + $0x88] sm:$0xf]  ;;  %v9999_v51 = vrot.slane %v4040_v15, 4  ;;  %v1178_v61 = vsel %vm9792_vm4, %v7662_v17, %v1177_v23 }
 0x16c   : > { %915 = vst [vmem:[#allocation2 + $0x168] sm:$0xf] %v882_v49  ;;  %v7965_v6 = vld [vmem:[#allocation3 + $0x1d4] sm:$0xf0]  ;;  %v9993_v49 = vrot.slane %v1707_v31, 4  ;;  %v1165_v54 = vsel %vm9792_vm4, %v7661_v35, %v1164_v34  ;;  %v2877_v52 = vshrl.u32 %v2740_v13, 16 }
 0x16d   : > { %3895 = vst [vmem:[#allocation3 + $0x214] sm:$0xf] %v3863_v18  ;;  %v2137_v33 = vld [vmem:[#allocation2 + $0xb8] sm:$0xf]  ;;  %v7968_v42 = vor.u32 %v8761_v47, %v7965_v6  ;;  %v709_v57 = vpop.f32.mrf.mxu0  ;;  %v2880_v56 = vshll.u32 %v2740_v13, 16  ;;  %v4048_v46 = vshrl.u32 %v3923_v32, 16 }
 0x16e   : > { %12427 = vst [vmem:[#allocation29_spill] sm:$0xff] %v9999_v51  ;;  %v2680_v59 = vld [vmem:[#allocation2 + $0x158] sm:$0xf]  ;;  %v3925_v29 = vld [vmem:[#allocation2 + $0x88] sm:$0xf]  ;;  %v4051_v40 = vshll.u32 %v3923_v32, 16  ;;  %v710_v34 = vadd.f32 %v9880_v44, %v709_v57 }
 0x16f   : > { %6092 = vmatmul.bf16.gmra.mxu2 %v7968_v42  ;;  %2712 = vst [vmem:[#allocation3 + $0x250] sm:$0xf] %v2680_v59  ;;  %v2891_v25 = vshrl.u32 %v2742_v55, 16  ;;  %v2894_v63 = vshll.u32 %v2742_v55, 16  ;;  %v2294_v14 = vshrl.u32 %v2137_v33, 16  ;;  %v10004_v8 = vrot.slane %v2877_v52, 4 }
 0x170   : > { %1457 = vst [vmem:[#allocation3 + $0x1b0] sm:$0xf] %v1165_v54  ;;  %v959_v43 = vld [vmem:[#allocation2 + $0x108] sm:$0xf]  ;;  %v2136_v5 = vld [vmem:[#allocation2 + $0xb4] sm:$0x8] }
 0x171   : > { %1458 = vst [vmem:[#allocation3 + $0x1d4] sm:$0xf] %v1178_v61  ;;  %v4062_v31 = vshrl.u32 %v3925_v29, 16  ;;  %v961_v11 = vld [vmem:[#allocation2 + $0x118] sm:$0xf]  ;;  %v10008_v18 = vrot.slane %v2880_v56, 5 }
 0x172   : > { %v4065_v35 = vshll.u32 %v3925_v29, 16  ;;  %v10010_v15 = vld [vmem:[#allocation2 + $0xb8] sm:$0xf]  ;;  %v2139_v23 = vld [vmem:[#allocation2 + $0xc8] sm:$0xf]  ;;  %v10012_v17 = vrot.slane %v4048_v46, 4 }
 0x173   : > { %v2296_v13 = vrot.slane %v2294_v14, 7  ;;  %v1185_v32 = vshrl.u32 %v959_v43, 16  ;;  %v7865_v47 = vld [vmem:[#allocation3 + $0x104] sm:$0xf0]  ;;  %v2289_v6 = vshrl.u32 %v2136_v5, 16  ;;  %v10014_v55 = vrot.slane %v4051_v40, 5 }
 0x174   : > { %v10016_v42 = vrot.slane %v2891_v25, 4  ;;  %v10018_v54 = vrot.slane %v2894_v63, 5  ;;  %v1198_v52 = vshrl.u32 %v961_v11, 16  ;;  %v10020_v57 = vrot.slane %v4062_v31, 4  ;;  %v8735_v61 = vld [vmem:[#allocation3 + $0xe4] sm:$0xf] }
 0x175   : > { %v2297_v56 = vshll.u32 %v2137_v33, 16  ;;  %v2307_v59 = vshrl.u32 %v2139_v23, 16  ;;  %v762_v29 = vmax.f32 %v710_v34, 0.0  ;;  %v10022_v30 = vrot.slane %v4065_v35, 5  ;;  %v2744_v14 = vld [vmem:[#allocation2 + $0xb8] sm:$0xf]  ;;  %v711_v40 = vpop.f32.mrf.mxu0 }
 0x176   : > { %v1735_v46 = vshrl.u32 %v10010_v15, 16  ;;  %v7868_v28 = vor.u32 %v8735_v61, %v7865_v47  ;;  %v2681_v5 = vld [vmem:[#allocation2 + $0x168] sm:$0xf]  ;;  %v1187_v25 = vrot.slane %v1185_v32, 7  ;;  %v7689_v62 = vrot.slane %v2289_v6, 11 }
 0x177   : > { %v2299_v26 = vor.u32 %v2297_v56, %v2296_v13  ;;  %v7963_v2 = vld [vmem:[#allocation3 + $0x1b0] sm:$0xf]  ;;  %v1738_v31 = vshll.u32 %v10010_v15, 16  ;;  %v1200_v58 = vrot.slane %v1198_v52, 7  ;;  %v3865_v20 = vld [vmem:[#allocation2 + $0x168] sm:$0xf]  ;;  %v883_v37 = vpack.c.bf16 %v762_v29, %v762_v29 }
 0x178   : > { %v8765_v63 = vld [vmem:[#allocation3 + $0x1d0] sm:$0xf0]  ;;  %v1491_v34 = vld [vmem:[#allocation2 + $0x108] sm:$0xf]  ;;  %v2309_v35 = vrot.slane %v2307_v59, 7  ;;  %v1188_v9 = vshll.u32 %v959_v43, 16  ;;  %v712_v47 = vadd.f32 %v9880_v44, %v711_v40  ;;  %v1713_v13 = vor.u32 %v9995_v50, %v9993_v49 }
 0x179   : > { %v7964_v33 = vor.u32 %v8765_v63, %v7963_v2  ;;  %6255 = vmatmul.bf16.gmra.mxu0 %v7868_v28  ;;  %2713 = vst [vmem:[#allocation3 + $0x274] sm:$0xf] %v2681_v5  ;;  %v1492_v38 = vld [vmem:[#allocation2 + $0x118] sm:$0xf]  ;;  %v2905_v32 = vshrl.u32 %v2744_v14, 16  ;;  %v1201_v56 = vshll.u32 %v961_v11, 16  ;;  %v2300_v43 = vsel %vm9792_vm4, %v7689_v62, %v2299_v26 }
 0x17a   : > { %3897 = vst [vmem:[#allocation3 + $0x25c] sm:$0xf] %v3865_v20  ;;  %v958_v15 = vld [vmem:[#allocation2 + $0x104] sm:$0x8]  ;;  %v2310_v6 = vshll.u32 %v2139_v23, 16  ;;  %v1190_v2 = vor.u32 %v1188_v9, %v1187_v25  ;;  %v2883_v59 = vor.u32 %v10008_v18, %v10004_v8  ;;  %v2908_v61 = vshll.u32 %v2744_v14, 16 }
 0x17b   : > { %6003 = vmatmul.bf16.gmra.mxu1 %v7964_v33  ;;  %1523 = vst [vmem:[#allocation3 + $0x1fc] sm:$0xf] %v1491_v34  ;;  %v960_v28 = vld [vmem:[#allocation2 + $0x114] sm:$0x8]  ;;  %v1180_v52 = vshrl.u32 %v958_v15, 16  ;;  %v1203_v29 = vor.u32 %v1201_v56, %v1200_v58  ;;  %v763_v5 = vmax.f32 %v712_v47, 0.0  ;;  %v4054_v40 = vor.u32 %v10014_v55, %v10012_v17 }
 0x17c   : > { %1524 = vst [vmem:[#allocation3 + $0x220] sm:$0xf] %v1492_v38  ;;  %v1193_v49 = vshrl.u32 %v960_v28, 16  ;;  %v2138_v50 = vld [vmem:[#allocation2 + $0xc4] sm:$0x8]  ;;  %v2312_v20 = vor.u32 %v2310_v6, %v2309_v35  ;;  %v1737_v25 = vrot.slane %v1735_v46, 4  ;;  %v2897_v56 = vor.u32 %v10018_v54, %v10016_v42 }
 0x17d   : > { %v10033_v11 = vld [vmem:[#allocation2 + $0x88] sm:$0xf]  ;;  %916 = vst [vmem:[#allocation2 + $0x178] sm:$0xf] %v883_v37  ;;  %v7663_v23 = vrot.slane %v1180_v52, 11  ;;  %v2302_v9 = vshrl.u32 %v2138_v50, 16  ;;  %v884_v18 = vpack.c.bf16 %v763_v5, %v763_v5  ;;  %v4068_v15 = vor.u32 %v10022_v30, %v10020_v57 }
 0x17e   : > { %12428 = vst [vmem:[#allocation30_spill] sm:$0xff] %v10033_v11  ;;  %v7664_v26 = vrot.slane %v1193_v49, 11  ;;  %v1493_v62 = vld [vmem:[#allocation2 + $0x148] sm:$0xf]  ;;  %v1740_v8 = vrot.slane %v1738_v31, 5  ;;  %v8889_v14 = vld [vmem:[#allocation7 + $0x130] sm:$0xff] }
 0x17f   : > { %2640 = vst [vmem:[#allocation3 + $0x12c] sm:$0xf] %v2300_v43  ;;  %v1191_v38 = vsel %vm9792_vm4, %v7663_v23, %v1190_v2  ;;  %v7690_v58 = vrot.slane %v2302_v9, 11  ;;  %v10039_v63 = vrot.slane %v1713_v13, 4  ;;  %v2907_v37 = vrot.slane %v2905_v32, 4  ;;  %6322 = vmatpush.bf16.msrb.mxu1 %v8889_v14 }
 0x180   : > { %1525 = vst [vmem:[#allocation3 + $0x244] sm:$0xf] %v1493_v62  ;;  %v2910_v33 = vrot.slane %v2908_v61, 5  ;;  %v1204_v34 = vsel %vm9792_vm4, %v7664_v26, %v1203_v29  ;;  %v10043_v17 = vrot.slane %v2883_v59, 4  ;;  %v12430_v55 = vshrl.u32 %v9991_v60, 16 }
 0x181   : > { %12429 = vst [vmem:[#allocation31_spill] sm:$0xff] %v10039_v63  ;;  %v1561_v31 = vld [vmem:[#allocation2 + $0xc8] sm:$0xf]  ;;  %v2313_v35 = vsel %vm9792_vm4, %v7690_v58, %v2312_v20  ;;  %v10051_v47 = vrot.slane %v4054_v40, 4  ;;  %v3453_v13 = vshrl.u32 %v10033_v11, 16  ;;  %v1741_v6 = vor.u32 %v1740_v8, %v1737_v25  ;;  %v714_v40 = vpop.f32.mrf.mxu0 }
 0x182   : > { %1459 = vst [vmem:[#allocation3 + $0x1f8] sm:$0xf] %v1191_v38  ;;  %v10047_v46 = vrot.slane %v12430_v55, 7  ;;  %v2746_v32 = vld [vmem:[#allocation2 + $0xc8] sm:$0xf]  ;;  %v2911_v52 = vor.u32 %v2910_v33, %v2907_v37  ;;  %v1749_v43 = vshrl.u32 %v1561_v31, 16 }
 0x183   : > { %1460 = vst [vmem:[#allocation3 + $0x21c] sm:$0xf] %v1204_v34  ;;  %v8770_v2 = vld [vmem:[#allocation3 + $0x1fc] sm:$0xf]  ;;  %v8001_v28 = vld [vmem:[#allocation3 + $0x21c] sm:$0xf0] }
 0x184   : > { %12431 = vst [vmem:[#allocation32_spill] sm:$0xff] %v10047_v46  ;;  %v1752_v59 = vshll.u32 %v1561_v31, 16  ;;  %v8004_v61 = vor.u32 %v8770_v2, %v8001_v28  ;;  %v2919_v49 = vshrl.u32 %v2746_v32, 16  ;;  %v10059_v50 = vld [vmem:[#allocation2 + $0xc8] sm:$0xf]  ;;  %v10061_v23 = vrot.slane %v3453_v13, 7 }
 0x185   : > { %12432 = vst [vmem:[#allocation33_spill] sm:$0xff] %v10051_v47  ;;  %v2682_v20 = vld [vmem:[#allocation2 + $0x178] sm:$0xf]  ;;  %v2922_v42 = vshll.u32 %v2746_v32, 16  ;;  %v10063_v30 = vrot.slane %v2897_v56, 4  ;;  %v10065_v57 = vrot.slane %v4068_v15, 4  ;;  %v715_v31 = vadd.f32 %v9880_v44, %v714_v40 }
 0x186   : > { %2641 = vst [vmem:[#allocation3 + $0x150] sm:$0xf] %v2313_v35  ;;  %v2141_v54 = vld [vmem:[#allocation2 + $0xd8] sm:$0xf]  ;;  %6097 = vmatmul.bf16.gmra.mxu2 %v8004_v61  ;;  %v3929_v9 = vld [vmem:[#allocation2 + $0xc8] sm:$0xf] }
 0x187   : > { %917 = vst [vmem:[#allocation2 + $0x188] sm:$0xf] %v884_v18  ;;  %v2143_v5 = vld [vmem:[#allocation2 + $0xe8] sm:$0xf]  ;;  %v10067_v25 = vrot.slane %v1741_v6, 4  ;;  %v10069_v26 = vrot.slane %v2911_v52, 4 }
 0x188   : > { %12433 = vst [vmem:[#allocation34_spill] sm:$0xff] %v10059_v50  ;;  %v1751_v62 = vrot.slane %v1749_v43, 4  ;;  %v1754_v8 = vrot.slane %v1752_v59, 5  ;;  %v3866_v38 = vld [vmem:[#allocation2 + $0x178] sm:$0xf]  ;;  %v10071_v58 = vrot.slane %v2919_v49, 4 }
 0x189   : > { %12434 = vst [vmem:[#allocation35_spill] sm:$0xff] %v10061_v23  ;;  %v3479_v18 = vshrl.u32 %v10059_v50, 16  ;;  %v2320_v37 = vshrl.u32 %v2141_v54, 16  ;;  %v10075_v33 = vrot.slane %v2922_v42, 5  ;;  %v4090_v34 = vshrl.u32 %v3929_v9, 16 }
 0x18a   : > { %2714 = vst [vmem:[#allocation3 + $0x298] sm:$0xf] %v2682_v20  ;;  %v2333_v55 = vshrl.u32 %v2143_v5, 16  ;;  %v2140_v35 = vld [vmem:[#allocation2 + $0xd4] sm:$0x8]  ;;  %v1755_v15 = vor.u32 %v1754_v8, %v1751_v62  ;;  %v4093_v42 = vshll.u32 %v3929_v9, 16  ;;  %v716_v9 = vpop.f32.mrf.mxu0 }
 0x18b   : > { %12435 = vst [vmem:[#allocation36_spill] sm:$0xff] %v10065_v57  ;;  %v7999_v13 = vld [vmem:[#allocation3 + $0x1f8] sm:$0xf]  ;;  %v8774_v32 = vld [vmem:[#allocation3 + $0x218] sm:$0xf0]  ;;  %v10078_v43 = vrot.slane %v3479_v18, 7 }
 0x18c   : > { %12436 = vst [vmem:[#allocation37_spill] sm:$0xff] %v10067_v25  ;;  %v2142_v56 = vld [vmem:[#allocation2 + $0xe4] sm:$0x8]  ;;  %v1563_v6 = vld [vmem:[#allocation2 + $0xd8] sm:$0xf]  ;;  %v8000_v2 = vor.u32 %v8774_v32, %v7999_v13  ;;  %v2322_v59 = vrot.slane %v2320_v37, 7 }
 0x18d   : > { %3898 = vst [vmem:[#allocation3 + $0x280] sm:$0xf] %v3866_v38  ;;  %v8744_v28 = vld [vmem:[#allocation3 + $0x12c] sm:$0xf]  ;;  %v7901_v52 = vld [vmem:[#allocation3 + $0x14c] sm:$0xf0] }
 0x18e   : > { %12437 = vst [vmem:[#allocation38_spill] sm:$0xff] %v10078_v43  ;;  %v2748_v61 = vld [vmem:[#allocation2 + $0xd8] sm:$0xf]  ;;  %v7904_v49 = vor.u32 %v8744_v28, %v7901_v52  ;;  %v2315_v20 = vshrl.u32 %v2140_v35, 16  ;;  %v2335_v38 = vrot.slane %v2333_v55, 7  ;;  %6008 = vmatmul.bf16.gmra.mxu1 %v8000_v2  ;;  %v764_v14 = vmax.f32 %v715_v31, 0.0 }
 0x18f   : > { %v2328_v40 = vshrl.u32 %v2142_v56, 16  ;;  %v4092_v29 = vrot.slane %v4090_v34, 4  ;;  %v1763_v50 = vshrl.u32 %v1563_v6, 16  ;;  %v1766_v11 = vshll.u32 %v1563_v6, 16  ;;  %v3931_v8 = vld [vmem:[#allocation2 + $0xd8] sm:$0xf] }
 0x190   : > { %v2323_v23 = vshll.u32 %v2141_v54, 16  ;;  %6260 = vmatmul.bf16.gmra.mxu0 %v7904_v49  ;;  %v2933_v62 = vshrl.u32 %v2748_v61, 16  ;;  %v2336_v13 = vshll.u32 %v2143_v5, 16  ;;  %v2683_v32 = vld [vmem:[#allocation2 + $0x188] sm:$0xf]  ;;  %v2936_v43 = vshll.u32 %v2748_v61, 16 }
 0x191   : > { %v10080_v37 = vld [vmem:[#allocation2 + $0xd8] sm:$0xf]  ;;  %v3867_v28 = vld [vmem:[#allocation2 + $0x188] sm:$0xf]  ;;  %v7691_v35 = vrot.slane %v2315_v20, 11  ;;  %v4095_v55 = vrot.slane %v4093_v42, 5  ;;  %v885_v34 = vpack.c.bf16 %v764_v14, %v764_v14  ;;  %v2925_v54 = vor.u32 %v10075_v33, %v10071_v58 }
 0x192   : > { %v2325_v18 = vor.u32 %v2323_v23, %v2322_v59  ;;  %12438 = vst [vmem:[#allocation39_spill] sm:$0xff] %v10080_v37  ;;  %v2338_v2 = vor.u32 %v2336_v13, %v2335_v38  ;;  %v965_v31 = vld [vmem:[#allocation2 + $0x158] sm:$0xf]  ;;  %v7692_v52 = vrot.slane %v2328_v40, 11  ;;  %v10082_v6 = vrot.slane %v1755_v15, 4 }
 0x193   : > { %v1494_v56 = vld [vmem:[#allocation2 + $0x158] sm:$0xf]  ;;  %v1765_v5 = vrot.slane %v1763_v50, 4  ;;  %v4104_v49 = vshrl.u32 %v3931_v8, 16  ;;  %2715 = vst [vmem:[#allocation3 + $0x2bc] sm:$0xf] %v2683_v32  ;;  %v717_v20 = vadd.f32 %v9880_v44, %v716_v9  ;;  %v4096_v15 = vor.u32 %v4095_v55, %v4092_v29 }
 0x194   : > { %12439 = vst [vmem:[#allocation40_spill] sm:$0xff] %v10082_v6  ;;  %v1768_v23 = vrot.slane %v1766_v11, 5  ;;  %v3492_v59 = vshrl.u32 %v10080_v37, 16  ;;  %v4107_v61 = vshll.u32 %v3931_v8, 16  ;;  %v2935_v42 = vrot.slane %v2933_v62, 4 }
 0x195   : > { %3899 = vst [vmem:[#allocation3 + $0x2a4] sm:$0xf] %v3867_v28  ;;  %v2938_v38 = vrot.slane %v2936_v43, 5  ;;  %v1224_v13 = vshrl.u32 %v965_v31, 16  ;;  %v2326_v14 = vsel %vm9792_vm4, %v7691_v35, %v2325_v18  ;;  %v962_v58 = vld [vmem:[#allocation2 + $0x144] sm:$0x8]  ;;  %v2339_v11 = vsel %vm9792_vm4, %v7692_v52, %v2338_v2 }
 0x196   : > { %1526 = vst [vmem:[#allocation3 + $0x268] sm:$0xf] %v1494_v56  ;;  %v963_v50 = vld [vmem:[#allocation2 + $0x148] sm:$0xf]  ;;  %v4106_v33 = vrot.slane %v4104_v49, 4  ;;  %v4109_v28 = vrot.slane %v4107_v61, 5  ;;  %v1769_v49 = vor.u32 %v1768_v23, %v1765_v5 }
 0x197   : > { %918 = vst [vmem:[#allocation2 + $0x198] sm:$0xf] %v885_v34  ;;  %v1565_v40 = vld [vmem:[#allocation2 + $0xe8] sm:$0xf]  ;;  %v964_v8 = vld [vmem:[#allocation2 + $0x154] sm:$0x8]  ;;  %v2939_v60 = vor.u32 %v2938_v38, %v2935_v42 }
 0x198   : > { %v1211_v32 = vshrl.u32 %v963_v50, 16  ;;  %v1206_v44 = vshrl.u32 %v962_v58, 16  ;;  %v1214_v62 = vshll.u32 %v963_v50, 16  ;;  %2642 = vst [vmem:[#allocation3 + $0x174] sm:$0xf] %v2326_v14  ;;  %v765_v43 = vmax.f32 %v717_v20, 0.0 }
 0x199   : > { %v10092_v9 = vrot.slane %v2925_v54, 4  ;;  %v1226_v56 = vrot.slane %v1224_v13, 7  ;;  %v1219_v29 = vshrl.u32 %v964_v8, 16  ;;  %2643 = vst [vmem:[#allocation3 + $0x198] sm:$0xf] %v2339_v11  ;;  %v10094_v35 = vrot.slane %v4096_v15, 4 }
 0x19a   : > { %v1213_v18 = vrot.slane %v1211_v32, 7  ;;  %v8779_v2 = vld [vmem:[#allocation3 + $0x244] sm:$0xf]  ;;  %v886_v34 = vpack.c.bf16 %v765_v43, %v765_v43  ;;  %v1495_v52 = vld [vmem:[#allocation2 + $0x168] sm:$0xf]  ;;  %v10097_v61 = vrot.slane %v3492_v59, 7  ;;  %v4110_v54 = vor.u32 %v4109_v28, %v4106_v33 }
 0x19b   : > { %12440 = vst [vmem:[#allocation41_spill] sm:$0xff] %v10094_v35  ;;  %v2750_v58 = vld [vmem:[#allocation2 + $0xe8] sm:$0xf]  ;;  %v1227_v14 = vshll.u32 %v965_v31, 16  ;;  %v1777_v20 = vshrl.u32 %v1565_v40, 16  ;;  %v7665_v50 = vrot.slane %v1206_v44, 11 }
 0x19c   : > { %12441 = vst [vmem:[#allocation42_spill] sm:$0xff] %v10097_v61  ;;  %v1216_v8 = vor.u32 %v1214_v62, %v1213_v18  ;;  %v1780_v15 = vshll.u32 %v1565_v40, 16  ;;  %v7666_v55 = vrot.slane %v1219_v29, 11  ;;  %v2947_v37 = vshrl.u32 %v2750_v58, 16  ;;  %v10099_v46 = vld [vmem:[#allocation2 + $0xe8] sm:$0xf]  ;;  %v719_v29 = vpop.f32.mrf.mxu0 }
 0x19d   : > { %1527 = vst [vmem:[#allocation3 + $0x28c] sm:$0xf] %v1495_v52  ;;  %v8037_v13 = vld [vmem:[#allocation3 + $0x264] sm:$0xf0]  ;;  %v1229_v11 = vor.u32 %v1227_v14, %v1226_v56  ;;  %v2950_v43 = vshll.u32 %v2750_v58, 16  ;;  %v10101_v31 = vrot.slane %v1769_v49, 4 }
 0x19e   : > { %919 = vst [vmem:[#allocation2 + $0x1a8] sm:$0xf] %v886_v34  ;;  %v8040_v32 = vor.u32 %v8779_v2, %v8037_v13  ;;  %v2684_v5 = vld [vmem:[#allocation2 + $0x198] sm:$0xf]  ;;  %v3933_v23 = vld [vmem:[#allocation2 + $0xe8] sm:$0xf]  ;;  %v1217_v40 = vsel %vm9792_vm4, %v7665_v50, %v1216_v8 }
 0x19f   : > { %12442 = vst [vmem:[#allocation43_spill] sm:$0xff] %v10099_v46  ;;  %v2145_v59 = vld [vmem:[#allocation2 + $0xf8] sm:$0xf]  ;;  %v10103_v42 = vrot.slane %v2939_v60, 4  ;;  %v10105_v38 = vrot.slane %v4110_v54, 4  ;;  %v10109_v28 = vrot.slane %v1777_v20, 4  ;;  %v1230_v18 = vsel %vm9792_vm4, %v7666_v55, %v1229_v11 }
 0x1a0   : > { %6102 = vmatmul.bf16.gmra.mxu2 %v8040_v32  ;;  %2716 = vst [vmem:[#allocation3 + $0x2e0] sm:$0xf] %v2684_v5  ;;  %v2147_v33 = vld [vmem:[#allocation2 + $0x108] sm:$0xf]  ;;  %v10111_v44 = vrot.slane %v1780_v15, 5  ;;  %v10116_v2 = vrot.slane %v2947_v37, 4 }
 0x1a1   : > { %12443 = vst [vmem:[#allocation44_spill] sm:$0xff] %v10101_v31  ;;  %v3868_v56 = vld [vmem:[#allocation2 + $0x198] sm:$0xf]  ;;  %v10118_v60 = vrot.slane %v2950_v43, 5  ;;  %v4118_v34 = vshrl.u32 %v3933_v23, 16  ;;  %v2346_v52 = vshrl.u32 %v2145_v59, 16 }
 0x1a2   : > { %12444 = vst [vmem:[#allocation45_spill] sm:$0xff] %v10105_v38  ;;  %v4121_v49 = vshll.u32 %v3933_v23, 16  ;;  %v2359_v58 = vshrl.u32 %v2147_v33, 16  ;;  %v2144_v14 = vld [vmem:[#allocation2 + $0xf4] sm:$0x8]  ;;  %v2349_v61 = vshll.u32 %v2145_v59, 16 }
 0x1a3   : > { %3900 = vst [vmem:[#allocation3 + $0x2c8] sm:$0xf] %v3868_v56  ;;  %v1567_v54 = vld [vmem:[#allocation2 + $0xf8] sm:$0xf]  ;;  %v967_v20 = vld [vmem:[#allocation2 + $0x168] sm:$0xf] }
 0x1a4   : > { %1461 = vst [vmem:[#allocation3 + $0x240] sm:$0xf] %v1217_v40  ;;  %v10123_v13 = vld [vmem:[%s12366_s2] ss:$0 sm:$0xff]  ;;  %v8753_v55 = vld [vmem:[#allocation3 + $0x174] sm:$0xf] }
 0x1a5   : > { %1462 = vst [vmem:[#allocation3 + $0x264] sm:$0xf] %v1230_v18  ;;  %v720_v37 = vadd.f32 %v10123_v13, %v719_v29  ;;  %v7937_v50 = vld [vmem:[#allocation3 + $0x194] sm:$0xf0]  ;;  %v2146_v8 = vld [vmem:[#allocation2 + $0x104] sm:$0x8] }
 0x1a6   : > { %v2348_v15 = vrot.slane %v2346_v52, 7  ;;  %v2752_v11 = vld [vmem:[#allocation2 + $0xf8] sm:$0xf]  ;;  %v7940_v43 = vor.u32 %v8753_v55, %v7937_v50  ;;  %v2341_v5 = vshrl.u32 %v2144_v14, 16  ;;  %v10126_v23 = vrot.slane %v4118_v34, 4  ;;  %v729_v52 = vpop.f32.mrf.mxu3 }
 0x1a7   : > { %v969_v32 = vld [vmem:[#allocation2 + $0x178] sm:$0xf]  ;;  %v1791_v40 = vshrl.u32 %v1567_v54, 16  ;;  %v1794_v56 = vshll.u32 %v1567_v54, 16  ;;  %v2361_v62 = vrot.slane %v2359_v58, 7  ;;  %v1237_v38 = vshrl.u32 %v967_v20, 16 }
 0x1a8   : > { %v3935_v18 = vld [vmem:[#allocation2 + $0xf8] sm:$0xf]  ;;  %6265 = vmatmul.bf16.gmra.mxu0 %v7940_v43  ;;  %v766_v35 = vmax.f32 %v720_v37, 0.0  ;;  %v2354_v31 = vshrl.u32 %v2146_v8, 16  ;;  %v2961_v29 = vshrl.u32 %v2752_v11, 16  ;;  %v2964_v4 = vshll.u32 %v2752_v11, 16 }
 0x1a9   : > { %v2362_v57 = vshll.u32 %v2147_v33, 16  ;;  %v1250_v47 = vshrl.u32 %v969_v32, 16  ;;  %v2351_v6 = vor.u32 %v2349_v61, %v2348_v15  ;;  %v4132_v51 = vshrl.u32 %v3935_v18, 16  ;;  %v2685_v14 = vld [vmem:[#allocation2 + $0x1a8] sm:$0xf] }
 0x1aa   : > { %v7693_v34 = vrot.slane %v2341_v5, 11  ;;  %v730_v50 = vadd.f32 %v10123_v13, %v729_v52  ;;  %v10129_v54 = vrot.slane %v4121_v49, 5  ;;  %v10131_v58 = vrot.slane %v1791_v40, 4  ;;  %v3869_v11 = vld [vmem:[#allocation2 + $0x1a8] sm:$0xf] }
 0x1ab   : > { %v8035_v55 = vld [vmem:[#allocation3 + $0x240] sm:$0xf]  ;;  %v4135_v59 = vshll.u32 %v3935_v18, 16  ;;  %v2364_v43 = vor.u32 %v2362_v57, %v2361_v62  ;;  %v1239_v8 = vrot.slane %v1237_v38, 7  ;;  %v1496_v33 = vld [vmem:[#allocation2 + $0x178] sm:$0xf]  ;;  %v887_v21 = vpack.c.bf16 %v766_v35, %v766_v35  ;;  %v10142_v18 = vpop.f32.mrf.mxu1 }
 0x1ac   : > { %v8783_v37 = vld [vmem:[#allocation3 + $0x260] sm:$0xf0]  ;;  %v7694_v7 = vrot.slane %v2354_v31, 11  ;;  %v1796_v61 = vrot.slane %v1794_v56, 5  ;;  %v2963_v15 = vrot.slane %v2961_v29, 4  ;;  %v2966_v63 = vrot.slane %v2964_v4, 5 }
 0x1ad   : > { %v8036_v25 = vor.u32 %v8783_v37, %v8035_v55  ;;  %v1252_v27 = vrot.slane %v1250_v47, 7  ;;  %2717 = vst [vmem:[#allocation3 + $0x304] sm:$0xf] %v2685_v14  ;;  %v4134_v5 = vrot.slane %v4132_v51, 4  ;;  %v1240_v52 = vshll.u32 %v967_v20, 16  ;;  %v8888_v31 = vld [vmem:[#allocation7 + $0x128] sm:$0xff] }
 0x1ae   : > { %3901 = vst [vmem:[#allocation3 + $0x2ec] sm:$0xf] %v3869_v11  ;;  %v2352_v49 = vsel %vm9792_vm4, %v7693_v34, %v2351_v6  ;;  %v770_v57 = vmax.f32 %v730_v50, 0.0  ;;  %v1253_v62 = vshll.u32 %v969_v32, 16  ;;  %v966_v38 = vld [vmem:[#allocation2 + $0x164] sm:$0x8]  ;;  %v2365_v35 = vsel %vm9792_vm4, %v7694_v7, %v2364_v43  ;;  %6323 = vmatpush.bf16.msrb.mxu1 %v8888_v31 }
 0x1af   : > { %6013 = vmatmul.bf16.gmra.mxu1 %v8036_v25  ;;  %1528 = vst [vmem:[#allocation3 + $0x2b0] sm:$0xf] %v1496_v33  ;;  %v4137_v40 = vrot.slane %v4135_v59, 5  ;;  %v1242_v56 = vor.u32 %v1240_v52, %v1239_v8  ;;  %v968_v4 = vld [vmem:[#allocation2 + $0x174] sm:$0x8]  ;;  %v1232_v47 = vshrl.u32 %v966_v38, 16  ;;  %v1783_v25 = vor.u32 %v10111_v44, %v10109_v28 }
 0x1b0   : > { %920 = vst [vmem:[#allocation2 + $0x1b8] sm:$0xf] %v887_v21  ;;  %v891_v51 = vpack.c.bf16 %v770_v57, %v770_v57  ;;  %v10140_v6 = vld [vmem:[#allocation2 + $0xf8] sm:$0xf]  ;;  %v1255_v32 = vor.u32 %v1253_v62, %v1252_v27  ;;  %v1245_v29 = vshrl.u32 %v968_v4, 16  ;;  %v12447_v7 = vshrl.u32 %v10099_v46, 16 }
 0x1b1   : > { %12445 = vst [vmem:[#allocation46_spill] sm:$0xff] %v10140_v6  ;;  %v1569_v21 = vld [vmem:[#allocation2 + $0x108] sm:$0xf]  ;;  %v7667_v14 = vrot.slane %v1232_v47, 11  ;;  %v2953_v28 = vor.u32 %v10118_v60, %v10116_v2  ;;  %v4124_v44 = vor.u32 %v10129_v54, %v10126_v23  ;;  %v1797_v27 = vor.u32 %v1796_v61, %v10131_v58  ;;  %v8788_v60 = vld [vmem:[#allocation3 + $0x28c] sm:$0xf] }
 0x1b2   : > { %12446 = vst [vmem:[#allocation47_spill] sm:$0xff] %v10142_v18  ;;  %v10146_v55 = vrot.slane %v12447_v7, 7  ;;  %v7668_v34 = vrot.slane %v1245_v29, 11  ;;  %v2967_v50 = vor.u32 %v2966_v63, %v2963_v15  ;;  %v3518_v59 = vshrl.u32 %v10140_v6, 16  ;;  %v2754_v61 = vld [vmem:[#allocation2 + $0x108] sm:$0xf] }
 0x1b3   : > { %2644 = vst [vmem:[#allocation3 + $0x1bc] sm:$0xf] %v2352_v49  ;;  %v4138_v43 = vor.u32 %v4137_v40, %v4134_v5  ;;  %v1243_v37 = vsel %vm9792_vm4, %v7667_v14, %v1242_v56  ;;  %v10156_v8 = vrot.slane %v1783_v25, 4  ;;  %v1805_v11 = vshrl.u32 %v1569_v21, 16  ;;  %v721_v5 = vpop.f32.mrf.mxu0  ;;  %v10173_v40 = vld [vmem:[#allocation2 + $0x108] sm:$0xf]  ;;  %v10177_v29 = vpop.f32.mrf.mxu1 }
 0x1b4   : > { %12448 = vst [vmem:[#allocation48_spill] sm:$0xff] %v10146_v55  ;;  %v1808_v33 = vshll.u32 %v1569_v21, 16  ;;  %v1256_v2 = vsel %vm9792_vm4, %v7668_v34, %v1255_v32  ;;  %v10160_v54 = vrot.slane %v2953_v28, 4  ;;  %v10162_v63 = vrot.slane %v4124_v44, 4  ;;  %v3937_v47 = vld [vmem:[#allocation2 + $0x108] sm:$0xf]  ;;  %v731_v14 = vpop.f32.mrf.mxu3 }
 0x1b5   : > { %2645 = vst [vmem:[#allocation3 + $0x1e0] sm:$0xf] %v2365_v35  ;;  %v10165_v52 = vrot.slane %v1797_v27, 4  ;;  %v10167_v49 = vrot.slane %v2967_v50, 4  ;;  %v10169_v57 = vrot.slane %v3518_v59, 7  ;;  %v10171_v62 = vrot.slane %v4138_v43, 4 }
 0x1b6   : > { %924 = vst [vmem:[#allocation2 + $0x218] sm:$0xf] %v891_v51  ;;  %v8073_v23 = vld [vmem:[#allocation3 + $0x2ac] sm:$0xf0]  ;;  %v1807_v35 = vrot.slane %v1805_v11, 4  ;;  %v1810_v31 = vrot.slane %v1808_v33, 5  ;;  %v722_v44 = vadd.f32 %v10123_v13, %v721_v5 }
 0x1b7   : > { %12449 = vst [vmem:[#allocation49_spill] sm:$0xff] %v10156_v8  ;;  %v8076_v15 = vor.u32 %v8788_v60, %v8073_v23  ;;  %v2686_v38 = vld [vmem:[#allocation2 + $0x1b8] sm:$0xf]  ;;  %v2975_v56 = vshrl.u32 %v2754_v61, 16  ;;  %v2978_v4 = vshll.u32 %v2754_v61, 16  ;;  %v3531_v21 = vshrl.u32 %v10173_v40, 16 }
 0x1b8   : > { %1463 = vst [vmem:[#allocation3 + $0x288] sm:$0xf] %v1243_v37  ;;  %v1571_v51 = vld [vmem:[#allocation2 + $0x118] sm:$0xf]  ;;  %v4146_v27 = vshrl.u32 %v3937_v47, 16  ;;  %v4149_v34 = vshll.u32 %v3937_v47, 16  ;;  %v732_v47 = vadd.f32 %v10123_v13, %v731_v14 }
 0x1b9   : > { %1464 = vst [vmem:[#allocation3 + $0x2ac] sm:$0xf] %v1256_v2  ;;  %6107 = vmatmul.bf16.gmra.mxu2 %v8076_v15  ;;  %v10175_v25 = vld [vmem:[#allocation2 + $0x118] sm:$0xf]  ;;  %v1819_v50 = vshrl.u32 %v1571_v51, 16  ;;  %v1822_v59 = vshll.u32 %v1571_v51, 16  ;;  %v1811_v2 = vor.u32 %v1810_v31, %v1807_v35 }
 0x1ba   : > { %12450 = vst [vmem:[#allocation50_spill] sm:$0xff] %v10162_v63  ;;  %v2756_v32 = vld [vmem:[#allocation2 + $0x118] sm:$0xf]  ;;  %v2372_v43 = vshrl.u32 %v10175_v25, 16  ;;  %v8762_v15 = vld [vmem:[#allocation3 + $0x1bc] sm:$0xf] }
 0x1bb   : > { %12451 = vst [vmem:[#allocation51_spill] sm:$0xff] %v10165_v52  ;;  %v3870_v7 = vld [vmem:[#allocation2 + $0x1b8] sm:$0xf]  ;;  %v2989_v37 = vshrl.u32 %v2756_v32, 16  ;;  %v2992_v60 = vshll.u32 %v2756_v32, 16  ;;  %v767_v5 = vmax.f32 %v722_v44, 0.0  ;;  %v724_v35 = vpop.f32.mrf.mxu0 }
 0x1bc   : > { %12452 = vst [vmem:[#allocation52_spill] sm:$0xff] %v10169_v57  ;;  %v3939_v28 = vld [vmem:[#allocation2 + $0x118] sm:$0xf]  ;;  %v2977_v51 = vrot.slane %v2975_v56, 4  ;;  %v2980_v18 = vrot.slane %v2978_v4, 5  ;;  %v4151_v6 = vrot.slane %v4149_v34, 5  ;;  %v725_v14 = vadd.f32 %v10123_v13, %v724_v35 }
 0x1bd   : > { %12453 = vst [vmem:[#allocation53_spill] sm:$0xff] %v10171_v62  ;;  %v4160_v23 = vshrl.u32 %v3939_v28, 16  ;;  %v4163_v58 = vshll.u32 %v3939_v28, 16  ;;  %v1504_v20 = vld [vmem:[#allocation2 + $0x218] sm:$0xf]  ;;  %v1821_v31 = vrot.slane %v1819_v50, 4 }
 0x1be   : > { %12454 = vst [vmem:[#allocation54_spill] sm:$0xff] %v10173_v40  ;;  %v4148_v40 = vrot.slane %v4146_v27, 4  ;;  %v1824_v32 = vrot.slane %v1822_v59, 5  ;;  %v10184_v57 = vld [vmem:[#allocation2 + $0x118] sm:$0xf]  ;;  %v2994_v28 = vrot.slane %v2992_v60, 5  ;;  %v888_v27 = vpack.c.bf16 %v767_v5, %v767_v5 }
 0x1bf   : > { %2718 = vst [vmem:[#allocation3 + $0x328] sm:$0xf] %v2686_v38  ;;  %v8071_v11 = vld [vmem:[#allocation3 + $0x288] sm:$0xf]  ;;  %v7973_v38 = vld [vmem:[#allocation3 + $0x1dc] sm:$0xf0]  ;;  %v2981_v60 = vor.u32 %v2980_v18, %v2977_v51 }
 0x1c0   : > { %12455 = vst [vmem:[#allocation55_spill] sm:$0xff] %v10177_v29  ;;  %v8792_v33 = vld [vmem:[#allocation3 + $0x2a8] sm:$0xf0]  ;;  %v2148_v29 = vld [vmem:[#allocation2 + $0x114] sm:$0x8]  ;;  %v4162_v56 = vrot.slane %v4160_v23, 4 }
 0x1c1   : > { %3902 = vst [vmem:[#allocation3 + $0x310] sm:$0xf] %v3870_v7  ;;  %v8072_v61 = vor.u32 %v8792_v33, %v8071_v11  ;;  %v7976_v7 = vor.u32 %v8762_v15, %v7973_v38  ;;  %v2374_v11 = vrot.slane %v2372_v43, 7  ;;  %v2991_v33 = vrot.slane %v2989_v37, 4  ;;  %v2758_v15 = vld [vmem:[#allocation2 + $0x128] sm:$0xf]  ;;  %v10192_v43 = vpop.f32.mrf.mxu1 }
 0x1c2   : > { %1536 = vst [vmem:[#allocation3 + $0x3d0] sm:$0xf] %v1504_v20  ;;  %v2690_v44 = vld [vmem:[#allocation2 + $0x218] sm:$0xf]  ;;  %v2367_v38 = vshrl.u32 %v2148_v29, 16  ;;  %v4165_v4 = vrot.slane %v4163_v58, 5  ;;  %v4152_v29 = vor.u32 %v4151_v6, %v4148_v40 }
 0x1c3   : > { %6018 = vmatmul.bf16.gmra.mxu1 %v8072_v61  ;;  %12456 = vst [vmem:[#allocation56_spill] sm:$0xff] %v10184_v57  ;;  %6270 = vmatmul.bf16.gmra.mxu0 %v7976_v7  ;;  %v771_v34 = vmax.f32 %v732_v47, 0.0  ;;  %v10187_v20 = vrot.slane %v1811_v2, 4  ;;  %v10189_v50 = vrot.slane %v3531_v21, 7  ;;  %v2375_v59 = vshll.u32 %v10175_v25, 16 }
 0x1c4   : > { %2722 = vst [vmem:[#allocation3 + $0x3b8] sm:$0xf] %v2690_v44  ;;  %v768_v37 = vmax.f32 %v725_v14, 0.0  ;;  %v3003_v61 = vshrl.u32 %v2758_v15, 16  ;;  %v3006_v7 = vshll.u32 %v2758_v15, 16  ;;  %v3544_v58 = vshrl.u32 %v10184_v57, 16 }
 0x1c5   : > { %12457 = vst [vmem:[#allocation57_spill] sm:$0xff] %v10187_v20  ;;  %v3941_v46 = vld [vmem:[#allocation2 + $0x128] sm:$0xf]  ;;  %v3874_v35 = vld [vmem:[#allocation2 + $0x218] sm:$0xf]  ;;  %v2377_v23 = vor.u32 %v2375_v59, %v2374_v11  ;;  %v7695_v2 = vrot.slane %v2367_v38, 11  ;;  %v1825_v47 = vor.u32 %v1824_v32, %v1821_v31  ;;  %v2995_v21 = vor.u32 %v2994_v28, %v2991_v33 }
 0x1c6   : > { %12458 = vst [vmem:[#allocation58_spill] sm:$0xff] %v10189_v50  ;;  %v1575_v5 = vld [vmem:[#allocation2 + $0x158] sm:$0xf]  ;;  %v4166_v44 = vor.u32 %v4165_v4, %v4162_v56  ;;  %v10195_v50 = vld [vmem:[#allocation2 + $0x128] sm:$0xf]  ;;  %v892_v18 = vpack.c.bf16 %v771_v34, %v771_v34  ;;  %v4174_v51 = vshrl.u32 %v3941_v46, 16  ;;  %v889_v6 = vpack.c.bf16 %v768_v37, %v768_v37 }
 0x1c7   : > { %12459 = vst [vmem:[#allocation59_spill] sm:$0xff] %v10192_v43  ;;  %v10197_v25 = vld [vmem:[#allocation2 + $0x128] sm:$0xf]  ;;  %v4177_v15 = vshll.u32 %v3941_v46, 16  ;;  %v1498_v43 = vld [vmem:[#allocation2 + $0x198] sm:$0xf]  ;;  %v2378_v33 = vsel %vm9792_vm4, %v7695_v2, %v2377_v23 }
 0x1c8   : > { %3906 = vst [vmem:[#allocation3 + $0x3a0] sm:$0xf] %v3874_v35  ;;  %v1497_v14 = vld [vmem:[#allocation2 + $0x188] sm:$0xf]  ;;  %v3005_v40 = vrot.slane %v3003_v61, 4  ;;  %v3008_v11 = vrot.slane %v3006_v7, 5 }
 0x1c9   : > { %12460 = vst [vmem:[#allocation60_spill] sm:$0xff] %v10197_v25  ;;  %v1847_v59 = vshrl.u32 %v1575_v5, 16  ;;  %v1850_v55 = vshll.u32 %v1575_v5, 16  ;;  %v10199_v38 = vrot.slane %v2981_v60, 4  ;;  %v10201_v31 = vrot.slane %v4152_v29, 4  ;;  %v10220_v5 = vpop.f32.mrf.mxu1 }
 0x1ca   : > { %921 = vst [vmem:[#allocation2 + $0x1c8] sm:$0xf] %v888_v27  ;;  %v10206_v28 = vrot.slane %v1825_v47, 4  ;;  %v10208_v46 = vrot.slane %v2995_v21, 4  ;;  %v10210_v56 = vrot.slane %v3544_v58, 7  ;;  %v10212_v4 = vrot.slane %v4166_v44, 4 }
 0x1cb   : > { %1529 = vst [vmem:[#allocation3 + $0x2d4] sm:$0xf] %v1497_v14  ;;  %v2385_v27 = vshrl.u32 %v10195_v50, 16  ;;  %v3557_v34 = vshrl.u32 %v10197_v25, 16  ;;  %v4176_v37 = vrot.slane %v4174_v51, 4  ;;  %v4179_v60 = vrot.slane %v4177_v15, 5 }
 0x1cc   : > { %12461 = vst [vmem:[#allocation61_spill] sm:$0xff] %v10201_v31  ;;  %v1849_v61 = vrot.slane %v1847_v59, 4  ;;  %v1852_v7 = vrot.slane %v1850_v55, 5  ;;  %v2760_v35 = vld [vmem:[#allocation2 + $0x158] sm:$0xf]  ;;  %v2388_v29 = vshll.u32 %v10195_v50, 16 }
 0x1cd   : > { %1530 = vst [vmem:[#allocation3 + $0x2f8] sm:$0xf] %v1498_v43  ;;  %v3009_v43 = vor.u32 %v3008_v11, %v3005_v40  ;;  %v10218_v58 = vld [vmem:[#allocation2 + $0x158] sm:$0xf]  ;;  %v1577_v47 = vld [vmem:[#allocation2 + $0x168] sm:$0xf]  ;;  %v4180_v50 = vor.u32 %v4179_v60, %v4176_v37 }
 0x1ce   : > { %12462 = vst [vmem:[#allocation62_spill] sm:$0xff] %v10206_v28  ;;  %v971_v21 = vld [vmem:[#allocation2 + $0x188] sm:$0xf]  ;;  %v10222_v44 = vld [vmem:[#allocation2 + $0x198] sm:$0xf]  ;;  %v10224_v51 = vrot.slane %v3557_v34, 7  ;;  %v1853_v40 = vor.u32 %v1852_v7, %v1849_v61 }
 0x1cf   : > { %12463 = vst [vmem:[#allocation63_spill] sm:$0xff] %v10208_v46  ;;  %v3017_v15 = vshrl.u32 %v2760_v35, 16  ;;  %v3020_v55 = vshll.u32 %v2760_v35, 16  ;;  %v2398_v11 = vshrl.u32 %v10218_v58, 16  ;;  %v10229_v59 = vld [vmem:[#allocation2 + $0x168] sm:$0xf] }
 0x1d0   : > { %12464 = vst [vmem:[#allocation64_spill] sm:$0xff] %v10210_v56  ;;  %v1861_v23 = vshrl.u32 %v1577_v47, 16  ;;  %v1864_v32 = vshll.u32 %v1577_v47, 16  ;;  %v970_v25 = vld [vmem:[#allocation2 + $0x184] sm:$0x8]  ;;  %v10237_v57 = vrot.slane %v1853_v40, 4  ;;  %v734_v56 = vpop.f32.mrf.mxu3 }
 0x1d1   : > { %12465 = vst [vmem:[#allocation65_spill] sm:$0xff] %v10212_v4  ;;  %v2687_v2 = vld [vmem:[#allocation2 + $0x1c8] sm:$0xf]  ;;  %v3019_v37 = vrot.slane %v3017_v15, 4  ;;  %v3022_v60 = vrot.slane %v3020_v55, 5  ;;  %v2411_v47 = vshrl.u32 %v10229_v59, 16 }
 0x1d2   : > { %925 = vst [vmem:[#allocation2 + $0x228] sm:$0xf] %v892_v18  ;;  %v2387_v18 = vrot.slane %v2385_v27, 7  ;;  %v3871_v14 = vld [vmem:[#allocation2 + $0x1c8] sm:$0xf]  ;;  %v1276_v27 = vshrl.u32 %v10222_v44, 16 }
 0x1d3   : > { %922 = vst [vmem:[#allocation2 + $0x1f8] sm:$0xf] %v889_v6  ;;  %v10226_v6 = vrot.slane %v3009_v43, 4  ;;  %v8797_v34 = vld [vmem:[#allocation3 + $0x2d4] sm:$0xf]  ;;  %v1866_v4 = vrot.slane %v1864_v32, 5  ;;  %v735_v32 = vadd.f32 %v10123_v13, %v734_v56 }
 0x1d4   : > { %2646 = vst [vmem:[#allocation3 + $0x204] sm:$0xf] %v2378_v33  ;;  %v10231_v33 = vpop.f32.mrf.mxu2  ;;  %v8109_v35 = vld [vmem:[#allocation3 + $0x2f4] sm:$0xf0]  ;;  %v972_v7 = vld [vmem:[#allocation2 + $0x194] sm:$0x8]  ;;  %v10242_v15 = vor.u32 %v2388_v29, %v2387_v18 }
 0x1d5   : > { %12466 = vst [vmem:[#allocation66_spill] sm:$0xff] %v10220_v5  ;;  %v1263_v5 = vshrl.u32 %v971_v21, 16  ;;  %v8112_v61 = vor.u32 %v8797_v34, %v8109_v35  ;;  %v2762_v31 = vld [vmem:[#allocation2 + $0x168] sm:$0xf]  ;;  %v1258_v43 = vshrl.u32 %v970_v25, 16  ;;  %v1271_v40 = vshrl.u32 %v972_v7, 16 }
 0x1d6   : > { %12467 = vst [vmem:[#allocation67_spill] sm:$0xff] %v10224_v51  ;;  %v10235_v51 = vrot.slane %v4180_v50, 4  ;;  %v10244_v55 = vld [vmem:[#allocation2 + $0x168] sm:$0xf]  ;;  %v1278_v50 = vrot.slane %v1276_v27, 7  ;;  %v3023_v35 = vor.u32 %v3022_v60, %v3019_v37  ;;  %v3034_v25 = vshll.u32 %v2762_v31, 16  ;;  %v726_v60 = vpop.f32.mrf.mxu0 }
 0x1d7   : > { %12468 = vst [vmem:[#allocation68_spill] sm:$0xff] %v10226_v6  ;;  %v1265_v28 = vrot.slane %v1263_v5, 7  ;;  %6112 = vmatmul.bf16.gmra.mxu2 %v8112_v61  ;;  %v3031_v5 = vshrl.u32 %v2762_v31, 16  ;;  %v1279_v29 = vshll.u32 %v10222_v44, 16  ;;  %v3583_v27 = vshrl.u32 %v10244_v55, 16 }
 0x1d8   : > { %12469 = vst [vmem:[#allocation69_spill] sm:$0xff] %v10231_v33  ;;  %v2150_v33 = vld [vmem:[#allocation2 + $0x124] sm:$0x8]  ;;  %v7669_v37 = vrot.slane %v1258_v43, 11  ;;  %v7670_v56 = vrot.slane %v1271_v40, 11  ;;  %v3036_v63 = vrot.slane %v3034_v25, 5 }
 0x1d9   : > { %2719 = vst [vmem:[#allocation3 + $0x34c] sm:$0xf] %v2687_v2  ;;  %v10239_v2 = vrot.slane %v2398_v11, 7  ;;  %v2691_v34 = vld [vmem:[#allocation2 + $0x228] sm:$0xf]  ;;  %v2380_v62 = vshrl.u32 %v2150_v33, 16 }
 0x1da   : > { %3903 = vst [vmem:[#allocation3 + $0x334] sm:$0xf] %v3871_v14  ;;  %v1863_v14 = vrot.slane %v1861_v23, 4  ;;  %v3945_v11 = vld [vmem:[#allocation2 + $0x168] sm:$0xf]  ;;  %v10254_v33 = vrot.slane %v3023_v35, 4 }
 0x1db   : > { %12470 = vst [vmem:[#allocation70_spill] sm:$0xff] %v10235_v51  ;;  %v1266_v51 = vshll.u32 %v971_v21, 16  ;;  %v3875_v20 = vld [vmem:[#allocation2 + $0x228] sm:$0xf]  ;;  %v4202_v21 = vshrl.u32 %v3945_v11, 16  ;;  %v4205_v7 = vshll.u32 %v3945_v11, 16 }
 0x1dc   : > { %12471 = vst [vmem:[#allocation71_spill] sm:$0xff] %v10237_v57  ;;  %v10246_v57 = vpop.f32.mrf.mxu1  ;;  %v1867_v18 = vor.u32 %v1866_v4, %v1863_v14  ;;  %v10252_v52 = vpop.f32.mrf.mxu2  ;;  %v10256_v23 = vrot.slane %v2411_v47, 7  ;;  %v1502_v31 = vld [vmem:[#allocation2 + $0x1f8] sm:$0xf]  ;;  %v7696_v44 = vrot.slane %v2380_v62, 11  ;;  %v772_v4 = vmax.f32 %v735_v32, 0.0 }
 0x1dd   : > { %12472 = vst [vmem:[#allocation72_spill] sm:$0xff] %v10244_v55  ;;  %v1268_v61 = vor.u32 %v1266_v51, %v1265_v28  ;;  %v3033_v14 = vrot.slane %v3031_v5, 4  ;;  %v727_v28 = vadd.f32 %v10123_v13, %v726_v60  ;;  %v2152_v51 = vld [vmem:[#allocation2 + $0x154] sm:$0x8]  ;;  %v10266_v40 = vrot.slane %v4202_v21, 4 }
 0x1de   : > { %12473 = vst [vmem:[#allocation73_spill] sm:$0xff] %v10246_v57  ;;  %v1281_v57 = vor.u32 %v1279_v29, %v1278_v50  ;;  %v10259_v43 = vrot.slane %v1867_v18, 4  ;;  %v10261_v50 = vrot.slane %v3583_v27, 7  ;;  %v10268_v62 = vrot.slane %v4205_v7, 5  ;;  %v2764_v35 = vld [vmem:[#allocation2 + $0x178] sm:$0xf]  ;;  %v736_v7 = vpop.f32.mrf.mxu3 }
 0x1df   : > { %2723 = vst [vmem:[#allocation3 + $0x3dc] sm:$0xf] %v2691_v34  ;;  %v1579_v34 = vld [vmem:[#allocation2 + $0x178] sm:$0xf]  ;;  %v1269_v47 = vsel %vm9792_vm4, %v7669_v37, %v1268_v61  ;;  %v2391_v25 = vsel %vm9792_vm4, %v7696_v44, %v10242_v15  ;;  %v893_v29 = vpack.c.bf16 %v772_v4, %v772_v4  ;;  %v2393_v27 = vshrl.u32 %v2152_v51, 16 }
 0x1e0   : > { %12474 = vst [vmem:[#allocation74_spill] sm:$0xff] %v10252_v52  ;;  %v2688_v11 = vld [vmem:[#allocation2 + $0x1f8] sm:$0xf]  ;;  %v1282_v32 = vsel %vm9792_vm4, %v7670_v56, %v1281_v57  ;;  %v3037_v60 = vor.u32 %v3036_v63, %v3033_v14  ;;  %v1875_v61 = vshrl.u32 %v1579_v34, 16  ;;  %v769_v21 = vmax.f32 %v727_v28, 0.0 }
 0x1e1   : > { %3907 = vst [vmem:[#allocation3 + $0x3c4] sm:$0xf] %v3875_v20  ;;  %v3947_v5 = vld [vmem:[#allocation2 + $0x178] sm:$0xf]  ;;  %v3045_v20 = vshrl.u32 %v2764_v35, 16  ;;  %v3048_v52 = vshll.u32 %v2764_v35, 16  ;;  %v737_v56 = vadd.f32 %v10123_v13, %v736_v7 }
 0x1e2   : > { %12475 = vst [vmem:[#allocation75_spill] sm:$0xff] %v10254_v33  ;;  %v8898_v18 = vld [vmem:[#allocation7 + $0x178] sm:$0xff]  ;;  %v12479_v15 = vshll.u32 %v10218_v58, 16  ;;  %v4216_v63 = vshrl.u32 %v3947_v5, 16  ;;  %v4219_v4 = vshll.u32 %v3947_v5, 16  ;;  %v890_v14 = vpack.c.bf16 %v769_v21, %v769_v21 }
 0x1e3   : > { %1534 = vst [vmem:[#allocation3 + $0x388] sm:$0xf] %v1502_v31  ;;  %v10275_v37 = vld [vmem:[#allocation2 + $0x178] sm:$0xf]  ;;  %v1878_v31 = vshll.u32 %v1579_v34, 16  ;;  %6410 = vmatpush.bf16.msrb.mxu2 %v8898_v18  ;;  %v773_v34 = vmax.f32 %v737_v56, 0.0 }
 0x1e4   : > { %12476 = vst [vmem:[#allocation76_spill] sm:$0xff] %v10259_v43  ;;  %v10277_v57 = vpop.f32.mrf.mxu1  ;;  %v2403_v44 = vor.u32 %v12479_v15, %v10239_v2  ;;  %v1499_v51 = vld [vmem:[#allocation2 + $0x1a8] sm:$0xf]  ;;  %v1500_v28 = vld [vmem:[#allocation2 + $0x1b8] sm:$0xf]  ;;  %v10283_v35 = vrot.slane %v3037_v60, 4  ;;  %v10286_v18 = vpop.f32.mrf.mxu2  ;;  %v4208_v60 = vor.u32 %v10268_v62, %v10266_v40 }
 0x1e5   : > { %12477 = vst [vmem:[#allocation77_spill] sm:$0xff] %v10261_v50  ;;  %v1877_v7 = vrot.slane %v1875_v61, 4  ;;  %v1880_v58 = vrot.slane %v1878_v31, 5  ;;  %v10288_v2 = vld [vmem:[#allocation2 + $0x178] sm:$0xf]  ;;  %v894_v5 = vpack.c.bf16 %v773_v34, %v773_v34  ;;  %v3050_v21 = vrot.slane %v3048_v52, 5 }
 0x1e6   : > { %2720 = vst [vmem:[#allocation3 + $0x370] sm:$0xf] %v2688_v11  ;;  %v2424_v11 = vshrl.u32 %v10275_v37, 16  ;;  %v4221_v56 = vrot.slane %v4219_v4, 5  ;;  %v8897_v61 = vld [vmem:[#allocation7 + $0x170] sm:$0xff]  ;;  %v10297_v40 = vrot.slane %v4208_v60, 4 }
 0x1e7   : > { %1465 = vst [vmem:[#allocation3 + $0x2d0] sm:$0xf] %v1269_v47  ;;  %v7697_v47 = vrot.slane %v2393_v27, 11  ;;  %v10294_v31 = vld [vmem:[#allocation2 + $0x188] sm:$0xf]  ;;  %6411 = vmatpush.bf16.msrb.mxu2 %v8897_v61 }
 0x1e8   : > { %1466 = vst [vmem:[#allocation3 + $0x2f4] sm:$0xf] %v1282_v32  ;;  %v1581_v32 = vld [vmem:[#allocation2 + $0x188] sm:$0xf]  ;;  %v2768_v62 = vld [vmem:[#allocation2 + $0x198] sm:$0xf] }
 0x1e9   : > { %12478 = vst [vmem:[#allocation78_spill] sm:$0xff] %v10277_v57  ;;  %v2404_v27 = vsel %vm9792_vm4, %v7697_v47, %v2403_v44  ;;  %v1889_v15 = vshrl.u32 %v1581_v32, 16  ;;  %v1892_v57 = vshll.u32 %v1581_v32, 16  ;;  %v3596_v44 = vshrl.u32 %v10288_v2, 16  ;;  %v2766_v61 = vld [vmem:[#allocation2 + $0x188] sm:$0xf] }
 0x1ea   : > { %2647 = vst [vmem:[#allocation3 + $0x228] sm:$0xf] %v2391_v25  ;;  %v3047_v25 = vrot.slane %v3045_v20, 4  ;;  %v8771_v20 = vld [vmem:[#allocation3 + $0x204] sm:$0xf]  ;;  %v2437_v32 = vshrl.u32 %v10294_v31, 16 }
 0x1eb   : > { %926 = vst [vmem:[#allocation2 + $0x238] sm:$0xf] %v893_v29  ;;  %v4218_v29 = vrot.slane %v4216_v63, 4  ;;  %v1881_v63 = vor.u32 %v1880_v58, %v1877_v7  ;;  %v10303_v7 = vrot.slane %v2424_v11, 7  ;;  %v10312_v60 = vrot.slane %v3596_v44, 7  ;;  %v8887_v44 = vld [vmem:[#allocation7 + $0x120] sm:$0xff] }
 0x1ec   : > { %12480 = vst [vmem:[#allocation79_spill] sm:$0xff] %v10283_v35  ;;  %v10319_v11 = vrot.slane %v2437_v32, 7  ;;  %v1583_v58 = vld [vmem:[#allocation2 + $0x198] sm:$0xf]  ;;  %6324 = vmatpush.bf16.msrb.mxu1 %v8887_v44  ;;  %v3073_v50 = vshrl.u32 %v2768_v62, 16 }
 0x1ed   : > { %12481 = vst [vmem:[#allocation80_spill] sm:$0xff] %v10286_v18  ;;  %v4222_v4 = vor.u32 %v4221_v56, %v4218_v29  ;;  %v10301_v18 = vpop.f32.mrf.mxu1  ;;  %v10329_v44 = vld [vmem:[#allocation2 + $0x198] sm:$0xf]  ;;  %v8800_v10 = vld [vmem:[#allocation3 + $0x2ec] sm:$0xf] }
 0x1ee   : > { %923 = vst [vmem:[#allocation2 + $0x208] sm:$0xf] %v890_v14  ;;  %v8107_v14 = vld [vmem:[#allocation3 + $0x2d0] sm:$0xf]  ;;  %v3075_v43 = vrot.slane %v3073_v50, 4  ;;  %v2450_v50 = vshrl.u32 %v10329_v44, 16 }
 0x1ef   : > { %12482 = vst [vmem:[#allocation81_spill] sm:$0xff] %v10288_v2  ;;  %v977_v2 = vld [vmem:[#allocation2 + $0x1b8] sm:$0xf] }
 0x1f0   : > { %1531 = vst [vmem:[#allocation3 + $0x31c] sm:$0xf] %v1499_v51  ;;  %v8801_v51 = vld [vmem:[#allocation3 + $0x2f0] sm:$0xf0] }
 0x1f1   : > { %1532 = vst [vmem:[#allocation3 + $0x340] sm:$0xf] %v1500_v28  ;;  %v8108_v34 = vor.u32 %v8801_v51, %v8107_v14  ;;  %v8009_v52 = vld [vmem:[#allocation3 + $0x224] sm:$0xf0]  ;;  %v3051_v28 = vor.u32 %v3050_v21, %v3047_v25  ;;  %v1891_v14 = vrot.slane %v1889_v15, 4  ;;  %v1894_v51 = vrot.slane %v1892_v57, 5  ;;  %v10315_v15 = vpop.f32.mrf.mxu2 }
 0x1f2   : > { %927 = vst [vmem:[#allocation2 + $0x248] sm:$0xf] %v894_v5  ;;  %v8012_v47 = vor.u32 %v8771_v20, %v8009_v52  ;;  %v2692_v5 = vld [vmem:[#allocation2 + $0x238] sm:$0xf]  ;;  %v10306_v25 = vld [vmem:[#allocation2 + $0x188] sm:$0xf] }
 0x1f3   : > { %2648 = vst [vmem:[#allocation3 + $0x24c] sm:$0xf] %v2404_v27  ;;  %6023 = vmatmul.bf16.gmra.mxu1 %v8108_v34  ;;  %v3949_v21 = vld [vmem:[#allocation2 + $0x188] sm:$0xf]  ;;  %v10308_v27 = vrot.slane %v1881_v63, 4  ;;  %v10310_v29 = vrot.slane %v3051_v28, 4 }
 0x1f4   : > { %12483 = vst [vmem:[#allocation82_spill] sm:$0xff] %v10297_v40  ;;  %6275 = vmatmul.bf16.gmra.mxu0 %v8012_v47  ;;  %v3876_v57 = vld [vmem:[#allocation2 + $0x238] sm:$0xf]  ;;  %v10317_v34 = vrot.slane %v4222_v4, 4  ;;  %v3059_v20 = vshrl.u32 %v2766_v61, 16  ;;  %v3062_v52 = vshll.u32 %v2766_v61, 16  ;;  %v1895_v47 = vor.u32 %v1894_v51, %v1891_v14 }
 0x1f5   : > { %12484 = vst [vmem:[#allocation83_spill] sm:$0xff] %v10301_v18  ;;  %v3609_v63 = vshrl.u32 %v10306_v25, 16  ;;  %v4233_v28 = vshll.u32 %v3949_v21, 16  ;;  %v975_v18 = vld [vmem:[#allocation2 + $0x1a8] sm:$0xf]  ;;  %v1903_v61 = vshrl.u32 %v1583_v58, 16 }
 0x1f6   : > { %2724 = vst [vmem:[#allocation3 + $0x400] sm:$0xf] %v2692_v5  ;;  %v4230_v5 = vshrl.u32 %v3949_v21, 16  ;;  %v1503_v56 = vld [vmem:[#allocation2 + $0x208] sm:$0xf]  ;;  %v3061_v32 = vrot.slane %v3059_v20, 4 }
 0x1f7   : > { %12485 = vst [vmem:[#allocation84_spill] sm:$0xff] %v10306_v25  ;;  %v8896_v4 = vld [vmem:[#allocation7 + $0x168] sm:$0xff]  ;;  %v10323_v14 = vrot.slane %v1895_v47, 4  ;;  %v10325_v51 = vrot.slane %v3609_v63, 7  ;;  %v4235_v55 = vrot.slane %v4233_v28, 5  ;;  %v1905_v47 = vrot.slane %v1903_v61, 4  ;;  %v739_v28 = vpop.f32.mrf.mxu3 }
 0x1f8   : > { %12486 = vst [vmem:[#allocation85_spill] sm:$0xff] %v10308_v27  ;;  %v4232_v21 = vrot.slane %v4230_v5, 4  ;;  %v2689_v40 = vld [vmem:[#allocation2 + $0x208] sm:$0xf]  ;;  %6412 = vmatpush.bf16.msrb.mxu2 %v8896_v4  ;;  %v3076_v27 = vshll.u32 %v2768_v62, 16  ;;  %v1292_v61 = vshll.u32 %v975_v18, 16 }
 0x1f9   : > { %12487 = vst [vmem:[#allocation86_spill] sm:$0xff] %v10310_v29  ;;  %v974_v25 = vld [vmem:[#allocation2 + $0x1a4] sm:$0x8]  ;;  %v3873_v20 = vld [vmem:[#allocation2 + $0x208] sm:$0xf]  ;;  %v10333_v4 = vpop.f32.mrf.mxu2 }
 0x1fa   : > { %12488 = vst [vmem:[#allocation87_spill] sm:$0xff] %v10312_v60  ;;  %v1289_v60 = vshrl.u32 %v975_v18, 16  ;;  %v2154_v63 = vld [vmem:[#allocation2 + $0x164] sm:$0x8]  ;;  %v10331_v5 = vld [vmem:[#allocation2 + $0x198] sm:$0xf] }
 0x1fb   : > { %12489 = vst [vmem:[#allocation88_spill] sm:$0xff] %v10315_v15  ;;  %v1302_v15 = vshrl.u32 %v977_v2, 16  ;;  %v1284_v62 = vshrl.u32 %v974_v25, 16  ;;  %v3078_v29 = vrot.slane %v3076_v27, 5  ;;  %v8145_v8 = vld [vmem:[#allocation3 + $0x33c] sm:$0xf0] }
 0x1fc   : > { %12490 = vst [vmem:[#allocation89_spill] sm:$0xff] %v10317_v34  ;;  %v3064_v34 = vrot.slane %v3062_v52, 5  ;;  %v976_v52 = vld [vmem:[#allocation2 + $0x1b4] sm:$0x8]  ;;  %v1305_v25 = vshll.u32 %v977_v2, 16  ;;  %v3622_v6 = vshrl.u32 %v10331_v5, 16  ;;  %v740_v2 = vadd.f32 %v10123_v13, %v739_v28 }
 0x1fd   : > { %3908 = vst [vmem:[#allocation3 + $0x3e8] sm:$0xf] %v3876_v57  ;;  %v1906_v57 = vshll.u32 %v1583_v58, 16  ;;  %v1304_v35 = vrot.slane %v1302_v15, 7  ;;  %v1297_v33 = vshrl.u32 %v976_v52, 16  ;;  %v8895_v15 = vld [vmem:[#allocation7 + $0x160] sm:$0xff] }
 0x1fe   : > { %1535 = vst [vmem:[#allocation3 + $0x3ac] sm:$0xf] %v1503_v56  ;;  %v10327_v56 = vpop.f32.mrf.mxu1  ;;  %v3065_v58 = vor.u32 %v3064_v34, %v3061_v32  ;;  %v12496_v34 = vshll.u32 %v10229_v59, 16  ;;  %6413 = vmatpush.bf16.msrb.mxu2 %v8895_v15 }
 0x1ff   : > { %12491 = vst [vmem:[#allocation90_spill] sm:$0xff] %v10323_v14  ;;  %v1908_v14 = vrot.slane %v1906_v57, 5  ;;  %v8806_v57 = vld [vmem:[#allocation3 + $0x31c] sm:$0xf]  ;;  %v7672_v46 = vrot.slane %v1297_v33, 11  ;;  %v10356_v33 = vrot.slane %v3622_v6, 7 }
 0x200   : > { %12492 = vst [vmem:[#allocation91_spill] sm:$0xff] %v10325_v51  ;;  %v1291_v51 = vrot.slane %v1289_v60, 7  ;;  %v10338_v32 = vor.u32 %v12496_v34, %v10256_v23  ;;  %v10340_v60 = vpop.f32.mrf.mxu0  ;;  %v8148_v27 = vor.u32 %v8806_v57, %v8145_v8  ;;  %v981_v23 = vld [vmem:[#allocation2 + $0x1f8] sm:$0xf]  ;;  %v7671_v34 = vrot.slane %v1284_v62, 11 }
 0x201   : > { %12493 = vst [vmem:[#allocation92_spill] sm:$0xff] %v10327_v56  ;;  %v3951_v56 = vld [vmem:[#allocation2 + $0x198] sm:$0xf]  ;;  %v1909_v52 = vor.u32 %v1908_v14, %v1905_v47  ;;  %v10350_v47 = vld [vmem:[#allocation2 + $0x1a8] sm:$0xf] }
 0x202   : > { %2721 = vst [vmem:[#allocation3 + $0x394] sm:$0xf] %v2689_v40  ;;  %v4236_v40 = vor.u32 %v4235_v55, %v4232_v21  ;;  %v1294_v59 = vor.u32 %v1292_v61, %v1291_v51  ;;  %v4244_v55 = vshrl.u32 %v3951_v56, 16  ;;  %v4247_v18 = vshll.u32 %v3951_v56, 16  ;;  %6117 = vmatmul.bf16.gmra.mxu2 %v8148_v27  ;;  %v8894_v8 = vld [vmem:[#allocation7 + $0x158] sm:$0xff]  ;;  %v10372_v27 = vpop.f32.mrf.mxu2 }
 0x203   : > { %12494 = vst [vmem:[#allocation93_spill] sm:$0xff] %v10331_v5  ;;  %v1307_v21 = vor.u32 %v1305_v25, %v1304_v35  ;;  %v1328_v51 = vshrl.u32 %v981_v23, 16  ;;  %v3877_v62 = vld [vmem:[#allocation2 + $0x248] sm:$0xf]  ;;  %v10354_v35 = vrot.slane %v2450_v50, 7  ;;  %v8886_v56 = vld [vmem:[#allocation7 + $0x118] sm:$0xff]  ;;  %6414 = vmatpush.bf16.msrb.mxu2 %v8894_v8 }
 0x204   : > { %12495 = vst [vmem:[#allocation94_spill] sm:$0xff] %v10333_v4  ;;  %v2406_v4 = vshrl.u32 %v2154_v63, 16  ;;  %v2693_v63 = vld [vmem:[#allocation2 + $0x248] sm:$0xf]  ;;  %v10361_v28 = vrot.slane %v1909_v52, 4  ;;  %v10365_v57 = vrot.slane %v4247_v18, 5  ;;  %6325 = vmatpush.bf16.msrb.mxu1 %v8886_v56 }
 0x205   : > { %3905 = vst [vmem:[#allocation3 + $0x37c] sm:$0xf] %v3873_v20  ;;  %v10342_v20 = vrot.slane %v3065_v58, 4  ;;  %v3079_v58 = vor.u32 %v3078_v29, %v3075_v43  ;;  %v1295_v29 = vsel %vm9792_vm4, %v7671_v34, %v1294_v59  ;;  %v1308_v50 = vsel %vm9792_vm4, %v7672_v46, %v1307_v21  ;;  %v8893_v59 = vld [vmem:[#allocation7 + $0x150] sm:$0xff] }
 0x206   : > { %12497 = vst [vmem:[#allocation95_spill] sm:$0xff] %v10340_v60  ;;  %v10346_v60 = vrot.slane %v4236_v40, 4  ;;  %v10352_v61 = vpop.f32.mrf.mxu1  ;;  %v10363_v40 = vrot.slane %v4244_v55, 4  ;;  %v1917_v6 = vshrl.u32 %v10350_v47, 16  ;;  %v774_v52 = vmax.f32 %v740_v2, 0.0  ;;  %v8885_v43 = vld [vmem:[#allocation7 + $0x110] sm:$0xff] }
 0x207   : > { %12498 = vst [vmem:[#allocation96_spill] sm:$0xff] %v10342_v20  ;;  %v7698_v20 = vrot.slane %v2406_v4, 11  ;;  %v741_v4 = vpop.f32.mrf.mxu3  ;;  %v10369_v25 = vrot.slane %v3079_v58, 4  ;;  %v1920_v34 = vshll.u32 %v10350_v47, 16  ;;  %v10378_v55 = vld [vmem:[#allocation2 + $0x1a8] sm:$0xf]  ;;  %6415 = vmatpush.bf16.msrb.mxu2 %v8893_v59 }
 0x208   : > { %12499 = vst [vmem:[#allocation97_spill] sm:$0xff] %v10352_v61  ;;  %v1330_v46 = vrot.slane %v1328_v51, 7  ;;  %v742_v18 = vadd.f32 %v10123_v13, %v741_v4  ;;  %v1331_v21 = vshll.u32 %v981_v23, 16  ;;  %v895_v58 = vpack.c.bf16 %v774_v52, %v774_v52  ;;  %v980_v2 = vld [vmem:[#allocation2 + $0x1f4] sm:$0x8]  ;;  %v8892_v47 = vld [vmem:[#allocation7 + $0x148] sm:$0xff]  ;;  %6326 = vmatpush.bf16.msrb.mxu1 %v8885_v43 }
 0x209   : > { %12500 = vst [vmem:[#allocation98_spill] sm:$0xff] %v10356_v33  ;;  %v2417_v15 = vsel %vm9792_vm4, %v7698_v20, %v10338_v32  ;;  %v978_v32 = vld [vmem:[#allocation2 + $0x1e4] sm:$0x8]  ;;  %v979_v20 = vld [vmem:[#allocation2 + $0x1e8] sm:$0xf]  ;;  %v2463_v51 = vshrl.u32 %v10378_v55, 16 }
 0x20a   : > { %2725 = vst [vmem:[#allocation3 + $0x424] sm:$0xf] %v2693_v63  ;;  %v10381_v63 = vpop.f32.mrf.mxu0  ;;  %v1315_v8 = vshrl.u32 %v979_v20, 16  ;;  %v1323_v13 = vshrl.u32 %v980_v2, 16  ;;  %v775_v23 = vmax.f32 %v742_v18, 0.0  ;;  %v1310_v4 = vshrl.u32 %v978_v32, 16 }
 0x20b   : > { %12501 = vst [vmem:[#allocation99_spill] sm:$0xff] %v10372_v27  ;;  %v2158_v52 = vld [vmem:[#allocation2 + $0x184] sm:$0x8]  ;;  %v10389_v43 = vld [vmem:[#allocation2 + $0x208] sm:$0xf]  ;;  %6416 = vmatpush.bf16.msrb.mxu2 %v8892_v47  ;;  %v4250_v32 = vor.u32 %v10365_v57, %v10363_v40 }
 0x20c   : > { %3909 = vst [vmem:[#allocation3 + $0x40c] sm:$0xf] %v3877_v62  ;;  %v1501_v62 = vld [vmem:[#allocation2 + $0x1e8] sm:$0xf]  ;;  %v1317_v14 = vrot.slane %v1315_v8, 7  ;;  %v7674_v59 = vrot.slane %v1323_v13, 11 }
 0x20d   : > { %1467 = vst [vmem:[#allocation3 + $0x318] sm:$0xf] %v1295_v29  ;;  %v1333_v29 = vor.u32 %v1331_v21, %v1330_v46  ;;  %v2432_v21 = vshrl.u32 %v2158_v52, 16  ;;  %v8884_v18 = vld [vmem:[#allocation7 + $0x108] sm:$0xff]  ;;  %v10402_v40 = vld [vmem:[#allocation2 + $0x1b8] sm:$0xf] }
 0x20e   : > { %1468 = vst [vmem:[#allocation3 + $0x33c] sm:$0xf] %v1308_v50  ;;  %v2156_v50 = vld [vmem:[#allocation2 + $0x174] sm:$0x8]  ;;  %v10387_v27 = vpop.f32.mrf.mxu1  ;;  %6327 = vmatpush.bf16.msrb.mxu1 %v8884_v18  ;;  %v7673_v61 = vrot.slane %v1310_v4, 11 }
 0x20f   : > { %12502 = vst [vmem:[#allocation100_spill] sm:$0xff] %v10381_v63  ;;  %v896_v63 = vpack.c.bf16 %v775_v23, %v775_v23  ;;  %v2419_v46 = vshrl.u32 %v2156_v50, 16  ;;  %v1334_v8 = vsel %vm9792_vm4, %v7674_v59, %v1333_v29  ;;  %v10398_v23 = vpop.f32.mrf.mxu2  ;;  %v8780_v50 = vld [vmem:[#allocation3 + $0x24c] sm:$0xf]  ;;  %v2729_v29 = vld [vmem:[#allocation2 + $0x1c] sm:$0x1] }
 0x210   : > { %2649 = vst [vmem:[#allocation3 + $0x270] sm:$0xf] %v2417_v15  ;;  %v10385_v15 = vld [vmem:[#allocation2 + $0x218] sm:$0xf]  ;;  %v2731_v4 = vld [vmem:[#allocation2 + $0x2c] sm:$0x1] }
 0x211   : > { %928 = vst [vmem:[#allocation2 + $0x258] sm:$0xf] %v895_v58  ;;  %v1318_v58 = vshll.u32 %v979_v20, 16  ;;  %v12504_v20 = vshll.u32 %v10275_v37, 16  ;;  %v1354_v37 = vshrl.u32 %v10385_v15, 16 }
 0x212   : > { %1533 = vst [vmem:[#allocation3 + $0x364] sm:$0xf] %v1501_v62  ;;  %v8891_v62 = vld [vmem:[#allocation7 + $0x140] sm:$0xff]  ;;  %v10408_v59 = vpop.f32.mrf.mxu0 }
 0x213   : > { %12503 = vst [vmem:[#allocation101_spill] sm:$0xff] %v10387_v27  ;;  %v2429_v13 = vor.u32 %v12504_v20, %v10303_v7  ;;  %v10400_v27 = vrot.slane %v1917_v6, 4  ;;  %v1320_v5 = vor.u32 %v1318_v58, %v1317_v14  ;;  %v1341_v7 = vshrl.u32 %v10389_v43, 16  ;;  %6417 = vmatpush.bf16.msrb.mxu2 %v8891_v62  ;;  %v10417_v20 = vld [vmem:[#allocation2 + $0x1a8] sm:$0xf] }
 0x214   : > { %v8143_v2 = vld [vmem:[#allocation3 + $0x318] sm:$0xf]  ;;  %929 = vst [vmem:[#allocation2 + $0x268] sm:$0xf] %v896_v63  ;;  %v10404_v63 = vrot.slane %v1920_v34, 5  ;;  %v12507_v6 = vshll.u32 %v10294_v31, 16 }
 0x215   : > { %v8810_v56 = vld [vmem:[#allocation3 + $0x338] sm:$0xf0]  ;;  %12505 = vst [vmem:[#allocation102_spill] sm:$0xff] %v10398_v23  ;;  %v7700_v14 = vrot.slane %v2432_v21, 11  ;;  %v982_v34 = vld [vmem:[#allocation2 + $0x204] sm:$0x8] }
 0x216   : > { %v8144_v47 = vor.u32 %v8810_v56, %v8143_v2  ;;  %1470 = vst [vmem:[#allocation3 + $0x384] sm:$0xf] %v1334_v8  ;;  %v7699_v2 = vrot.slane %v2419_v46, 11  ;;  %v2442_v18 = vor.u32 %v12507_v6, %v10319_v11  ;;  %v10413_v8 = vrot.slane %v4250_v32, 4  ;;  %v984_v62 = vld [vmem:[#allocation2 + $0x214] sm:$0x8]  ;;  %v10431_v23 = vpop.f32.mrf.mxu1 }
 0x217   : > { %v8045_v52 = vld [vmem:[#allocation3 + $0x26c] sm:$0xf0]  ;;  %12506 = vst [vmem:[#allocation103_spill] sm:$0xff] %v10408_v59  ;;  %v10415_v58 = vrot.slane %v2463_v51, 7  ;;  %v1357_v46 = vshll.u32 %v10385_v15, 16  ;;  %v1321_v32 = vsel %vm9792_vm4, %v7673_v61, %v1320_v5  ;;  %v1356_v21 = vrot.slane %v1354_v37, 7 }
 0x218   : > { %v8048_v57 = vor.u32 %v8780_v50, %v8045_v52  ;;  %6028 = vmatmul.bf16.gmra.mxu1 %v8144_v47  ;;  %v2694_v56 = vld [vmem:[#allocation2 + $0x258] sm:$0xf]  ;;  %12508 = vst [vmem:[#allocation104_spill] sm:$0xff] %v10413_v8  ;;  %v2476_v47 = vshrl.u32 %v10402_v40, 16  ;;  %v2802_v50 = vshll.u32 %v2729_v29, 16  ;;  %v2430_v51 = vsel %vm9792_vm4, %v7699_v2, %v2429_v13  ;;  %v8883_v8 = vld [vmem:[#allocation7 + $0x100] sm:$0xff] }
 0x219   : > { %2726 = vst [vmem:[#allocation3 + $0x448] sm:$0xf] %v2694_v56  ;;  %v10421_v52 = vld [vmem:[#allocation2 + $0x1c8] sm:$0xf]  ;;  %v3878_v31 = vld [vmem:[#allocation2 + $0x258] sm:$0xf]  ;;  %v2443_v15 = vsel %vm9792_vm4, %v7700_v14, %v2442_v18  ;;  %6328 = vmatpush.bf16.msrb.mxu1 %v8883_v8 }
 0x21a   : > { %6280 = vmatmul.bf16.gmra.mxu0 %v8048_v57  ;;  %v8181_v11 = vld [vmem:[#allocation3 + $0x384] sm:$0xf0]  ;;  %v1343_v57 = vrot.slane %v1341_v7, 7  ;;  %3910 = vst [vmem:[#allocation3 + $0x430] sm:$0xf] %v3878_v31  ;;  %v1336_v56 = vshrl.u32 %v982_v34, 16 }
 0x21b   : > { %v10427_v6 = vld [vmem:[#allocation2 + $0x228] sm:$0xf]  ;;  %v8815_v59 = vld [vmem:[#allocation3 + $0x364] sm:$0xf]  ;;  %v1349_v29 = vshrl.u32 %v984_v62, 16  ;;  %12509 = vst [vmem:[#allocation105_spill] sm:$0xff] %v10431_v23  ;;  %v10440_v62 = vpop.f32.mrf.mxu2 }
 0x21c   : > { %v2489_v33 = vshrl.u32 %v10421_v52, 16  ;;  %v1344_v5 = vshll.u32 %v10389_v43, 16  ;;  %v8184_v61 = vor.u32 %v8815_v59, %v8181_v11  ;;  %1469 = vst [vmem:[#allocation3 + $0x360] sm:$0xf] %v1321_v32  ;;  %v2816_v37 = vshll.u32 %v2731_v4, 16 }
 0x21d   : > { %v989_v2 = vld [vmem:[#allocation2 + $0x238] sm:$0xf]  ;;  %2650 = vst [vmem:[#allocation3 + $0x294] sm:$0xf] %v2430_v51  ;;  %v10437_v34 = vrot.slane %v2476_v47, 7  ;;  %v1367_v18 = vshrl.u32 %v10427_v6, 16  ;;  %v1359_v59 = vor.u32 %v1357_v46, %v1356_v21  ;;  %v10447_v51 = vpop.f32.mrf.mxu0 }
 0x21e   : > { %v1346_v14 = vor.u32 %v1344_v5, %v1343_v57  ;;  %12510 = vst [vmem:[#allocation106_spill] sm:$0xff] %v10440_v62  ;;  %6122 = vmatmul.bf16.gmra.mxu2 %v8184_v61  ;;  %v7675_v43 = vrot.slane %v1336_v56, 11  ;;  %v10442_v31 = vld [vmem:[#allocation2 + $0x1f8] sm:$0xf]  ;;  %v2695_v4 = vld [vmem:[#allocation2 + $0x268] sm:$0xf] }
 0x21f   : > { %2651 = vst [vmem:[#allocation3 + $0x2b8] sm:$0xf] %v2443_v15  ;;  %v7676_v11 = vrot.slane %v1349_v29, 11  ;;  %v2804_v32 = vrot.slane %v2802_v50, 5  ;;  %v10444_v13 = vrot.slane %v2489_v33, 7  ;;  %v1380_v47 = vshrl.u32 %v989_v2, 16 }
 0x220   : > { %12511 = vst [vmem:[#allocation107_spill] sm:$0xff] %v10447_v51  ;;  %v2818_v7 = vrot.slane %v2816_v37, 5  ;;  %v10449_v57 = vld [vmem:[#allocation2 + $0x248] sm:$0xf]  ;;  %v8819_v5 = vld [vmem:[#allocation3 + $0x380] sm:$0xf0]  ;;  %v1347_v33 = vsel %vm9792_vm4, %v7675_v43, %v1346_v14  ;;  %v10468_v51 = vpop.f32.mrf.mxu1 }
 0x221   : > { %v3879_v61 = vld [vmem:[#allocation2 + $0x268] sm:$0xf]  ;;  %v1369_v15 = vrot.slane %v1367_v18, 7  ;;  %v1370_v46 = vshll.u32 %v10427_v6, 16  ;;  %2727 = vst [vmem:[#allocation3 + $0x46c] sm:$0xf] %v2695_v4  ;;  %v1360_v37 = vsel %vm9792_vm4, %v7676_v11, %v1359_v59  ;;  %v2805_v18 = vsel %vm9799_vm5, %v9859_v19, %v2804_v32 }
 0x222   : > { %v10455_v50 = vld [vmem:[#allocation2 + $0x208] sm:$0xf]  ;;  %v10457_v56 = vld [vmem:[#allocation2 + $0x258] sm:$0xf]  ;;  %v1382_v8 = vrot.slane %v1380_v47, 7  ;;  %v1383_v6 = vshll.u32 %v989_v2, 16  ;;  %v2819_v43 = vsel %vm9799_vm5, %v9896_v48, %v2818_v7 }
 0x223   : > { %v8179_v29 = vld [vmem:[#allocation3 + $0x360] sm:$0xf]  ;;  %v1393_v21 = vshrl.u32 %v10449_v57, 16  ;;  %3911 = vst [vmem:[#allocation3 + $0x454] sm:$0xf] %v3879_v61  ;;  %v1396_v11 = vshll.u32 %v10449_v57, 16 }
 0x224   : > { %v8180_v4 = vor.u32 %v8819_v5, %v8179_v29  ;;  %v8789_v62 = vld [vmem:[#allocation3 + $0x294] sm:$0xf]  ;;  %1471 = vst [vmem:[#allocation3 + $0x3a8] sm:$0xf] %v1347_v33  ;;  %v1406_v19 = vshrl.u32 %v10457_v56, 16  ;;  %v12513_v5 = vshll.u32 %v10329_v44, 16  ;;  %v10479_v33 = vpop.f32.mrf.mxu2 }
 0x225   : > { %12512 = vst [vmem:[#allocation108_spill] sm:$0xff] %v10468_v51  ;;  %v2160_v32 = vld [vmem:[#allocation2 + $0x194] sm:$0x8]  ;;  %v2162_v47 = vld [vmem:[#allocation2 + $0x1a4] sm:$0x8]  ;;  %v12514_v48 = vshll.u32 %v10378_v55, 16  ;;  %v10481_v23 = vpop.f32.mrf.mxu0 }
 0x226   : > { %v8081_v14 = vld [vmem:[#allocation3 + $0x2b4] sm:$0xf0]  ;;  %1472 = vst [vmem:[#allocation3 + $0x3cc] sm:$0xf] %v1360_v37  ;;  %v2455_v61 = vor.u32 %v12513_v5, %v10354_v35  ;;  %v2445_v57 = vshrl.u32 %v2160_v32, 16  ;;  %v2458_v29 = vshrl.u32 %v2162_v47, 16  ;;  %v1385_v37 = vor.u32 %v1383_v6, %v1382_v8 }
 0x227   : > { %v8084_v2 = vor.u32 %v8789_v62, %v8081_v14  ;;  %3272 = vst [vmem:[#allocation3 + $0x14] sm:$0xf] %v2805_v18  ;;  %v2468_v7 = vor.u32 %v12514_v48, %v10415_v58  ;;  %v1372_v62 = vor.u32 %v1370_v46, %v1369_v15  ;;  %v1395_v18 = vrot.slane %v1393_v21, 7  ;;  %v988_v14 = vld [vmem:[#allocation2 + $0x234] sm:$0x8] }
 0x228   : > { %6033 = vmatmul.bf16.gmra.mxu1 %v8180_v4  ;;  %12515 = vst [vmem:[#allocation109_spill] sm:$0xff] %v10479_v33  ;;  %v986_v4 = vld [vmem:[#allocation2 + $0x224] sm:$0x8]  ;;  %v2733_v51 = vld [vmem:[#allocation2 + $0x3c] sm:$0x1]  ;;  %v7701_v44 = vrot.slane %v2445_v57, 11 }
 0x229   : > { %3273 = vst [vmem:[#allocation3 + $0x38] sm:$0xf] %v2819_v43  ;;  %v1362_v59 = vshrl.u32 %v986_v4, 16  ;;  %v7702_v35 = vrot.slane %v2458_v29, 11  ;;  %v1375_v5 = vshrl.u32 %v988_v14, 16  ;;  %v2830_v58 = vshll.u32 %v2733_v51, 16 }
 0x22a   : > { %6285 = vmatmul.bf16.gmra.mxu0 %v8084_v2  ;;  %12516 = vst [vmem:[#allocation110_spill] sm:$0xff] %v10481_v23  ;;  %v2735_v55 = vld [vmem:[#allocation2 + $0x4c] sm:$0x1]  ;;  %v1408_v48 = vrot.slane %v1406_v19, 7  ;;  %v1409_v2 = vshll.u32 %v10457_v56, 16  ;;  %v2456_v8 = vsel %vm9792_vm4, %v7701_v44, %v2455_v61  ;;  %v12517_v57 = vshll.u32 %v10402_v40, 16 }
 0x22b   : > { %v7677_v43 = vrot.slane %v1362_v59, 11  ;;  %v2844_v32 = vshll.u32 %v2735_v55, 16  ;;  %v8215_v47 = vld [vmem:[#allocation3 + $0x3a8] sm:$0xf]  ;;  %v2469_v15 = vsel %vm9792_vm4, %v7702_v35, %v2468_v7  ;;  %v7678_v46 = vrot.slane %v1375_v5, 11  ;;  %v10504_v55 = vpop.f32.mrf.mxu1  ;;  %v12639_v33 = vld [vmem:[#allocation70_spill] sm:$0xff] }
 0x22c   : > { %v2832_v21 = vrot.slane %v2830_v58, 5  ;;  %v2164_v6 = vld [vmem:[#allocation2 + $0x1b4] sm:$0x8]  ;;  %v2481_v29 = vor.u32 %v12517_v57, %v10437_v34  ;;  %2652 = vst [vmem:[#allocation3 + $0x2dc] sm:$0xf] %v2456_v8  ;;  %v12518_v40 = vshll.u32 %v10421_v52, 16 }
 0x22d   : > { %v8828_v51 = vld [vmem:[#allocation3 + $0x3c8] sm:$0xf0]  ;;  %v1373_v56 = vsel %vm9792_vm4, %v7677_v43, %v1372_v62  ;;  %v2846_v59 = vrot.slane %v2844_v32, 5  ;;  %v2471_v19 = vshrl.u32 %v2164_v6, 16  ;;  %2653 = vst [vmem:[#allocation3 + $0x300] sm:$0xf] %v2469_v15  ;;  %v1386_v61 = vsel %vm9792_vm4, %v7678_v46, %v1385_v37  ;;  %v10510_v6 = vpop.f32.mrf.mxu2 }
 0x22e   : > { %v8216_v4 = vor.u32 %v8828_v51, %v8215_v47  ;;  %v8709_v14 = vld [vmem:[#allocation3 + $0x14] sm:$0xf]  ;;  %v2833_v7 = vsel %vm9799_vm5, %v9903_v41, %v2832_v21  ;;  %v2166_v44 = vld [vmem:[#allocation2 + $0x1c4] sm:$0x8]  ;;  %v2494_v34 = vor.u32 %v12518_v40, %v10444_v13  ;;  %1473 = vst [vmem:[#allocation3 + $0x3f0] sm:$0xf] %v1373_v56  ;;  %v1398_v32 = vor.u32 %v1396_v11, %v1395_v18 }
 0x22f   : > { %v8713_v5 = vld [vmem:[#allocation3 + $0x30] sm:$0xf0]  ;;  %v2847_v62 = vsel %vm9799_vm5, %v9914_v3, %v2846_v59  ;;  %12519 = vst [vmem:[#allocation111_spill] sm:$0xff] %v10504_v55  ;;  %v7703_v58 = vrot.slane %v2471_v19, 11  ;;  %v2484_v37 = vshrl.u32 %v2166_v44, 16  ;;  %v1411_v41 = vor.u32 %v1409_v2, %v1408_v48 }
 0x230   : > { %v7765_v35 = vld [vmem:[#allocation3 + $0x34] sm:$0xf0]  ;;  %v10506_v43 = vld [vmem:[#allocation2 + $0x1a8] sm:$0xf]  ;;  %6038 = vmatmul.bf16.vlgmr.msrb.gmra.mxu3 %v8216_v4  ;;  %1474 = vst [vmem:[#allocation3 + $0x414] sm:$0xf] %v1386_v61  ;;  %v1923_v56 = vor.u32 %v10404_v63, %v10400_v27  ;;  %v10519_v4 = vpop.f32.mrf.mxu0 }
 0x231   : > { %v7768_v47 = vor.u32 %v8709_v14, %v7765_v35  ;;  %v990_v52 = vld [vmem:[#allocation2 + $0x244] sm:$0x8]  ;;  %v992_v13 = vld [vmem:[#allocation2 + $0x254] sm:$0x8]  ;;  %v7763_v8 = vld [vmem:[#allocation3 + $0x10] sm:$0xf]  ;;  %v2482_v15 = vsel %vm9792_vm4, %v7703_v58, %v2481_v29 }
 0x232   : > { %3274 = vst [vmem:[#allocation3 + $0x5c] sm:$0xf] %v2833_v7  ;;  %v7704_v46 = vrot.slane %v2484_v37, 11  ;;  %v1388_v3 = vshrl.u32 %v990_v52, 16  ;;  %v1401_v21 = vshrl.u32 %v992_v13, 16  ;;  %v3090_v29 = vshll.u32 %v10417_v20, 16 }
 0x233   : > { %12520 = vst [vmem:[#allocation112_spill] sm:$0xff] %v10510_v6  ;;  %6418 = vmatmul.bf16.vlgmr.msrb.gmra.mxu2 %v7768_v47  ;;  %v2737_v57 = vld [vmem:[#allocation2 + $0x5c] sm:$0x1]  ;;  %v2739_v11 = vld [vmem:[#allocation2 + $0x6c] sm:$0x1]  ;;  %v7764_v19 = vor.u32 %v8713_v5, %v7763_v8  ;;  %v3635_v61 = vshrl.u32 %v10506_v43, 16 }
 0x234   : > { %3275 = vst [vmem:[#allocation3 + $0x80] sm:$0xf] %v2847_v62  ;;  %v2495_v18 = vsel %vm9792_vm4, %v7704_v46, %v2494_v34  ;;  %v7679_v48 = vrot.slane %v1388_v3, 11  ;;  %v7680_v2 = vrot.slane %v1401_v21, 11  ;;  %v2858_v51 = vshll.u32 %v2737_v57, 16 }
 0x235   : > { %2654 = vst [vmem:[#allocation3 + $0x324] sm:$0xf] %v2482_v15  ;;  %v10517_v59 = vld [vmem:[#allocation2 + $0x218] sm:$0xf]  ;;  %v2872_v14 = vshll.u32 %v2739_v11, 16  ;;  %v12522_v63 = vshrl.u32 %v10442_v31, 16  ;;  %v10548_v11 = vpop.f32.mrf.mxu1 }
 0x236   : > { %12521 = vst [vmem:[#allocation113_spill] sm:$0xff] %v10519_v4  ;;  %v8798_v7 = vld [vmem:[#allocation3 + $0x2dc] sm:$0xf]  ;;  %v8117_v44 = vld [vmem:[#allocation3 + $0x2fc] sm:$0xf0]  ;;  %v1399_v40 = vsel %vm9792_vm4, %v7679_v48, %v1398_v32  ;;  %v1412_v34 = vsel %vm9792_vm4, %v7680_v2, %v1411_v41  ;;  %v2860_v27 = vrot.slane %v2858_v51, 5 }
 0x237   : > { %2655 = vst [vmem:[#allocation3 + $0x348] sm:$0xf] %v2495_v18  ;;  %v2504_v35 = vrot.slane %v12522_v63, 7  ;;  %v12523_v5 = vshrl.u32 %v10455_v50, 16  ;;  %v8120_v58 = vor.u32 %v8798_v7, %v8117_v44  ;;  %v2874_v37 = vrot.slane %v2872_v14, 5  ;;  %v10554_v7 = vpop.f32.mrf.mxu2 }
 0x238   : > { %6329 = vmatmul.bf16.vlgmr.msrb.gmra.mxu1 %v7764_v19  ;;  %1475 = vst [vmem:[#allocation3 + $0x438] sm:$0xf] %v1399_v40  ;;  %v12524_v47 = vshrl.u32 %v10417_v20, 16  ;;  %v10535_v13 = vld [vmem:[#allocation2 + $0x1a8] sm:$0xf]  ;;  %v2861_v41 = vsel %vm9799_vm5, %v9978_v53, %v2860_v27  ;;  %v2505_v8 = vshll.u32 %v10442_v31, 16 }
 0x239   : > { %v2517_v62 = vrot.slane %v12523_v5, 7  ;;  %1476 = vst [vmem:[#allocation3 + $0x45c] sm:$0xf] %v1412_v34  ;;  %v2518_v15 = vshll.u32 %v10455_v50, 16  ;;  %v2875_v46 = vsel %vm9799_vm5, %v9989_v36, %v2874_v37  ;;  %v2168_v3 = vld [vmem:[#allocation2 + $0x1f4] sm:$0x8] }
 0x23a   : > { %v10532_v52 = vrot.slane %v12524_v47, 4  ;;  %6290 = vmatmul.bf16.gmra.mxu0 %v8120_v58  ;;  %3276 = vst [vmem:[#allocation3 + $0xa4] sm:$0xf] %v2861_v41  ;;  %v10545_v21 = vrot.slane %v1923_v56, 4  ;;  %v2528_v57 = vshrl.u32 %v10517_v59, 16  ;;  %v2507_v31 = vor.u32 %v2505_v8, %v2504_v35  ;;  %v10558_v41 = vpop.f32.mrf.mxu0 }
 0x23b   : > { %12525 = vst [vmem:[#allocation114_spill] sm:$0xff] %v10548_v11  ;;  %v2170_v18 = vld [vmem:[#allocation2 + $0x204] sm:$0x8]  ;;  %v10550_v53 = vld [vmem:[#allocation2 + $0x228] sm:$0xf]  ;;  %v2520_v48 = vor.u32 %v2518_v15, %v2517_v62  ;;  %v2497_v50 = vshrl.u32 %v2168_v3, 16 }
 0x23c   : > { %3277 = vst [vmem:[#allocation3 + $0xc8] sm:$0xf] %v2875_v46  ;;  %v2510_v2 = vshrl.u32 %v2170_v18, 16  ;;  %v8251_v51 = vld [vmem:[#allocation3 + $0x3f0] sm:$0xf]  ;;  %v4258_v36 = vshrl.u32 %v10535_v13, 16 }
 0x23d   : > { %v8837_v19 = vld [vmem:[#allocation3 + $0x410] sm:$0xf0]  ;;  %v2741_v14 = vld [vmem:[#allocation2 + $0x7c] sm:$0x1]  ;;  %v2531_v56 = vshll.u32 %v10517_v59, 16  ;;  %12526 = vst [vmem:[#allocation115_spill] sm:$0xff] %v10554_v7 }
 0x23e   : > { %v7705_v44 = vrot.slane %v2497_v50, 11  ;;  %v7706_v40 = vrot.slane %v2510_v2, 11  ;;  %v2743_v34 = vld [vmem:[#allocation2 + $0x8c] sm:$0x1]  ;;  %v2530_v27 = vrot.slane %v2528_v57, 7  ;;  %v2541_v63 = vshrl.u32 %v10550_v53, 16 }
 0x23f   : > { %v7801_v5 = vld [vmem:[#allocation3 + $0x7c] sm:$0xf0]  ;;  %v2886_v35 = vshll.u32 %v2741_v14, 16  ;;  %v2900_v62 = vshll.u32 %v2743_v34, 16  ;;  %v2544_v58 = vshll.u32 %v10550_v53, 16  ;;  %v8252_v37 = vor.u32 %v8837_v19, %v8251_v51  ;;  %12527 = vst [vmem:[#allocation116_spill] sm:$0xff] %v10558_v41 }
 0x240   : > { %v8718_v47 = vld [vmem:[#allocation3 + $0x5c] sm:$0xf]  ;;  %v2508_v59 = vsel %vm9792_vm4, %v7705_v44, %v2507_v31  ;;  %v2521_v8 = vsel %vm9792_vm4, %v7706_v40, %v2520_v48  ;;  %v1541_v15 = vld [vmem:[#allocation2 + $0x8] sm:$0xf]  ;;  %v1542_v57 = vld [vmem:[#allocation2 + $0xc] sm:$0x1]  ;;  %v1643_v34 = vor.u32 %v9863_v24, %v9861_v22 }
 0x241   : > { %2656 = vst [vmem:[#allocation3 + $0x36c] sm:$0xf] %v2508_v59  ;;  %v2888_v46 = vrot.slane %v2886_v35, 5  ;;  %v2902_v3 = vrot.slane %v2900_v62, 5  ;;  %6043 = vmatmul.bf16.gmra.mxu3 %v8252_v37  ;;  %v7804_v18 = vor.u32 %v8718_v47, %v7801_v5  ;;  %v8722_v50 = vld [vmem:[#allocation3 + $0x78] sm:$0xf0]  ;;  %v10572_v47 = vpop.f32.mrf.mxu1 }
 0x242   : > { %2657 = vst [vmem:[#allocation3 + $0x390] sm:$0xf] %v2521_v8  ;;  %v8874_v53 = vld [vmem:[#allocation7 + $0xb8] sm:$0xff]  ;;  %v1609_v2 = vshrl.u32 %v1541_v15, 16  ;;  %v2543_v51 = vrot.slane %v2541_v63, 7  ;;  %v1612_v40 = vshll.u32 %v1541_v15, 16 }
 0x243   : > { %v7799_v19 = vld [vmem:[#allocation3 + $0x58] sm:$0xf]  ;;  %v2889_v31 = vsel %vm9799_vm5, %v10043_v17, %v2888_v46  ;;  %v2903_v48 = vsel %vm9799_vm5, %v10063_v30, %v2902_v3  ;;  %v2745_v14 = vld [vmem:[#allocation2 + $0xbc] sm:$0x1]  ;;  %6423 = vmatmul.bf16.gmra.mxu2 %v7804_v18  ;;  %6143 = vmatpush.bf16.msrb.mxu3 %v8874_v53  ;;  %v8873_v5 = vld [vmem:[#allocation7 + $0xb0] sm:$0xff]  ;;  %v1618_v62 = vshll.u32 %v1542_v57, 16  ;;  %v2533_v3 = vor.u32 %v2531_v56, %v2530_v27 }
 0x244   : > { %v1544_v44 = vld [vmem:[#allocation2 + $0x1c] sm:$0x1]  ;;  %3278 = vst [vmem:[#allocation3 + $0xec] sm:$0xf] %v2889_v31  ;;  %v2914_v63 = vshll.u32 %v2745_v14, 16  ;;  %v1611_v35 = vrot.slane %v1609_v2, 4  ;;  %v7800_v22 = vor.u32 %v8722_v50, %v7799_v19  ;;  %v2546_v18 = vor.u32 %v2544_v58, %v2543_v51  ;;  %v10581_v2 = vpop.f32.mrf.mxu2  ;;  %v10588_v51 = vpop.f32.mrf.mxu0 }
 0x245   : > { %v8153_v37 = vld [vmem:[#allocation3 + $0x344] sm:$0xf0]  ;;  %12528 = vst [vmem:[#allocation117_spill] sm:$0xff] %v10572_v47  ;;  %v1614_v17 = vrot.slane %v1612_v40, 5  ;;  %v1632_v59 = vshll.u32 %v1544_v44, 16  ;;  %v10576_v30 = vrot.slane %v3090_v29, 5 }
 0x246   : > { %3279 = vst [vmem:[#allocation3 + $0x110] sm:$0xf] %v2903_v48  ;;  %v4261_v8 = vshll.u32 %v10535_v13, 16  ;;  %v2916_v24 = vrot.slane %v2914_v63, 5  ;;  %v1546_v15 = vld [vmem:[#allocation2 + $0x2c] sm:$0x1] }
 0x247   : > { %v10579_v46 = vrot.slane %v4258_v36, 4  ;;  %v8807_v57 = vld [vmem:[#allocation3 + $0x324] sm:$0xf]  ;;  %v1615_v53 = vor.u32 %v1614_v17, %v1611_v35  ;;  %12529 = vst [vmem:[#allocation118_spill] sm:$0xff] %v10581_v2  ;;  %6144 = vmatpush.bf16.msrb.mxu3 %v8873_v5  ;;  %v2172_v48 = vld [vmem:[#allocation2 + $0x214] sm:$0x8] }
 0x248   : > { %6334 = vmatmul.bf16.gmra.mxu1 %v7800_v22  ;;  %v8156_v31 = vor.u32 %v8807_v57, %v8153_v37  ;;  %v2174_v20 = vld [vmem:[#allocation2 + $0x224] sm:$0x8]  ;;  %v2917_v29 = vsel %vm9799_vm5, %v10069_v26, %v2916_v24  ;;  %v1620_v13 = vrot.slane %v1618_v62, 5  ;;  %v1644_v50 = vrot.slane %v1643_v34, 4  ;;  %v10586_v58 = vld [vmem:[#allocation2 + $0x238] sm:$0xf] }
 0x249   : > { %v2523_v19 = vshrl.u32 %v2172_v48, 16  ;;  %v2536_v36 = vshrl.u32 %v2174_v20, 16  ;;  %3280 = vst [vmem:[#allocation3 + $0x134] sm:$0xf] %v2917_v29  ;;  %v1634_v56 = vrot.slane %v1632_v59, 5  ;;  %v1646_v27 = vshll.u32 %v1546_v15, 16 }
 0x24a   : > { %6295 = vmatmul.bf16.gmra.mxu0 %v8156_v31  ;;  %12530 = vst [vmem:[#allocation119_spill] sm:$0xff] %v10588_v51  ;;  %v8872_v14 = vld [vmem:[#allocation7 + $0xa8] sm:$0xff]  ;;  %v1506_v40 = vld [vmem:[#allocation2 + $0x238] sm:$0xf]  ;;  %v1616_v5 = vrot.slane %v1615_v53, 4  ;;  %v1671_v53 = vor.u32 %v9909_v1, %v9907_v0  ;;  %v10603_v29 = vrot.slane %v4261_v8, 5 }
 0x24b   : > { %v1505_v44 = vld [vmem:[#allocation2 + $0x228] sm:$0xf]  ;;  %v7707_v35 = vrot.slane %v2523_v19, 11  ;;  %v7708_v26 = vrot.slane %v2536_v36, 11  ;;  %v1548_v34 = vld [vmem:[#allocation2 + $0x3c] sm:$0x1]  ;;  %6145 = vmatpush.bf16.msrb.mxu3 %v8872_v14  ;;  %v1635_v57 = vsel %vm9799_vm5, %v9857_v16, %v1634_v56 }
 0x24c   : > { %v10590_v63 = vld [vmem:[#allocation2 + $0x248] sm:$0xf]  ;;  %1537 = vst [vmem:[#allocation3 + $0x3f4] sm:$0xf] %v1505_v44  ;;  %v8287_v62 = vld [vmem:[#allocation3 + $0x438] sm:$0xf]  ;;  %v1621_v17 = vsel %vm9799_vm5, %v1616_v5, %v1620_v13 }
 0x24d   : > { %1538 = vst [vmem:[#allocation3 + $0x418] sm:$0xf] %v1506_v40  ;;  %v2747_v37 = vld [vmem:[#allocation2 + $0xcc] sm:$0x1]  ;;  %v8846_v59 = vld [vmem:[#allocation3 + $0x458] sm:$0xf0]  ;;  %v2534_v22 = vsel %vm9792_vm4, %v7707_v35, %v2533_v3  ;;  %v2547_v24 = vsel %vm9792_vm4, %v7708_v26, %v2546_v18  ;;  %v10607_v18 = vpop.f32.mrf.mxu1  ;;  %v10617_v40 = vpop.f32.mrf.mxu2 }
 0x24e   : > { %v2928_v15 = vshll.u32 %v2747_v37, 16  ;;  %2088 = vst [vmem:[#allocation3 + $0x8] sm:$0xf] %v1621_v17  ;;  %v7837_v31 = vld [vmem:[#allocation3 + $0xc4] sm:$0xf0]  ;;  %v1648_v48 = vrot.slane %v1646_v27, 5  ;;  %v8288_v36 = vor.u32 %v8846_v59, %v8287_v62  ;;  %v10625_v59 = vpop.f32.mrf.mxu0 }
 0x24f   : > { %2658 = vst [vmem:[#allocation3 + $0x3b4] sm:$0xf] %v2534_v22  ;;  %v1660_v20 = vshll.u32 %v1548_v34, 16  ;;  %v2554_v3 = vshrl.u32 %v10586_v58, 16  ;;  %v2557_v13 = vshll.u32 %v10586_v58, 16  ;;  %v2567_v16 = vshrl.u32 %v10590_v63, 16 }
 0x250   : > { %12531 = vst [vmem:[#allocation120_spill] sm:$0xff] %v10607_v18  ;;  %v2930_v19 = vrot.slane %v2928_v15, 5  ;;  %v8727_v56 = vld [vmem:[#allocation3 + $0xa4] sm:$0xf]  ;;  %v1649_v0 = vsel %vm9799_vm5, %v1644_v50, %v1648_v48  ;;  %v1550_v58 = vld [vmem:[#allocation2 + $0x4c] sm:$0x1]  ;;  %v3093_v34 = vor.u32 %v10576_v30, %v10532_v52 }
 0x251   : > { %2659 = vst [vmem:[#allocation3 + $0x3d8] sm:$0xf] %v2547_v24  ;;  %v1662_v1 = vrot.slane %v1660_v20, 5  ;;  %v7840_v27 = vor.u32 %v8727_v56, %v7837_v31  ;;  %v1552_v14 = vld [vmem:[#allocation2 + $0x5c] sm:$0x1]  ;;  %6048 = vmatmul.bf16.gmra.mxu3 %v8288_v36  ;;  %v1672_v50 = vrot.slane %v1671_v53, 4 }
 0x252   : > { %2089 = vst [vmem:[#allocation3 + $0x2c] sm:$0xf] %v1635_v57  ;;  %v2931_v8 = vsel %vm9799_vm5, %v10092_v9, %v2930_v19  ;;  %v10615_v44 = vld [vmem:[#allocation2 + $0x1b8] sm:$0xf]  ;;  %v1674_v35 = vshll.u32 %v1550_v58, 16  ;;  %v1688_v26 = vshll.u32 %v1552_v14, 16 }
 0x253   : > { %2090 = vst [vmem:[#allocation3 + $0x50] sm:$0xf] %v1649_v0  ;;  %v1663_v5 = vsel %vm9799_vm5, %v9898_v39, %v1662_v1  ;;  %v8731_v9 = vld [vmem:[#allocation3 + $0xc0] sm:$0xf0]  ;;  %v2749_v62 = vld [vmem:[#allocation2 + $0xdc] sm:$0x1]  ;;  %6428 = vmatmul.bf16.gmra.mxu2 %v7840_v27 }
 0x254   : > { %12532 = vst [vmem:[#allocation121_spill] sm:$0xff] %v10617_v40  ;;  %v2556_v37 = vrot.slane %v2554_v3, 7  ;;  %v2570_v17 = vshll.u32 %v10590_v63, 16  ;;  %v8871_v22 = vld [vmem:[#allocation7 + $0xa0] sm:$0xff]  ;;  %v2942_v24 = vshll.u32 %v2749_v62, 16  ;;  %v1676_v15 = vrot.slane %v1674_v35, 5 }
 0x255   : > { %3281 = vst [vmem:[#allocation3 + $0x158] sm:$0xf] %v2931_v8  ;;  %v2569_v57 = vrot.slane %v2567_v16, 7  ;;  %v7835_v39 = vld [vmem:[#allocation3 + $0xa0] sm:$0xf]  ;;  %v1690_v31 = vrot.slane %v1688_v26, 5  ;;  %6146 = vmatpush.bf16.msrb.mxu3 %v8871_v22  ;;  %v4264_v16 = vor.u32 %v10603_v29, %v10579_v46  ;;  %v10645_v29 = vpop.f32.mrf.mxu1  ;;  %v10647_v62 = vpop.f32.mrf.mxu2 }
 0x256   : > { %2091 = vst [vmem:[#allocation3 + $0x74] sm:$0xf] %v1663_v5  ;;  %v8189_v53 = vld [vmem:[#allocation3 + $0x38c] sm:$0xf0]  ;;  %v10629_v48 = vrot.slane %v3635_v61, 7  ;;  %v7836_v52 = vor.u32 %v8731_v9, %v7835_v39  ;;  %v8870_v30 = vld [vmem:[#allocation7 + $0x98] sm:$0xff]  ;;  %v1677_v63 = vsel %vm9799_vm5, %v1672_v50, %v1676_v15  ;;  %v2559_v1 = vor.u32 %v2557_v13, %v2556_v37 }
 0x257   : > { %12533 = vst [vmem:[#allocation122_spill] sm:$0xff] %v10625_v59  ;;  %v2944_v20 = vrot.slane %v2942_v24, 5  ;;  %v1554_v3 = vld [vmem:[#allocation2 + $0x6c] sm:$0x1]  ;;  %v10633_v19 = vrot.slane %v3093_v34, 4  ;;  %v1931_v36 = vshrl.u32 %v10615_v44, 16  ;;  %v1691_v61 = vsel %vm9799_vm5, %v9926_v45, %v1690_v31 }
 0x258   : > { %v8816_v56 = vld [vmem:[#allocation3 + $0x36c] sm:$0xf]  ;;  %2092 = vst [vmem:[#allocation3 + $0x98] sm:$0xf] %v1677_v63  ;;  %v1934_v0 = vshll.u32 %v10615_v44, 16  ;;  %6339 = vmatmul.bf16.gmra.mxu1 %v7836_v52  ;;  %v2572_v46 = vor.u32 %v2570_v17, %v2569_v57  ;;  %v1702_v35 = vshll.u32 %v1554_v3, 16  ;;  %v10659_v52 = vpop.f32.mrf.mxu0 }
 0x259   : > { %v8192_v27 = vor.u32 %v8816_v56, %v8189_v53  ;;  %v2176_v8 = vld [vmem:[#allocation2 + $0x234] sm:$0x8]  ;;  %v2178_v58 = vld [vmem:[#allocation2 + $0x244] sm:$0x8]  ;;  %v2945_v14 = vsel %vm9799_vm5, %v10103_v42, %v2944_v20  ;;  %12534 = vst [vmem:[#allocation123_spill] sm:$0xff] %v10645_v29  ;;  %6147 = vmatpush.bf16.msrb.mxu3 %v8870_v30  ;;  %v8914_v45 = vld [vmem:[#allocation7 + $0x1f8] sm:$0xff] }
 0x25a   : > { %v2549_v5 = vshrl.u32 %v2176_v8, 16  ;;  %v2562_v50 = vshrl.u32 %v2178_v58, 16  ;;  %3282 = vst [vmem:[#allocation3 + $0x17c] sm:$0xf] %v2945_v14  ;;  %v8869_v44 = vld [vmem:[#allocation7 + $0x90] sm:$0xff]  ;;  %6588 = vmatpush.bf16.msra.mxu0 %v8914_v45  ;;  %v10649_v17 = vrot.slane %v4264_v16, 4 }
 0x25b   : > { %6300 = vmatmul.bf16.gmra.mxu0 %v8192_v27  ;;  %v1507_v13 = vld [vmem:[#allocation2 + $0x248] sm:$0xf]  ;;  %2093 = vst [vmem:[#allocation3 + $0xbc] sm:$0xf] %v1691_v61  ;;  %v1508_v9 = vld [vmem:[#allocation2 + $0x258] sm:$0xf] }
 0x25c   : > { %v7709_v26 = vrot.slane %v2549_v5, 11  ;;  %v7710_v34 = vrot.slane %v2562_v50, 11  ;;  %1539 = vst [vmem:[#allocation3 + $0x43c] sm:$0xf] %v1507_v13  ;;  %v8824_v42 = vld [vmem:[#allocation3 + $0x3ac] sm:$0xf] }
 0x25d   : > { %12535 = vst [vmem:[#allocation124_spill] sm:$0xff] %v10647_v62  ;;  %v2751_v37 = vld [vmem:[#allocation2 + $0xec] sm:$0x1]  ;;  %v8217_v22 = vld [vmem:[#allocation3 + $0x3cc] sm:$0xf0]  ;;  %6148 = vmatpush.bf16.msrb.mxu3 %v8869_v44  ;;  %v1704_v63 = vrot.slane %v1702_v35, 5 }
 0x25e   : > { %1540 = vst [vmem:[#allocation3 + $0x460] sm:$0xf] %v1508_v9  ;;  %v2560_v24 = vsel %vm9792_vm4, %v7709_v26, %v2559_v1  ;;  %v2573_v15 = vsel %vm9792_vm4, %v7710_v34, %v2572_v46  ;;  %v2956_v57 = vshll.u32 %v2751_v37, 16  ;;  %v1556_v39 = vld [vmem:[#allocation2 + $0x7c] sm:$0x1]  ;;  %v10661_v3 = vrot.slane %v1931_v36, 4  ;;  %v10675_v26 = vpop.f32.mrf.mxu1 }
 0x25f   : > { %v10655_v53 = vld [vmem:[#allocation2 + $0x258] sm:$0xf]  ;;  %v10657_v31 = vld [vmem:[#allocation2 + $0x268] sm:$0xf]  ;;  %12536 = vst [vmem:[#allocation125_spill] sm:$0xff] %v10659_v52  ;;  %v10663_v16 = vrot.slane %v1934_v0, 5  ;;  %v8220_v56 = vor.u32 %v8824_v42, %v8217_v22 }
 0x260   : > { %2660 = vst [vmem:[#allocation3 + $0x3fc] sm:$0xf] %v2560_v24  ;;  %v7873_v30 = vld [vmem:[#allocation3 + $0x10c] sm:$0xf0]  ;;  %v2958_v20 = vrot.slane %v2956_v57, 5  ;;  %v1716_v61 = vshll.u32 %v1556_v39, 16 }
 0x261   : > { %2661 = vst [vmem:[#allocation3 + $0x420] sm:$0xf] %v2573_v15  ;;  %v3856_v1 = vld [vmem:[#allocation2 + $0x98] sm:$0xf]  ;;  %v2580_v27 = vshrl.u32 %v10655_v53, 16  ;;  %v2593_v8 = vshrl.u32 %v10657_v31, 16  ;;  %6127 = vmatmul.bf16.vlgmr.msra.gmra.mxu3 %v8220_v56 }
 0x262   : > { %v8736_v58 = vld [vmem:[#allocation3 + $0xec] sm:$0xf]  ;;  %v2959_v14 = vsel %vm9799_vm5, %v10160_v54, %v2958_v20  ;;  %v12537_v46 = vld [vmem:[#allocation26_spill] sm:$0xff]  ;;  %3888 = vst [vmem:[#allocation3 + $0x118] sm:$0xf] %v3856_v1  ;;  %v8913_v35 = vld [vmem:[#allocation7 + $0x1f0] sm:$0xff] }
 0x263   : > { %v1705_v5 = vsel %vm9799_vm5, %v12537_v46, %v1704_v63  ;;  %v10673_v36 = vld [vmem:[#allocation2 + $0x1b8] sm:$0xf]  ;;  %v7876_v0 = vor.u32 %v8736_v58, %v7873_v30  ;;  %v8740_v50 = vld [vmem:[#allocation3 + $0x108] sm:$0xf0]  ;;  %3283 = vst [vmem:[#allocation3 + $0x1a0] sm:$0xf] %v2959_v14  ;;  %6589 = vmatpush.bf16.msra.mxu0 %v8913_v35  ;;  %v10688_v35 = vpop.f32.mrf.mxu0 }
 0x264   : > { %v1718_v45 = vrot.slane %v1716_v61, 5  ;;  %v7871_v44 = vld [vmem:[#allocation3 + $0xe8] sm:$0xf]  ;;  %v8825_v13 = vld [vmem:[#allocation3 + $0x3b4] sm:$0xf]  ;;  %12538 = vst [vmem:[#allocation26_spill] sm:$0xff] %v10675_v26 }
 0x265   : > { %2094 = vst [vmem:[#allocation3 + $0xe0] sm:$0xf] %v1705_v5  ;;  %v3918_v34 = vld [vmem:[#allocation2 + $0x4c] sm:$0x1]  ;;  %v2583_v54 = vshll.u32 %v10655_v53, 16  ;;  %6433 = vmatmul.bf16.gmra.mxu2 %v7876_v0  ;;  %v12539_v37 = vld [vmem:[#allocation31_spill] sm:$0xff]  ;;  %v10684_v53 = vpop.f32.mrf.mxu2  ;;  %v7872_v61 = vor.u32 %v8740_v50, %v7871_v44 }
 0x266   : > { %v8868_v9 = vld [vmem:[#allocation7 + $0x88] sm:$0xff]  ;;  %v1719_v22 = vsel %vm9799_vm5, %v12539_v37, %v1718_v45  ;;  %v3920_v24 = vld [vmem:[#allocation2 + $0x5c] sm:$0x1]  ;;  %v4015_v15 = vshll.u32 %v3918_v34, 16  ;;  %v2582_v57 = vrot.slane %v2580_v27, 7  ;;  %v2595_v63 = vrot.slane %v2593_v8, 7 }
 0x267   : > { %v8912_v42 = vld [vmem:[#allocation7 + $0x1e8] sm:$0xff]  ;;  %v8225_v39 = vld [vmem:[#allocation3 + $0x3d4] sm:$0xf0]  ;;  %2095 = vst [vmem:[#allocation3 + $0x104] sm:$0xf] %v1719_v22  ;;  %v4029_v30 = vshll.u32 %v3920_v24, 16  ;;  %6149 = vmatpush.bf16.msrb.mxu3 %v8868_v9 }
 0x268   : > { %v10681_v20 = vld [vmem:[#allocation2 + $0x1b8] sm:$0xf]  ;;  %v2596_v56 = vshll.u32 %v10657_v31, 16  ;;  %12540 = vst [vmem:[#allocation31_spill] sm:$0xff] %v10684_v53  ;;  %v1557_v1 = vld [vmem:[#allocation2 + $0xa8] sm:$0xf]  ;;  %6344 = vmatmul.bf16.gmra.mxu1 %v7872_v61  ;;  %v8228_v45 = vor.u32 %v8825_v13, %v8225_v39  ;;  %6590 = vmatpush.bf16.msra.mxu0 %v8912_v42  ;;  %v2585_v50 = vor.u32 %v2583_v54, %v2582_v57 }
 0x269   : > { %v1721_v14 = vshrl.u32 %v1557_v1, 16  ;;  %v1724_v46 = vshll.u32 %v1557_v1, 16  ;;  %v4017_v5 = vrot.slane %v4015_v15, 5  ;;  %v3922_v0 = vld [vmem:[#allocation2 + $0x6c] sm:$0x1]  ;;  %12541 = vst [vmem:[#allocation126_spill] sm:$0xff] %v10688_v35 }
 0x26a   : > { %v8911_v8 = vld [vmem:[#allocation7 + $0x1e0] sm:$0xff]  ;;  %v2180_v34 = vld [vmem:[#allocation2 + $0x254] sm:$0x8]  ;;  %v4043_v37 = vshll.u32 %v3922_v0, 16  ;;  %v4031_v24 = vrot.slane %v4029_v30, 5  ;;  %v2598_v15 = vor.u32 %v2596_v56, %v2595_v63  ;;  %v10694_v63 = vpop.f32.mrf.mxu1 }
 0x26b   : > { %v8867_v31 = vld [vmem:[#allocation7 + $0x80] sm:$0xff]  ;;  %v2575_v9 = vshrl.u32 %v2180_v34, 16  ;;  %v1723_v22 = vrot.slane %v1721_v14, 4  ;;  %6305 = vmatmul.bf16.gmra.mxu0 %v8228_v45  ;;  %v12542_v27 = vld [vmem:[#allocation21_spill] sm:$0xff]  ;;  %v1558_v58 = vld [vmem:[#allocation2 + $0xac] sm:$0x1] }
 0x26c   : > { %v2182_v44 = vld [vmem:[#allocation2 + $0x264] sm:$0x8]  ;;  %6150 = vmatpush.bf16.msrb.mxu3 %v8867_v31  ;;  %v4018_v13 = vsel %vm9799_vm5, %v12542_v27, %v4017_v5  ;;  %v8833_v42 = vld [vmem:[#allocation3 + $0x3f4] sm:$0xf]  ;;  %v8253_v39 = vld [vmem:[#allocation3 + $0x414] sm:$0xf0]  ;;  %6591 = vmatpush.bf16.msra.mxu0 %v8911_v8 }
 0x26d   : > { %v2588_v32 = vshrl.u32 %v2182_v44, 16  ;;  %v7711_v61 = vrot.slane %v2575_v9, 11  ;;  %v1560_v0 = vld [vmem:[#allocation2 + $0xbc] sm:$0x1]  ;;  %v1726_v54 = vrot.slane %v1724_v46, 5  ;;  %v1730_v30 = vshll.u32 %v1558_v58, 16 }
 0x26e   : > { %v8910_v14 = vld [vmem:[#allocation7 + $0x1d8] sm:$0xff]  ;;  %v1744_v34 = vshll.u32 %v1560_v0, 16  ;;  %v4045_v1 = vrot.slane %v4043_v37, 5  ;;  %12543 = vst [vmem:[#allocation21_spill] sm:$0xff] %v10694_v63  ;;  %v3926_v44 = vld [vmem:[#allocation2 + $0x8c] sm:$0x1] }
 0x26f   : > { %v7712_v57 = vrot.slane %v2588_v32, 11  ;;  %v2586_v56 = vsel %vm9792_vm4, %v7711_v61, %v2585_v50  ;;  %v1727_v45 = vor.u32 %v1726_v54, %v1723_v22  ;;  %v12544_v31 = vld [vmem:[#allocation25_spill] sm:$0xff]  ;;  %4459 = vst [vmem:[#allocation3 + $0x68] sm:$0xf] %v4018_v13  ;;  %v3924_v27 = vld [vmem:[#allocation2 + $0x7c] sm:$0x1]  ;;  %v10704_v22 = vpop.f32.mrf.mxu2  ;;  %v8256_v61 = vor.u32 %v8833_v42, %v8253_v39 }
 0x270   : > { %v4032_v5 = vsel %vm9799_vm5, %v12544_v31, %v4031_v24  ;;  %2662 = vst [vmem:[#allocation3 + $0x444] sm:$0xf] %v2586_v56  ;;  %v1732_v58 = vrot.slane %v1730_v30, 5  ;;  %v1746_v46 = vrot.slane %v1744_v34, 5  ;;  %v3927_v8 = vld [vmem:[#allocation2 + $0x98] sm:$0xf]  ;;  %6592 = vmatpush.bf16.msra.mxu0 %v8910_v14  ;;  %v10711_v31 = vpop.f32.mrf.mxu0 }
 0x271   : > { %v2599_v32 = vsel %vm9792_vm4, %v7712_v57, %v2598_v15  ;;  %v7909_v37 = vld [vmem:[#allocation3 + $0x154] sm:$0xf0]  ;;  %v1728_v9 = vrot.slane %v1727_v45, 4  ;;  %v4057_v0 = vshll.u32 %v3924_v27, 16  ;;  %12545 = vst [vmem:[#allocation25_spill] sm:$0xff] %v10704_v22  ;;  %v4076_v15 = vshrl.u32 %v3927_v8, 16  ;;  %6132 = vmatmul.bf16.gmra.mxu3 %v8256_v61 }
 0x272   : > { %2663 = vst [vmem:[#allocation3 + $0x468] sm:$0xf] %v2599_v32  ;;  %v8745_v24 = vld [vmem:[#allocation3 + $0x134] sm:$0xf]  ;;  %v3928_v34 = vld [vmem:[#allocation2 + $0x9c] sm:$0x1] }
 0x273   : > { %v12546_v13 = vld [vmem:[#allocation37_spill] sm:$0xff]  ;;  %4460 = vst [vmem:[#allocation3 + $0x8c] sm:$0xf] %v4032_v5  ;;  %v1733_v30 = vsel %vm9799_vm5, %v1728_v9, %v1732_v58  ;;  %v4071_v56 = vshll.u32 %v3926_v44, 16  ;;  %v4079_v45 = vshll.u32 %v3927_v8, 16  ;;  %v7912_v42 = vor.u32 %v8745_v24, %v7909_v37  ;;  %v8908_v22 = vld [vmem:[#allocation7 + $0x1c8] sm:$0xff] }
 0x274   : > { %v1747_v54 = vsel %vm9799_vm5, %v12546_v13, %v1746_v46  ;;  %v8749_v57 = vld [vmem:[#allocation3 + $0x150] sm:$0xf0]  ;;  %12547 = vst [vmem:[#allocation37_spill] sm:$0xff] %v10711_v31  ;;  %v8834_v39 = vld [vmem:[#allocation3 + $0x3fc] sm:$0xf]  ;;  %v4059_v8 = vrot.slane %v4057_v0, 5 }
 0x275   : > { %2097 = vst [vmem:[#allocation3 + $0x14c] sm:$0xf] %v1747_v54  ;;  %v8906_v14 = vld [vmem:[#allocation7 + $0x1b8] sm:$0xff]  ;;  %v8909_v27 = vld [vmem:[#allocation7 + $0x1d0] sm:$0xff]  ;;  %v2755_v9 = vld [vmem:[#allocation2 + $0x10c] sm:$0x1]  ;;  %6438 = vmatmul.bf16.gmra.mxu2 %v7912_v42 }
 0x276   : > { %v2753_v32 = vld [vmem:[#allocation2 + $0xfc] sm:$0x1]  ;;  %2096 = vst [vmem:[#allocation3 + $0x128] sm:$0xf] %v1733_v30  ;;  %v12548_v46 = vld [vmem:[#allocation29_spill] sm:$0xff]  ;;  %6499 = vmatpush.bf16.msra.mxu3 %v8906_v14  ;;  %v2984_v37 = vshll.u32 %v2755_v9, 16  ;;  %6593 = vmatpush.bf16.msra.mxu0 %v8909_v27 }
 0x277   : > { %v4046_v5 = vsel %vm9799_vm5, %v12548_v46, %v4045_v1  ;;  %v10716_v13 = vld [vmem:[#allocation2 + $0x1b8] sm:$0xf]  ;;  %v7907_v58 = vld [vmem:[#allocation3 + $0x130] sm:$0xf]  ;;  %v2970_v54 = vshll.u32 %v2753_v32, 16  ;;  %v4078_v50 = vrot.slane %v4076_v15, 4  ;;  %v10726_v15 = vpop.f32.mrf.mxu1 }
 0x278   : > { %v1562_v44 = vld [vmem:[#allocation2 + $0xcc] sm:$0x1]  ;;  %v8261_v61 = vld [vmem:[#allocation3 + $0x41c] sm:$0xf0]  ;;  %v4085_v26 = vshll.u32 %v3928_v34, 16  ;;  %v4073_v18 = vrot.slane %v4071_v56, 5  ;;  %v7908_v32 = vor.u32 %v8749_v57, %v7907_v58 }
 0x279   : > { %v1758_v24 = vshll.u32 %v1562_v44, 16  ;;  %v2972_v30 = vrot.slane %v2970_v54, 5  ;;  %4461 = vst [vmem:[#allocation3 + $0xb0] sm:$0xf] %v4046_v5  ;;  %v4081_v1 = vrot.slane %v4079_v45, 5  ;;  %v12549_v46 = vshrl.u32 %v10673_v36, 16 }
 0x27a   : > { %v2986_v11 = vrot.slane %v2984_v37, 5  ;;  %v12550_v42 = vshll.u32 %v10673_v36, 16  ;;  %v8264_v9 = vor.u32 %v8834_v39, %v8261_v61  ;;  %12551 = vst [vmem:[#allocation29_spill] sm:$0xff] %v10726_v15  ;;  %v4272_v45 = vshrl.u32 %v10716_v13, 16  ;;  %6349 = vmatmul.bf16.gmra.mxu1 %v7908_v32  ;;  %v8922_v27 = vld [vmem:[#allocation7 + $0x238] sm:$0xff]  ;;  %v12552_v36 = vld [vmem:[#allocation40_spill] sm:$0xff]  ;;  %6594 = vmatpush.bf16.msra.mxu0 %v8908_v22  ;;  %v10747_v37 = vpop.f32.mrf.mxu2 }
 0x27b   : > { %v10720_v62 = vrot.slane %v12549_v46, 4  ;;  %v1760_v0 = vrot.slane %v1758_v24, 5  ;;  %v2973_v34 = vsel %vm9799_vm5, %v10167_v49, %v2972_v30  ;;  %v4082_v56 = vor.u32 %v4081_v1, %v4078_v50  ;;  %v12553_v5 = vld [vmem:[#allocation33_spill] sm:$0xff]  ;;  %v8907_v50 = vld [vmem:[#allocation7 + $0x1c0] sm:$0xff]  ;;  %v12554_v54 = vld [vmem:[#allocation36_spill] sm:$0xff]  ;;  %12555 = vst [vmem:[#allocation40_spill] sm:$0xff] %v10747_v37  ;;  %6677 = vmatpush.bf16.msra.mxu1 %v8922_v27 }
 0x27c   : > { %v10724_v14 = vrot.slane %v12550_v42, 5  ;;  %v2987_v57 = vsel %vm9799_vm5, %v10199_v38, %v2986_v11  ;;  %3284 = vst [vmem:[#allocation3 + $0x1c4] sm:$0xf] %v2973_v34  ;;  %v4060_v58 = vsel %vm9799_vm5, %v12553_v5, %v4059_v8  ;;  %v4275_v49 = vshll.u32 %v10716_v13, 16  ;;  %6310 = vmatmul.bf16.gmra.mxu0 %v8264_v9  ;;  %v1564_v24 = vld [vmem:[#allocation2 + $0xdc] sm:$0x1] }
 0x27d   : > { %v1761_v39 = vsel %vm9799_vm5, %v12552_v36, %v1760_v0  ;;  %3285 = vst [vmem:[#allocation3 + $0x1e8] sm:$0xf] %v2987_v57  ;;  %v4074_v44 = vsel %vm9799_vm5, %v12554_v54, %v4073_v18  ;;  %v4083_v38 = vrot.slane %v4082_v56, 4  ;;  %v4087_v11 = vrot.slane %v4085_v26, 5  ;;  %v3930_v8 = vld [vmem:[#allocation2 + $0xcc] sm:$0x1]  ;;  %v10751_v18 = vpop.f32.mrf.mxu0 }
 0x27e   : > { %v1937_v61 = vor.u32 %v10663_v16, %v10661_v3  ;;  %2098 = vst [vmem:[#allocation3 + $0x170] sm:$0xf] %v1761_v39  ;;  %v8842_v13 = vld [vmem:[#allocation3 + $0x43c] sm:$0xf]  ;;  %v1772_v30 = vshll.u32 %v1564_v24, 16  ;;  %v4099_v1 = vshll.u32 %v3930_v8, 16  ;;  %6595 = vmatpush.bf16.msra.mxu0 %v8907_v50 }
 0x27f   : > { %4462 = vst [vmem:[#allocation3 + $0xd4] sm:$0xf] %v4060_v58  ;;  %v4088_v22 = vsel %vm9799_vm5, %v4083_v38, %v4087_v11  ;;  %v8289_v26 = vld [vmem:[#allocation3 + $0x45c] sm:$0xf0]  ;;  %v3309_v46 = vld [vmem:[#allocation2 + $0x44] sm:$0x8] }
 0x280   : > { %12556 = vst [vmem:[#allocation33_spill] sm:$0xff] %v10751_v18  ;;  %v12557_v3 = vld [vmem:[#allocation20_spill] sm:$0xff]  ;;  %v12558_v16 = vld [vmem:[#allocation19_spill] sm:$0xff]  ;;  %v12561_v9 = vld [vmem:[#allocation22_spill] sm:$0xff]  ;;  %v1774_v57 = vrot.slane %v1772_v30, 5  ;;  %v4101_v27 = vrot.slane %v4099_v1, 5  ;;  %v3107_v1 = vor.u32 %v10724_v14, %v10720_v62 }
 0x281   : > { %4463 = vst [vmem:[#allocation3 + $0xf8] sm:$0xf] %v4074_v44  ;;  %v12559_v32 = vshll.u32 %v12558_v16, 16  ;;  %v12560_v42 = vld [vmem:[#allocation23_spill] sm:$0xff]  ;;  %v12562_v34 = vshll.u32 %v12561_v9, 16  ;;  %v10759_v39 = vrot.slane %v1937_v61, 4 }
 0x282   : > { %4464 = vst [vmem:[#allocation3 + $0x11c] sm:$0xf] %v4088_v22  ;;  %v3311_v36 = vld [vmem:[#allocation2 + $0x54] sm:$0x8]  ;;  %v12563_v5 = vshrl.u32 %v10681_v20, 16  ;;  %v3396_v54 = vshrl.u32 %v3309_v46, 16  ;;  %v8292_v46 = vor.u32 %v8842_v13, %v8289_v26 }
 0x283   : > { %v3406_v0 = vor.u32 %v12559_v32, %v12557_v3  ;;  %v3419_v56 = vor.u32 %v12562_v34, %v12560_v42  ;;  %v3409_v44 = vshrl.u32 %v3311_v36, 16  ;;  %v3313_v38 = vld [vmem:[#allocation2 + $0x64] sm:$0x8]  ;;  %v4274_v11 = vrot.slane %v4272_v45, 4  ;;  %v7945_v8 = vld [vmem:[#allocation3 + $0x19c] sm:$0xf0]  ;;  %v10775_v42 = vpop.f32.mrf.mxu1 }
 0x284   : > { %v10763_v58 = vrot.slane %v12563_v5, 7  ;;  %v4277_v24 = vrot.slane %v4275_v49, 5  ;;  %v12564_v3 = vld [vmem:[#allocation44_spill] sm:$0xff]  ;;  %v3932_v30 = vld [vmem:[#allocation2 + $0xdc] sm:$0x1]  ;;  %v12565_v22 = vld [vmem:[#allocation41_spill] sm:$0xff]  ;;  %6137 = vmatmul.bf16.gmra.mxu3 %v8292_v46 }
 0x285   : > { %v1775_v50 = vsel %vm9799_vm5, %v12564_v3, %v1774_v57  ;;  %v4102_v61 = vsel %vm9799_vm5, %v12565_v22, %v4101_v27  ;;  %v10773_v16 = vld [vmem:[#allocation2 + $0x218] sm:$0xf]  ;;  %v4113_v32 = vshll.u32 %v3932_v30, 16  ;;  %v7715_v45 = vrot.slane %v3396_v54, 11  ;;  %v8754_v49 = vld [vmem:[#allocation3 + $0x17c] sm:$0xf] }
 0x286   : > { %2099 = vst [vmem:[#allocation3 + $0x194] sm:$0xf] %v1775_v50  ;;  %v8758_v9 = vld [vmem:[#allocation3 + $0x198] sm:$0xf0]  ;;  %v7716_v34 = vrot.slane %v3409_v44, 11  ;;  %v3422_v57 = vshrl.u32 %v3313_v38, 16  ;;  %v7948_v22 = vor.u32 %v8754_v49, %v7945_v8  ;;  %v4278_v26 = vor.u32 %v4277_v24, %v4274_v11  ;;  %v10787_v8 = vpop.f32.mrf.mxu2 }
 0x287   : > { %12566 = vst [vmem:[#allocation36_spill] sm:$0xff] %v10775_v42  ;;  %v12567_v36 = vld [vmem:[#allocation27_spill] sm:$0xff]  ;;  %v12568_v5 = vld [vmem:[#allocation24_spill] sm:$0xff]  ;;  %v2757_v62 = vld [vmem:[#allocation2 + $0x11c] sm:$0x1]  ;;  %v3407_v13 = vsel %vm9792_vm4, %v7715_v45, %v3406_v0  ;;  %v4115_v49 = vrot.slane %v4113_v32, 5 }
 0x288   : > { %4465 = vst [vmem:[#allocation3 + $0x140] sm:$0xf] %v4102_v61  ;;  %v12569_v3 = vshll.u32 %v12568_v5, 16  ;;  %v2759_v14 = vld [vmem:[#allocation2 + $0x12c] sm:$0x1]  ;;  %v2998_v30 = vshll.u32 %v2757_v62, 16  ;;  %6443 = vmatmul.bf16.gmra.mxu2 %v7948_v22  ;;  %v3420_v0 = vsel %vm9792_vm4, %v7716_v34, %v3419_v56 }
 0x289   : > { %v1566_v15 = vld [vmem:[#allocation2 + $0xec] sm:$0x1]  ;;  %v7943_v54 = vld [vmem:[#allocation3 + $0x178] sm:$0xf]  ;;  %v8843_v50 = vld [vmem:[#allocation3 + $0x444] sm:$0xf] }
 0x28a   : > { %v3432_v27 = vor.u32 %v12569_v3, %v12567_v36  ;;  %v3012_v18 = vshll.u32 %v2759_v14, 16  ;;  %v1786_v61 = vshll.u32 %v1566_v15, 16  ;;  %v3315_v44 = vld [vmem:[#allocation2 + $0x74] sm:$0x8]  ;;  %v12570_v38 = vld [vmem:[#allocation32_spill] sm:$0xff]  ;;  %v10785_v36 = vrot.slane %v3107_v1, 4 }
 0x28b   : > { %v12571_v31 = vld [vmem:[#allocation28_spill] sm:$0xff]  ;;  %12573 = vst [vmem:[#allocation20_spill] sm:$0xff] %v10787_v8  ;;  %v1987_v11 = vshrl.u32 %v10773_v16, 16  ;;  %v3000_v24 = vrot.slane %v2998_v30, 5  ;;  %v7944_v1 = vor.u32 %v8758_v9, %v7943_v54  ;;  %v7717_v3 = vrot.slane %v3422_v57, 11  ;;  %v12575_v32 = vld [vmem:[#allocation63_spill] sm:$0xff] }
 0x28c   : > { %v12572_v2 = vshll.u32 %v12571_v31, 16  ;;  %v8297_v46 = vld [vmem:[#allocation3 + $0x464] sm:$0xf0]  ;;  %3819 = vst [vmem:[#allocation3 + $0x60] sm:$0xf] %v3407_v13  ;;  %v3014_v15 = vrot.slane %v3012_v18, 5 }
 0x28d   : > { %v1788_v45 = vrot.slane %v1786_v61, 5  ;;  %3820 = vst [vmem:[#allocation3 + $0x84] sm:$0xf] %v3420_v0  ;;  %v1990_v31 = vshll.u32 %v10773_v16, 16  ;;  %v3435_v62 = vshrl.u32 %v3315_v44, 16  ;;  %v10795_v22 = vrot.slane %v4278_v26, 4  ;;  %6354 = vmatmul.bf16.gmra.mxu1 %v7944_v1 }
 0x28e   : > { %v3445_v5 = vor.u32 %v12572_v2, %v12570_v38  ;;  %v10793_v2 = vpop.f32.mrf.mxu0  ;;  %v3001_v56 = vsel %vm9799_vm5, %v12575_v32, %v3000_v24  ;;  %v12576_v34 = vld [vmem:[#allocation68_spill] sm:$0xff]  ;;  %v12577_v18 = vld [vmem:[#allocation49_spill] sm:$0xff]  ;;  %v8300_v16 = vor.u32 %v8843_v50, %v8297_v46  ;;  %v3317_v54 = vld [vmem:[#allocation2 + $0x84] sm:$0x8]  ;;  %v3433_v61 = vsel %vm9792_vm4, %v7717_v3, %v3432_v27  ;;  %v10815_v46 = vpop.f32.mrf.mxu1 }
 0x28f   : > { %12574 = vst [vmem:[#allocation19_spill] sm:$0xff] %v10793_v2  ;;  %v3015_v14 = vsel %vm9799_vm5, %v12576_v34, %v3014_v15  ;;  %v1789_v13 = vsel %vm9799_vm5, %v12577_v18, %v1788_v45  ;;  %v12578_v9 = vld [vmem:[#allocation45_spill] sm:$0xff]  ;;  %v3934_v26 = vld [vmem:[#allocation2 + $0xec] sm:$0x1]  ;;  %v7718_v44 = vrot.slane %v3435_v62, 11  ;;  %v10811_v15 = vrot.slane %v1987_v11, 4 }
 0x290   : > { %3286 = vst [vmem:[#allocation3 + $0x20c] sm:$0xf] %v3001_v56  ;;  %v4116_v57 = vsel %vm9799_vm5, %v12578_v9, %v4115_v49  ;;  %v4127_v30 = vshll.u32 %v3934_v26, 16  ;;  %v3319_v38 = vld [vmem:[#allocation2 + $0x94] sm:$0x8]  ;;  %6315 = vmatmul.bf16.gmra.mxu0 %v8300_v16  ;;  %v12580_v32 = vld [vmem:[#allocation35_spill] sm:$0xff]  ;;  %v10827_v26 = vpop.f32.mrf.mxu2 }
 0x291   : > { %3287 = vst [vmem:[#allocation3 + $0x230] sm:$0xf] %v3015_v14  ;;  %v1568_v0 = vld [vmem:[#allocation2 + $0xfc] sm:$0x1]  ;;  %v3320_v24 = vld [vmem:[#allocation2 + $0x98] sm:$0xf]  ;;  %v3446_v1 = vsel %vm9792_vm4, %v7718_v44, %v3445_v5 }
 0x292   : > { %2100 = vst [vmem:[#allocation3 + $0x1b8] sm:$0xf] %v1789_v13  ;;  %v10813_v50 = vld [vmem:[#allocation2 + $0x218] sm:$0xf]  ;;  %v1800_v49 = vshll.u32 %v1568_v0, 16  ;;  %v4129_v45 = vrot.slane %v4127_v30, 5 }
 0x293   : > { %12579 = vst [vmem:[#allocation23_spill] sm:$0xff] %v10815_v46  ;;  %v12581_v27 = vld [vmem:[#allocation30_spill] sm:$0xff]  ;;  %v7755_v56 = vld [vmem:[#allocation3 + $0x8] sm:$0xf]  ;;  %v3448_v34 = vshrl.u32 %v3317_v54, 16  ;;  %v3461_v14 = vshrl.u32 %v3319_v38, 16 }
 0x294   : > { %4466 = vst [vmem:[#allocation3 + $0x164] sm:$0xf] %v4116_v57  ;;  %v12582_v3 = vshll.u32 %v12581_v27, 16  ;;  %v8712_v11 = vld [vmem:[#allocation3 + $0x28] sm:$0xf0]  ;;  %v1802_v18 = vrot.slane %v1800_v49, 5 }
 0x295   : > { %3821 = vst [vmem:[#allocation3 + $0xa8] sm:$0xf] %v3433_v61  ;;  %v12583_v13 = vld [vmem:[#allocation50_spill] sm:$0xff]  ;;  %v3466_v9 = vshrl.u32 %v3320_v24, 16  ;;  %v10825_v57 = vrot.slane %v1990_v31, 5  ;;  %v7719_v30 = vrot.slane %v3448_v34, 11 }
 0x296   : > { %v3458_v62 = vor.u32 %v12582_v3, %v12580_v32  ;;  %v4130_v16 = vsel %vm9799_vm5, %v12583_v13, %v4129_v45  ;;  %3822 = vst [vmem:[#allocation3 + $0xcc] sm:$0xf] %v3446_v1  ;;  %v7981_v5 = vld [vmem:[#allocation3 + $0x1e4] sm:$0xf0]  ;;  %v3936_v61 = vld [vmem:[#allocation2 + $0xfc] sm:$0x1]  ;;  %v10833_v45 = vpop.f32.mrf.mxu0  ;;  %v7756_v1 = vor.u32 %v8712_v11, %v7755_v56 }
 0x297   : > { %12584 = vst [vmem:[#allocation22_spill] sm:$0xff] %v10827_v26  ;;  %v12585_v44 = vld [vmem:[#allocation51_spill] sm:$0xff]  ;;  %v7720_v38 = vrot.slane %v3461_v14, 11  ;;  %v3468_v0 = vrot.slane %v3466_v9, 7  ;;  %v3469_v49 = vshll.u32 %v3320_v24, 16  ;;  %v4141_v31 = vshll.u32 %v3936_v61, 16 }
 0x298   : > { %4467 = vst [vmem:[#allocation3 + $0x188] sm:$0xf] %v4130_v16  ;;  %v1803_v54 = vsel %vm9799_vm5, %v12585_v44, %v1802_v18  ;;  %v3459_v27 = vsel %vm9792_vm4, %v7719_v30, %v3458_v62  ;;  %v8763_v3 = vld [vmem:[#allocation3 + $0x1c4] sm:$0xf]  ;;  %6151 = vmatmul.bf16.vlgmr.msrb.gmra.mxu3 %v7756_v1  ;;  %v8905_v16 = vld [vmem:[#allocation7 + $0x1b0] sm:$0xff]  ;;  %v12589_v1 = vld [vmem:[#allocation34_spill] sm:$0xff] }
 0x299   : > { %12586 = vst [vmem:[#allocation44_spill] sm:$0xff] %v10833_v45  ;;  %v3471_v34 = vor.u32 %v3469_v49, %v3468_v0  ;;  %v3321_v13 = vld [vmem:[#allocation2 + $0xc4] sm:$0x8]  ;;  %v7984_v18 = vor.u32 %v8763_v3, %v7981_v5  ;;  %v2761_v14 = vld [vmem:[#allocation2 + $0x15c] sm:$0x1]  ;;  %v4143_v24 = vrot.slane %v4141_v31, 5  ;;  %6500 = vmatpush.bf16.msra.mxu3 %v8905_v16  ;;  %v10847_v3 = vpop.f32.mrf.mxu1  ;;  %v1993_v16 = vor.u32 %v10825_v57, %v10811_v15 }
 0x29a   : > { %2101 = vst [vmem:[#allocation3 + $0x1dc] sm:$0xf] %v1803_v54  ;;  %v2763_v9 = vld [vmem:[#allocation2 + $0x16c] sm:$0x1]  ;;  %v8767_v44 = vld [vmem:[#allocation3 + $0x1e0] sm:$0xf0] }
 0x29b   : > { %3823 = vst [vmem:[#allocation3 + $0xf0] sm:$0xf] %v3459_v27  ;;  %v3026_v32 = vshll.u32 %v2761_v14, 16  ;;  %v3040_v46 = vshll.u32 %v2763_v9, 16  ;;  %v1570_v8 = vld [vmem:[#allocation2 + $0x10c] sm:$0x1]  ;;  %v3472_v56 = vsel %vm9792_vm4, %v7720_v38, %v3471_v34  ;;  %6448 = vmatmul.bf16.gmra.mxu2 %v7984_v18 }
 0x29c   : > { %v10839_v11 = vld [vmem:[#allocation2 + $0x218] sm:$0xf]  ;;  %v7773_v30 = vld [vmem:[#allocation3 + $0x3c] sm:$0xf0]  ;;  %v1814_v54 = vshll.u32 %v1570_v8, 16  ;;  %v3474_v0 = vshrl.u32 %v3321_v13, 16 }
 0x29d   : > { %v3963_v62 = vld [vmem:[#allocation2 + $0x218] sm:$0xf]  ;;  %v12590_v31 = vshll.u32 %v12589_v1, 16  ;;  %12591 = vst [vmem:[#allocation41_spill] sm:$0xff] %v10847_v3  ;;  %v7979_v14 = vld [vmem:[#allocation3 + $0x1c0] sm:$0xf] }
 0x29e   : > { %v12587_v61 = vld [vmem:[#allocation53_spill] sm:$0xff]  ;;  %v12588_v49 = vld [vmem:[#allocation38_spill] sm:$0xff]  ;;  %v3028_v38 = vrot.slane %v3026_v32, 5  ;;  %v3042_v34 = vrot.slane %v3040_v46, 5  ;;  %v2774_v9 = vld [vmem:[#allocation2 + $0x1c8] sm:$0xf]  ;;  %v7980_v18 = vor.u32 %v8767_v44, %v7979_v14  ;;  %v10858_v44 = vpop.f32.mrf.mxu2 }
 0x29f   : > { %v4144_v5 = vsel %vm9799_vm5, %v12587_v61, %v4143_v24  ;;  %v3484_v27 = vor.u32 %v12590_v31, %v12588_v49  ;;  %v1816_v45 = vrot.slane %v1814_v54, 5  ;;  %3824 = vst [vmem:[#allocation3 + $0x114] sm:$0xf] %v3472_v56  ;;  %v7721_v8 = vrot.slane %v3474_v0, 11  ;;  %v8710_v24 = vld [vmem:[#allocation3 + $0x1c] sm:$0xf] }
 0x2a0   : > { %4468 = vst [vmem:[#allocation3 + $0x1ac] sm:$0xf] %v4144_v5  ;;  %v3160_v13 = vshll.u32 %v10813_v50, 16  ;;  %v12592_v61 = vld [vmem:[#allocation75_spill] sm:$0xff]  ;;  %v4328_v32 = vshrl.u32 %v3963_v62, 16  ;;  %v4331_v5 = vshll.u32 %v3963_v62, 16  ;;  %6359 = vmatmul.bf16.gmra.mxu1 %v7980_v18  ;;  %v7776_v56 = vor.u32 %v8710_v24, %v7773_v30  ;;  %v10870_v18 = vpop.f32.mrf.mxu0 }
 0x2a1   : > { %v3029_v49 = vsel %vm9799_vm5, %v12592_v61, %v3028_v38  ;;  %v12593_v1 = vld [vmem:[#allocation79_spill] sm:$0xff]  ;;  %12594 = vst [vmem:[#allocation27_spill] sm:$0xff] %v10858_v44  ;;  %v8921_v54 = vld [vmem:[#allocation7 + $0x230] sm:$0xff]  ;;  %v3700_v0 = vshrl.u32 %v10839_v11, 16  ;;  %v3115_v31 = vshrl.u32 %v2774_v9, 16  ;;  %v3485_v38 = vsel %vm9792_vm4, %v7721_v8, %v3484_v27  ;;  %v12605_v35 = vld [vmem:[#allocation62_spill] sm:$0xff] }
 0x2a2   : > { %v3043_v46 = vsel %vm9799_vm5, %v12593_v1, %v3042_v34  ;;  %3288 = vst [vmem:[#allocation3 + $0x254] sm:$0xf] %v3029_v49  ;;  %v12595_v15 = vld [vmem:[#allocation57_spill] sm:$0xff]  ;;  %v12596_v34 = vld [vmem:[#allocation42_spill] sm:$0xff]  ;;  %v12597_v62 = vld [vmem:[#allocation39_spill] sm:$0xff]  ;;  %6596 = vmatmul.bf16.vlgmr.msra.gmra.mxu0 %v7776_v56  ;;  %6678 = vmatpush.bf16.msra.mxu1 %v8921_v54  ;;  %v12600_v49 = vshrl.u32 %v10813_v50, 16  ;;  %v10878_v54 = vpop.f32.mrf.mxu1 }
 0x2a3   : > { %v1817_v57 = vsel %vm9799_vm5, %v12595_v15, %v1816_v45  ;;  %3289 = vst [vmem:[#allocation3 + $0x278] sm:$0xf] %v3043_v46  ;;  %v3323_v14 = vld [vmem:[#allocation2 + $0xd4] sm:$0x8]  ;;  %v12598_v61 = vshll.u32 %v12597_v62, 16  ;;  %v3162_v15 = vrot.slane %v3160_v13, 5 }
 0x2a4   : > { %12599 = vst [vmem:[#allocation24_spill] sm:$0xff] %v10870_v18  ;;  %v1572_v24 = vld [vmem:[#allocation2 + $0x11c] sm:$0x1]  ;;  %v3487_v45 = vshrl.u32 %v3323_v14, 16  ;;  %v3159_v46 = vrot.slane %v12600_v49, 4  ;;  %v3118_v44 = vshll.u32 %v2774_v9, 16 }
 0x2a5   : > { %v3497_v1 = vor.u32 %v12598_v61, %v12596_v34  ;;  %2102 = vst [vmem:[#allocation3 + $0x200] sm:$0xf] %v1817_v57  ;;  %v1828_v2 = vshll.u32 %v1572_v24, 16  ;;  %v10874_v27 = vrot.slane %v1993_v16, 4  ;;  %v4330_v8 = vrot.slane %v4328_v32, 4  ;;  %v12603_v16 = vld [vmem:[#allocation43_spill] sm:$0xff] }
 0x2a6   : > { %3825 = vst [vmem:[#allocation3 + $0x138] sm:$0xf] %v3485_v38  ;;  %v4333_v34 = vrot.slane %v4331_v5, 5  ;;  %v10876_v62 = vld [vmem:[#allocation2 + $0x1c8] sm:$0xf]  ;;  %v7722_v61 = vrot.slane %v3487_v45, 11  ;;  %v3163_v52 = vor.u32 %v3162_v15, %v3159_v46 }
 0x2a7   : > { %v3117_v30 = vrot.slane %v3115_v31, 4  ;;  %v3957_v56 = vld [vmem:[#allocation2 + $0x1c8] sm:$0xf]  ;;  %12601 = vst [vmem:[#allocation32_spill] sm:$0xff] %v10878_v54  ;;  %v8721_v57 = vld [vmem:[#allocation3 + $0x70] sm:$0xf0] }
 0x2a8   : > { %v1830_v14 = vrot.slane %v1828_v2, 5  ;;  %v7791_v18 = vld [vmem:[#allocation3 + $0x50] sm:$0xf]  ;;  %v3864_v50 = vld [vmem:[#allocation2 + $0x138] sm:$0xf]  ;;  %v3498_v9 = vsel %vm9792_vm4, %v7722_v61, %v3497_v1  ;;  %v12604_v24 = vshll.u32 %v12603_v16, 16  ;;  %v4334_v6 = vor.u32 %v4333_v34, %v4330_v8 }
 0x2a9   : > { %v3325_v13 = vld [vmem:[#allocation2 + $0xe4] sm:$0x8]  ;;  %v12602_v38 = vld [vmem:[#allocation48_spill] sm:$0xff]  ;;  %v3120_v5 = vrot.slane %v3118_v44, 5  ;;  %3896 = vst [vmem:[#allocation3 + $0x238] sm:$0xf] %v3864_v50  ;;  %v7792_v51 = vor.u32 %v8721_v57, %v7791_v18 }
 0x2aa   : > { %v3510_v32 = vor.u32 %v12604_v24, %v12602_v38  ;;  %v8017_v49 = vld [vmem:[#allocation3 + $0x22c] sm:$0xf0]  ;;  %v1831_v31 = vsel %vm9799_vm5, %v12605_v35, %v1830_v14  ;;  %v3500_v45 = vshrl.u32 %v3325_v13, 16  ;;  %v10888_v2 = vrot.slane %v3700_v0, 7  ;;  %v1597_v59 = vld [vmem:[#allocation2 + $0x228] sm:$0xf]  ;;  %v10891_v24 = vpop.f32.mrf.mxu2  ;;  %v10900_v13 = vpop.f32.mrf.mxu0 }
 0x2ab   : > { %2103 = vst [vmem:[#allocation3 + $0x224] sm:$0xf] %v1831_v31  ;;  %v3661_v1 = vshrl.u32 %v10876_v62, 16  ;;  %v8772_v61 = vld [vmem:[#allocation3 + $0x20c] sm:$0xf]  ;;  %v4286_v44 = vshrl.u32 %v3957_v56, 16  ;;  %6156 = vmatmul.bf16.gmra.mxu3 %v7792_v51  ;;  %v3121_v46 = vor.u32 %v3120_v5, %v3117_v30  ;;  %v10902_v51 = vpop.f32.mrf.mxu1 }
 0x2ac   : > { %3826 = vst [vmem:[#allocation3 + $0x15c] sm:$0xf] %v3498_v9  ;;  %v7723_v38 = vrot.slane %v3500_v45, 11  ;;  %v4289_v16 = vshll.u32 %v3957_v56, 16  ;;  %v8020_v35 = vor.u32 %v8772_v61, %v8017_v49  ;;  %v2765_v14 = vld [vmem:[#allocation2 + $0x17c] sm:$0x1] }
 0x2ad   : > { %12606 = vst [vmem:[#allocation28_spill] sm:$0xff] %v10891_v24  ;;  %v2767_v50 = vld [vmem:[#allocation2 + $0x18c] sm:$0x1]  ;;  %v3054_v15 = vshll.u32 %v2765_v14, 16  ;;  %v10895_v34 = vrot.slane %v3163_v52, 4  ;;  %v10897_v57 = vrot.slane %v4334_v6, 4 }
 0x2ae   : > { %v8776_v0 = vld [vmem:[#allocation3 + $0x228] sm:$0xf0]  ;;  %v3068_v8 = vshll.u32 %v2767_v50, 16  ;;  %v3511_v18 = vsel %vm9792_vm4, %v7723_v38, %v3510_v32  ;;  %v2001_v56 = vshrl.u32 %v1597_v59, 16  ;;  %12607 = vst [vmem:[#allocation63_spill] sm:$0xff] %v10900_v13  ;;  %6453 = vmatmul.bf16.gmra.mxu2 %v8020_v35  ;;  %v10904_v45 = vrot.slane %v3661_v1, 7 }
 0x2af   : > { %3827 = vst [vmem:[#allocation3 + $0x180] sm:$0xf] %v3511_v18  ;;  %v8015_v30 = vld [vmem:[#allocation3 + $0x208] sm:$0xf]  ;;  %v3056_v49 = vrot.slane %v3054_v15, 5  ;;  %v4288_v32 = vrot.slane %v4286_v44, 4 }
 0x2b0   : > { %12608 = vst [vmem:[#allocation68_spill] sm:$0xff] %v10902_v51  ;;  %v7809_v5 = vld [vmem:[#allocation3 + $0x84] sm:$0xf0]  ;;  %v3070_v31 = vrot.slane %v3068_v8, 5  ;;  %v4291_v52 = vrot.slane %v4289_v16, 5  ;;  %v8016_v61 = vor.u32 %v8776_v0, %v8015_v30  ;;  %v10906_v38 = vrot.slane %v3121_v46, 4 }
 0x2b1   : > { %v1573_v6 = vld [vmem:[#allocation2 + $0x148] sm:$0xf]  ;;  %v2004_v14 = vshll.u32 %v1597_v59, 16  ;;  %v8719_v50 = vld [vmem:[#allocation3 + $0x64] sm:$0xf]  ;;  %v12609_v9 = vld [vmem:[#allocation86_spill] sm:$0xff] }
 0x2b2   : > { %v3057_v35 = vsel %vm9799_vm5, %v12609_v9, %v3056_v49  ;;  %v12610_v18 = vld [vmem:[#allocation96_spill] sm:$0xff]  ;;  %6364 = vmatmul.bf16.gmra.mxu1 %v8016_v61  ;;  %v7812_v15 = vor.u32 %v8719_v50, %v7809_v5  ;;  %v1833_v1 = vshrl.u32 %v1573_v6, 16  ;;  %v1836_v44 = vshll.u32 %v1573_v6, 16  ;;  %v1576_v41 = vld [vmem:[#allocation2 + $0x15c] sm:$0x1] }
 0x2b3   : > { %v3071_v13 = vsel %vm9799_vm5, %v12610_v18, %v3070_v31  ;;  %3290 = vst [vmem:[#allocation3 + $0x29c] sm:$0xf] %v3057_v35  ;;  %v3938_v16 = vld [vmem:[#allocation2 + $0x10c] sm:$0x1]  ;;  %v10914_v0 = vrot.slane %v2001_v56, 4  ;;  %v4292_v8 = vor.u32 %v4291_v52, %v4288_v32  ;;  %v10916_v4 = vrot.slane %v2004_v14, 5  ;;  %v10918_v18 = vpop.f32.mrf.mxu2 }
 0x2b4   : > { %v2782_v46 = vld [vmem:[#allocation2 + $0x228] sm:$0xf]  ;;  %3291 = vst [vmem:[#allocation3 + $0x2c0] sm:$0xf] %v3071_v13  ;;  %v4155_v59 = vshll.u32 %v3938_v16, 16  ;;  %6601 = vmatmul.bf16.gmra.mxu0 %v7812_v15  ;;  %v1835_v9 = vrot.slane %v1833_v1, 4  ;;  %v10925_v1 = vpop.f32.mrf.mxu1 }
 0x2b5   : > { %v1574_v30 = vld [vmem:[#allocation2 + $0x14c] sm:$0x1]  ;;  %v1838_v49 = vrot.slane %v1836_v44, 5  ;;  %v1856_v61 = vshll.u32 %v1576_v41, 16  ;;  %v3327_v50 = vld [vmem:[#allocation2 + $0xf4] sm:$0x8] }
 0x2b6   : > { %v1842_v31 = vshll.u32 %v1574_v30, 16  ;;  %v4157_v5 = vrot.slane %v4155_v59, 5  ;;  %v3171_v35 = vshrl.u32 %v2782_v46, 16  ;;  %v3174_v6 = vshll.u32 %v2782_v46, 16  ;;  %12611 = vst [vmem:[#allocation49_spill] sm:$0xff] %v10918_v18  ;;  %v12612_v13 = vld [vmem:[#allocation52_spill] sm:$0xff]  ;;  %v10930_v46 = vpop.f32.mrf.mxu0 }
 0x2b7   : > { %v1839_v56 = vor.u32 %v1838_v49, %v1835_v9  ;;  %v3513_v23 = vshrl.u32 %v3327_v50, 16  ;;  %v12613_v16 = vld [vmem:[#allocation46_spill] sm:$0xff]  ;;  %v10923_v15 = vld [vmem:[#allocation2 + $0x228] sm:$0xf]  ;;  %12616 = vst [vmem:[#allocation35_spill] sm:$0xff] %v10925_v1  ;;  %v1858_v30 = vrot.slane %v1856_v61, 5 }
 0x2b8   : > { %v12614_v32 = vshll.u32 %v12613_v16, 16  ;;  %12615 = vst [vmem:[#allocation45_spill] sm:$0xff] %v10923_v15  ;;  %v8730_v14 = vld [vmem:[#allocation3 + $0xb8] sm:$0xf0]  ;;  %v1844_v44 = vrot.slane %v1842_v31, 5  ;;  %v12617_v41 = vld [vmem:[#allocation61_spill] sm:$0xff] }
 0x2b9   : > { %v4158_v59 = vsel %vm9799_vm5, %v12617_v41, %v4157_v5  ;;  %12618 = vst [vmem:[#allocation30_spill] sm:$0xff] %v10930_v46  ;;  %v1840_v18 = vrot.slane %v1839_v56, 4  ;;  %v7724_v9 = vrot.slane %v3513_v23, 11  ;;  %v3329_v49 = vld [vmem:[#allocation2 + $0x104] sm:$0x8]  ;;  %v12619_v50 = vld [vmem:[#allocation58_spill] sm:$0xff] }
 0x2ba   : > { %v3523_v52 = vor.u32 %v12614_v32, %v12612_v13  ;;  %4469 = vst [vmem:[#allocation3 + $0x1d0] sm:$0xf] %v4158_v59  ;;  %v12620_v16 = vld [vmem:[#allocation54_spill] sm:$0xff]  ;;  %v10935_v51 = vrot.slane %v4292_v8, 4  ;;  %v12622_v31 = vld [vmem:[#allocation71_spill] sm:$0xff]  ;;  %v3526_v3 = vshrl.u32 %v3329_v49, 16 }
 0x2bb   : > { %v12621_v13 = vshll.u32 %v12620_v16, 16  ;;  %v7827_v1 = vld [vmem:[#allocation3 + $0x98] sm:$0xf]  ;;  %v1859_v61 = vsel %vm9799_vm5, %v12622_v31, %v1858_v30  ;;  %v10940_v5 = vrot.slane %v3171_v35, 4  ;;  %v3713_v56 = vshrl.u32 %v10923_v15, 16  ;;  %v8904_v46 = vld [vmem:[#allocation7 + $0x1a8] sm:$0xff] }
 0x2bc   : > { %v8053_v54 = vld [vmem:[#allocation3 + $0x274] sm:$0xf0]  ;;  %v7828_v41 = vor.u32 %v8730_v14, %v7827_v1  ;;  %v1845_v23 = vsel %vm9799_vm5, %v1840_v18, %v1844_v44  ;;  %2105 = vst [vmem:[#allocation3 + $0x26c] sm:$0xf] %v1859_v61  ;;  %v3940_v59 = vld [vmem:[#allocation2 + $0x11c] sm:$0x1]  ;;  %v3524_v30 = vsel %vm9792_vm4, %v7724_v9, %v3523_v52  ;;  %6501 = vmatpush.bf16.msra.mxu3 %v8904_v46  ;;  %v10956_v52 = vpop.f32.mrf.mxu1 }
 0x2bd   : > { %v3536_v32 = vor.u32 %v12621_v13, %v12619_v50  ;;  %v10945_v50 = vld [vmem:[#allocation2 + $0x228] sm:$0xf]  ;;  %v8781_v8 = vld [vmem:[#allocation3 + $0x254] sm:$0xf]  ;;  %2104 = vst [vmem:[#allocation3 + $0x248] sm:$0xf] %v1845_v23  ;;  %v2007_v23 = vor.u32 %v10916_v4, %v10914_v0 }
 0x2be   : > { %v8785_v16 = vld [vmem:[#allocation3 + $0x270] sm:$0xf0]  ;;  %v4169_v13 = vshll.u32 %v3940_v59, 16  ;;  %v7725_v49 = vrot.slane %v3526_v3, 11  ;;  %v3176_v35 = vrot.slane %v3174_v6, 5  ;;  %6161 = vmatmul.bf16.gmra.mxu3 %v7828_v41  ;;  %v8056_v31 = vor.u32 %v8781_v8, %v8053_v54  ;;  %v10954_v54 = vpop.f32.mrf.mxu3  ;;  %12623 = vst [vmem:[#allocation50_spill] sm:$0xff] %v10956_v52 }
 0x2bf   : > { %v2769_v1 = vld [vmem:[#allocation2 + $0x19c] sm:$0x1]  ;;  %v2771_v14 = vld [vmem:[#allocation2 + $0x1ac] sm:$0x1]  ;;  %v7845_v3 = vld [vmem:[#allocation3 + $0xcc] sm:$0xf0] }
 0x2c0   : > { %v3082_v24 = vshll.u32 %v2769_v1, 16  ;;  %v3096_v18 = vshll.u32 %v2771_v14, 16  ;;  %v1578_v44 = vld [vmem:[#allocation2 + $0x16c] sm:$0x1]  ;;  %v4171_v61 = vrot.slane %v4169_v13, 5  ;;  %v3537_v42 = vsel %vm9792_vm4, %v7725_v49, %v3536_v32  ;;  %6458 = vmatmul.bf16.gmra.mxu2 %v8056_v31  ;;  %v12624_v13 = vld [vmem:[#allocation65_spill] sm:$0xff]  ;;  %v10962_v49 = vpop.f32.mrf.mxu2 }
 0x2c1   : > { %v1870_v6 = vshll.u32 %v1578_v44, 16  ;;  %3828 = vst [vmem:[#allocation3 + $0x1a4] sm:$0xf] %v3524_v30  ;;  %v8051_v9 = vld [vmem:[#allocation3 + $0x250] sm:$0xf]  ;;  %v4342_v4 = vshrl.u32 %v10945_v50, 16  ;;  %v3177_v30 = vor.u32 %v3176_v35, %v10940_v5 }
 0x2c2   : > { %v3084_v41 = vrot.slane %v3082_v24, 5  ;;  %v3098_v8 = vrot.slane %v3096_v18, 5  ;;  %v4172_v32 = vsel %vm9799_vm5, %v12624_v13, %v4171_v61  ;;  %3829 = vst [vmem:[#allocation3 + $0x1c8] sm:$0xf] %v3537_v42  ;;  %v1591_v0 = vld [vmem:[#allocation2 + $0x1f8] sm:$0xf]  ;;  %v8052_v46 = vor.u32 %v8785_v16, %v8051_v9  ;;  %v10976_v16 = vpop.f32.mrf.mxu0 }
 0x2c3   : > { %12625 = vst [vmem:[#allocation51_spill] sm:$0xff] %v10962_v49  ;;  %v1872_v31 = vrot.slane %v1870_v6, 5  ;;  %v4345_v1 = vshll.u32 %v10945_v50, 16  ;;  %v2776_v14 = vld [vmem:[#allocation2 + $0x1f8] sm:$0xf]  ;;  %v10972_v44 = vrot.slane %v2007_v23, 4 }
 0x2c4   : > { %4470 = vst [vmem:[#allocation3 + $0x1f4] sm:$0xf] %v4172_v32  ;;  %v8728_v24 = vld [vmem:[#allocation3 + $0xac] sm:$0xf]  ;;  %v3085_v18 = vsel %vm9799_vm5, %v10369_v25, %v3084_v41  ;;  %v3099_v42 = vsel %vm9799_vm5, %v10633_v19, %v3098_v8  ;;  %v10974_v61 = vrot.slane %v3713_v56, 7  ;;  %6369 = vmatmul.bf16.gmra.mxu1 %v8052_v46  ;;  %v1959_v9 = vshrl.u32 %v1591_v0, 16 }
 0x2c5   : > { %12626 = vst [vmem:[#allocation53_spill] sm:$0xff] %v10976_v16  ;;  %v7848_v5 = vor.u32 %v8728_v24, %v7845_v3  ;;  %v8920_v50 = vld [vmem:[#allocation7 + $0x228] sm:$0xff]  ;;  %v1962_v25 = vshll.u32 %v1591_v0, 16  ;;  %v3331_v41 = vld [vmem:[#allocation2 + $0x114] sm:$0x8]  ;;  %v3129_v56 = vshrl.u32 %v2776_v14, 16 }
 0x2c6   : > { %3292 = vst [vmem:[#allocation3 + $0x2e4] sm:$0xf] %v3085_v18  ;;  %v12627_v35 = vld [vmem:[#allocation76_spill] sm:$0xff]  ;;  %6679 = vmatpush.bf16.msra.mxu1 %v8920_v50  ;;  %v1580_v32 = vld [vmem:[#allocation2 + $0x17c] sm:$0x1]  ;;  %v3539_v3 = vshrl.u32 %v3331_v41, 16 }
 0x2c7   : > { %v1873_v6 = vsel %vm9799_vm5, %v12627_v35, %v1872_v31  ;;  %3293 = vst [vmem:[#allocation3 + $0x308] sm:$0xf] %v3099_v42  ;;  %v12628_v13 = vld [vmem:[#allocation64_spill] sm:$0xff]  ;;  %6606 = vmatmul.bf16.gmra.mxu0 %v7848_v5  ;;  %v10984_v46 = vrot.slane %v3177_v30, 4  ;;  %v10986_v24 = vrot.slane %v4342_v4, 4  ;;  %v10988_v18 = vrot.slane %v4345_v1, 5  ;;  %v10996_v5 = vpop.f32.mrf.mxu1 }
 0x2c8   : > { %v12629_v19 = vld [vmem:[#allocation56_spill] sm:$0xff]  ;;  %2106 = vst [vmem:[#allocation3 + $0x290] sm:$0xf] %v1873_v6  ;;  %v1884_v31 = vshll.u32 %v1580_v32, 16  ;;  %v3132_v0 = vshll.u32 %v2776_v14, 16  ;;  %v7726_v59 = vrot.slane %v3539_v3, 11 }
 0x2c9   : > { %v12630_v23 = vshll.u32 %v12629_v19, 16  ;;  %v10990_v42 = vld [vmem:[#allocation2 + $0x208] sm:$0xf]  ;;  %v3943_v35 = vld [vmem:[#allocation2 + $0x138] sm:$0xf]  ;;  %v10992_v19 = vrot.slane %v1959_v9, 4 }
 0x2ca   : > { %12631 = vst [vmem:[#allocation38_spill] sm:$0xff] %v10996_v5  ;;  %v8739_v50 = vld [vmem:[#allocation3 + $0x100] sm:$0xf0]  ;;  %v1886_v6 = vrot.slane %v1884_v31, 5  ;;  %v4188_v30 = vshrl.u32 %v3943_v35, 16  ;;  %v4191_v41 = vshll.u32 %v3943_v35, 16  ;;  %v11010_v35 = vpop.f32.mrf.mxu2 }
 0x2cb   : > { %v3549_v8 = vor.u32 %v12630_v23, %v12628_v13  ;;  %v10994_v13 = vpop.f32.mrf.mxu3  ;;  %v10998_v4 = vrot.slane %v1962_v25, 5  ;;  %v11000_v1 = vrot.slane %v3129_v56, 4  ;;  %v7863_v23 = vld [vmem:[#allocation3 + $0xe0] sm:$0xf]  ;;  %v3333_v32 = vld [vmem:[#allocation2 + $0x124] sm:$0x8] }
 0x2cc   : > { %v8089_v3 = vld [vmem:[#allocation3 + $0x2bc] sm:$0xf0]  ;;  %v12632_v9 = vld [vmem:[#allocation85_spill] sm:$0xff]  ;;  %v4190_v52 = vrot.slane %v4188_v30, 4  ;;  %v4193_v5 = vrot.slane %v4191_v41, 5  ;;  %v11007_v31 = vrot.slane %v3132_v0, 5  ;;  %v7864_v56 = vor.u32 %v8739_v50, %v7863_v23 }
 0x2cd   : > { %v3550_v14 = vsel %vm9792_vm4, %v7726_v59, %v3549_v8  ;;  %v1887_v16 = vsel %vm9799_vm5, %v12632_v9, %v1886_v6  ;;  %v3143_v25 = vshrl.u32 %v10990_v42, 16  ;;  %12633 = vst [vmem:[#allocation34_spill] sm:$0xff] %v11010_v35  ;;  %v3942_v49 = vld [vmem:[#allocation2 + $0x12c] sm:$0x1]  ;;  %v11012_v26 = vld [vmem:[#allocation2 + $0x238] sm:$0xf]  ;;  %v4348_v9 = vor.u32 %v10988_v18, %v10986_v24  ;;  %v11021_v35 = vpop.f32.mrf.mxu0 }
 0x2ce   : > { %3830 = vst [vmem:[#allocation3 + $0x1ec] sm:$0xf] %v3550_v14  ;;  %v8790_v59 = vld [vmem:[#allocation3 + $0x29c] sm:$0xf]  ;;  %v4183_v37 = vshll.u32 %v3942_v49, 16  ;;  %v4194_v29 = vor.u32 %v4193_v5, %v4190_v52  ;;  %v3552_v6 = vshrl.u32 %v3333_v32, 16  ;;  %6166 = vmatmul.bf16.gmra.mxu3 %v7864_v56 }
 0x2cf   : > { %2107 = vst [vmem:[#allocation3 + $0x2b4] sm:$0xf] %v1887_v16  ;;  %v8794_v8 = vld [vmem:[#allocation3 + $0x2b8] sm:$0xf0]  ;;  %v12634_v30 = vld [vmem:[#allocation67_spill] sm:$0xff]  ;;  %v12635_v41 = vld [vmem:[#allocation60_spill] sm:$0xff]  ;;  %v8092_v16 = vor.u32 %v8790_v59, %v8089_v3  ;;  %v11026_v3 = vpop.f32.mrf.mxu1 }
 0x2d0   : > { %v3944_v63 = vld [vmem:[#allocation2 + $0x13c] sm:$0x1]  ;;  %v12636_v14 = vshll.u32 %v12635_v41, 16  ;;  %12637 = vst [vmem:[#allocation75_spill] sm:$0xff] %v11021_v35  ;;  %v2775_v23 = vld [vmem:[#allocation2 + $0x1cc] sm:$0x1] }
 0x2d1   : > { %v2773_v50 = vld [vmem:[#allocation2 + $0x1bc] sm:$0x1]  ;;  %v1582_v53 = vld [vmem:[#allocation2 + $0x18c] sm:$0x1]  ;;  %v8737_v47 = vld [vmem:[#allocation3 + $0xf4] sm:$0xf]  ;;  %6463 = vmatmul.bf16.gmra.mxu2 %v8092_v16 }
 0x2d2   : > { %v11017_v0 = vor.u32 %v12636_v14, %v12634_v30  ;;  %v7881_v40 = vld [vmem:[#allocation3 + $0x114] sm:$0xf0]  ;;  %v3110_v49 = vshll.u32 %v2773_v50, 16  ;;  %v3124_v52 = vshll.u32 %v2775_v23, 16  ;;  %v1898_v5 = vshll.u32 %v1582_v53, 16  ;;  %12638 = vst [vmem:[#allocation79_spill] sm:$0xff] %v11026_v3 }
 0x2d3   : > { %v4185_v32 = vrot.slane %v4183_v37, 5  ;;  %v3335_v55 = vld [vmem:[#allocation2 + $0x134] sm:$0x8]  ;;  %v3146_v30 = vshll.u32 %v10990_v42, 16  ;;  %v8087_v41 = vld [vmem:[#allocation3 + $0x298] sm:$0xf]  ;;  %v11024_v35 = vpop.f32.mrf.mxu3 }
 0x2d4   : > { %v4195_v14 = vrot.slane %v4194_v29, 4  ;;  %v4197_v24 = vshll.u32 %v3944_v63, 16  ;;  %v7727_v18 = vrot.slane %v3552_v6, 11  ;;  %v3112_v56 = vrot.slane %v3110_v49, 5  ;;  %v3336_v37 = vld [vmem:[#allocation2 + $0x138] sm:$0xf] }
 0x2d5   : > { %v3126_v59 = vrot.slane %v3124_v52, 5  ;;  %v1900_v7 = vrot.slane %v1898_v5, 5  ;;  %v4186_v53 = vsel %vm9799_vm5, %v12639_v33, %v4185_v32  ;;  %v2015_v50 = vshrl.u32 %v11012_v26, 16  ;;  %v12640_v49 = vld [vmem:[#allocation90_spill] sm:$0xff] }
 0x2d6   : > { %v8088_v42 = vor.u32 %v8794_v8, %v8087_v41  ;;  %v4199_v16 = vrot.slane %v4197_v24, 5  ;;  %4471 = vst [vmem:[#allocation3 + $0x218] sm:$0xf] %v4186_v53  ;;  %v3565_v29 = vshrl.u32 %v3335_v55, 16  ;;  %v2018_v63 = vshll.u32 %v11012_v26, 16 }
 0x2d7   : > { %v3113_v6 = vsel %vm9799_vm5, %v10785_v36, %v3112_v56  ;;  %v3127_v23 = vsel %vm9799_vm5, %v10906_v38, %v3126_v59  ;;  %v1901_v33 = vsel %vm9799_vm5, %v12640_v49, %v1900_v7  ;;  %v1965_v8 = vor.u32 %v10998_v4, %v10992_v19  ;;  %v2784_v52 = vld [vmem:[#allocation2 + $0x238] sm:$0xf]  ;;  %v11053_v4 = vpop.f32.mrf.mxu2  ;;  %v3337_v49 = vld [vmem:[#allocation2 + $0x164] sm:$0x8] }
 0x2d8   : > { %v3145_v5 = vrot.slane %v3143_v25, 4  ;;  %6374 = vmatmul.bf16.gmra.mxu1 %v8088_v42  ;;  %v7884_v55 = vor.u32 %v8737_v47, %v7881_v40  ;;  %3294 = vst [vmem:[#allocation3 + $0x32c] sm:$0xf] %v3113_v6  ;;  %v3570_v26 = vshrl.u32 %v3336_v37, 16  ;;  %v11044_v32 = vld [vmem:[#allocation2 + $0x238] sm:$0xf]  ;;  %v4200_v38 = vsel %vm9799_vm5, %v4195_v14, %v4199_v16  ;;  %v11064_v42 = vpop.f32.mrf.mxu1 }
 0x2d9   : > { %12641 = vst [vmem:[#allocation57_spill] sm:$0xff] %v11044_v32  ;;  %v3148_v36 = vrot.slane %v3146_v30, 5  ;;  %v3563_v7 = vsel %vm9792_vm4, %v7727_v18, %v11017_v0  ;;  %v3573_v41 = vshll.u32 %v3336_v37, 16  ;;  %v3135_v19 = vor.u32 %v11007_v31, %v11000_v1  ;;  %v1584_v47 = vld [vmem:[#allocation2 + $0x19c] sm:$0x1]  ;;  %v11058_v18 = vpop.f32.mrf.mxu0  ;;  %v8903_v6 = vld [vmem:[#allocation7 + $0x1a0] sm:$0xff] }
 0x2da   : > { %3295 = vst [vmem:[#allocation3 + $0x350] sm:$0xf] %v3127_v23  ;;  %6611 = vmatmul.bf16.gmra.mxu0 %v7884_v55  ;;  %v7728_v40 = vrot.slane %v3565_v29, 11  ;;  %v3572_v25 = vrot.slane %v3570_v26, 7  ;;  %v11055_v30 = vrot.slane %v4348_v9, 4  ;;  %v2017_v24 = vrot.slane %v2015_v50, 4  ;;  %6502 = vmatpush.bf16.msra.mxu3 %v8903_v6 }
 0x2db   : > { %12642 = vst [vmem:[#allocation42_spill] sm:$0xff] %v11053_v4  ;;  %v3185_v56 = vshrl.u32 %v2784_v52, 16  ;;  %v1912_v14 = vshll.u32 %v1584_v47, 16  ;;  %v2020_v59 = vrot.slane %v2018_v63, 5  ;;  %v3188_v53 = vshll.u32 %v2784_v52, 16  ;;  %v11062_v37 = vpop.f32.mrf.mxu3  ;;  %v12646_v52 = vld [vmem:[#allocation72_spill] sm:$0xff] }
 0x2dc   : > { %2108 = vst [vmem:[#allocation3 + $0x2d8] sm:$0xf] %v1901_v33  ;;  %v3726_v0 = vshrl.u32 %v11044_v32, 16  ;;  %v3575_v1 = vor.u32 %v3573_v41, %v3572_v25  ;;  %v11060_v31 = vrot.slane %v1965_v8, 4  ;;  %v7899_v9 = vld [vmem:[#allocation3 + $0x128] sm:$0xf]  ;;  %v3149_v63 = vor.u32 %v3148_v36, %v3145_v5 }
 0x2dd   : > { %4472 = vst [vmem:[#allocation3 + $0x23c] sm:$0xf] %v4200_v38  ;;  %v8748_v16 = vld [vmem:[#allocation3 + $0x148] sm:$0xf0]  ;;  %v1914_v50 = vrot.slane %v1912_v14, 5  ;;  %v3136_v29 = vrot.slane %v3135_v19, 4  ;;  %v2021_v5 = vor.u32 %v2020_v59, %v2017_v24 }
 0x2de   : > { %12643 = vst [vmem:[#allocation39_spill] sm:$0xff] %v11058_v18  ;;  %v3576_v23 = vsel %vm9792_vm4, %v7728_v40, %v3575_v1  ;;  %v12645_v33 = vld [vmem:[#allocation77_spill] sm:$0xff]  ;;  %v12647_v55 = vshll.u32 %v12646_v52, 16  ;;  %v11072_v26 = vrot.slane %v3185_v56, 4  ;;  %v3578_v19 = vshrl.u32 %v3337_v49, 16 }
 0x2df   : > { %3831 = vst [vmem:[#allocation3 + $0x210] sm:$0xf] %v3563_v7  ;;  %v11074_v38 = vld [vmem:[#allocation2 + $0x238] sm:$0xf]  ;;  %v8125_v7 = vld [vmem:[#allocation3 + $0x304] sm:$0xf0]  ;;  %v1915_v41 = vsel %vm9799_vm5, %v10361_v28, %v1914_v50  ;;  %v7900_v40 = vor.u32 %v8748_v16, %v7899_v9  ;;  %v11090_v49 = vpop.f32.mrf.mxu2 }
 0x2e0   : > { %12644 = vst [vmem:[#allocation48_spill] sm:$0xff] %v11064_v42  ;;  %v3588_v8 = vor.u32 %v12647_v55, %v12645_v33  ;;  %v11079_v36 = vrot.slane %v3188_v53, 5  ;;  %v11081_v47 = vrot.slane %v3726_v0, 7  ;;  %v3946_v25 = vld [vmem:[#allocation2 + $0x16c] sm:$0x1]  ;;  %v7729_v33 = vrot.slane %v3578_v19, 11  ;;  %v11094_v19 = vpop.f32.mrf.mxu1 }
 0x2e1   : > { %3832 = vst [vmem:[#allocation3 + $0x234] sm:$0xf] %v3576_v23  ;;  %v11083_v14 = vld [vmem:[#allocation2 + $0x208] sm:$0xf]  ;;  %v8799_v56 = vld [vmem:[#allocation3 + $0x2e4] sm:$0xf]  ;;  %6171 = vmatmul.bf16.gmra.mxu3 %v7900_v40 }
 0x2e2   : > { %12648 = vst [vmem:[#allocation43_spill] sm:$0xff] %v11081_v47  ;;  %v4211_v1 = vshll.u32 %v3946_v25, 16  ;;  %v3150_v52 = vrot.slane %v3149_v63, 4  ;;  %v8128_v55 = vor.u32 %v8799_v56, %v8125_v7  ;;  %v2777_v28 = vld [vmem:[#allocation2 + $0x1fc] sm:$0x1]  ;;  %v3589_v0 = vsel %vm9792_vm4, %v7729_v33, %v3588_v8  ;;  %v11098_v33 = vpop.f32.mrf.mxu0 }
 0x2e3   : > { %2109 = vst [vmem:[#allocation3 + $0x2fc] sm:$0xf] %v1915_v41  ;;  %v2779_v50 = vld [vmem:[#allocation2 + $0x20c] sm:$0x1]  ;;  %v8803_v23 = vld [vmem:[#allocation3 + $0x300] sm:$0xf0]  ;;  %v11092_v41 = vpop.f32.mrf.mxu3  ;;  %v3191_v6 = vor.u32 %v11079_v36, %v11072_v26 }
 0x2e4   : > { %v3138_v24 = vshll.u32 %v2777_v28, 16  ;;  %v3152_v59 = vshll.u32 %v2779_v50, 16  ;;  %v1586_v53 = vld [vmem:[#allocation2 + $0x1ac] sm:$0x1]  ;;  %v11087_v9 = vrot.slane %v2021_v5, 4  ;;  %v4356_v16 = vshrl.u32 %v11074_v38, 16  ;;  %6468 = vmatmul.bf16.gmra.mxu2 %v8128_v55 }
 0x2e5   : > { %12649 = vst [vmem:[#allocation62_spill] sm:$0xff] %v11090_v49  ;;  %v1926_v63 = vshll.u32 %v1586_v53, 16  ;;  %v4213_v7 = vrot.slane %v4211_v1, 5  ;;  %v8123_v40 = vld [vmem:[#allocation3 + $0x2e0] sm:$0xf]  ;;  %v4359_v8 = vshll.u32 %v11074_v38, 16 }
 0x2e6   : > { %3833 = vst [vmem:[#allocation3 + $0x258] sm:$0xf] %v3589_v0  ;;  %v7917_v25 = vld [vmem:[#allocation3 + $0x15c] sm:$0xf0]  ;;  %v3140_v56 = vrot.slane %v3138_v24, 5  ;;  %v3154_v28 = vrot.slane %v3152_v59, 5  ;;  %v8124_v50 = vor.u32 %v8803_v23, %v8123_v40 }
 0x2e7   : > { %12650 = vst [vmem:[#allocation86_spill] sm:$0xff] %v11094_v19  ;;  %v1973_v5 = vshrl.u32 %v11083_v14, 16  ;;  %v1928_v55 = vrot.slane %v1926_v63, 5  ;;  %v11102_v1 = vld [vmem:[#allocation2 + $0x208] sm:$0xf]  ;;  %v1976_v59 = vshll.u32 %v11083_v14, 16 }
 0x2e8   : > { %12651 = vst [vmem:[#allocation96_spill] sm:$0xff] %v11098_v33  ;;  %v11104_v53 = vld [vmem:[#allocation2 + $0x208] sm:$0xf]  ;;  %v8746_v0 = vld [vmem:[#allocation3 + $0x13c] sm:$0xf]  ;;  %v3141_v24 = vsel %vm9799_vm5, %v3136_v29, %v3140_v56  ;;  %v3155_v38 = vsel %vm9799_vm5, %v3150_v52, %v3154_v28  ;;  %6379 = vmatmul.bf16.gmra.mxu1 %v8124_v50  ;;  %v8919_v63 = vld [vmem:[#allocation7 + $0x220] sm:$0xff] }
 0x2e9   : > { %v2786_v18 = vld [vmem:[#allocation2 + $0x248] sm:$0xf]  ;;  %v7920_v23 = vor.u32 %v8746_v0, %v7917_v25  ;;  %3296 = vst [vmem:[#allocation3 + $0x374] sm:$0xf] %v3141_v24  ;;  %v3948_v40 = vld [vmem:[#allocation2 + $0x17c] sm:$0x1]  ;;  %v1929_v29 = vsel %vm9799_vm5, %v10545_v21, %v1928_v55  ;;  %6680 = vmatpush.bf16.msra.mxu1 %v8919_v63 }
 0x2ea   : > { %v12652_v26 = vld [vmem:[#allocation82_spill] sm:$0xff]  ;;  %v11114_v33 = vrot.slane %v4356_v16, 4  ;;  %3297 = vst [vmem:[#allocation3 + $0x398] sm:$0xf] %v3155_v38  ;;  %v4225_v52 = vshll.u32 %v3948_v40, 16  ;;  %v12653_v14 = vld [vmem:[#allocation87_spill] sm:$0xff] }
 0x2eb   : > { %v4214_v36 = vsel %vm9799_vm5, %v12652_v26, %v4213_v7  ;;  %v3339_v56 = vld [vmem:[#allocation2 + $0x174] sm:$0x8]  ;;  %v11122_v0 = vrot.slane %v4359_v8, 5  ;;  %6616 = vmatmul.bf16.gmra.mxu0 %v7920_v23  ;;  %v1588_v24 = vld [vmem:[#allocation2 + $0x1bc] sm:$0x1]  ;;  %v11124_v16 = vrot.slane %v3191_v6, 4  ;;  %v11136_v6 = vpop.f32.mrf.mxu1 }
 0x2ec   : > { %v12654_v28 = vld [vmem:[#allocation81_spill] sm:$0xff]  ;;  %2110 = vst [vmem:[#allocation3 + $0x320] sm:$0xf] %v1929_v29  ;;  %v3591_v7 = vshrl.u32 %v3339_v56, 16  ;;  %v11126_v38 = vrot.slane %v1973_v5, 4  ;;  %v1940_v26 = vshll.u32 %v1588_v24, 16  ;;  %v11134_v29 = vpop.f32.mrf.mxu3 }
 0x2ed   : > { %v12655_v50 = vshll.u32 %v12654_v28, 16  ;;  %v4227_v19 = vrot.slane %v4225_v52, 5  ;;  %4473 = vst [vmem:[#allocation3 + $0x260] sm:$0xf] %v4214_v36  ;;  %v11128_v21 = vrot.slane %v1976_v59, 5  ;;  %v3199_v63 = vshrl.u32 %v2786_v18, 16  ;;  %v11141_v36 = vpop.f32.mrf.mxu2 }
 0x2ee   : > { %v11132_v8 = vld [vmem:[#allocation2 + $0x248] sm:$0xf]  ;;  %v7730_v23 = vrot.slane %v3591_v7, 11  ;;  %12656 = vst [vmem:[#allocation52_spill] sm:$0xff] %v11136_v6  ;;  %v8757_v5 = vld [vmem:[#allocation3 + $0x190] sm:$0xf0] }
 0x2ef   : > { %v3601_v25 = vor.u32 %v12655_v50, %v12653_v14  ;;  %v3202_v14 = vshll.u32 %v2786_v18, 16  ;;  %v1942_v56 = vrot.slane %v1940_v26, 5  ;;  %v12657_v28 = vld [vmem:[#allocation89_spill] sm:$0xff]  ;;  %12658 = vst [vmem:[#allocation46_spill] sm:$0xff] %v11141_v36  ;;  %v3341_v24 = vld [vmem:[#allocation2 + $0x184] sm:$0x8] }
 0x2f0   : > { %v4228_v59 = vsel %vm9799_vm5, %v12657_v28, %v4227_v19  ;;  %v7935_v52 = vld [vmem:[#allocation3 + $0x170] sm:$0xf]  ;;  %v12659_v7 = vld [vmem:[#allocation91_spill] sm:$0xff]  ;;  %v3604_v19 = vshrl.u32 %v3341_v24, 16  ;;  %v11155_v28 = vld [vmem:[%s12368_s4] ss:$0 sm:$0xff] }
 0x2f1   : > { %4474 = vst [vmem:[#allocation3 + $0x284] sm:$0xf] %v4228_v59  ;;  %v3602_v50 = vsel %vm9792_vm4, %v7730_v23, %v3601_v25  ;;  %v12660_v18 = vld [vmem:[#allocation84_spill] sm:$0xff]  ;;  %v1943_v26 = vsel %vm9799_vm5, %v10759_v39, %v1942_v56  ;;  %v2029_v25 = vshrl.u32 %v11132_v8, 16  ;;  %v2032_v23 = vshll.u32 %v11132_v8, 16  ;;  %v11159_v59 = vpop.f32.mrf.mxu0 }
 0x2f2   : > { %v12661_v55 = vshll.u32 %v12660_v18, 16  ;;  %v8161_v42 = vld [vmem:[#allocation3 + $0x34c] sm:$0xf0]  ;;  %3834 = vst [vmem:[#allocation3 + $0x27c] sm:$0xf] %v3602_v50  ;;  %v3201_v18 = vrot.slane %v3199_v63, 4 }
 0x2f3   : > { %12662 = vst [vmem:[#allocation61_spill] sm:$0xff] %v11159_v59  ;;  %v3204_v6 = vrot.slane %v3202_v14, 5  ;;  %v8808_v3 = vld [vmem:[#allocation3 + $0x32c] sm:$0xf]  ;;  %v7731_v56 = vrot.slane %v3604_v19, 11  ;;  %v6040_v14 = vadd.f32 %v11155_v28, %v10954_v54 }
 0x2f4   : > { %v3614_v40 = vor.u32 %v12661_v55, %v12659_v7  ;;  %v7936_v55 = vor.u32 %v8757_v5, %v7935_v52  ;;  %2111 = vst [vmem:[#allocation3 + $0x344] sm:$0xf] %v1943_v26  ;;  %v3950_v7 = vld [vmem:[#allocation2 + $0x18c] sm:$0x1]  ;;  %v8164_v50 = vor.u32 %v8808_v3, %v8161_v42  ;;  %v2781_v36 = vld [vmem:[#allocation2 + $0x21c] sm:$0x1]  ;;  %v4362_v5 = vor.u32 %v11122_v0, %v11114_v33  ;;  %v6128_v42 = vpop.f32.mrf.mxu3 }
 0x2f5   : > { %v4239_v39 = vshll.u32 %v3950_v7, 16  ;;  %v8812_v24 = vld [vmem:[#allocation3 + $0x348] sm:$0xf0]  ;;  %v3166_v4 = vshll.u32 %v2781_v36, 16  ;;  %v3872_v47 = vld [vmem:[#allocation2 + $0x1d8] sm:$0xf]  ;;  %v1979_v3 = vor.u32 %v11128_v21, %v11126_v38  ;;  %v11176_v54 = vadd.f32 %v6128_v42, %v6040_v14 }
 0x2f6   : > { %6176 = vmatmul.bf16.gmra.mxu3 %v7936_v55  ;;  %v2783_v49 = vld [vmem:[#allocation2 + $0x22c] sm:$0x1]  ;;  %v3615_v8 = vsel %vm9792_vm4, %v7731_v56, %v3614_v40  ;;  %v2788_v63 = vld [vmem:[#allocation2 + $0x258] sm:$0xf]  ;;  %6473 = vmatmul.bf16.gmra.mxu2 %v8164_v50  ;;  %v7953_v52 = vld [vmem:[#allocation3 + $0x1a4] sm:$0xf0]  ;;  %v3205_v55 = vor.u32 %v3204_v6, %v3201_v18 }
 0x2f7   : > { %v3180_v32 = vshll.u32 %v2783_v49, 16  ;;  %v4241_v15 = vrot.slane %v4239_v39, 5  ;;  %3904 = vst [vmem:[#allocation3 + $0x358] sm:$0xf] %v3872_v47  ;;  %v11169_v49 = vpop.f32.mrf.mxu1  ;;  %v8159_v36 = vld [vmem:[#allocation3 + $0x328] sm:$0xf] }
 0x2f8   : > { %12663 = vst [vmem:[#allocation58_spill] sm:$0xff] %v11169_v49  ;;  %v3168_v26 = vrot.slane %v3166_v4, 5  ;;  %v11174_v0 = vld [vmem:[#allocation2 + $0x248] sm:$0xf]  ;;  %v8160_v40 = vor.u32 %v8812_v24, %v8159_v36  ;;  %v3343_v47 = vld [vmem:[#allocation2 + $0x194] sm:$0x8]  ;;  %v11191_v24 = vpop.f32.mrf.mxu2 }
 0x2f9   : > { %v3182_v19 = vrot.slane %v3180_v32, 5  ;;  %v4242_v33 = vsel %vm9799_vm5, %v10346_v60, %v4241_v15  ;;  %3835 = vst [vmem:[#allocation3 + $0x2a0] sm:$0xf] %v3615_v8  ;;  %v11178_v38 = vld [vmem:[#allocation2 + $0x248] sm:$0xf]  ;;  %v3213_v21 = vshrl.u32 %v2788_v63, 16 }
 0x2fa   : > { %4475 = vst [vmem:[#allocation3 + $0x2a8] sm:$0xf] %v4242_v33  ;;  %v8755_v7 = vld [vmem:[#allocation3 + $0x184] sm:$0xf]  ;;  %v3169_v32 = vsel %vm9799_vm5, %v10895_v34, %v3168_v26  ;;  %v12664_v15 = vld [vmem:[#allocation98_spill] sm:$0xff]  ;;  %v12665_v4 = vld [vmem:[#allocation93_spill] sm:$0xff]  ;;  %6384 = vmatmul.bf16.gmra.mxu1 %v8160_v40  ;;  %v11207_v40 = vpop.f32.mrf.mxu0 }
 0x2fb   : > { %v3183_v60 = vsel %vm9799_vm5, %v10984_v46, %v3182_v19  ;;  %v12666_v39 = vshll.u32 %v12665_v4, 16  ;;  %v11189_v50 = vrot.slane %v4362_v5, 4  ;;  %12667 = vst [vmem:[#allocation54_spill] sm:$0xff] %v11191_v24  ;;  %v7956_v6 = vor.u32 %v8755_v7, %v7953_v52  ;;  %v3952_v18 = vld [vmem:[#allocation2 + $0x19c] sm:$0x1] }
 0x2fc   : > { %3298 = vst [vmem:[#allocation3 + $0x3bc] sm:$0xf] %v3169_v32  ;;  %v3617_v8 = vshrl.u32 %v3343_v47, 16  ;;  %v11193_v14 = vrot.slane %v1979_v3, 4  ;;  %v12668_v34 = vshrl.u32 %v11104_v53, 16  ;;  %v3216_v46 = vshll.u32 %v2788_v63, 16 }
 0x2fd   : > { %v3627_v56 = vor.u32 %v12666_v39, %v12664_v15  ;;  %3299 = vst [vmem:[#allocation3 + $0x3e0] sm:$0xf] %v3183_v60  ;;  %v4253_v36 = vshll.u32 %v3952_v18, 16  ;;  %v12669_v26 = vshll.u32 %v11104_v53, 16  ;;  %v11203_v19 = vrot.slane %v2029_v25, 4  ;;  %6621 = vmatmul.bf16.gmra.mxu0 %v7956_v6  ;;  %v6130_v18 = vpop.f32.mrf.mxu3 }
 0x2fe   : > { %v11197_v42 = vrot.slane %v12668_v34, 4  ;;  %v11205_v33 = vrot.slane %v2032_v23, 5  ;;  %v2790_v52 = vld [vmem:[#allocation2 + $0x268] sm:$0xf]  ;;  %12670 = vst [vmem:[#allocation71_spill] sm:$0xff] %v11207_v40  ;;  %v7732_v3 = vrot.slane %v3617_v8, 11  ;;  %v6042_v25 = vadd.f32 %v11155_v28, %v10994_v13 }
 0x2ff   : > { %v11201_v5 = vrot.slane %v12669_v26, 5  ;;  %v11209_v47 = vrot.slane %v3205_v55, 4  ;;  %v11213_v32 = vrot.slane %v3213_v21, 4  ;;  %v1589_v53 = vld [vmem:[#allocation2 + $0x1e8] sm:$0xf]  ;;  %v4255_v15 = vrot.slane %v4253_v36, 5  ;;  %v11219_v55 = vpop.f32.mrf.mxu1 }
 0x300   : > { %v1945_v60 = vshrl.u32 %v1589_v53, 16  ;;  %v1948_v23 = vshll.u32 %v1589_v53, 16  ;;  %v11217_v4 = vrot.slane %v3216_v46, 5  ;;  %v3227_v39 = vshrl.u32 %v2790_v52, 16  ;;  %12671 = vst [vmem:[#allocation65_spill] sm:$0xff] %v11219_v55  ;;  %v12672_v13 = vld [vmem:[#allocation104_spill] sm:$0xff] }
 0x301   : > { %v3230_v6 = vshll.u32 %v2790_v52, 16  ;;  %v8766_v8 = vld [vmem:[#allocation3 + $0x1d8] sm:$0xf0]  ;;  %v3628_v34 = vsel %vm9792_vm4, %v7732_v3, %v3627_v56  ;;  %v11223_v21 = vadd.f32 %v6130_v18, %v6042_v25  ;;  %v7971_v26 = vld [vmem:[#allocation3 + $0x1b8] sm:$0xf]  ;;  %v4256_v36 = vsel %vm9799_vm5, %v12672_v13, %v4255_v15  ;;  %v11236_v15 = vpop.f32.mrf.mxu2 }
 0x302   : > { %v1947_v63 = vrot.slane %v1945_v60, 4  ;;  %v1950_v7 = vrot.slane %v1948_v23, 5  ;;  %3836 = vst [vmem:[#allocation3 + $0x2c4] sm:$0xf] %v3628_v34  ;;  %v8197_v46 = vld [vmem:[#allocation3 + $0x394] sm:$0xf0]  ;;  %v7972_v59 = vor.u32 %v8766_v8, %v7971_v26  ;;  %v2035_v23 = vor.u32 %v11205_v33, %v11203_v19  ;;  %v11242_v33 = vpop.f32.mrf.mxu0 }
 0x303   : > { %v1590_v53 = vld [vmem:[#allocation2 + $0x1ec] sm:$0x1]  ;;  %v1592_v52 = vld [vmem:[#allocation2 + $0x1fc] sm:$0x1]  ;;  %v11228_v40 = vld [vmem:[#allocation2 + $0x258] sm:$0xf]  ;;  %v6045_v19 = vadd.f32 %v11155_v28, %v11024_v35 }
 0x304   : > { %v1951_v55 = vor.u32 %v1950_v7, %v1947_v63  ;;  %v1954_v49 = vshll.u32 %v1590_v53, 16  ;;  %v1968_v24 = vshll.u32 %v1592_v52, 16  ;;  %4476 = vst [vmem:[#allocation3 + $0x2cc] sm:$0xf] %v4256_v36  ;;  %v11230_v56 = vrot.slane %v3227_v39, 4  ;;  %v8902_v34 = vld [vmem:[#allocation7 + $0x198] sm:$0xff] }
 0x305   : > { %v11232_v3 = vrot.slane %v3230_v6, 5  ;;  %v8817_v25 = vld [vmem:[#allocation3 + $0x374] sm:$0xf]  ;;  %v3954_v60 = vld [vmem:[#allocation2 + $0x1ac] sm:$0x1]  ;;  %12673 = vst [vmem:[#allocation76_spill] sm:$0xff] %v11236_v15  ;;  %6503 = vmatpush.bf16.msra.mxu3 %v8902_v34 }
 0x306   : > { %6181 = vmatmul.bf16.gmra.mxu3 %v7972_v59  ;;  %v8200_v18 = vor.u32 %v8817_v25, %v8197_v46  ;;  %v2785_v13 = vld [vmem:[#allocation2 + $0x23c] sm:$0x1]  ;;  %v2787_v8 = vld [vmem:[#allocation2 + $0x24c] sm:$0x1]  ;;  %v1952_v7 = vrot.slane %v1951_v55, 4  ;;  %v1956_v39 = vrot.slane %v1954_v49, 5  ;;  %v3219_v55 = vor.u32 %v11217_v4, %v11213_v32  ;;  %v6133_v25 = vpop.f32.mrf.mxu3 }
 0x307   : > { %v8821_v63 = vld [vmem:[#allocation3 + $0x390] sm:$0xf0]  ;;  %v3194_v26 = vshll.u32 %v2785_v13, 16  ;;  %v3208_v36 = vshll.u32 %v2787_v8, 16  ;;  %v1970_v53 = vrot.slane %v1968_v24, 5  ;;  %v2043_v6 = vshrl.u32 %v11228_v40, 16  ;;  %v11246_v13 = vpop.f32.mrf.mxu1 }
 0x308   : > { %v2046_v52 = vshll.u32 %v11228_v40, 16  ;;  %12674 = vst [vmem:[#allocation64_spill] sm:$0xff] %v11242_v33  ;;  %6478 = vmatmul.bf16.gmra.mxu2 %v8200_v18  ;;  %v7989_v59 = vld [vmem:[#allocation3 + $0x1ec] sm:$0xf0]  ;;  %v4267_v46 = vshll.u32 %v3954_v60, 16  ;;  %v1957_v40 = vsel %vm9799_vm5, %v1952_v7, %v1956_v39  ;;  %v11250_v35 = vadd.f32 %v6133_v25, %v6045_v19 }
 0x309   : > { %v8195_v49 = vld [vmem:[#allocation3 + $0x370] sm:$0xf]  ;;  %v3196_v24 = vrot.slane %v3194_v26, 5  ;;  %v3210_v8 = vrot.slane %v3208_v36, 5  ;;  %v3345_v15 = vld [vmem:[#allocation2 + $0x1a4] sm:$0x8]  ;;  %v1971_v60 = vsel %vm9799_vm5, %v11060_v31, %v1970_v53  ;;  %v3233_v4 = vor.u32 %v11232_v3, %v11230_v56 }
 0x30a   : > { %v8196_v33 = vor.u32 %v8821_v63, %v8195_v49  ;;  %v8764_v18 = vld [vmem:[#allocation3 + $0x1cc] sm:$0xf]  ;;  %2112 = vst [vmem:[#allocation3 + $0x368] sm:$0xf] %v1957_v40  ;;  %v4269_v32 = vrot.slane %v4267_v46, 5  ;;  %v11263_v36 = vrot.slane %v2035_v23, 4 }
 0x30b   : > { %v3197_v34 = vsel %vm9799_vm5, %v11124_v16, %v3196_v24  ;;  %v3211_v7 = vsel %vm9799_vm5, %v11209_v47, %v3210_v8  ;;  %2113 = vst [vmem:[#allocation3 + $0x38c] sm:$0xf] %v1971_v60  ;;  %v1594_v63 = vld [vmem:[#allocation2 + $0x20c] sm:$0x1]  ;;  %v1596_v26 = vld [vmem:[#allocation2 + $0x21c] sm:$0x1]  ;;  %v7992_v31 = vor.u32 %v8764_v18, %v7989_v59 }
 0x30c   : > { %6389 = vmatmul.bf16.gmra.mxu1 %v8196_v33  ;;  %3300 = vst [vmem:[#allocation3 + $0x404] sm:$0xf] %v3197_v34  ;;  %v3347_v39 = vld [vmem:[#allocation2 + $0x1b4] sm:$0x8]  ;;  %v3630_v53 = vshrl.u32 %v3345_v15, 16  ;;  %v11265_v19 = vrot.slane %v2043_v6, 4  ;;  %v4270_v15 = vsel %vm9799_vm5, %v10649_v17, %v4269_v32 }
 0x30d   : > { %3301 = vst [vmem:[#allocation3 + $0x428] sm:$0xf] %v3211_v7  ;;  %v8918_v56 = vld [vmem:[#allocation7 + $0x218] sm:$0xff]  ;;  %v1982_v3 = vshll.u32 %v1594_v63, 16  ;;  %v1996_v16 = vshll.u32 %v1596_v26, 16  ;;  %v12675_v46 = vshll.u32 %v10506_v43, 16  ;;  %6626 = vmatmul.bf16.gmra.mxu0 %v7992_v31  ;;  %v6047_v43 = vadd.f32 %v11155_v28, %v11062_v37  ;;  %v11294_v26 = vpop.f32.mrf.mxu0 }
 0x30e   : > { %v11270_v25 = vrot.slane %v2046_v52, 5  ;;  %v11272_v49 = vrot.slane %v3219_v55, 4  ;;  %v1598_v23 = vld [vmem:[#allocation2 + $0x22c] sm:$0x1]  ;;  %v1600_v33 = vld [vmem:[#allocation2 + $0x23c] sm:$0x1]  ;;  %6681 = vmatpush.bf16.msra.mxu1 %v8918_v56  ;;  %v6135_v18 = vpop.f32.mrf.mxu3 }
 0x30f   : > { %v3640_v47 = vor.u32 %v12675_v46, %v10629_v48  ;;  %v11277_v6 = vrot.slane %v3233_v4, 4  ;;  %v1984_v59 = vrot.slane %v1982_v3, 5  ;;  %v1998_v24 = vrot.slane %v1996_v16, 5  ;;  %v11281_v48 = vpop.f32.mrf.mxu2  ;;  %v11283_v60 = vpop.f32.mrf.mxu1  ;;  %v8007_v34 = vld [vmem:[#allocation3 + $0x200] sm:$0xf]  ;;  %12677 = vst [vmem:[#allocation56_spill] sm:$0xff] %v11294_v26 }
 0x310   : > { %v3643_v8 = vshrl.u32 %v3347_v39, 16  ;;  %v2010_v52 = vshll.u32 %v1598_v23, 16  ;;  %v2024_v55 = vshll.u32 %v1600_v33, 16  ;;  %v7733_v40 = vrot.slane %v3630_v53, 11  ;;  %v8775_v7 = vld [vmem:[#allocation3 + $0x220] sm:$0xf0] }
 0x311   : > { %v1985_v17 = vsel %vm9799_vm5, %v11193_v14, %v1984_v59  ;;  %v1999_v32 = vsel %vm9799_vm5, %v10874_v27, %v1998_v24  ;;  %v3956_v4 = vld [vmem:[#allocation2 + $0x1bc] sm:$0x1]  ;;  %4477 = vst [vmem:[#allocation3 + $0x2f0] sm:$0xf] %v4270_v15  ;;  %v12676_v37 = vshll.u32 %v10681_v20, 16  ;;  %v11296_v31 = vadd.f32 %v6135_v18, %v6047_v43 }
 0x312   : > { %v8826_v39 = vld [vmem:[#allocation3 + $0x3bc] sm:$0xf]  ;;  %2114 = vst [vmem:[#allocation3 + $0x3b0] sm:$0xf] %v1985_v17  ;;  %v2012_v53 = vrot.slane %v2010_v52, 5  ;;  %v2026_v56 = vrot.slane %v2024_v55, 5  ;;  %v8008_v46 = vor.u32 %v8775_v7, %v8007_v34  ;;  %v3641_v23 = vsel %vm9792_vm4, %v7733_v40, %v3640_v47 }
 0x313   : > { %v3653_v63 = vor.u32 %v12676_v37, %v10763_v58  ;;  %v8233_v3 = vld [vmem:[#allocation3 + $0x3dc] sm:$0xf0]  ;;  %2115 = vst [vmem:[#allocation3 + $0x3d4] sm:$0xf] %v1999_v32  ;;  %v4281_v14 = vshll.u32 %v3956_v4, 16  ;;  %v7734_v16 = vrot.slane %v3643_v8, 11  ;;  %v4320_v34 = vor.u32 %v11201_v5, %v11197_v42 }
 0x314   : > { %v2013_v27 = vsel %vm9799_vm5, %v10972_v44, %v2012_v53  ;;  %v2027_v20 = vsel %vm9799_vm5, %v11087_v9, %v2026_v56  ;;  %v3958_v58 = vld [vmem:[#allocation2 + $0x1cc] sm:$0x1]  ;;  %v8231_v33 = vld [vmem:[#allocation3 + $0x3b8] sm:$0xf]  ;;  %v8830_v15 = vld [vmem:[#allocation3 + $0x3d8] sm:$0xf0]  ;;  %v8236_v8 = vor.u32 %v8826_v39, %v8233_v3  ;;  %v6050_v7 = vadd.f32 %v11155_v28, %v11092_v41 }
 0x315   : > { %2116 = vst [vmem:[#allocation3 + $0x3f8] sm:$0xf] %v2013_v27  ;;  %v4283_v59 = vrot.slane %v4281_v14, 5  ;;  %v3959_v24 = vld [vmem:[#allocation2 + $0x1d8] sm:$0xf]  ;;  %v4295_v43 = vshll.u32 %v3958_v58, 16  ;;  %v3654_v44 = vsel %vm9792_vm4, %v7734_v16, %v3653_v63  ;;  %v2049_v37 = vor.u32 %v11270_v25, %v11265_v19  ;;  %v11334_v58 = vpop.f32.mrf.mxu0 }
 0x316   : > { %6186 = vmatmul.bf16.gmra.mxu3 %v8008_v46  ;;  %v2789_v52 = vld [vmem:[#allocation2 + $0x25c] sm:$0x1]  ;;  %v2791_v55 = vld [vmem:[#allocation2 + $0x26c] sm:$0x1]  ;;  %2117 = vst [vmem:[#allocation3 + $0x41c] sm:$0xf] %v2027_v20  ;;  %v6138_v63 = vpop.f32.mrf.mxu3  ;;  %v8232_v3 = vor.u32 %v8830_v15, %v8231_v33 }
 0x317   : > { %v3222_v18 = vshll.u32 %v2789_v52, 16  ;;  %v3236_v9 = vshll.u32 %v2791_v55, 16  ;;  %v4284_v47 = vsel %vm9799_vm5, %v10795_v22, %v4283_v59  ;;  %v4297_v40 = vrot.slane %v4295_v43, 5  ;;  %3837 = vst [vmem:[#allocation3 + $0x2e8] sm:$0xf] %v3641_v23  ;;  %v11317_v39 = vpop.f32.mrf.mxu1  ;;  %v11322_v41 = vpop.f32.mrf.mxu2  ;;  %v8930_v33 = vld [vmem:[#allocation9 + $0x38] sm:$0xff] }
 0x318   : > { %6483 = vmatmul.bf16.gmra.mxu2 %v8236_v8  ;;  %v8773_v17 = vld [vmem:[#allocation3 + $0x214] sm:$0xf]  ;;  %4478 = vst [vmem:[#allocation3 + $0x314] sm:$0xf] %v4284_v47  ;;  %v4300_v32 = vshrl.u32 %v3959_v24, 16  ;;  %v4303_v4 = vshll.u32 %v3959_v24, 16  ;;  %v11324_v5 = vadd.f32 %v6138_v63, %v6050_v7 }
 0x319   : > { %v8025_v22 = vld [vmem:[#allocation3 + $0x234] sm:$0xf0]  ;;  %v3224_v53 = vrot.slane %v3222_v18, 5  ;;  %v3238_v56 = vrot.slane %v3236_v9, 5  ;;  %v4298_v42 = vsel %vm9799_vm5, %v10935_v51, %v4297_v40  ;;  %3838 = vst [vmem:[#allocation3 + $0x30c] sm:$0xf] %v3654_v44  ;;  %6882 = vmatpush.bf16.msra.mxu2 %v8930_v33 }
 0x31a   : > { %v3960_v14 = vld [vmem:[#allocation2 + $0x1dc] sm:$0x1]  ;;  %v4302_v16 = vrot.slane %v4300_v32, 4  ;;  %v4305_v46 = vrot.slane %v4303_v4, 5  ;;  %v1602_v27 = vld [vmem:[#allocation2 + $0x24c] sm:$0x1]  ;;  %v8028_v23 = vor.u32 %v8773_v17, %v8025_v22 }
 0x31b   : > { %v3225_v19 = vsel %vm9799_vm5, %v11272_v49, %v3224_v53  ;;  %v3239_v25 = vsel %vm9799_vm5, %v11277_v6, %v3238_v56  ;;  %v1604_v20 = vld [vmem:[#allocation2 + $0x25c] sm:$0x1]  ;;  %4479 = vst [vmem:[#allocation3 + $0x338] sm:$0xf] %v4298_v42  ;;  %v11332_v51 = vld [vmem:[#allocation2 + $0x258] sm:$0xf] }
 0x31c   : > { %12678 = vst [vmem:[#allocation85_spill] sm:$0xff] %v11334_v58  ;;  %6394 = vmatmul.bf16.gmra.mxu1 %v8232_v3  ;;  %v2038_v15 = vshll.u32 %v1602_v27, 16  ;;  %v4306_v59 = vor.u32 %v4305_v46, %v4302_v16  ;;  %v12679_v24 = vshrl.u32 %v11102_v1, 16  ;;  %v3690_v43 = vshll.u32 %v11102_v1, 16  ;;  %v11349_v7 = vld [vmem:[#allocation2 + $0x258] sm:$0xf] }
 0x31d   : > { %3302 = vst [vmem:[#allocation3 + $0x44c] sm:$0xf] %v3225_v19  ;;  %v4373_v6 = vshll.u32 %v11178_v38, 16  ;;  %v4309_v8 = vshll.u32 %v3960_v14, 16  ;;  %v11342_v52 = vrot.slane %v4320_v34, 4  ;;  %v2050_v55 = vrot.slane %v2049_v37, 4  ;;  %6631 = vmatmul.bf16.gmra.mxu0 %v8028_v23 }
 0x31e   : > { %v11338_v49 = vrot.slane %v12679_v24, 7  ;;  %3303 = vst [vmem:[#allocation3 + $0x470] sm:$0xf] %v3239_v25  ;;  %v2040_v44 = vrot.slane %v2038_v15, 5  ;;  %v2052_v18 = vshll.u32 %v1604_v20, 16  ;;  %v12680_v9 = vshrl.u32 %v11174_v0, 16  ;;  %v6140_v3 = vpop.f32.mrf.mxu3 }
 0x31f   : > { %v4384_v17 = vshrl.u32 %v11332_v51, 16  ;;  %v4307_v32 = vrot.slane %v4306_v59, 4  ;;  %v12681_v4 = vshrl.u32 %v11178_v38, 16  ;;  %v6052_v37 = vadd.f32 %v11155_v28, %v11134_v29  ;;  %v8043_v63 = vld [vmem:[#allocation3 + $0x248] sm:$0xf]  ;;  %v11363_v14 = vpop.f32.mrf.mxu1 }
 0x320   : > { %v11346_v47 = vrot.slane %v12680_v9, 7  ;;  %v8784_v22 = vld [vmem:[#allocation3 + $0x268] sm:$0xf0]  ;;  %v2041_v53 = vsel %vm9799_vm5, %v11263_v36, %v2040_v44  ;;  %v2054_v56 = vrot.slane %v2052_v18, 5  ;;  %v11361_v42 = vrot.slane %v4373_v6, 5  ;;  %v12682_v59 = vld [vmem:[#allocation47_spill] sm:$0xff]  ;;  %v11379_v6 = vpop.f32.mrf.mxu2 }
 0x321   : > { %v11354_v34 = vrot.slane %v12681_v4, 4  ;;  %2118 = vst [vmem:[#allocation3 + $0x440] sm:$0xf] %v2041_v53  ;;  %v4311_v16 = vrot.slane %v4309_v8, 5  ;;  %v3349_v38 = vld [vmem:[#allocation2 + $0x1c4] sm:$0x8]  ;;  %v11367_v29 = vadd.f32 %v6140_v3, %v6052_v37  ;;  %v5975_v24 = vadd.f32 %v11155_v28, %v12682_v59 }
 0x322   : > { %v8835_v25 = vld [vmem:[#allocation3 + $0x404] sm:$0xf]  ;;  %v2055_v27 = vsel %vm9799_vm5, %v2050_v55, %v2054_v56  ;;  %v11371_v36 = vld [vmem:[#allocation2 + $0x1d8] sm:$0xf]  ;;  %v11373_v20 = vrot.slane %v4384_v17, 4  ;;  %v3656_v15 = vshrl.u32 %v3349_v38, 16  ;;  %v8044_v8 = vor.u32 %v8784_v22, %v8043_v63  ;;  %v11390_v63 = vpop.f32.mrf.mxu0 }
 0x323   : > { %v8269_v23 = vld [vmem:[#allocation3 + $0x424] sm:$0xf0]  ;;  %2119 = vst [vmem:[#allocation3 + $0x464] sm:$0xf] %v2055_v27  ;;  %v4312_v33 = vsel %vm9799_vm5, %v4307_v32, %v4311_v16  ;;  %v8267_v44 = vld [vmem:[#allocation3 + $0x400] sm:$0xf] }
 0x324   : > { %v8839_v18 = vld [vmem:[#allocation3 + $0x420] sm:$0xf0]  ;;  %v8917_v9 = vld [vmem:[#allocation7 + $0x210] sm:$0xff]  ;;  %4480 = vst [vmem:[#allocation3 + $0x35c] sm:$0xf] %v4312_v33  ;;  %v3674_v17 = vshrl.u32 %v11371_v36, 16  ;;  %v8272_v22 = vor.u32 %v8835_v25, %v8269_v23 }
 0x325   : > { %v3351_v55 = vld [vmem:[#allocation2 + $0x1d4] sm:$0x8]  ;;  %v12683_v4 = vshll.u32 %v10876_v62, 16  ;;  %v3962_v53 = vld [vmem:[#allocation2 + $0x20c] sm:$0x1]  ;;  %v12684_v3 = vshll.u32 %v10839_v11, 16  ;;  %6682 = vmatpush.bf16.msra.mxu1 %v8917_v9  ;;  %v11395_v11 = vor.u32 %v3690_v43, %v11338_v49 }
 0x326   : > { %v3964_v32 = vld [vmem:[#allocation2 + $0x21c] sm:$0x1]  ;;  %v3966_v56 = vld [vmem:[#allocation2 + $0x22c] sm:$0x1]  ;;  %12685 = vst [vmem:[#allocation67_spill] sm:$0xff] %v11390_v63  ;;  %6191 = vmatmul.bf16.gmra.mxu3 %v8044_v8  ;;  %v8901_v38 = vld [vmem:[#allocation7 + $0x190] sm:$0xff] }
 0x327   : > { %v3666_v37 = vor.u32 %v12683_v4, %v10904_v45  ;;  %v11388_v16 = vor.u32 %v12684_v3, %v10888_v2  ;;  %v8916_v27 = vld [vmem:[#allocation7 + $0x208] sm:$0xff]  ;;  %v4323_v33 = vshll.u32 %v3962_v53, 16  ;;  %v4337_v59 = vshll.u32 %v3964_v32, 16  ;;  %v3968_v40 = vld [vmem:[#allocation2 + $0x23c] sm:$0x1]  ;;  %v12686_v2 = vld [vmem:[#allocation69_spill] sm:$0xff]  ;;  %6504 = vmatpush.bf16.msra.mxu3 %v8901_v38  ;;  %v6152_v53 = vpop.f32.mrf.mxu3  ;;  %v11398_v32 = vpop.f32.mrf.mxu1 }
 0x328   : > { %v3880_v62 = vld [vmem:[#allocation2 + $0x278] sm:$0xf]  ;;  %v4351_v45 = vshll.u32 %v3966_v56, 16  ;;  %v4365_v4 = vshll.u32 %v3968_v40, 16  ;;  %v7735_v46 = vrot.slane %v3656_v15, 11  ;;  %v3669_v19 = vshrl.u32 %v3351_v55, 16  ;;  %6488 = vmatmul.bf16.gmra.mxu2 %v8272_v22 }
 0x329   : > { %v6064_v8 = vadd.f32 %v12686_v2, %v5975_v24  ;;  %v8061_v25 = vld [vmem:[#allocation3 + $0x27c] sm:$0xf0]  ;;  %3912 = vst [vmem:[#allocation3 + $0x478] sm:$0xf] %v3880_v62  ;;  %v4325_v23 = vrot.slane %v4323_v33, 5  ;;  %v4339_v9 = vrot.slane %v4337_v59, 5  ;;  %v8268_v56 = vor.u32 %v8839_v18, %v8267_v44  ;;  %6683 = vmatpush.bf16.msra.mxu1 %v8916_v27 }
 0x32a   : > { %v4353_v40 = vrot.slane %v4351_v45, 5  ;;  %v4367_v15 = vrot.slane %v4365_v4, 5  ;;  %v3667_v55 = vsel %vm9792_vm4, %v7735_v46, %v3666_v37  ;;  %v3353_v1 = vld [vmem:[#allocation2 + $0x204] sm:$0x8]  ;;  %v3355_v49 = vld [vmem:[#allocation2 + $0x214] sm:$0x8] }
 0x32b   : > { %v11402_v43 = vadd.f32 %v6152_v53, %v6064_v8  ;;  %v4326_v24 = vsel %vm9799_vm5, %v11342_v52, %v4325_v23  ;;  %v4340_v3 = vsel %vm9799_vm5, %v10897_v57, %v4339_v9  ;;  %v3676_v22 = vrot.slane %v3674_v17, 7  ;;  %3839 = vst [vmem:[#allocation3 + $0x330] sm:$0xf] %v3667_v55  ;;  %v8782_v44 = vld [vmem:[#allocation3 + $0x25c] sm:$0xf]  ;;  %v8915_v17 = vld [vmem:[#allocation7 + $0x200] sm:$0xff] }
 0x32c   : > { %4481 = vst [vmem:[#allocation3 + $0x380] sm:$0xf] %v4326_v24  ;;  %v4354_v46 = vsel %vm9799_vm5, %v11055_v30, %v4353_v40  ;;  %v4368_v18 = vsel %vm9799_vm5, %v11189_v50, %v4367_v15  ;;  %v7736_v37 = vrot.slane %v3669_v19, 11  ;;  %v3677_v38 = vshll.u32 %v11371_v36, 16  ;;  %6399 = vmatmul.bf16.gmra.mxu1 %v8268_v56  ;;  %v12688_v62 = vld [vmem:[#allocation45_spill] sm:$0xff]  ;;  %v11422_v19 = vpop.f32.mrf.mxu2  ;;  %v12690_v23 = vld [vmem:[#allocation43_spill] sm:$0xff] }
 0x32d   : > { %v12687_v52 = vshll.u32 %v11332_v51, 16  ;;  %v8064_v57 = vor.u32 %v8782_v44, %v8061_v25  ;;  %4482 = vst [vmem:[#allocation3 + $0x3a4] sm:$0xf] %v4340_v3  ;;  %v3682_v33 = vshrl.u32 %v3353_v1, 16  ;;  %v3695_v59 = vshrl.u32 %v3355_v49, 16  ;;  %6684 = vmatpush.bf16.msra.mxu1 %v8915_v17  ;;  %v12691_v9 = vld [vmem:[#allocation57_spill] sm:$0xff]  ;;  %v11434_v49 = vpop.f32.mrf.mxu0 }
 0x32e   : > { %v12689_v45 = vshll.u32 %v12688_v62, 16  ;;  %4483 = vst [vmem:[#allocation3 + $0x3c8] sm:$0xf] %v4354_v46  ;;  %v3679_v4 = vor.u32 %v3677_v38, %v3676_v22  ;;  %v3357_v2 = vld [vmem:[#allocation2 + $0x224] sm:$0x8]  ;;  %v12692_v53 = vshll.u32 %v12691_v9, 16 }
 0x32f   : > { %v4389_v27 = vrot.slane %v12687_v52, 5  ;;  %v3359_v50 = vld [vmem:[#allocation2 + $0x234] sm:$0x8]  ;;  %6636 = vmatmul.bf16.gmra.mxu0 %v8064_v57  ;;  %4484 = vst [vmem:[#allocation3 + $0x3ec] sm:$0xf] %v4368_v18  ;;  %v7737_v51 = vrot.slane %v3682_v33, 11  ;;  %v11446_v18 = vpop.f32.mrf.mxu3 }
 0x330   : > { %v3718_v30 = vor.u32 %v12689_v45, %v10974_v61  ;;  %v7738_v36 = vrot.slane %v3695_v59, 11  ;;  %v3708_v8 = vshrl.u32 %v3357_v2, 16  ;;  %v3721_v25 = vshrl.u32 %v3359_v50, 16  ;;  %12694 = vst [vmem:[#allocation60_spill] sm:$0xff] %v11434_v49  ;;  %v3973_v46 = vld [vmem:[#allocation2 + $0x268] sm:$0xf] }
 0x331   : > { %v3731_v56 = vor.u32 %v12692_v53, %v12690_v23  ;;  %v4376_v61 = vor.u32 %v11361_v42, %v11354_v34  ;;  %v3755_v40 = vshll.u32 %v11349_v7, 16  ;;  %v3680_v15 = vsel %vm9792_vm4, %v7736_v37, %v3679_v4  ;;  %v3361_v42 = vld [vmem:[#allocation2 + $0x244] sm:$0x8]  ;;  %v11448_v37 = vpop.f32.mrf.mxu1  ;;  %v8079_v38 = vld [vmem:[#allocation3 + $0x290] sm:$0xf] }
 0x332   : > { %v12693_v55 = vshrl.u32 %v11349_v7, 16  ;;  %3840 = vst [vmem:[#allocation3 + $0x354] sm:$0xf] %v3680_v15  ;;  %v3693_v24 = vsel %vm9792_vm4, %v7737_v51, %v11395_v11  ;;  %v3706_v3 = vsel %vm9792_vm4, %v7738_v36, %v11388_v16  ;;  %v7739_v34 = vrot.slane %v3708_v8, 11  ;;  %v8793_v52 = vld [vmem:[#allocation3 + $0x2b0] sm:$0xf0] }
 0x333   : > { %v12695_v22 = vshll.u32 %v11174_v0, 16  ;;  %v4390_v7 = vor.u32 %v4389_v27, %v11373_v20  ;;  %12696 = vst [vmem:[#allocation70_spill] sm:$0xff] %v11448_v37  ;;  %v7740_v11 = vrot.slane %v3721_v25, 11  ;;  %v3734_v57 = vshrl.u32 %v3361_v42, 16  ;;  %v8844_v17 = vld [vmem:[#allocation3 + $0x44c] sm:$0xf] }
 0x334   : > { %v3754_v1 = vrot.slane %v12693_v55, 7  ;;  %3841 = vst [vmem:[#allocation3 + $0x378] sm:$0xf] %v3693_v24  ;;  %v3719_v16 = vsel %vm9792_vm4, %v7739_v34, %v3718_v30  ;;  %v3363_v33 = vld [vmem:[#allocation2 + $0x254] sm:$0x8]  ;;  %v12697_v59 = vld [vmem:[#allocation59_spill] sm:$0xff]  ;;  %v8080_v2 = vor.u32 %v8793_v52, %v8079_v38  ;;  %v11458_v24 = vpop.f32.mrf.mxu2 }
 0x335   : > { %v3744_v44 = vor.u32 %v12695_v22, %v11346_v47  ;;  %3842 = vst [vmem:[#allocation3 + $0x39c] sm:$0xf] %v3706_v3  ;;  %v8305_v0 = vld [vmem:[#allocation3 + $0x46c] sm:$0xf0]  ;;  %v3732_v47 = vsel %vm9792_vm4, %v7740_v11, %v3731_v56  ;;  %v7741_v20 = vrot.slane %v3734_v57, 11  ;;  %v3747_v27 = vshrl.u32 %v3363_v33, 16  ;;  %v11467_v52 = vpop.f32.mrf.mxu0 }
 0x336   : > { %3843 = vst [vmem:[#allocation3 + $0x3c0] sm:$0xf] %v3719_v16  ;;  %v5980_v62 = vadd.f32 %v11155_v28, %v12697_v59  ;;  %v4377_v45 = vrot.slane %v4376_v61, 4  ;;  %v3757_v4 = vor.u32 %v3755_v40, %v3754_v1  ;;  %v3970_v50 = vld [vmem:[#allocation2 + $0x24c] sm:$0x1]  ;;  %v4391_v36 = vrot.slane %v4390_v7, 4  ;;  %6196 = vmatmul.bf16.gmra.mxu3 %v8080_v2 }
 0x337   : > { %v3972_v51 = vld [vmem:[#allocation2 + $0x25c] sm:$0x1]  ;;  %v3366_v8 = vld [vmem:[#allocation2 + $0x268] sm:$0xf]  ;;  %v4379_v25 = vshll.u32 %v3970_v50, 16  ;;  %v3745_v23 = vsel %vm9792_vm4, %v7741_v20, %v3744_v44  ;;  %v4398_v9 = vshrl.u32 %v3973_v46, 16  ;;  %v8308_v56 = vor.u32 %v8844_v17, %v8305_v0  ;;  %v6157_v22 = vpop.f32.mrf.mxu3 }
 0x338   : > { %v4393_v30 = vshll.u32 %v3972_v51, 16  ;;  %3844 = vst [vmem:[#allocation3 + $0x3e4] sm:$0xf] %v3732_v47  ;;  %v4401_v53 = vshll.u32 %v3973_v46, 16  ;;  %v7742_v15 = vrot.slane %v3747_v27, 11  ;;  %v12698_v3 = vld [vmem:[#allocation80_spill] sm:$0xff] }
 0x339   : > { %3845 = vst [vmem:[#allocation3 + $0x408] sm:$0xf] %v3745_v23  ;;  %v8303_v55 = vld [vmem:[#allocation3 + $0x448] sm:$0xf]  ;;  %v8848_v61 = vld [vmem:[#allocation3 + $0x468] sm:$0xf0]  ;;  %6493 = vmatmul.bf16.gmra.mxu2 %v8308_v56  ;;  %v6069_v34 = vadd.f32 %v12698_v3, %v5980_v62  ;;  %v11471_v33 = vpop.f32.mrf.mxu1 }
 0x33a   : > { %v4381_v40 = vrot.slane %v4379_v25, 5  ;;  %v4395_v1 = vrot.slane %v4393_v30, 5  ;;  %v3758_v42 = vsel %vm9792_vm4, %v7742_v15, %v3757_v4  ;;  %v8097_v44 = vld [vmem:[#allocation3 + $0x2c4] sm:$0xf0]  ;;  %v3765_v38 = vshrl.u32 %v3366_v8, 16  ;;  %12699 = vst [vmem:[#allocation90_spill] sm:$0xff] %v11467_v52 }
 0x33b   : > { %3846 = vst [vmem:[#allocation3 + $0x42c] sm:$0xf] %v3758_v42  ;;  %v11469_v11 = vadd.f32 %v6157_v22, %v6069_v34  ;;  %v8304_v57 = vor.u32 %v8848_v61, %v8303_v55  ;;  %v4400_v17 = vrot.slane %v4398_v9, 4  ;;  %v4403_v16 = vrot.slane %v4401_v53, 5  ;;  %v8791_v0 = vld [vmem:[#allocation3 + $0x2a4] sm:$0xf] }
 0x33c   : > { %v4382_v7 = vsel %vm9799_vm5, %v4377_v45, %v4381_v40  ;;  %v4396_v46 = vsel %vm9799_vm5, %v4391_v36, %v4395_v1  ;;  %12700 = vst [vmem:[#allocation77_spill] sm:$0xff] %v11471_v33  ;;  %v8100_v47 = vor.u32 %v8791_v0, %v8097_v44  ;;  %v8929_v20 = vld [vmem:[#allocation9 + $0x30] sm:$0xff]  ;;  %v3767_v27 = vrot.slane %v3765_v38, 7  ;;  %v3368_v62 = vld [vmem:[#allocation2 + $0x278] sm:$0xf] }
 0x33d   : > { %4485 = vst [vmem:[#allocation3 + $0x410] sm:$0xf] %v4382_v7  ;;  %6404 = vmatmul.bf16.gmra.mxu1 %v8304_v57  ;;  %v3768_v59 = vshll.u32 %v3366_v8, 16  ;;  %6883 = vmatpush.bf16.msra.mxu2 %v8929_v20  ;;  %v4404_v45 = vor.u32 %v4403_v16, %v4400_v17  ;;  %v3778_v4 = vshrl.u32 %v3368_v62, 16  ;;  %v3975_v2 = vld [vmem:[#allocation2 + $0x278] sm:$0xf]  ;;  %v11477_v42 = vpop.f32.mrf.mxu0 }
 0x33e   : > { %4486 = vst [vmem:[#allocation3 + $0x434] sm:$0xf] %v4396_v46  ;;  %v3365_v50 = vld [vmem:[#allocation2 + $0x264] sm:$0x8]  ;;  %v8802_v36 = vld [vmem:[#allocation3 + $0x2f8] sm:$0xf0] }
 0x33f   : > { %6641 = vmatmul.bf16.gmra.mxu0 %v8100_v47  ;;  %v11473_v51 = vpop.f32.mrf.mxu3  ;;  %v4412_v25 = vshrl.u32 %v3975_v2, 16  ;;  %v4415_v30 = vshll.u32 %v3975_v2, 16  ;;  %v3367_v23 = vld [vmem:[#allocation2 + $0x274] sm:$0x8]  ;;  %v3770_v9 = vor.u32 %v3768_v59, %v3767_v27  ;;  %v3760_v53 = vshrl.u32 %v3365_v50, 16  ;;  %12702 = vst [vmem:[#allocation72_spill] sm:$0xff] %v11477_v42 }
 0x340   : > { %v3773_v56 = vshrl.u32 %v3367_v23, 16  ;;  %v3780_v15 = vrot.slane %v3778_v4, 7  ;;  %v4405_v55 = vrot.slane %v4404_v45, 4  ;;  %v8115_v61 = vld [vmem:[#allocation3 + $0x2d8] sm:$0xf]  ;;  %v3781_v1 = vshll.u32 %v3368_v62, 16 }
 0x341   : > { %v4414_v8 = vrot.slane %v4412_v25, 4  ;;  %v4417_v40 = vrot.slane %v4415_v30, 5  ;;  %v12701_v3 = vld [vmem:[#allocation73_spill] sm:$0xff]  ;;  %v8116_v22 = vor.u32 %v8802_v36, %v8115_v61  ;;  %v3974_v44 = vld [vmem:[#allocation2 + $0x26c] sm:$0x1]  ;;  %v7743_v46 = vrot.slane %v3760_v53, 11  ;;  %v11479_v57 = vpop.f32.mrf.mxu1 }
 0x342   : > { %v5985_v34 = vadd.f32 %v11155_v28, %v12701_v3  ;;  %v3976_v7 = vld [vmem:[#allocation2 + $0x27c] sm:$0x1]  ;;  %v7744_v38 = vrot.slane %v3773_v56, 11  ;;  %12703 = vst [vmem:[#allocation82_spill] sm:$0xff] %v11479_v57  ;;  %v4407_v17 = vshll.u32 %v3974_v44, 16  ;;  %v3783_v47 = vor.u32 %v3781_v1, %v3780_v15  ;;  %v8900_v27 = vld [vmem:[#allocation7 + $0x188] sm:$0xff] }
 0x343   : > { %v4418_v16 = vor.u32 %v4417_v40, %v4414_v8  ;;  %v4421_v0 = vshll.u32 %v3976_v7, 16  ;;  %v8715_v20 = vld [vmem:[#allocation3 + $0x40] sm:$0xf0]  ;;  %v3771_v59 = vsel %vm9792_vm4, %v7743_v46, %v3770_v9  ;;  %v12704_v50 = vld [vmem:[#allocation94_spill] sm:$0xff]  ;;  %6505 = vmatpush.bf16.msra.mxu3 %v8900_v27  ;;  %v8133_v23 = vld [vmem:[#allocation3 + $0x30c] sm:$0xf0] }
 0x344   : > { %v4409_v62 = vrot.slane %v4407_v17, 5  ;;  %v3784_v2 = vsel %vm9792_vm4, %v7744_v38, %v3783_v47  ;;  %3847 = vst [vmem:[#allocation3 + $0x450] sm:$0xf] %v3771_v59  ;;  %v6074_v36 = vadd.f32 %v12704_v50, %v5985_v34  ;;  %v7779_v30 = vld [vmem:[#allocation3 + $0x20] sm:$0xf]  ;;  %v8136_v61 = vor.u32 %v8800_v10, %v8133_v23  ;;  %v12712_v10 = vld [vmem:[#allocation109_spill] sm:$0xff] }
 0x345   : > { %v4419_v45 = vrot.slane %v4418_v16, 4  ;;  %v4423_v4 = vrot.slane %v4421_v0, 5  ;;  %3848 = vst [vmem:[#allocation3 + $0x474] sm:$0xf] %v3784_v2  ;;  %v7780_v15 = vor.u32 %v8715_v20, %v7779_v30  ;;  %v11492_v8 = vpop.f32.mrf.mxu0  ;;  %v8811_v3 = vld [vmem:[#allocation3 + $0x340] sm:$0xf0] }
 0x346   : > { %6201 = vmatmul.bf16.gmra.mxu3 %v8116_v22  ;;  %v4410_v53 = vsel %vm9799_vm5, %v4405_v55, %v4409_v62  ;;  %12705 = vst [vmem:[#allocation87_spill] sm:$0xff] %v11492_v8  ;;  %v8151_v55 = vld [vmem:[#allocation3 + $0x320] sm:$0xf]  ;;  %v8724_v44 = vld [vmem:[#allocation3 + $0x88] sm:$0xf0]  ;;  %v12711_v30 = vld [vmem:[#allocation97_spill] sm:$0xff] }
 0x347   : > { %v6162_v25 = vpop.f32.mrf.mxu3  ;;  %v4424_v9 = vsel %vm9799_vm5, %v4419_v45, %v4423_v4  ;;  %4487 = vst [vmem:[#allocation3 + $0x458] sm:$0xf] %v4410_v53  ;;  %v12707_v34 = vld [vmem:[#allocation83_spill] sm:$0xff]  ;;  %v8152_v22 = vor.u32 %v8811_v3, %v8151_v55  ;;  %v12708_v46 = vld [vmem:[#allocation102_spill] sm:$0xff]  ;;  %v8809_v47 = vld [vmem:[#allocation3 + $0x334] sm:$0xf] }
 0x348   : > { %v11490_v56 = vadd.f32 %v6162_v25, %v6074_v36  ;;  %4488 = vst [vmem:[#allocation3 + $0x47c] sm:$0xf] %v4424_v9  ;;  %v5990_v12 = vadd.f32 %v11155_v28, %v12707_v34  ;;  %v7815_v0 = vld [vmem:[#allocation3 + $0x68] sm:$0xf]  ;;  %v8169_v20 = vld [vmem:[#allocation3 + $0x354] sm:$0xf0] }
 0x349   : > { %v11494_v40 = vpop.f32.mrf.mxu1  ;;  %v7816_v59 = vor.u32 %v8724_v44, %v7815_v0  ;;  %v8172_v62 = vor.u32 %v8809_v47, %v8169_v20  ;;  %v8928_v45 = vld [vmem:[#allocation9 + $0x28] sm:$0xff]  ;;  %v11516_v25 = vld [vmem:[%s12368_s4] ss:$0 sm:$0xff]  ;;  %v7851_v55 = vld [vmem:[#allocation3 + $0xb0] sm:$0xf] }
 0x34a   : > { %12706 = vst [vmem:[#allocation81_spill] sm:$0xff] %v11494_v40  ;;  %v6079_v38 = vadd.f32 %v12708_v46, %v5990_v12  ;;  %6884 = vmatpush.bf16.msra.mxu2 %v8928_v45  ;;  %v8187_v4 = vld [vmem:[#allocation3 + $0x368] sm:$0xf]  ;;  %v8820_v2 = vld [vmem:[#allocation3 + $0x388] sm:$0xf0]  ;;  %v5995_v23 = vadd.f32 %v11516_v25, %v12711_v30  ;;  %v8899_v9 = vld [vmem:[#allocation7 + $0x180] sm:$0xff] }
 0x34b   : > { %v8188_v53 = vor.u32 %v8820_v2, %v8187_v4  ;;  %6506 = vmatpush.bf16.msra.mxu3 %v8899_v9  ;;  %v8818_v34 = vld [vmem:[#allocation3 + $0x37c] sm:$0xf]  ;;  %v8205_v12 = vld [vmem:[#allocation3 + $0x39c] sm:$0xf0]  ;;  %v8223_v47 = vld [vmem:[#allocation3 + $0x3b0] sm:$0xf] }
 0x34c   : > { %v8829_v20 = vld [vmem:[#allocation3 + $0x3d0] sm:$0xf0]  ;;  %v7887_v30 = vld [vmem:[#allocation3 + $0xf8] sm:$0xf]  ;;  %v8924_v40 = vld [vmem:[#allocation9 + $0x8] sm:$0xff] }
 0x34d   : > { %6685 = vmatmul.bf16.vlgmr.msra.gmra.mxu1 %v7780_v15  ;;  %v11500_v7 = vpop.f32.mrf.mxu0  ;;  %v8733_v15 = vld [vmem:[#allocation3 + $0xd0] sm:$0xf0]  ;;  %v8224_v45 = vor.u32 %v8829_v20, %v8223_v47  ;;  %v8259_v20 = vld [vmem:[#allocation3 + $0x3f8] sm:$0xf]  ;;  %v8211_v57 = vld [vmem:[#allocation3 + $0x380] sm:$0xf] }
 0x34e   : > { %v7852_v44 = vor.u32 %v8733_v15, %v7851_v55  ;;  %v8823_v33 = vld [vmem:[#allocation3 + $0x3a0] sm:$0xf0] }
 0x34f   : > { %6646 = vmatmul.bf16.gmra.mxu0 %v8136_v61  ;;  %v11496_v1 = vpop.f32.mrf.mxu3  ;;  %v6084_v61 = vadd.f32 %v12712_v10, %v5995_v23  ;;  %v8742_v23 = vld [vmem:[#allocation3 + $0x118] sm:$0xf0]  ;;  %v8827_v10 = vld [vmem:[#allocation3 + $0x3c4] sm:$0xf] }
 0x350   : > { %v7888_v55 = vor.u32 %v8742_v23, %v7887_v30  ;;  %v12719_v30 = vld [vmem:[#allocation121_spill] sm:$0xff] }
 0x351   : > { %v11503_v17 = vpop.f32.mrf.mxu1 }
 0x352   : > { %12709 = vst [vmem:[#allocation89_spill] sm:$0xff] %v11503_v17  ;;  %v7843_v17 = vld [vmem:[#allocation3 + $0xa8] sm:$0xf] }
 0x355   : > { %v11509_v50 = vpop.f32.mrf.mxu0 }
 0x356   : > { %6206 = vmatmul.bf16.gmra.mxu3 %v8152_v22 }
 0x357   : > { %v6167_v16 = vpop.f32.mrf.mxu3 }
 0x358   : > { %v11505_v27 = vadd.f32 %v6167_v16, %v6079_v38  ;;  %v8208_v38 = vor.u32 %v8818_v34, %v8205_v12  ;;  %v8927_v12 = vld [vmem:[#allocation9 + $0x20] sm:$0xff] }
 0x359   : > { %v11511_v36 = vpop.f32.mrf.mxu1  ;;  %6885 = vmatpush.bf16.msra.mxu2 %v8927_v12 }
 0x35a   : > { %12710 = vst [vmem:[#allocation91_spill] sm:$0xff] %v11511_v36 }
 0x35d   : > { %6690 = vmatmul.bf16.gmra.mxu1 %v7816_v59  ;;  %v11523_v46 = vpop.f32.mrf.mxu0  ;;  %v12714_v59 = vld [vmem:[#allocation105_spill] sm:$0xff] }
 0x35f   : > { %6651 = vmatmul.bf16.gmra.mxu0 %v8172_v62  ;;  %v11507_v28 = vpop.f32.mrf.mxu3  ;;  %v6000_v62 = vadd.f32 %v11516_v25, %v12714_v59  ;;  %v8838_v59 = vld [vmem:[#allocation3 + $0x418] sm:$0xf0] }
 0x361   : > { %v11525_v16 = vpop.f32.mrf.mxu1 }
 0x362   : > { %12713 = vst [vmem:[#allocation84_spill] sm:$0xff] %v11525_v16  ;;  %v7807_v16 = vld [vmem:[#allocation3 + $0x60] sm:$0xf] }
 0x365   : > { %v11531_v4 = vpop.f32.mrf.mxu0 }
 0x366   : > { %6211 = vmatmul.bf16.gmra.mxu3 %v8188_v53  ;;  %v12716_v53 = vld [vmem:[#allocation115_spill] sm:$0xff] }
 0x367   : > { %v6172_v3 = vpop.f32.mrf.mxu3  ;;  %v6089_v9 = vadd.f32 %v12716_v53, %v6000_v62  ;;  %v12718_v62 = vld [vmem:[#allocation111_spill] sm:$0xff]  ;;  %v8260_v53 = vor.u32 %v8838_v59, %v8259_v20 }
 0x368   : > { %v11521_v22 = vadd.f32 %v6172_v3, %v6084_v61  ;;  %v8241_v61 = vld [vmem:[#allocation3 + $0x3e4] sm:$0xf0]  ;;  %v8295_v20 = vld [vmem:[#allocation3 + $0x440] sm:$0xf]  ;;  %v8847_v59 = vld [vmem:[#allocation3 + $0x460] sm:$0xf0] }
 0x369   : > { %v11533_v2 = vpop.f32.mrf.mxu1  ;;  %v8244_v34 = vor.u32 %v8827_v10, %v8241_v61  ;;  %v7923_v10 = vld [vmem:[#allocation3 + $0x140] sm:$0xf]  ;;  %v8836_v61 = vld [vmem:[#allocation3 + $0x40c] sm:$0xf]  ;;  %v8296_v49 = vor.u32 %v8847_v59, %v8295_v20  ;;  %v8714_v59 = vld [vmem:[#allocation3 + $0x38] sm:$0xf0] }
 0x36a   : > { %12715 = vst [vmem:[#allocation98_spill] sm:$0xff] %v11533_v2 }
 0x36d   : > { %6695 = vmatmul.bf16.gmra.mxu1 %v7852_v44  ;;  %v11538_v44 = vpop.f32.mrf.mxu0 }
 0x36f   : > { %6656 = vmatmul.bf16.gmra.mxu0 %v8208_v38  ;;  %v11527_v0 = vpop.f32.mrf.mxu3 }
 0x371   : > { %v11540_v38 = vpop.f32.mrf.mxu1 }
 0x372   : > { %12717 = vst [vmem:[#allocation93_spill] sm:$0xff] %v11540_v38 }
 0x376   : > { %6216 = vmatmul.bf16.gmra.mxu3 %v8224_v45  ;;  %v6005_v45 = vadd.f32 %v11516_v25, %v12718_v62 }
 0x378   : > { %v6094_v23 = vadd.f32 %v12719_v30, %v6005_v45 }
 0x379   : > { %v6177_v15 = vpop.f32.mrf.mxu3  ;;  %v11551_v42 = vpop.f32.mrf.mxu1 }
 0x37a   : > { %v11536_v3 = vadd.f32 %v6177_v15, %v6089_v9  ;;  %v8751_v9 = vld [vmem:[#allocation3 + $0x160] sm:$0xf0]  ;;  %12720 = vst [vmem:[#allocation104_spill] sm:$0xff] %v11551_v42  ;;  %v8926_v42 = vld [vmem:[#allocation9 + $0x18] sm:$0xff] }
 0x37b   : > { %v7924_v8 = vor.u32 %v8751_v9, %v7923_v10  ;;  %v12723_v9 = vld [vmem:[#allocation31_spill] sm:$0xff]  ;;  %6886 = vmatpush.bf16.msra.mxu2 %v8926_v42 }
 0x37d   : > { %6700 = vmatmul.bf16.gmra.mxu1 %v7888_v55  ;;  %v8277_v55 = vld [vmem:[#allocation3 + $0x42c] sm:$0xf0] }
 0x37e   : > { %v8280_v52 = vor.u32 %v8836_v61, %v8277_v55  ;;  %v8845_v61 = vld [vmem:[#allocation3 + $0x454] sm:$0xf] }
 0x37f   : > { %6661 = vmatmul.bf16.gmra.mxu0 %v8244_v34  ;;  %v11547_v34 = vpop.f32.mrf.mxu0 }
 0x381   : > { %v11542_v47 = vpop.f32.mrf.mxu3  ;;  %v11559_v63 = vpop.f32.mrf.mxu1 }
 0x382   : > { %12722 = vst [vmem:[#allocation47_spill] sm:$0xff] %v11559_v63 }
 0x386   : > { %6221 = vmatmul.bf16.gmra.mxu3 %v8260_v53  ;;  %v12721_v53 = vld [vmem:[#allocation117_spill] sm:$0xff] }
 0x387   : > { %v6010_v45 = vadd.f32 %v11516_v25, %v12721_v53  ;;  %v11557_v30 = vpop.f32.mrf.mxu0 }
 0x389   : > { %v6182_v15 = vpop.f32.mrf.mxu3  ;;  %v11566_v20 = vpop.f32.mrf.mxu1 }
 0x38a   : > { %v11549_v12 = vadd.f32 %v6182_v15, %v6094_v23  ;;  %v8760_v23 = vld [vmem:[#allocation3 + $0x1a8] sm:$0xf0]  ;;  %v6099_v15 = vadd.f32 %v12723_v9, %v6010_v45  ;;  %12725 = vst [vmem:[#allocation45_spill] sm:$0xff] %v11566_v20  ;;  %v7771_v45 = vld [vmem:[#allocation3 + $0x18] sm:$0xf]  ;;  %v12727_v9 = vld [vmem:[#allocation123_spill] sm:$0xff] }
 0x38b   : > { %v6015_v63 = vadd.f32 %v11516_v25, %v12727_v9  ;;  %v7772_v38 = vor.u32 %v8714_v59, %v7771_v45  ;;  %v8723_v20 = vld [vmem:[#allocation3 + $0x80] sm:$0xf0]  ;;  %v12733_v9 = vld [vmem:[#allocation21_spill] sm:$0xff]  ;;  %v8778_v45 = vld [vmem:[#allocation3 + $0x238] sm:$0xf0] }
 0x38c   : > { %v7808_v59 = vor.u32 %v8723_v20, %v7807_v16 }
 0x38d   : > { %6705 = vmatmul.bf16.gmra.mxu1 %v7924_v8  ;;  %v7959_v8 = vld [vmem:[#allocation3 + $0x188] sm:$0xf] }
 0x38e   : > { %v7960_v58 = vor.u32 %v8760_v23, %v7959_v8  ;;  %v12728_v23 = vld [vmem:[#allocation40_spill] sm:$0xff] }
 0x38f   : > { %6666 = vmatmul.bf16.gmra.mxu0 %v8280_v52  ;;  %v8313_v52 = vld [vmem:[#allocation3 + $0x474] sm:$0xf0]  ;;  %v11564_v53 = vpop.f32.mrf.mxu0 }
 0x390   : > { %v8316_v26 = vor.u32 %v8845_v61, %v8313_v52  ;;  %v7995_v61 = vld [vmem:[#allocation3 + $0x1d0] sm:$0xf] }
 0x391   : > { %v11553_v62 = vpop.f32.mrf.mxu3 }
 0x396   : > { %6226 = vmatmul.bf16.gmra.mxu3 %v8296_v49 }
 0x399   : > { %v6187_v10 = vpop.f32.mrf.mxu3 }
 0x39a   : > { %v11562_v55 = vadd.f32 %v6187_v10, %v6099_v15  ;;  %v8769_v15 = vld [vmem:[#allocation3 + $0x1f0] sm:$0xf0]  ;;  %v11573_v10 = vpop.f32.mrf.mxu1 }
 0x39b   : > { %12729 = vst [vmem:[#allocation57_spill] sm:$0xff] %v11573_v10  ;;  %v7996_v42 = vor.u32 %v8769_v15, %v7995_v61 }
 0x39c   : > { %12724 = vst [vmem:[#allocation69_spill] sm:$0xff] %v11562_v55 }
 0x39d   : > { %6710 = vmatmul.bf16.gmra.mxu1 %v7960_v58  ;;  %v6104_v58 = vadd.f32 %v12728_v23, %v6015_v63  ;;  %v8031_v63 = vld [vmem:[#allocation3 + $0x218] sm:$0xf] }
 0x39e   : > { %v12734_v23 = vld [vmem:[#allocation22_spill] sm:$0xff]  ;;  %v8032_v15 = vor.u32 %v8778_v45, %v8031_v63 }
 0x39f   : > { %6671 = vmatmul.bf16.gmra.mxu0 %v8316_v26  ;;  %v8067_v45 = vld [vmem:[#allocation3 + $0x260] sm:$0xf] }
 0x3a1   : > { %v11568_v49 = vpop.f32.mrf.mxu3 }
 0x3a2   : > { %12726 = vst [vmem:[#allocation43_spill] sm:$0xff] %v11568_v49  ;;  %v11579_v2 = vpop.f32.mrf.mxu1 }
 0x3a3   : > { %12732 = vst [vmem:[#allocation73_spill] sm:$0xff] %v11579_v2  ;;  %v8732_v2 = vld [vmem:[#allocation3 + $0xc8] sm:$0xf0] }
 0x3a4   : > { %v7844_v20 = vor.u32 %v8732_v2, %v7843_v17  ;;  %v8741_v17 = vld [vmem:[#allocation3 + $0x110] sm:$0xf0] }
 0x3a5   : > { %v12744_v2 = vld [vmem:[#allocation41_spill] sm:$0xff] }
 0x3a6   : > { %6507 = vmatmul.bf16.vlgmr.msra.gmra.mxu3 %v7772_v38  ;;  %v6020_v38 = vadd.f32 %v11516_v25, %v12733_v9  ;;  %v12738_v9 = vld [vmem:[#allocation36_spill] sm:$0xff] }
 0x3a7   : > { %v6025_v16 = vadd.f32 %v11516_v25, %v12738_v9  ;;  %v7879_v9 = vld [vmem:[#allocation3 + $0xf0] sm:$0xf] }
 0x3a8   : > { %v6109_v10 = vadd.f32 %v12734_v23, %v6020_v38  ;;  %v8787_v38 = vld [vmem:[#allocation3 + $0x280] sm:$0xf0] }
 0x3a9   : > { %v6192_v8 = vpop.f32.mrf.mxu3 }
 0x3aa   : > { %v11575_v26 = vadd.f32 %v6192_v8, %v6104_v58  ;;  %v8925_v8 = vld [vmem:[#allocation9 + $0x10] sm:$0xff]  ;;  %v11586_v61 = vpop.f32.mrf.mxu1 }
 0x3ab   : > { %12736 = vst [vmem:[#allocation83_spill] sm:$0xff] %v11586_v61  ;;  %6887 = vmatpush.bf16.msra.mxu2 %v8925_v8  ;;  %v11597_v8 = vpop.f32.mrf.mxu2 }
 0x3ac   : > { %12730 = vst [vmem:[#allocation59_spill] sm:$0xff] %v11575_v26 }
 0x3ad   : > { %6715 = vmatmul.bf16.gmra.mxu1 %v7996_v42 }
 0x3af   : > { %6888 = vmatpush.bf16.msra.mxu2 %v8924_v40 }
 0x3b1   : > { %v11577_v52 = vpop.f32.mrf.mxu3 }
 0x3b2   : > { %12731 = vst [vmem:[#allocation80_spill] sm:$0xff] %v11577_v52  ;;  %v12751_v52 = vld [vmem:[#allocation68_spill] sm:$0xff] }
 0x3b6   : > { %6512 = vmatmul.bf16.gmra.mxu3 %v7808_v59  ;;  %v11592_v59 = vpop.f32.mrf.mxu1 }
 0x3b7   : > { %12739 = vst [vmem:[#allocation97_spill] sm:$0xff] %v11592_v59  ;;  %v7880_v59 = vor.u32 %v8741_v17, %v7879_v9  ;;  %v12749_v9 = vld [vmem:[#allocation34_spill] sm:$0xff] }
 0x3b9   : > { %v6197_v36 = vpop.f32.mrf.mxu3 }
 0x3ba   : > { %v11584_v58 = vadd.f32 %v6197_v36, %v6109_v10  ;;  %v12740_v36 = vld [vmem:[#allocation28_spill] sm:$0xff] }
 0x3bb   : > { %v6114_v10 = vadd.f32 %v12740_v36, %v6025_v16  ;;  %v8796_v16 = vld [vmem:[#allocation3 + $0x2c8] sm:$0xf0]  ;;  %v12745_v36 = vld [vmem:[#allocation51_spill] sm:$0xff] }
 0x3bc   : > { %12735 = vst [vmem:[#allocation94_spill] sm:$0xff] %v11584_v58 }
 0x3bd   : > { %6720 = vmatmul.bf16.gmra.mxu1 %v8032_v15  ;;  %v8068_v15 = vor.u32 %v8787_v38, %v8067_v45  ;;  %v11606_v38 = vpop.f32.mrf.mxu2 }
 0x3be   : > { %v11599_v61 = vpop.f32.mrf.mxu1 }
 0x3bf   : > { %12742 = vst [vmem:[#allocation105_spill] sm:$0xff] %v11599_v61 }
 0x3c1   : > { %v11588_v42 = vpop.f32.mrf.mxu3 }
 0x3c2   : > { %12737 = vst [vmem:[#allocation102_spill] sm:$0xff] %v11588_v42 }
 0x3c6   : > { %6517 = vmatmul.bf16.gmra.mxu3 %v7844_v20  ;;  %v6030_v20 = vadd.f32 %v11516_v25, %v12744_v2  ;;  %v11610_v61 = vpop.f32.mrf.mxu1  ;;  %v8750_v2 = vld [vmem:[#allocation3 + $0x158] sm:$0xf0] }
 0x3c7   : > { %12747 = vst [vmem:[#allocation121_spill] sm:$0xff] %v11610_v61 }
 0x3c8   : > { %v6119_v58 = vadd.f32 %v12745_v36, %v6030_v20  ;;  %v7915_v36 = vld [vmem:[#allocation3 + $0x138] sm:$0xf] }
 0x3c9   : > { %v6202_v63 = vpop.f32.mrf.mxu3 }
 0x3ca   : > { %v11595_v23 = vadd.f32 %v6202_v63, %v6114_v10  ;;  %v8103_v63 = vld [vmem:[#allocation3 + $0x2a8] sm:$0xf] }
 0x3cc   : > { %12741 = vst [vmem:[#allocation109_spill] sm:$0xff] %v11595_v23 }
 0x3cd   : > { %6725 = vmatmul.bf16.gmra.mxu1 %v8068_v15  ;;  %v8104_v15 = vor.u32 %v8796_v16, %v8103_v63  ;;  %v7916_v16 = vor.u32 %v8750_v2, %v7915_v36  ;;  %v12756_v2 = vld [vmem:[#allocation62_spill] sm:$0xff] }
 0x3ce   : > { %v11621_v63 = vpop.f32.mrf.mxu1 }
 0x3cf   : > { %12752 = vst [vmem:[#allocation31_spill] sm:$0xff] %v11621_v63 }
 0x3d1   : > { %v11601_v42 = vpop.f32.mrf.mxu3 }
 0x3d2   : > { %12743 = vst [vmem:[#allocation115_spill] sm:$0xff] %v11601_v42  ;;  %v12748_v42 = vld [vmem:[#allocation32_spill] sm:$0xff] }
 0x3d3   : > { %v6032_v23 = vadd.f32 %v11516_v25, %v12748_v42  ;;  %v8805_v42 = vld [vmem:[#allocation3 + $0x310] sm:$0xf0] }
 0x3d6   : > { %6522 = vmatmul.bf16.gmra.mxu3 %v7880_v59  ;;  %v6121_v59 = vadd.f32 %v12749_v9, %v6032_v23 }
 0x3d9   : > { %v6207_v10 = vpop.f32.mrf.mxu3 }
 0x3da   : > { %v11608_v45 = vadd.f32 %v6207_v10, %v6119_v58  ;;  %v6035_v58 = vadd.f32 %v11516_v25, %v12751_v52  ;;  %v11619_v10 = vpop.f32.mrf.mxu2  ;;  %v11630_v52 = vpop.f32.mrf.mxu1 }
 0x3dc   : > { %12746 = vst [vmem:[#allocation111_spill] sm:$0xff] %v11608_v45  ;;  %v8139_v45 = vld [vmem:[#allocation3 + $0x2f0] sm:$0xf] }
 0x3dd   : > { %6730 = vmatmul.bf16.gmra.mxu1 %v8104_v15  ;;  %v12753_v15 = vld [vmem:[#allocation42_spill] sm:$0xff]  ;;  %v8140_v9 = vor.u32 %v8805_v42, %v8139_v45 }
 0x3de   : > { %v6124_v61 = vadd.f32 %v12753_v15, %v6035_v58  ;;  %v7951_v58 = vld [vmem:[#allocation3 + $0x180] sm:$0xf] }
 0x3e1   : > { %v6209_v17 = vpop.f32.mrf.mxu3 }
 0x3e2   : > { %v11615_v20 = vadd.f32 %v6209_v17, %v6121_v59  ;;  %v12755_v59 = vld [vmem:[#allocation35_spill] sm:$0xff]  ;;  %v11637_v42 = vpop.f32.mrf.mxu1 }
 0x3e3   : > { %v6037_v17 = vadd.f32 %v11516_v25, %v12755_v59 }
 0x3e4   : > { %12750 = vst [vmem:[#allocation117_spill] sm:$0xff] %v11615_v20  ;;  %v11628_v20 = vpop.f32.mrf.mxu2 }
 0x3e5   : > { %v6126_v36 = vadd.f32 %v12756_v2, %v6037_v17  ;;  %v8923_v17 = vld [vmem:[#allocation9] sm:$0xff] }
 0x3e6   : > { %6527 = vmatmul.bf16.gmra.mxu3 %v7916_v16  ;;  %v8759_v16 = vld [vmem:[#allocation3 + $0x1a0] sm:$0xf0]  ;;  %6889 = vmatpush.bf16.msra.mxu2 %v8923_v17 }
 0x3e7   : > { %v7952_v15 = vor.u32 %v8759_v16, %v7951_v58 }
 0x3e9   : > { %v6212_v40 = vpop.f32.mrf.mxu3 }
 0x3ea   : > { %v11624_v23 = vadd.f32 %v6212_v40, %v6124_v61  ;;  %v8175_v61 = vld [vmem:[#allocation3 + $0x338] sm:$0xf]  ;;  %v8814_v40 = vld [vmem:[#allocation3 + $0x358] sm:$0xf0]  ;;  %v11647_v58 = vpop.f32.mrf.mxu1 }
 0x3ec   : > { %12754 = vst [vmem:[#allocation123_spill] sm:$0xff] %v11624_v23  ;;  %v11635_v45 = vpop.f32.mrf.mxu2  ;;  %v8176_v23 = vor.u32 %v8814_v40, %v8175_v61 }
 0x3ed   : > { %6735 = vmatmul.bf16.gmra.mxu1 %v8140_v9 }
 0x3f1   : > { %v6214_v63 = vpop.f32.mrf.mxu3 }
 0x3f2   : > { %v11633_v26 = vadd.f32 %v6214_v63, %v6126_v36  ;;  %v8768_v63 = vld [vmem:[#allocation3 + $0x1e8] sm:$0xf0] }
 0x3f4   : > { %12757 = vst [vmem:[#allocation40_spill] sm:$0xff] %v11633_v26  ;;  %v11642_v36 = vpop.f32.mrf.mxu2 }
 0x3f5   : > { %12759 = vst [vmem:[#allocation22_spill] sm:$0xff] %v11642_v36 }
 0x3f6   : > { %6532 = vmatmul.bf16.gmra.mxu3 %v7952_v15  ;;  %v7987_v15 = vld [vmem:[#allocation3 + $0x1c8] sm:$0xf] }
 0x3f7   : > { %v7988_v26 = vor.u32 %v8768_v63, %v7987_v15 }
 0x3f9   : > { %v6217_v9 = vpop.f32.mrf.mxu3 }
 0x3fa   : > { %v11640_v59 = vadd.f32 %v6217_v9, %v11176_v54  ;;  %v11654_v9 = vpop.f32.mrf.mxu1 }
 0x3fc   : > { %12758 = vst [vmem:[#allocation21_spill] sm:$0xff] %v11640_v59  ;;  %v11652_v40 = vpop.f32.mrf.mxu2 }
 0x3fd   : > { %6740 = vmatmul.bf16.gmra.mxu1 %v8176_v23  ;;  %v8212_v23 = vor.u32 %v8823_v33, %v8211_v57  ;;  %12762 = vst [vmem:[#allocation41_spill] sm:$0xff] %v11652_v40 }
 0x401   : > { %v6219_v2 = vpop.f32.mrf.mxu3 }
 0x402   : > { %v11645_v16 = vadd.f32 %v6219_v2, %v11223_v21  ;;  %v8023_v21 = vld [vmem:[#allocation3 + $0x210] sm:$0xf]  ;;  %v8777_v2 = vld [vmem:[#allocation3 + $0x230] sm:$0xf0]  ;;  %v11661_v15 = vpop.f32.mrf.mxu1 }
 0x403   : > { %v8024_v63 = vor.u32 %v8777_v2, %v8023_v21  ;;  %v8786_v21 = vld [vmem:[#allocation3 + $0x278] sm:$0xf0]  ;;  %v12768_v2 = vld [vmem:[#allocation95_spill] sm:$0xff] }
 0x404   : > { %12760 = vst [vmem:[#allocation36_spill] sm:$0xff] %v11645_v16 }
 0x406   : > { %6537 = vmatmul.bf16.gmra.mxu3 %v7988_v26  ;;  %v11659_v26 = vpop.f32.mrf.mxu2 }
 0x407   : > { %12764 = vst [vmem:[#allocation32_spill] sm:$0xff] %v11659_v26 }
 0x409   : > { %v6222_v54 = vpop.f32.mrf.mxu3 }
 0x40a   : > { %v11650_v61 = vadd.f32 %v6222_v54, %v11250_v35  ;;  %v8247_v35 = vld [vmem:[#allocation3 + $0x3c8] sm:$0xf]  ;;  %v8832_v54 = vld [vmem:[#allocation3 + $0x3e8] sm:$0xf0] }
 0x40c   : > { %12761 = vst [vmem:[#allocation28_spill] sm:$0xff] %v11650_v61  ;;  %v12766_v61 = vld [vmem:[#allocation55_spill] sm:$0xff] }
 0x40d   : > { %6745 = vmatmul.bf16.gmra.mxu1 %v8212_v23  ;;  %v8248_v23 = vor.u32 %v8832_v54, %v8247_v35  ;;  %v5977_v59 = vadd.f32 %v11516_v25, %v12766_v61  ;;  %v12771_v61 = vld [vmem:[#allocation50_spill] sm:$0xff] }
 0x40e   : > { %v11668_v40 = vpop.f32.mrf.mxu2 }
 0x40f   : > { %12767 = vst [vmem:[#allocation68_spill] sm:$0xff] %v11668_v40  ;;  %v12772_v40 = vld [vmem:[#allocation100_spill] sm:$0xff] }
 0x411   : > { %v6224_v17 = vpop.f32.mrf.mxu3 }
 0x412   : > { %v11657_v16 = vadd.f32 %v6224_v17, %v11296_v31  ;;  %v11670_v31 = vpop.f32.mrf.mxu1 }
 0x414   : > { %12763 = vst [vmem:[#allocation51_spill] sm:$0xff] %v11657_v16  ;;  %v12769_v16 = vld [vmem:[#allocation74_spill] sm:$0xff] }
 0x415   : > { %v6066_v26 = vadd.f32 %v12769_v16, %v5977_v59 }
 0x416   : > { %6542 = vmatmul.bf16.gmra.mxu3 %v8024_v63  ;;  %v6242_v63 = vadd.f32 %v12768_v2, %v11402_v43  ;;  %v11681_v37 = vpop.f32.mrf.mxu2  ;;  %v12773_v43 = vld [vmem:[#allocation46_spill] sm:$0xff] }
 0x417   : > { %v6155_v35 = vadd.f32 %v11446_v18, %v6066_v26  ;;  %v12775_v26 = vld [vmem:[#allocation66_spill] sm:$0xff] }
 0x419   : > { %v6227_v33 = vpop.f32.mrf.mxu3  ;;  %v6244_v55 = vadd.f32 %v12772_v40, %v6155_v35  ;;  %v8795_v35 = vld [vmem:[#allocation3 + $0x2c0] sm:$0xf0] }
 0x41a   : > { %v11664_v57 = vadd.f32 %v6227_v33, %v11324_v5  ;;  %v8059_v5 = vld [vmem:[#allocation3 + $0x258] sm:$0xf]  ;;  %v6331_v33 = vadd.f32 %v12771_v61, %v6242_v63  ;;  %v11684_v16 = vpop.f32.mrf.mxu1  ;;  %v12777_v61 = vld [vmem:[#allocation103_spill] sm:$0xff] }
 0x41b   : > { %v8060_v54 = vor.u32 %v8786_v21, %v8059_v5  ;;  %v5982_v21 = vadd.f32 %v11516_v25, %v12775_v26  ;;  %v12776_v5 = vld [vmem:[#allocation54_spill] sm:$0xff] }
 0x41c   : > { %12765 = vst [vmem:[#allocation34_spill] sm:$0xff] %v11664_v57  ;;  %v8841_v57 = vld [vmem:[#allocation3 + $0x430] sm:$0xf0]  ;;  %v6420_v2 = vadd.f32 %v12773_v43, %v6331_v33  ;;  %v12778_v33 = vld [vmem:[#allocation88_spill] sm:$0xff]  ;;  %v8095_v43 = vld [vmem:[#allocation3 + $0x2a0] sm:$0xf] }
 0x41d   : > { %6750 = vmatmul.bf16.gmra.mxu1 %v8248_v23  ;;  %v8283_v23 = vld [vmem:[#allocation3 + $0x410] sm:$0xf]  ;;  %v8319_v26 = vld [vmem:[#allocation3 + $0x458] sm:$0xf] }
 0x41e   : > { %v8284_v59 = vor.u32 %v8841_v57, %v8283_v23  ;;  %v6071_v57 = vadd.f32 %v12778_v33, %v5982_v21  ;;  %v8850_v21 = vld [vmem:[#allocation3 + $0x478] sm:$0xf0] }
 0x421   : > { %v6229_v17 = vpop.f32.mrf.mxu3 }
 0x422   : > { %v11676_v49 = vadd.f32 %v6229_v17, %v11367_v29  ;;  %v12774_v17 = vld [vmem:[#allocation38_spill] sm:$0xff] }
 0x423   : > { %v6333_v18 = vadd.f32 %v12774_v17, %v6244_v55 }
 0x424   : > { %12770 = vst [vmem:[#allocation42_spill] sm:$0xff] %v11676_v49  ;;  %v6247_v49 = vadd.f32 %v12777_v61, %v11469_v11 }
 0x426   : > { %6547 = vmatmul.bf16.gmra.mxu3 %v8060_v54  ;;  %v6422_v54 = vadd.f32 %v12776_v5, %v6333_v18  ;;  %v12779_v18 = vld [vmem:[#allocation79_spill] sm:$0xff] }
 0x427   : > { %v6336_v11 = vadd.f32 %v12779_v18, %v6247_v49  ;;  %v12780_v5 = vld [vmem:[#allocation107_spill] sm:$0xff]  ;;  %v8804_v18 = vld [vmem:[#allocation3 + $0x308] sm:$0xf0] }
 0x429   : > { %v6508_v36 = vpop.f32.mrf.mxu3 }
 0x42a   : > { %v6509_v29 = vadd.f32 %v6508_v36, %v6420_v2  ;;  %v6160_v36 = vadd.f32 %v11473_v51, %v6071_v57  ;;  %v11695_v2 = vpop.f32.mrf.mxu2  ;;  %v12781_v57 = vld [vmem:[#allocation76_spill] sm:$0xff] }
 0x42c   : > { %v6598_v63 = vadd.f32 %v11500_v7, %v6509_v29  ;;  %v8096_v7 = vor.u32 %v8795_v35, %v8095_v43  ;;  %v11699_v29 = vpop.f32.mrf.mxu1  ;;  %v12782_v35 = vld [vmem:[#allocation48_spill] sm:$0xff]  ;;  %v12783_v43 = vld [vmem:[#allocation78_spill] sm:$0xff] }
 0x42d   : > { %6755 = vmatmul.bf16.gmra.mxu1 %v8284_v59  ;;  %v5987_v49 = vadd.f32 %v11516_v25, %v12783_v43 }
 0x42e   : > { %v6687_v55 = vadd.f32 %v11630_v52, %v6598_v63  ;;  %v6425_v52 = vadd.f32 %v12781_v57, %v6336_v11  ;;  %v8320_v63 = vor.u32 %v8850_v21, %v8319_v26  ;;  %v12784_v11 = vld [vmem:[#allocation110_spill] sm:$0xff]  ;;  %v12785_v21 = vld [vmem:[#allocation99_spill] sm:$0xff] }
 0x42f   : > { %v6252_v26 = vadd.f32 %v12784_v11, %v11490_v56 }
 0x431   : > { %v6510_v40 = vpop.f32.mrf.mxu3 }
 0x432   : > { %v6511_v23 = vadd.f32 %v6510_v40, %v6422_v54  ;;  %v6249_v54 = vadd.f32 %v12780_v5, %v6160_v36  ;;  %v6766_v40 = vmax.f32 %v6687_v55, 0.0  ;;  %v6076_v5 = vadd.f32 %v12785_v21, %v5987_v49 }
 0x434   : > { %v6600_v59 = vadd.f32 %v11509_v50, %v6511_v23  ;;  %v6338_v23 = vadd.f32 %v12782_v35, %v6249_v54  ;;  %v11712_v36 = vpop.f32.mrf.mxu1 }
 0x436   : > { %v6689_v17 = vadd.f32 %v11637_v42, %v6600_v59  ;;  %6552 = vmatmul.bf16.gmra.mxu3 %v8096_v7  ;;  %v11706_v42 = vpop.f32.mrf.mxu0  ;;  %v11710_v59 = vpop.f32.mrf.mxu2  ;;  %v6427_v7 = vadd.f32 %v11281_v48, %v6338_v23  ;;  %v12786_v48 = vld [vmem:[#allocation86_spill] sm:$0xff] }
 0x438   : > { %v6767_v51 = vmax.f32 %v6689_v17, 0.0 }
 0x439   : > { %v6513_v61 = vpop.f32.mrf.mxu3 }
 0x43a   : > { %v6798_v33 = vpack.c.bf16 %v6767_v51, %v6766_v40  ;;  %v6514_v50 = vadd.f32 %v6513_v61, %v6425_v52  ;;  %v8131_v40 = vld [vmem:[#allocation3 + $0x2e8] sm:$0xf]  ;;  %v6165_v51 = vadd.f32 %v11496_v1, %v6076_v5  ;;  %v6341_v52 = vadd.f32 %v12786_v48, %v6252_v26 }
 0x43b   : > { %v8132_v57 = vor.u32 %v8804_v18, %v8131_v40  ;;  %v8813_v40 = vld [vmem:[#allocation3 + $0x350] sm:$0xf0] }
 0x43c   : > { %6890 = vmatmul.bf16.vlgmr.msra.gmra.mxu2 %v6798_v33  ;;  %v6603_v55 = vadd.f32 %v11523_v46, %v6514_v50  ;;  %v12787_v50 = vld [vmem:[#allocation113_spill] sm:$0xff]  ;;  %v11729_v49 = vpop.f32.mrf.mxu1 }
 0x43d   : > { %6760 = vmatmul.bf16.gmra.mxu1 %v8320_v63  ;;  %v6254_v56 = vadd.f32 %v12787_v50, %v6165_v51  ;;  %v12790_v51 = vld [vmem:[#allocation116_spill] sm:$0xff] }
 0x43e   : > { %v6692_v61 = vadd.f32 %v11647_v58, %v6603_v55  ;;  %v11724_v63 = vpop.f32.mrf.mxu0  ;;  %v11727_v35 = vpop.f32.mrf.mxu2  ;;  %v6430_v58 = vadd.f32 %v11322_v41, %v6341_v52  ;;  %v6257_v41 = vadd.f32 %v12790_v51, %v11505_v27  ;;  %v12793_v27 = vld [vmem:[#allocation119_spill] sm:$0xff]  ;;  %v12796_v51 = vld [vmem:[#allocation122_spill] sm:$0xff] }
 0x440   : > { %v6768_v23 = vmax.f32 %v6692_v61, 0.0  ;;  %v12791_v61 = vld [vmem:[#allocation106_spill] sm:$0xff] }
 0x441   : > { %v6515_v17 = vpop.f32.mrf.mxu3 }
 0x442   : > { %v6516_v54 = vadd.f32 %v6515_v17, %v6427_v7  ;;  %v12789_v17 = vld [vmem:[#allocation92_spill] sm:$0xff] }
 0x443   : > { %v5992_v18 = vadd.f32 %v11516_v25, %v12789_v17 }
 0x444   : > { %v6605_v33 = vadd.f32 %v11531_v4, %v6516_v54  ;;  %v8167_v54 = vld [vmem:[#allocation3 + $0x330] sm:$0xf]  ;;  %v11744_v48 = vpop.f32.mrf.mxu1 }
 0x445   : > { %v8168_v50 = vor.u32 %v8813_v40, %v8167_v54 }
 0x446   : > { %v6694_v46 = vadd.f32 %v11654_v9, %v6605_v33  ;;  %6557 = vmatmul.bf16.gmra.mxu3 %v8132_v57  ;;  %v12788_v9 = vld [vmem:[#allocation52_spill] sm:$0xff]  ;;  %v11737_v21 = vpop.f32.mrf.mxu0  ;;  %v6081_v33 = vadd.f32 %v12791_v61, %v5992_v18  ;;  %v11742_v57 = vpop.f32.mrf.mxu2 }
 0x447   : > { %v6343_v7 = vadd.f32 %v12788_v9, %v6254_v56  ;;  %v12797_v61 = vld [vmem:[#allocation112_spill] sm:$0xff] }
 0x448   : > { %v6769_v43 = vmax.f32 %v6694_v46, 0.0  ;;  %v6170_v52 = vadd.f32 %v11507_v28, %v6081_v33 }
 0x449   : > { %v6518_v1 = vpop.f32.mrf.mxu3  ;;  %v6432_v26 = vadd.f32 %v11379_v6, %v6343_v7 }
 0x44a   : > { %v6799_v4 = vpack.c.bf16 %v6769_v43, %v6768_v23  ;;  %v6519_v55 = vadd.f32 %v6518_v1, %v6430_v58  ;;  %v12792_v23 = vld [vmem:[#allocation58_spill] sm:$0xff]  ;;  %v6259_v1 = vadd.f32 %v12793_v27, %v6170_v52  ;;  %v12798_v27 = vld [vmem:[#allocation125_spill] sm:$0xff] }
 0x44b   : > { %v6346_v43 = vadd.f32 %v12792_v23, %v6257_v41  ;;  %v6262_v41 = vadd.f32 %v12796_v51, %v11521_v22  ;;  %v8822_v52 = vld [vmem:[#allocation3 + $0x398] sm:$0xf0] }
 0x44c   : > { %6895 = vmatmul.bf16.gmra.mxu2 %v6799_v4  ;;  %v6608_v11 = vadd.f32 %v11538_v44, %v6519_v55 }
 0x44d   : > { %v6435_v9 = vadd.f32 %v11422_v19, %v6346_v43  ;;  %v8203_v19 = vld [vmem:[#allocation3 + $0x378] sm:$0xf]  ;;  %v6351_v22 = vadd.f32 %v11246_v13, %v6262_v41 }
 0x44e   : > { %v6697_v44 = vadd.f32 %v11661_v15, %v6608_v11  ;;  %v11753_v17 = vpop.f32.mrf.mxu0  ;;  %v11755_v28 = vpop.f32.mrf.mxu2  ;;  %v12795_v11 = vld [vmem:[#allocation101_spill] sm:$0xff] }
 0x450   : > { %v6770_v58 = vmax.f32 %v6697_v44, 0.0 }
 0x451   : > { %v6520_v5 = vpop.f32.mrf.mxu3 }
 0x452   : > { %v6521_v46 = vadd.f32 %v6520_v5, %v6432_v26  ;;  %v5997_v26 = vadd.f32 %v11516_v25, %v12795_v11 }
 0x454   : > { %v6610_v6 = vadd.f32 %v11547_v34, %v6521_v46  ;;  %v12794_v34 = vld [vmem:[#allocation65_spill] sm:$0xff]  ;;  %v6086_v33 = vadd.f32 %v12797_v61, %v5997_v26 }
 0x455   : > { %v6348_v18 = vadd.f32 %v12794_v34, %v6259_v1 }
 0x456   : > { %v6699_v56 = vadd.f32 %v11670_v31, %v6610_v6  ;;  %6562 = vmatmul.bf16.gmra.mxu3 %v8168_v50  ;;  %v11758_v31 = vpop.f32.mrf.mxu1  ;;  %v6175_v44 = vadd.f32 %v11527_v0, %v6086_v33  ;;  %v11770_v23 = vpop.f32.mrf.mxu0 }
 0x457   : > { %v6437_v54 = vadd.f32 %v11458_v24, %v6348_v18 }
 0x458   : > { %v6771_v4 = vmax.f32 %v6699_v56, 0.0  ;;  %v8204_v56 = vor.u32 %v8822_v52, %v8203_v19  ;;  %v6264_v1 = vadd.f32 %v12798_v27, %v6175_v44  ;;  %v12802_v52 = vld [vmem:[#allocation37_spill] sm:$0xff]  ;;  %v12803_v27 = vld [vmem:[#allocation114_spill] sm:$0xff] }
 0x459   : > { %v6523_v55 = vpop.f32.mrf.mxu3 }
 0x45a   : > { %v6800_v7 = vpack.c.bf16 %v6771_v4, %v6770_v58  ;;  %v6524_v15 = vadd.f32 %v6523_v55, %v6435_v9  ;;  %v6353_v9 = vadd.f32 %v11283_v60, %v6264_v1  ;;  %v12801_v60 = vld [vmem:[#allocation118_spill] sm:$0xff] }
 0x45c   : > { %6900 = vmatmul.bf16.gmra.mxu2 %v6800_v7  ;;  %v6613_v5 = vadd.f32 %v11557_v30, %v6524_v15  ;;  %v11772_v30 = vpop.f32.mrf.mxu2  ;;  %v12799_v7 = vld [vmem:[#allocation108_spill] sm:$0xff]  ;;  %v6442_v18 = vadd.f32 %v11606_v38, %v6353_v9 }
 0x45e   : > { %v6702_v6 = vadd.f32 %v11684_v16, %v6613_v5  ;;  %v11776_v43 = vpop.f32.mrf.mxu1  ;;  %v6440_v16 = vadd.f32 %v11597_v8, %v6351_v22  ;;  %v11783_v15 = vpop.f32.mrf.mxu0  ;;  %v8239_v8 = vld [vmem:[#allocation3 + $0x3c0] sm:$0xf]  ;;  %v8831_v5 = vld [vmem:[#allocation3 + $0x3e0] sm:$0xf0] }
 0x460   : > { %v6772_v58 = vmax.f32 %v6702_v6, 0.0 }
 0x461   : > { %v6525_v40 = vpop.f32.mrf.mxu3 }
 0x462   : > { %v6526_v46 = vadd.f32 %v6525_v40, %v6437_v54  ;;  %v12800_v54 = vld [vmem:[#allocation126_spill] sm:$0xff] }
 0x463   : > { %v6267_v40 = vadd.f32 %v12800_v54, %v11536_v3 }
 0x464   : > { %v6615_v50 = vadd.f32 %v11564_v53, %v6526_v46  ;;  %v11785_v13 = vpop.f32.mrf.mxu2 }
 0x465   : > { %v6356_v46 = vadd.f32 %v11317_v39, %v6267_v40  ;;  %v6007_v39 = vadd.f32 %v11516_v25, %v12803_v27  ;;  %v12813_v27 = vld [vmem:[#allocation43_spill] sm:$0xff] }
 0x466   : > { %v6704_v24 = vadd.f32 %v11699_v29, %v6615_v50  ;;  %6567 = vmatmul.bf16.gmra.mxu3 %v8204_v56  ;;  %v6002_v29 = vadd.f32 %v11516_v25, %v12799_v7  ;;  %v11789_v11 = vpop.f32.mrf.mxu1  ;;  %v11800_v3 = vpop.f32.mrf.mxu0 }
 0x468   : > { %v6773_v0 = vmax.f32 %v6704_v24, 0.0  ;;  %v6091_v19 = vadd.f32 %v12801_v60, %v6002_v29 }
 0x469   : > { %v6528_v4 = vpop.f32.mrf.mxu3 }
 0x46a   : > { %v6801_v53 = vpack.c.bf16 %v6773_v0, %v6772_v58  ;;  %v6529_v55 = vadd.f32 %v6528_v4, %v6440_v16  ;;  %v6180_v41 = vadd.f32 %v11542_v47, %v6091_v19  ;;  %v6445_v47 = vadd.f32 %v11619_v10, %v6356_v46  ;;  %v8275_v4 = vld [vmem:[#allocation3 + $0x408] sm:$0xf]  ;;  %v8840_v16 = vld [vmem:[#allocation3 + $0x428] sm:$0xf0]  ;;  %v12809_v46 = vld [vmem:[#allocation22_spill] sm:$0xff] }
 0x46c   : > { %6905 = vmatmul.bf16.gmra.mxu2 %v6801_v53  ;;  %v6618_v34 = vadd.f32 %v11706_v42, %v6529_v55  ;;  %v8240_v42 = vor.u32 %v8831_v5, %v8239_v8  ;;  %v6269_v44 = vadd.f32 %v12802_v52, %v6180_v41  ;;  %v11802_v24 = vpop.f32.mrf.mxu2  ;;  %v12804_v53 = vld [vmem:[#allocation33_spill] sm:$0xff]  ;;  %v12805_v55 = vld [vmem:[#allocation124_spill] sm:$0xff] }
 0x46d   : > { %v6272_v10 = vadd.f32 %v12804_v53, %v11549_v12  ;;  %v6096_v9 = vadd.f32 %v12805_v55, %v6007_v39  ;;  %v12806_v12 = vld [vmem:[#allocation19_spill] sm:$0xff] }
 0x46e   : > { %v6707_v61 = vadd.f32 %v11712_v36, %v6618_v34  ;;  %v11805_v22 = vpop.f32.mrf.mxu1  ;;  %v6634_v29 = vpop.f32.mrf.mxu0 }
 0x46f   : > { %v6185_v34 = vadd.f32 %v11553_v62, %v6096_v9  ;;  %v6361_v5 = vadd.f32 %v11398_v32, %v6272_v10  ;;  %v12815_v10 = vld [vmem:[#allocation24_spill] sm:$0xff] }
 0x470   : > { %v6774_v6 = vmax.f32 %v6707_v61, 0.0 }
 0x471   : > { %v6530_v26 = vpop.f32.mrf.mxu3  ;;  %v6274_v54 = vadd.f32 %v12806_v12, %v6185_v34  ;;  %v6450_v62 = vadd.f32 %v11635_v45, %v6361_v5  ;;  %v8849_v45 = vld [vmem:[#allocation3 + $0x470] sm:$0xf0] }
 0x472   : > { %v6531_v51 = vadd.f32 %v6530_v26, %v6442_v18  ;;  %v8276_v26 = vor.u32 %v8840_v16, %v8275_v4  ;;  %v12814_v4 = vld [vmem:[#allocation77_spill] sm:$0xff] }
 0x474   : > { %v6620_v33 = vadd.f32 %v11724_v63, %v6531_v51 }
 0x476   : > { %v6709_v38 = vadd.f32 %v11729_v49, %v6620_v33  ;;  %6572 = vmatmul.bf16.gmra.mxu3 %v8240_v42  ;;  %v6358_v49 = vadd.f32 %v11363_v14, %v6269_v44  ;;  %v11816_v14 = vpop.f32.mrf.mxu2  ;;  %v12808_v33 = vld [vmem:[#allocation120_spill] sm:$0xff] }
 0x477   : > { %v6012_v42 = vadd.f32 %v11516_v25, %v12808_v33  ;;  %v12822_v33 = vld [vmem:[#allocation20_spill] sm:$0xff] }
 0x478   : > { %v6775_v50 = vmax.f32 %v6709_v38, 0.0  ;;  %v6447_v58 = vadd.f32 %v11628_v20, %v6358_v49  ;;  %v6723_v20 = vpop.f32.mrf.mxu1 }
 0x479   : > { %v6533_v56 = vpop.f32.mrf.mxu3 }
 0x47a   : > { %v6802_v36 = vpack.c.bf16 %v6775_v50, %v6774_v6  ;;  %v6534_v63 = vadd.f32 %v6533_v56, %v6445_v47  ;;  %v8311_v6 = vld [vmem:[#allocation3 + $0x450] sm:$0xf] }
 0x47b   : > { %v12810_v50 = vld [vmem:[#allocation69_spill] sm:$0xff]  ;;  %v12811_v56 = vld [vmem:[#allocation44_spill] sm:$0xff] }
 0x47c   : > { %6910 = vmatmul.bf16.gmra.mxu2 %v6802_v36  ;;  %v6623_v1 = vadd.f32 %v11737_v21, %v6534_v63  ;;  %v6277_v47 = vadd.f32 %v12811_v56, %v12810_v50  ;;  %v12812_v36 = vld [vmem:[#allocation25_spill] sm:$0xff] }
 0x47d   : > { %v6101_v63 = vadd.f32 %v12812_v36, %v6012_v42  ;;  %v12825_v36 = vld [vmem:[#allocation30_spill] sm:$0xff] }
 0x47e   : > { %v6712_v18 = vadd.f32 %v11744_v48, %v6623_v1  ;;  %v12807_v48 = vld [vmem:[#allocation70_spill] sm:$0xff]  ;;  %v6366_v16 = vadd.f32 %v12814_v4, %v6277_v47 }
 0x47f   : > { %v6363_v61 = vadd.f32 %v12807_v48, %v6274_v54  ;;  %v6190_v39 = vadd.f32 %v12813_v27, %v6101_v63  ;;  %v12821_v48 = vld [vmem:[#allocation63_spill] sm:$0xff] }
 0x480   : > { %v6776_v40 = vmax.f32 %v6712_v18, 0.0  ;;  %v11829_v38 = vpop.f32.mrf.mxu1 }
 0x481   : > { %v6535_v0 = vpop.f32.mrf.mxu3  ;;  %v6452_v52 = vadd.f32 %v12809_v46, %v6363_v61  ;;  %v6279_v55 = vadd.f32 %v12815_v10, %v6190_v39 }
 0x482   : > { %v6536_v7 = vadd.f32 %v6535_v0, %v6447_v58  ;;  %v8312_v0 = vor.u32 %v8849_v45, %v8311_v6 }
 0x484   : > { %v6625_v21 = vadd.f32 %v11753_v17, %v6536_v7  ;;  %v6637_v17 = vpop.f32.mrf.mxu0 }
 0x486   : > { %v6714_v8 = vadd.f32 %v11758_v31, %v6625_v21  ;;  %6577 = vmatmul.bf16.gmra.mxu3 %v8276_v26  ;;  %v11827_v31 = vpop.f32.mrf.mxu2  ;;  %v12816_v26 = vld [vmem:[#allocation41_spill] sm:$0xff] }
 0x488   : > { %v6777_v60 = vmax.f32 %v6714_v8, 0.0  ;;  %v6728_v18 = vpop.f32.mrf.mxu1  ;;  %v6455_v8 = vadd.f32 %v12816_v26, %v6366_v16  ;;  %v12827_v16 = vld [vmem:[#allocation89_spill] sm:$0xff]  ;;  %v12829_v26 = vld [vmem:[#allocation94_spill] sm:$0xff] }
 0x489   : > { %v6538_v19 = vpop.f32.mrf.mxu3 }
 0x48a   : > { %v6803_v51 = vpack.c.bf16 %v6777_v60, %v6776_v40  ;;  %v6539_v41 = vadd.f32 %v6538_v19, %v6450_v62  ;;  %v12819_v60 = vld [vmem:[#allocation32_spill] sm:$0xff] }
 0x48c   : > { %6915 = vmatmul.bf16.gmra.mxu2 %v6803_v51  ;;  %v6628_v32 = vadd.f32 %v11770_v23, %v6539_v41  ;;  %v6639_v53 = vpop.f32.mrf.mxu0  ;;  %v12820_v41 = vld [vmem:[#allocation59_spill] sm:$0xff] }
 0x48d   : > { %v6282_v61 = vadd.f32 %v12821_v48, %v12820_v41  ;;  %v12833_v41 = vld [vmem:[#allocation91_spill] sm:$0xff] }
 0x48e   : > { %v6717_v1 = vadd.f32 %v11776_v43, %v6628_v32  ;;  %v11842_v9 = vpop.f32.mrf.mxu2 }
 0x490   : > { %v6778_v7 = vmax.f32 %v6717_v1, 0.0  ;;  %v12826_v1 = vld [vmem:[#allocation68_spill] sm:$0xff] }
 0x491   : > { %v6540_v44 = vpop.f32.mrf.mxu3 }
 0x492   : > { %v6541_v49 = vadd.f32 %v6540_v44, %v6452_v52  ;;  %v6731_v52 = vpop.f32.mrf.mxu1  ;;  %v12823_v44 = vld [vmem:[#allocation80_spill] sm:$0xff] }
 0x494   : > { %v6630_v58 = vadd.f32 %v11783_v15, %v6541_v49  ;;  %v12817_v15 = vld [vmem:[#allocation82_spill] sm:$0xff]  ;;  %v6642_v62 = vpop.f32.mrf.mxu0 }
 0x495   : > { %v6368_v12 = vadd.f32 %v12817_v15, %v6279_v55 }
 0x496   : > { %v6719_v23 = vadd.f32 %v11789_v11, %v6630_v58  ;;  %6582 = vmatmul.bf16.gmra.mxu3 %v8312_v0  ;;  %v12818_v11 = vld [vmem:[#allocation26_spill] sm:$0xff]  ;;  %v11853_v46 = vpop.f32.mrf.mxu2 }
 0x497   : > { %v6017_v54 = vadd.f32 %v11516_v25, %v12818_v11  ;;  %v6457_v19 = vadd.f32 %v12819_v60, %v6368_v12  ;;  %v12832_v11 = vld [vmem:[#allocation102_spill] sm:$0xff] }
 0x498   : > { %v6779_v34 = vmax.f32 %v6719_v23, 0.0 }
 0x499   : > { %v6543_v21 = vpop.f32.mrf.mxu3  ;;  %v6106_v42 = vadd.f32 %v12822_v33, %v6017_v54 }
 0x49a   : > { %v6804_v43 = vpack.c.bf16 %v6779_v34, %v6778_v7  ;;  %v6544_v5 = vadd.f32 %v6543_v21, %v6455_v8  ;;  %v12830_v8 = vld [vmem:[#allocation53_spill] sm:$0xff] }
 0x49b   : > { %v6195_v6 = vadd.f32 %v12823_v44, %v6106_v42  ;;  %v8938_v44 = vld [vmem:[%s12371_s7 + $0x38] sm:$0xff] }
 0x49c   : > { %6920 = vmatmul.bf16.gmra.mxu2 %v6804_v43  ;;  %v6633_v40 = vadd.f32 %v11800_v3, %v6544_v5  ;;  %v12824_v3 = vld [vmem:[#allocation81_spill] sm:$0xff]  ;;  %v6644_v23 = vpop.f32.mrf.mxu0  ;;  %v6287_v43 = vadd.f32 %v12830_v8, %v12829_v26  ;;  %v12831_v5 = vld [vmem:[#allocation27_spill] sm:$0xff]  ;;  %7122 = vmatpush.bf16.msrb.mxu3 %v8938_v44 }
 0x49d   : > { %v6371_v47 = vadd.f32 %v12824_v3, %v6282_v61  ;;  %v6284_v63 = vadd.f32 %v12825_v36, %v6195_v6 }
 0x49e   : > { %v6722_v45 = vadd.f32 %v11805_v22, %v6633_v40  ;;  %v11861_v55 = vpop.f32.mrf.mxu2  ;;  %v6733_v22 = vpop.f32.mrf.mxu1  ;;  %v6376_v48 = vadd.f32 %v12833_v41, %v6287_v43 }
 0x49f   : > { %v6460_v58 = vadd.f32 %v12826_v1, %v6371_v47  ;;  %v6373_v10 = vadd.f32 %v12827_v16, %v6284_v63  ;;  %v12837_v1 = vld [vmem:[#allocation109_spill] sm:$0xff] }
 0x4a0   : > { %v6780_v49 = vmax.f32 %v6722_v45, 0.0  ;;  %v6465_v45 = vadd.f32 %v11695_v2, %v6376_v48  ;;  %v12844_v48 = vld [vmem:[#allocation111_spill] sm:$0xff] }
 0x4a1   : > { %v6545_v51 = vpop.f32.mrf.mxu3  ;;  %v6462_v34 = vadd.f32 %v11681_v37, %v6373_v10  ;;  %v12834_v37 = vld [vmem:[#allocation75_spill] sm:$0xff] }
 0x4a2   : > { %v6546_v32 = vadd.f32 %v6545_v51, %v6457_v19  ;;  %v12840_v10 = vld [vmem:[#allocation115_spill] sm:$0xff] }
 0x4a4   : > { %v6635_v50 = vadd.f32 %v6634_v29, %v6546_v32  ;;  %v12828_v29 = vld [vmem:[#allocation29_spill] sm:$0xff]  ;;  %v6647_v19 = vpop.f32.mrf.mxu0 }
 0x4a6   : > { %v6724_v56 = vadd.f32 %v6723_v20, %v6635_v50  ;;  %v6022_v20 = vadd.f32 %v11516_v25, %v12828_v29  ;;  %v11872_v61 = vpop.f32.mrf.mxu2 }
 0x4a8   : > { %v6781_v27 = vmax.f32 %v6724_v56, 0.0  ;;  %v6111_v15 = vadd.f32 %v12831_v5, %v6022_v20  ;;  %v12836_v56 = vld [vmem:[#allocation23_spill] sm:$0xff] }
 0x4a9   : > { %v6548_v39 = vpop.f32.mrf.mxu3  ;;  %v6027_v3 = vadd.f32 %v11516_v25, %v12836_v56  ;;  %v12841_v25 = vld [vmem:[#allocation98_spill] sm:$0xff]  ;;  %v12848_v56 = vld [vmem:[#allocation71_spill] sm:$0xff] }
 0x4aa   : > { %v6805_v0 = vpack.c.bf16 %v6781_v27, %v6780_v49  ;;  %v6549_v4 = vadd.f32 %v6548_v39, %v6460_v58  ;;  %v6200_v54 = vadd.f32 %v12832_v11, %v6111_v15  ;;  %v12838_v58 = vld [vmem:[#allocation39_spill] sm:$0xff] }
 0x4ab   : > { %v6292_v2 = vadd.f32 %v12838_v58, %v12837_v1 }
 0x4ac   : > { %6925 = vmatmul.bf16.gmra.mxu2 %v6805_v0  ;;  %v6638_v7 = vadd.f32 %v6637_v17, %v6549_v4  ;;  %v6736_v17 = vpop.f32.mrf.mxu1  ;;  %v6289_v33 = vadd.f32 %v12834_v37, %v6200_v54  ;;  %v6649_v47 = vpop.f32.mrf.mxu0  ;;  %v12839_v0 = vld [vmem:[#allocation49_spill] sm:$0xff] }
 0x4ad   : > { %v6116_v4 = vadd.f32 %v12839_v0, %v6027_v3  ;;  %v12845_v37 = vld [vmem:[#allocation61_spill] sm:$0xff] }
 0x4ae   : > { %v6727_v40 = vadd.f32 %v11829_v38, %v6638_v7 }
 0x4af   : > { %v6205_v29 = vadd.f32 %v12840_v10, %v6116_v4 }
 0x4b0   : > { %v6782_v42 = vmax.f32 %v6727_v40, 0.0 }
 0x4b1   : > { %v6550_v21 = vpop.f32.mrf.mxu3 }
 0x4b2   : > { %v6551_v12 = vadd.f32 %v6550_v21, %v6462_v34  ;;  %v6381_v21 = vadd.f32 %v12841_v25, %v6292_v2 }
 0x4b4   : > { %v6640_v60 = vadd.f32 %v6639_v53, %v6551_v12  ;;  %v6738_v27 = vpop.f32.mrf.mxu1  ;;  %v6652_v5 = vpop.f32.mrf.mxu0  ;;  %v6470_v12 = vadd.f32 %v11727_v35, %v6381_v21 }
 0x4b6   : > { %v6729_v51 = vadd.f32 %v6728_v18, %v6640_v60  ;;  %v12835_v18 = vld [vmem:[#allocation84_spill] sm:$0xff]  ;;  %v12843_v60 = vld [vmem:[#allocation93_spill] sm:$0xff] }
 0x4b7   : > { %v6378_v50 = vadd.f32 %v12835_v18, %v6289_v33  ;;  %v6297_v33 = vadd.f32 %v12845_v37, %v12844_v48 }
 0x4b8   : > { %v6783_v32 = vmax.f32 %v6729_v51, 0.0 }
 0x4b9   : > { %v6553_v6 = vpop.f32.mrf.mxu3  ;;  %v6467_v49 = vadd.f32 %v11710_v59, %v6378_v50  ;;  %v12847_v50 = vld [vmem:[#allocation117_spill] sm:$0xff] }
 0x4ba   : > { %v6806_v38 = vpack.c.bf16 %v6783_v32, %v6782_v42  ;;  %v6554_v53 = vadd.f32 %v6553_v6, %v6465_v45  ;;  %v6299_v3 = vadd.f32 %v12848_v56, %v12847_v50  ;;  %v12858_v56 = vld [vmem:[#allocation73_spill] sm:$0xff] }
 0x4bc   : > { %6930 = vmatmul.bf16.gmra.mxu2 %v6806_v38  ;;  %v6643_v63 = vadd.f32 %v6642_v62, %v6554_v53  ;;  %v12842_v62 = vld [vmem:[#allocation96_spill] sm:$0xff]  ;;  %v6741_v54 = vpop.f32.mrf.mxu1  ;;  %v6654_v32 = vpop.f32.mrf.mxu0 }
 0x4bd   : > { %v6294_v8 = vadd.f32 %v12842_v62, %v6205_v29  ;;  %v12846_v38 = vld [vmem:[#allocation104_spill] sm:$0xff]  ;;  %v12850_v29 = vld [vmem:[#allocation123_spill] sm:$0xff]  ;;  %v12852_v62 = vld [vmem:[#allocation45_spill] sm:$0xff] }
 0x4be   : > { %v6732_v20 = vadd.f32 %v6731_v52, %v6643_v63  ;;  %v6386_v53 = vadd.f32 %v12846_v38, %v6297_v33 }
 0x4bf   : > { %v11882_v36 = vpop.f32.mrf.mxu2  ;;  %v6383_v52 = vadd.f32 %v12843_v60, %v6294_v8 }
 0x4c0   : > { %v6784_v59 = vmax.f32 %v6732_v20, 0.0  ;;  %v12851_v20 = vld [vmem:[#allocation64_spill] sm:$0xff] }
 0x4c1   : > { %v6555_v39 = vpop.f32.mrf.mxu3  ;;  %v6472_v51 = vadd.f32 %v11742_v57, %v6383_v52  ;;  %v8937_v57 = vld [vmem:[%s12371_s7 + $0x30] sm:$0xff] }
 0x4c2   : > { %v6556_v16 = vadd.f32 %v6555_v39, %v6467_v49  ;;  %v6475_v39 = vadd.f32 %v11755_v28, %v6386_v53  ;;  %7123 = vmatpush.bf16.msrb.mxu3 %v8937_v57  ;;  %v12860_v57 = vld [vmem:[#allocation67_spill] sm:$0xff] }
 0x4c4   : > { %v6645_v7 = vadd.f32 %v6644_v23, %v6556_v16  ;;  %v6743_v35 = vpop.f32.mrf.mxu1  ;;  %v6657_v58 = vpop.f32.mrf.mxu0 }
 0x4c6   : > { %v6734_v34 = vadd.f32 %v6733_v22, %v6645_v7  ;;  %v6302_v7 = vadd.f32 %v12851_v20, %v12850_v29 }
 0x4c7   : > { %v11890_v26 = vpop.f32.mrf.mxu2 }
 0x4c8   : > { %v6785_v43 = vmax.f32 %v6734_v34, 0.0  ;;  %v6391_v8 = vadd.f32 %v12852_v62, %v6302_v7 }
 0x4c9   : > { %v6558_v15 = vpop.f32.mrf.mxu3 }
 0x4ca   : > { %v6807_v11 = vpack.c.bf16 %v6785_v43, %v6784_v59  ;;  %v6559_v40 = vadd.f32 %v6558_v15, %v6470_v12  ;;  %v12853_v15 = vld [vmem:[#allocation40_spill] sm:$0xff]  ;;  %v6480_v52 = vadd.f32 %v11785_v13, %v6391_v8 }
 0x4cb   : > { %v12854_v12 = vld [vmem:[#allocation56_spill] sm:$0xff] }
 0x4cc   : > { %6935 = vmatmul.bf16.gmra.mxu2 %v6807_v11  ;;  %v6648_v22 = vadd.f32 %v6647_v19, %v6559_v40  ;;  %v6746_v2 = vpop.f32.mrf.mxu1  ;;  %v6659_v59 = vpop.f32.mrf.mxu0  ;;  %v6304_v11 = vadd.f32 %v12854_v12, %v12853_v15  ;;  %v12864_v12 = vld [vmem:[#allocation97_spill] sm:$0xff] }
 0x4ce   : > { %v6737_v44 = vadd.f32 %v6736_v17, %v6648_v22 }
 0x4cf   : > { %v11895_v23 = vpop.f32.mrf.mxu2 }
 0x4d0   : > { %v6786_v19 = vmax.f32 %v6737_v44, 0.0  ;;  %v12856_v44 = vld [vmem:[#allocation21_spill] sm:$0xff] }
 0x4d1   : > { %v6560_v41 = vpop.f32.mrf.mxu3 }
 0x4d2   : > { %v6561_v42 = vadd.f32 %v6560_v41, %v6472_v51 }
 0x4d4   : > { %v6650_v6 = vadd.f32 %v6649_v47, %v6561_v42  ;;  %v6748_v60 = vpop.f32.mrf.mxu1  ;;  %v6662_v42 = vpop.f32.mrf.mxu0 }
 0x4d6   : > { %v6739_v45 = vadd.f32 %v6738_v27, %v6650_v6  ;;  %v12849_v27 = vld [vmem:[#allocation47_spill] sm:$0xff]  ;;  %v12857_v6 = vld [vmem:[#allocation85_spill] sm:$0xff] }
 0x4d7   : > { %v11901_v18 = vpop.f32.mrf.mxu2  ;;  %v6388_v1 = vadd.f32 %v12849_v27, %v6299_v3 }
 0x4d8   : > { %v6787_v63 = vmax.f32 %v6739_v45, 0.0 }
 0x4d9   : > { %v6563_v49 = vpop.f32.mrf.mxu3  ;;  %v6477_v16 = vadd.f32 %v11772_v30, %v6388_v1 }
 0x4da   : > { %v6808_v17 = vpack.c.bf16 %v6787_v63, %v6786_v19  ;;  %v6564_v47 = vadd.f32 %v6563_v49, %v6475_v39  ;;  %v12859_v63 = vld [vmem:[#allocation36_spill] sm:$0xff] }
 0x4db   : > { %v6309_v49 = vadd.f32 %v12860_v57, %v12859_v63 }
 0x4dc   : > { %6940 = vmatmul.bf16.gmra.mxu2 %v6808_v17  ;;  %v6653_v4 = vadd.f32 %v6652_v5, %v6564_v47  ;;  %v6751_v38 = vpop.f32.mrf.mxu1 }
 0x4de   : > { %v6742_v25 = vadd.f32 %v6741_v54, %v6653_v4  ;;  %v12855_v54 = vld [vmem:[#allocation57_spill] sm:$0xff]  ;;  %v12861_v4 = vld [vmem:[#allocation83_spill] sm:$0xff] }
 0x4df   : > { %v11910_v0 = vpop.f32.mrf.mxu2  ;;  %v6393_v41 = vadd.f32 %v12855_v54, %v6304_v11 }
 0x4e0   : > { %v6788_v40 = vmax.f32 %v6742_v25, 0.0  ;;  %v12862_v25 = vld [vmem:[#allocation28_spill] sm:$0xff] }
 0x4e1   : > { %v6565_v10 = vpop.f32.mrf.mxu3  ;;  %v6482_v33 = vadd.f32 %v11802_v24, %v6393_v41  ;;  %v8936_v24 = vld [vmem:[%s12371_s7 + $0x28] sm:$0xff] }
 0x4e2   : > { %v6566_v34 = vadd.f32 %v6565_v10, %v6477_v16  ;;  %7124 = vmatpush.bf16.msrb.mxu3 %v8936_v24  ;;  %v6398_v16 = vadd.f32 %v12861_v4, %v6309_v49  ;;  %v12870_v49 = vld [vmem:[#allocation121_spill] sm:$0xff]  ;;  %v12871_v24 = vld [vmem:[#allocation42_spill] sm:$0xff] }
 0x4e4   : > { %v6655_v28 = vadd.f32 %v6654_v32, %v6566_v34  ;;  %v6753_v10 = vpop.f32.mrf.mxu1  ;;  %v6487_v7 = vadd.f32 %v11827_v31, %v6398_v16 }
 0x4e6   : > { %v6744_v21 = vadd.f32 %v6743_v35, %v6655_v28  ;;  %v6307_v35 = vadd.f32 %v12857_v6, %v12856_v44  ;;  %v12863_v28 = vld [vmem:[#allocation60_spill] sm:$0xff] }
 0x4e7   : > { %v11916_v43 = vpop.f32.mrf.mxu2 }
 0x4e8   : > { %v6789_v5 = vmax.f32 %v6744_v21, 0.0  ;;  %v6396_v3 = vadd.f32 %v12858_v56, %v6307_v35  ;;  %v6312_v21 = vadd.f32 %v12863_v28, %v12862_v25 }
 0x4e9   : > { %v6568_v30 = vpop.f32.mrf.mxu3 }
 0x4ea   : > { %v6809_v22 = vpack.c.bf16 %v6789_v5, %v6788_v40  ;;  %v6569_v51 = vadd.f32 %v6568_v30, %v6480_v52  ;;  %v6485_v27 = vadd.f32 %v11816_v14, %v6396_v3  ;;  %v6401_v11 = vadd.f32 %v12864_v12, %v6312_v21  ;;  %v12866_v30 = vld [vmem:[#allocation90_spill] sm:$0xff] }
 0x4ec   : > { %6945 = vmatmul.bf16.gmra.mxu2 %v6809_v22  ;;  %v6658_v37 = vadd.f32 %v6657_v58, %v6569_v51  ;;  %v6664_v58 = vpop.f32.mrf.mxu0  ;;  %v6756_v40 = vpop.f32.mrf.mxu1  ;;  %v6490_v54 = vadd.f32 %v11842_v9, %v6401_v11  ;;  %v8935_v9 = vld [vmem:[%s12371_s7 + $0x20] sm:$0xff] }
 0x4ed   : > { %7125 = vmatpush.bf16.msrb.mxu3 %v8935_v9 }
 0x4ee   : > { %v6747_v53 = vadd.f32 %v6746_v2, %v6658_v37 }
 0x4ef   : > { %v11922_v48 = vpop.f32.mrf.mxu2 }
 0x4f0   : > { %v6790_v39 = vmax.f32 %v6747_v53, 0.0  ;;  %v12868_v53 = vld [vmem:[#allocation34_spill] sm:$0xff] }
 0x4f1   : > { %v6570_v32 = vpop.f32.mrf.mxu3 }
 0x4f2   : > { %v6571_v45 = vadd.f32 %v6570_v32, %v6482_v33  ;;  %v12867_v33 = vld [vmem:[#allocation105_spill] sm:$0xff] }
 0x4f4   : > { %v6660_v50 = vadd.f32 %v6659_v59, %v6571_v45  ;;  %v6667_v59 = vpop.f32.mrf.mxu0  ;;  %v6758_v45 = vpop.f32.mrf.mxu1 }
 0x4f6   : > { %v6749_v13 = vadd.f32 %v6748_v60, %v6660_v50  ;;  %v12865_v60 = vld [vmem:[#allocation51_spill] sm:$0xff]  ;;  %v12869_v50 = vld [vmem:[#allocation72_spill] sm:$0xff] }
 0x4f7   : > { %v11928_v19 = vpop.f32.mrf.mxu2  ;;  %v6314_v52 = vadd.f32 %v12866_v30, %v12865_v60 }
 0x4f8   : > { %v6791_v17 = vmax.f32 %v6749_v13, 0.0  ;;  %v6317_v13 = vadd.f32 %v12869_v50, %v12868_v53  ;;  %v11972_v50 = vld [vmem:[#allocation10] ss:$0 sm:$0xff] }
 0x4f9   : > { %v6573_v47 = vpop.f32.mrf.mxu3 }
 0x4fa   : > { %v6810_v1 = vpack.c.bf16 %v6791_v17, %v6790_v39  ;;  %v6574_v2 = vadd.f32 %v6573_v47, %v6485_v27  ;;  %v6406_v39 = vadd.f32 %v12870_v49, %v6317_v13  ;;  %v12872_v47 = vld [vmem:[#allocation87_spill] sm:$0xff] }
 0x4fb   : > { %v8931_v13 = vld [vmem:[%s12371_s7] sm:$0xff] }
 0x4fc   : > { %6950 = vmatmul.bf16.gmra.mxu2 %v6810_v1  ;;  %v6663_v20 = vadd.f32 %v6662_v42, %v6574_v2  ;;  %v6403_v42 = vadd.f32 %v12867_v33, %v6314_v52  ;;  %v6669_v32 = vpop.f32.mrf.mxu0  ;;  %v6495_v4 = vadd.f32 %v11861_v55, %v6406_v39 }
 0x4fe   : > { %v6752_v8 = vadd.f32 %v6751_v38, %v6663_v20  ;;  %v6492_v35 = vadd.f32 %v11853_v46, %v6403_v42  ;;  %v6319_v46 = vadd.f32 %v12872_v47, %v12871_v24  ;;  %v12004_v24 = vadd.f32 %v11972_v50, %v11882_v36 }
 0x4ff   : > { %v11937_v29 = vpop.f32.mrf.mxu2 }
 0x500   : > { %v6792_v22 = vmax.f32 %v6752_v8, 0.0 }
 0x501   : > { %v6575_v34 = vpop.f32.mrf.mxu3 }
 0x502   : > { %v6576_v62 = vadd.f32 %v6575_v34, %v6487_v7  ;;  %v12873_v7 = vld [vmem:[#allocation31_spill] sm:$0xff] }
 0x503   : > { %v6408_v34 = vadd.f32 %v12873_v7, %v6319_v46 }
 0x504   : > { %v6665_v14 = vadd.f32 %v6664_v58, %v6576_v62  ;;  %v6672_v58 = vpop.f32.mrf.mxu0 }
 0x505   : > { %v6497_v21 = vadd.f32 %v11872_v61, %v6408_v34  ;;  %v12050_v34 = vadd.f32 %v11972_v50, %v11916_v43 }
 0x506   : > { %v6754_v15 = vadd.f32 %v6753_v10, %v6665_v14  ;;  %v6761_v10 = vpop.f32.mrf.mxu1 }
 0x507   : > { %v11943_v5 = vpop.f32.mrf.mxu2 }
 0x508   : > { %v6793_v51 = vmax.f32 %v6754_v15, 0.0 }
 0x509   : > { %v6578_v31 = vpop.f32.mrf.mxu3 }
 0x50a   : > { %v6811_v41 = vpack.c.bf16 %v6793_v51, %v6792_v22  ;;  %v6579_v37 = vadd.f32 %v6578_v31, %v6490_v54  ;;  %v8934_v22 = vld [vmem:[%s12371_s7 + $0x18] sm:$0xff] }
 0x50b   : > { %7126 = vmatpush.bf16.msrb.mxu3 %v8934_v22 }
 0x50c   : > { %6955 = vmatmul.bf16.gmra.mxu2 %v6811_v41  ;;  %v6668_v6 = vadd.f32 %v6667_v59, %v6579_v37  ;;  %v6674_v14 = vpop.f32.mrf.mxu0  ;;  %v8933_v41 = vld [vmem:[%s12371_s7 + $0x10] sm:$0xff] }
 0x50e   : > { %v6757_v3 = vadd.f32 %v6756_v40, %v6668_v6  ;;  %v6763_v12 = vpop.f32.mrf.mxu1  ;;  %v8932_v6 = vld [vmem:[%s12371_s7 + $0x8] sm:$0xff] }
 0x50f   : > { %v11949_v44 = vpop.f32.mrf.mxu2  ;;  %7127 = vmatpush.bf16.msrb.mxu3 %v8933_v41 }
 0x510   : > { %v6794_v27 = vmax.f32 %v6757_v3, 0.0  ;;  %v11986_v3 = vadd.f32 %v11972_v50, %v11890_v26  ;;  %v12008_v26 = vadd.f32 %v11972_v50, %v11895_v23 }
 0x511   : > { %v6580_v38 = vpop.f32.mrf.mxu3 }
 0x512   : > { %v6581_v56 = vadd.f32 %v6580_v38, %v6492_v35  ;;  %v6971_v36 = vadd.f32 %v11986_v3, %v12004_v24 }
 0x513   : > { %7128 = vmatpush.bf16.msrb.mxu3 %v8932_v6 }
 0x514   : > { %v6670_v63 = vadd.f32 %v6669_v32, %v6581_v56  ;;  %v11979_v56 = vadd.f32 %v11972_v50, %v11943_v5 }
 0x516   : > { %v6759_v57 = vadd.f32 %v6758_v45, %v6670_v63  ;;  %v11990_v63 = vadd.f32 %v11972_v50, %v11937_v29 }
 0x517   : > { %v6918_v17 = vpop.f32.mrf.mxu2  ;;  %7129 = vmatpush.bf16.msrb.mxu3 %v8931_v13 }
 0x518   : > { %v6795_v1 = vmax.f32 %v6759_v57, 0.0  ;;  %v11994_v57 = vadd.f32 %v11972_v50, %v11949_v44  ;;  %v6984_v29 = vadd.f32 %v11979_v56, %v11990_v63  ;;  %v12013_v44 = vadd.f32 %v11972_v50, %v6918_v17 }
 0x519   : > { %v6583_v2 = vpop.f32.mrf.mxu3 }
 0x51a   : > { %v6812_v16 = vpack.c.bf16 %v6795_v1, %v6794_v27  ;;  %v6584_v20 = vadd.f32 %v6583_v2, %v6495_v4  ;;  %v12024_v27 = vadd.f32 %v11972_v50, %v11901_v18  ;;  %v6985_v23 = vadd.f32 %v6984_v29, %v11994_v57 }
 0x51b   : > { %v6972_v2 = vadd.f32 %v6971_v36, %v12008_v26  ;;  %v12037_v4 = vadd.f32 %v11972_v50, %v11910_v0 }
 0x51c   : > { %6960 = vmatmul.bf16.gmra.mxu2 %v6812_v16  ;;  %v6673_v28 = vadd.f32 %v6672_v58, %v6584_v20  ;;  %v6986_v16 = vadd.f32 %v6985_v23, %v12013_v44 }
 0x51d   : > { %v6973_v7 = vadd.f32 %v6972_v2, %v12024_v27 }
 0x51e   : > { %v6762_v59 = vadd.f32 %v6761_v10, %v6673_v28 }
 0x51f   : > { %v6921_v25 = vpop.f32.mrf.mxu2 }
 0x520   : > { %v6796_v60 = vmax.f32 %v6762_v59, 0.0  ;;  %v12028_v1 = vadd.f32 %v11972_v50, %v6921_v25 }
 0x521   : > { %v6585_v62 = vpop.f32.mrf.mxu3 }
 0x522   : > { %v6586_v8 = vadd.f32 %v6585_v62, %v6497_v21  ;;  %v6987_v25 = vadd.f32 %v6986_v16, %v12028_v1 }
 0x524   : > { %v6675_v15 = vadd.f32 %v6674_v14, %v6586_v8  ;;  %v6974_v8 = vadd.f32 %v6973_v7, %v12037_v4  ;;  %v12063_v14 = vadd.f32 %v11972_v50, %v11922_v48 }
 0x526   : > { %v6764_v11 = vadd.f32 %v6763_v12, %v6675_v15 }
 0x527   : > { %v6923_v40 = vpop.f32.mrf.mxu2 }
 0x528   : > { %v6797_v55 = vmax.f32 %v6764_v11, 0.0  ;;  %v12041_v18 = vadd.f32 %v11972_v50, %v6923_v40  ;;  %v6975_v11 = vadd.f32 %v6974_v8, %v12050_v34  ;;  %v12076_v40 = vadd.f32 %v11972_v50, %v11928_v19 }
 0x52a   : > { %v6813_v30 = vpack.c.bf16 %v6797_v55, %v6796_v60  ;;  %v6988_v43 = vadd.f32 %v6987_v25, %v12041_v18  ;;  %v6976_v55 = vadd.f32 %v6975_v11, %v12063_v14 }
 0x52c   : > { %6965 = vmatmul.bf16.gmra.mxu2 %v6813_v30  ;;  %v6977_v22 = vadd.f32 %v6976_v55, %v12076_v40 }
 0x52e   : > { %v6978_v41 = vrot.slane %v6977_v22, 4 }
 0x52f   : > { %v6926_v52 = vpop.f32.mrf.mxu2 }
 0x530   : > { %v12054_v0 = vadd.f32 %v11972_v50, %v6926_v52 }
 0x532   : > { %v6989_v60 = vadd.f32 %v6988_v43, %v12054_v0 }
 0x537   : > { %v6928_v51 = vpop.f32.mrf.mxu2 }
 0x538   : > { %v12067_v59 = vadd.f32 %v11972_v50, %v6928_v51  ;;  %v9438_v51 = vmov 64.0  }
 0x539   : > { %9227 = vrcp.f32 %v9438_v51 }
 0x53a   : > { %v6990_v30 = vadd.f32 %v6989_v60, %v12067_v59 }
 0x53f   : > { %v6931_v61 = vpop.f32.mrf.mxu2 }
 0x540   : > { %v11997_v49 = vadd.f32 %v11972_v50, %v6931_v61 }
 0x547   : > { %v6933_v31 = vpop.f32.mrf.mxu2 }
 0x548   : > { %v11982_v9 = vadd.f32 %v11972_v50, %v6933_v31  ;;  %v6991_v31 = vrot.slane %v6990_v30, 4 }
 0x54a   : > { %v6997_v47 = vadd.f32 %v11982_v9, %v11997_v49 }
 0x54f   : > { %v6936_v54 = vpop.f32.mrf.mxu2 }
 0x550   : > { %v12000_v5 = vadd.f32 %v11972_v50, %v6936_v54 }
 0x552   : > { %v6998_v17 = vadd.f32 %v6997_v47, %v12000_v5 }
 0x557   : > { %v6938_v37 = vpop.f32.mrf.mxu2 }
 0x558   : > { %v12018_v46 = vadd.f32 %v11972_v50, %v6938_v37  ;;  %v9228_v37 = vpop.eup %9227 }
 0x559   : > { %v7024_v47 = vmul.f32 64.0, %v9228_v37  ;;  %vm7028_vm7 = vweird.f32 %v9228_v37 }
 0x55a   : > { %v6999_v10 = vadd.f32 %v6998_v17, %v12018_v46 }
 0x55b   : > { %v7025_v7 = vsub.f32 1.0, %v7024_v47 }
 0x55d   : > { %v7026_v11 = vmul.f32 %v9228_v37, %v7025_v7 }
 0x55f   : > { %v6941_v33 = vpop.f32.mrf.mxu2 }
 0x560   : > { %v12032_v58 = vadd.f32 %v11972_v50, %v6941_v33  ;;  %v6992_v33 = vadd.f32 %v6991_v31, %v6990_v30 }
 0x562   : > { %v7000_v28 = vadd.f32 %v6999_v10, %v12032_v58 }
 0x567   : > { %v6943_v42 = vpop.f32.mrf.mxu2 }
 0x568   : > { %v12045_v20 = vadd.f32 %v11972_v50, %v6943_v42 }
 0x56a   : > { %v7001_v15 = vadd.f32 %v7000_v28, %v12045_v20 }
 0x56f   : > { %v6946_v32 = vpop.f32.mrf.mxu2 }
 0x570   : > { %v12058_v21 = vadd.f32 %v11972_v50, %v6946_v32 }
 0x572   : > { %v7002_v48 = vadd.f32 %v7001_v15, %v12058_v21 }
 0x577   : > { %v6948_v35 = vpop.f32.mrf.mxu2 }
 0x578   : > { %v12071_v12 = vadd.f32 %v11972_v50, %v6948_v35  ;;  %v6979_v35 = vadd.f32 %v6978_v41, %v6977_v22 }
 0x57a   : > { %v7003_v52 = vadd.f32 %v7002_v48, %v12071_v12  ;;  %v6980_v2 = vrot.slane %v6979_v35, 2 }
 0x57c   : > { %v7004_v54 = vrot.slane %v7003_v52, 4  ;;  %v6981_v43 = vadd.f32 %v6980_v2, %v6979_v35 }
 0x57e   : > { %v7005_v6 = vadd.f32 %v7004_v54, %v7003_v52  ;;  %v6982_v22 = vrot.slane %v6981_v43, 1 }
 0x57f   : > { %v6951_v45 = vpop.f32.mrf.mxu2 }
 0x580   : > { %v12088_v42 = vadd.f32 %v11972_v50, %v6951_v45  ;;  %v7006_v45 = vrot.slane %v7005_v6, 2 }
 0x582   : > { %v7007_v8 = vadd.f32 %v7006_v45, %v7005_v6 }
 0x584   : > { %v7008_v52 = vrot.slane %v7007_v8, 1 }
 0x586   : > { %v7009_v41 = vadd.f32 %v7008_v52, %v7007_v8 }
 0x587   : > { %v6953_v38 = vpop.f32.mrf.mxu2 }
 0x588   : > { %v12085_v19 = vadd.f32 %v11972_v50, %v6953_v38  ;;  %v6993_v38 = vrot.slane %v6992_v33, 2 }
 0x58a   : > { %v7010_v13 = vadd.f32 %v12085_v19, %v12088_v42  ;;  %v6994_v25 = vadd.f32 %v6993_v38, %v6992_v33  ;;  %v6983_v33 = vadd.f32 %v6982_v22, %v6981_v43 }
 0x58c   : > { %v6995_v48 = vrot.slane %v6994_v25, 1 }
 0x58e   : > { %v6996_v31 = vadd.f32 %v6995_v48, %v6994_v25  ;;  %v9225_v48 = vld [vmem:[%s12372_s8] ss:$0 sm:$0xff] }
 0x58f   : > { %v6956_v53 = vpop.f32.mrf.mxu2 }
 0x590   : > { %v12091_v32 = vadd.f32 %v11972_v50, %v6956_v53  ;;  %v7137_v53 = vld [vmem:[%s12373_s9] sm:$0xf] }
 0x591   : > { %v7148_v10 = vsel %vm7146_vm6, %v7137_v53, 0 }
 0x592   : > { %v7011_v23 = vadd.f32 %v7010_v13, %v12091_v32  ;;  %7157 = vmatpush.bf16.msra.mxu3 %v7148_v10 }
 0x597   : > { %v6958_v39 = vpop.f32.mrf.mxu2 }
 0x598   : > { %v12096_v29 = vadd.f32 %v11972_v50, %v6958_v39 }
 0x59a   : > { %v7012_v16 = vadd.f32 %v7011_v23, %v12096_v29 }
 0x59f   : > { %v6961_v62 = vpop.f32.mrf.mxu2 }
 0x5a0   : > { %v12100_v17 = vadd.f32 %v11972_v50, %v6961_v62 }
 0x5a2   : > { %v7013_v28 = vadd.f32 %v7012_v16, %v12100_v17 }
 0x5a7   : > { %v6963_v61 = vpop.f32.mrf.mxu2 }
 0x5a8   : > { %v12107_v39 = vadd.f32 %v11972_v50, %v6963_v61  ;;  %v7027_v61 = vadd.f32 %v9228_v37, %v7026_v11 }
 0x5aa   : > { %v7014_v15 = vadd.f32 %v7013_v28, %v12107_v39  ;;  %v7029_v35 = vsel %vm7028_vm7, %v9228_v37, %v7027_v61 }
 0x5ab   : > { %v7031_v13 = vmul.f32 %v7029_v35, %v6996_v31  ;;  %v7030_v38 = vmul.f32 %v7029_v35, %v6983_v33  ;;  %v9226_v31 = vld [vmem:[%s12374_s10] ss:$0 sm:$0xff] }
 0x5ad   : > { %v7035_v45 = vpack.c.bf16 %v7031_v13, %v7031_v13  ;;  %v7034_v2 = vpack.c.bf16 %v7030_v38, %v7030_v38 }
 0x5af   : > { %v6966_v36 = vpop.f32.mrf.mxu2  ;;  %v7063_v10 = vunpack.c.l.b16 %v7035_v45  ;;  %v7062_v25 = vunpack.c.l.b16 %v7034_v2  ;;  %v12129_v2 = vld [vmem:[%s9625_s26 + $0x8] sm:$0xff]  }
 0x5b0   : > { %v12111_v62 = vadd.f32 %v11972_v50, %v6966_v36  ;;  %v7032_v36 = vmul.f32 %v7029_v35, %v7009_v41 }
 0x5b1   : > { %v7067_v8 = vsel %vm7066_vm8, %v7063_v10, %v7062_v25  ;;  %v12132_v10 = vld [vmem:[%s9625_s26 + $0x10] sm:$0xff]  }
 0x5b2   : > { %v7015_v55 = vadd.f32 %v7014_v15, %v12111_v62  ;;  %v7036_v53 = vpack.c.bf16 %v7032_v36, %v7032_v36 }
 0x5b4   : > { %v7064_v28 = vunpack.c.l.b16 %v7036_v53  ;;  %v12126_v53 = vld [vmem:[%s9625_s26] sm:$0xff]  }
 0x5b6   : > { %v7069_v43 = vsel %vm7068_vm9, %v7064_v28, %v7067_v8  ;;  %v12140_v8 = vld [vmem:[%s9625_s26 + $0x20] sm:$0xff]  }
 0x5b7   : > { %v6968_v60 = vpop.f32.mrf.mxu2 }
 0x5b8   : > { %v12116_v30 = vadd.f32 %v11972_v50, %v6968_v60 }
 0x5ba   : > { %v7016_v51 = vadd.f32 %v7015_v55, %v12116_v30 }
 0x5bc   : > { %v7017_v54 = vrot.slane %v7016_v51, 4 }
 0x5be   : > { %v7018_v6 = vadd.f32 %v7017_v54, %v7016_v51 }
 0x5c0   : > { %v7019_v47 = vrot.slane %v7018_v6, 2 }
 0x5c2   : > { %v7020_v23 = vadd.f32 %v7019_v47, %v7018_v6 }
 0x5c4   : > { %v7021_v50 = vrot.slane %v7020_v23, 1 }
 0x5c6   : > { %v7022_v16 = vadd.f32 %v7021_v50, %v7020_v23 }
 0x5c8   : > { %v7033_v7 = vmul.f32 %v7029_v35, %v7022_v16 }
 0x5ca   : > { %v7037_v15 = vpack.c.bf16 %v7033_v7, %v7033_v7  ;;  %v12135_v7 = vld [vmem:[%s9625_s26 + $0x18] sm:$0xff]  }
 0x5cc   : > { %v7065_v37 = vunpack.c.l.b16 %v7037_v15 }
 0x5ce   : > { %v7071_v11 = vsel %vm7070_vm10, %v7065_v37, %v7069_v43  ;;  %v12143_v37 = vld [vmem:[%s9625_s26 + $0x28] sm:$0xff]  }
 0x5cf   : > { %v7072_v60 = vpack.c.b16 %v7071_v11, %v7071_v11 }
 0x5d1   : > { %7130 = vmatmul.bf16.vlgmr.msrb.gmra.mxu3 %v7072_v60 }
 0x654   : > { %v7131_v55 = vpop.f32.mrf.mxu3 }
 0x655   : > { %v7132_v52 = vadd.f32 %v9225_v48, %v7131_v55  ;;  %v12148_v48 = vld [vmem:[%s9625_s26 + $0x30] sm:$0xff]   ;;  %v12151_v55 = vld [vmem:[%s9625_s26 + $0x38] sm:$0xff]  }
 0x657   : > { %v7135_v22 = vmax.f32 %v7132_v52, 0.0 }
 0x659   : > { %v7136_v51 = vpack.c.bf16 %v7135_v22, %v7135_v22 }
 0x65b   : > { %8673 = vmatmul.msk.bf16.vlgmr.msra.gmra.mxu3 %vm7142_vm11, %v7136_v51 }
 0x65c   : > { %v7133_v61 = vpop.f32.mrf.mxu3 }
 0x6de   : > { %v7159_v54 = vpop.f32.mrf.mxu3 }
 0x6df   : > { %v7160_v41 = vadd.f32 %v9226_v31, %v7159_v54  ;;  %v12157_v31 = vld [vmem:[%s9625_s26 + $0x40] sm:$0xff]  }
 0x6e1   : > { %v8674_v33 = vmul.f32 -1.442695, %v7160_v41 }
 0x6e3   : > { %9229 = vpow2.f32 %v8674_v33 }
 0x6e6   : > { %v7161_v6 = vpop.f32.mrf.mxu3 }
 0x6e7   : > { %v12188_v6 = vld [vmem:[%s9625_s26 + $0x70] sm:$0xff]  }
 0x6e8   : > { %v9000_v54 = vunpack.c.h.bf16 %v12188_v6 }
 0x6e9   : > { %v9230_v35 = vpop.eup %9229 }
 0x6ea   : > { %v7166_v13 = vadd.f32 1.0, %v9230_v35  ;;  %v12164_v35 = vld [vmem:[%s9625_s26 + $0x48] sm:$0xff]  }
 0x6ec   : > { %9231 = vrcp.f32 %v7166_v13  ;;  %v7178_v23 = vand.u32 2147483648, %v7166_v13  ;;  %v7176_v50 = vand.u32 2147483647, %v7166_v13  ;;  %vm7172_vm13 = vweird.f32 %v7166_v13 }
 0x6ee   : > { %v7179_v28 = vor.u32 1.1754944e-38, %v7178_v23  ;;  %vm7177_vm15 = vcmp.eq.f32.partialorder %v7176_v50, 8.507059e+37  ;;  %v12171_v23 = vld [vmem:[%s9625_s26 + $0x50] sm:$0xff]  }
 0x6f2   : > { %v9232_v47 = vpop.eup %9231 }
 0x6f3   : > { %v7168_v36 = vmul.f32 %v9232_v47, %v7166_v13  ;;  %vm7173_vm12 = vweird.f32 %v9232_v47  ;;  %v12183_v13 = vld [vmem:[%s9625_s26 + $0x68] sm:$0xff]  }
 0x6f4   : > { %vm7174_vm14 = vmor %vm7172_vm13, %vm7173_vm12 }
 0x6f5   : > { %v7169_v38 = vsub.f32 1.0, %v7168_v36 }
 0x6f7   : > { %v7170_v45 = vmul.f32 %v9232_v47, %v7169_v38 }
 0x6f9   : > { %v7171_v16 = vadd.f32 %v9232_v47, %v7170_v45  ;;  %v12174_v45 = vld [vmem:[%s9625_s26 + $0x58] sm:$0xff]  }
 0x6fb   : > { %v7175_v43 = vsel %vm7174_vm14, %v9232_v47, %v7171_v16 }
 0x6fc   : > { %v7180_v52 = vsel %vm7177_vm15, %v7179_v28, %v7175_v43  ;;  %v12180_v43 = vld [vmem:[%s9625_s26 + $0x60] sm:$0xff]   ;;  %v12194_v28 = vld [vmem:[%s9625_s26 + $0x78] sm:$0xff]   ;;  %s12303_s26 = scalar_lea.vmem [#allocation12], %s7548_s19  ;;  %s8940_s19 = sshll.u32 %s9522_s21, 7 }
 0x6fd   : > { %v7247_v47 = vrot.slane %v7180_v52, 1  ;;  %v7248_v33 = vrot.slane %v7180_v52, 2  ;;  %v7249_v41 = vrot.slane %v7180_v52, 3  ;;  %v7250_v61 = vperm.slane %v7180_v52, 0  ;;  %s7431_s28 = scalar_lea.hbm %s12375_s11, %s8940_s19  ;;  %s7432_s22 = sshll.u32 %s12303_s26, 4  ;;  %s7433_s22 = int_to_ptr.vmem [resolvable:$true] %s7432_s22 }
 0x6fe   : > { %s7434_s23 = sshll.u32 %s7431_s28, 4  ;;  %s7435_s23 = int_to_ptr.hbm [resolvable:$true] %s7434_s23 }
 0x6ff   : > { %v7251_v50 = vperm.slane %v7247_v47, 0  ;;  %v7252_v52 = vperm.slane %v7248_v33, 0  ;;  %v7253_v25 = vperm.slane %v7249_v41, 0  ;;  %v7258_v51 = vmul.f32 %v7250_v61, %v12004_v24  ;;  %s9370_s29 = sshra.s32 %s7435_s23, 4  ;;  %s9371_s29 = int_to_ptr.hbm [resolvable:$true] %s9370_s29 }
 0x700   : > { %v7259_v22 = vmul.f32 %v7250_v61, %v11986_v3  ;;  %v7260_v36 = vmul.f32 %v7250_v61, %v12008_v26  ;;  %v7261_v38 = vmul.f32 %v7250_v61, %v12024_v27  ;;  %v7262_v60 = vmul.f32 %v7250_v61, %v12037_v4  ;;  %s9372_s27 = scalar_lea.hbm %s9371_s29, 128  ;;  %p9377_p11 = scmp.lt.s32.totalorder %s9371_s29, %s12375_s11 }
 0x701   : > { %v7263_v11 = vmul.f32 %v7250_v61, %v12050_v34  ;;  %v7264_v47 = vmul.f32 %v7250_v61, %v12063_v14  ;;  %v7265_v16 = vmul.f32 %v7250_v61, %v12076_v40  ;;  %v7266_v15 = vmul.f32 %v7251_v50, %v11990_v63  ;;  %p9373_p1 = scmp.ne.s32.totalorder %s9371_s29, %s9372_s27  ;;  %p9378_p9 = scmp.lt.s32.totalorder %s9376_s15, %s9372_s27 }
 0x702   : > { %v7267_v41 = vmul.f32 %v7251_v50, %v11979_v56  ;;  %v7268_v24 = vmul.f32 %v7251_v50, %v11994_v57  ;;  %v7269_v3 = vmul.f32 %v7251_v50, %v12013_v44  ;;  %v7270_v26 = vmul.f32 %v7251_v50, %v12028_v1 }
 0x703   : > { %v7271_v27 = vmul.f32 %v7251_v50, %v12041_v18  ;;  %v7272_v4 = vmul.f32 %v7251_v50, %v12054_v0  ;;  %v7273_v34 = vmul.f32 %v7251_v50, %v12067_v59  ;;  %v7274_v14 = vmul.f32 %v7252_v52, %v11997_v49  ;;  %p9374_p4 = pnand %p9373_p1, %p9589_p3  ;;  %p9379_p2 = por %p9378_p9, %p9377_p11 }
 0x704   : > { %v7275_v40 = vmul.f32 %v7252_v52, %v11982_v9  ;;  %v7276_v63 = vmul.f32 %v7252_v52, %v12000_v5  ;;  %v7277_v56 = vmul.f32 %v7252_v52, %v12018_v46  ;;  %v7278_v57 = vmul.f32 %v7252_v52, %v12032_v58 }
 0x705   : > { %v7279_v44 = vmul.f32 %v7252_v52, %v12045_v20  ;;  %v7280_v1 = vmul.f32 %v7252_v52, %v12058_v21  ;;  %v7281_v18 = vmul.f32 %v7252_v52, %v12071_v12  ;;  %v7282_v0 = vmul.f32 %v7253_v25, %v12088_v42  ;;  %p9375_p8 = pneg %p9374_p4 }
 0x706   : > { %v7283_v59 = vmul.f32 %v7253_v25, %v12085_v19  ;;  %v7284_v49 = vmul.f32 %v7253_v25, %v12091_v32  ;;  %v7285_v9 = vmul.f32 %v7253_v25, %v12096_v29  ;;  %v7286_v5 = vmul.f32 %v7253_v25, %v12100_v17 }
 0x707   : > { %v7287_v46 = vmul.f32 %v7253_v25, %v12107_v39  ;;  %v7288_v58 = vmul.f32 %v7253_v25, %v12111_v62  ;;  %v12237_v20 = vmul.f32 %v7253_v25, %v12116_v30  ;;  %v12874_v21 = vunpack.c.l.bf16 %v12126_v53  ;;  %p9380_p10 = pnand %p9379_p2, %p9375_p8 }
 0x708   : > { %v12875_v42 = vunpack.c.h.bf16 %v12126_v53  ;;  %v12876_v19 = vunpack.c.l.bf16 %v12129_v2  ;;  %v12877_v29 = vunpack.c.h.bf16 %v12129_v2  ;;  %v12878_v17 = vunpack.c.l.bf16 %v12132_v10 }
 0x709   : > { %v7290_v12 = vadd.f32 %v12874_v21, %v7258_v51  ;;  %v12879_v62 = vunpack.c.h.bf16 %v12132_v10  ;;  %v12880_v30 = vunpack.c.l.bf16 %v12135_v7  ;;  %v12881_v51 = vunpack.c.h.bf16 %v12135_v7 }
 0x70a   : > { %v7291_v61 = vadd.f32 %v12875_v42, %v7259_v22  ;;  %v7292_v32 = vadd.f32 %v12876_v19, %v7260_v36  ;;  %v7293_v33 = vadd.f32 %v12877_v29, %v7261_v38  ;;  %v7294_v39 = vadd.f32 %v12878_v17, %v7262_v60 }
 0x70b   : > { %v7295_v50 = vadd.f32 %v12879_v62, %v7263_v11  ;;  %v7296_v25 = vadd.f32 %v12880_v30, %v7264_v47  ;;  %v7297_v52 = vadd.f32 %v12881_v51, %v7265_v16  ;;  %v12882_v53 = vunpack.c.l.bf16 %v12140_v8 }
 0x70c   : > { %v12883_v36 = vunpack.c.h.bf16 %v12140_v8  ;;  %v12884_v2 = vunpack.c.l.bf16 %v12143_v37  ;;  %v12885_v60 = vunpack.c.h.bf16 %v12143_v37  ;;  %v12886_v10 = vunpack.c.l.bf16 %v12148_v48 }
 0x70d   : > { %v7298_v22 = vadd.f32 %v12882_v53, %v7266_v15  ;;  %v12887_v47 = vunpack.c.h.bf16 %v12148_v48  ;;  %v12888_v7 = vunpack.c.l.bf16 %v12151_v55  ;;  %v12889_v15 = vunpack.c.h.bf16 %v12151_v55 }
 0x70e   : > { %v7299_v21 = vadd.f32 %v12883_v36, %v7267_v41  ;;  %v7300_v38 = vadd.f32 %v12884_v2, %v7268_v24  ;;  %v7301_v42 = vadd.f32 %v12885_v60, %v7269_v3  ;;  %v7302_v11 = vadd.f32 %v12886_v10, %v7270_v26 }
 0x70f   : > { %v7303_v19 = vadd.f32 %v12887_v47, %v7271_v27  ;;  %v7304_v16 = vadd.f32 %v12888_v7, %v7272_v4  ;;  %v7305_v29 = vadd.f32 %v12889_v15, %v7273_v34  ;;  %v12890_v8 = vunpack.c.l.bf16 %v12157_v31 }
 0x710   : > { %v12891_v24 = vunpack.c.h.bf16 %v12157_v31  ;;  %v12892_v37 = vunpack.c.l.bf16 %v12164_v35  ;;  %v12893_v26 = vunpack.c.h.bf16 %v12164_v35  ;;  %v12894_v48 = vunpack.c.l.bf16 %v12171_v23 }
 0x711   : > { %v7306_v41 = vadd.f32 %v12890_v8, %v7274_v14  ;;  %v12895_v4 = vunpack.c.h.bf16 %v12171_v23  ;;  %v12896_v55 = vunpack.c.l.bf16 %v12174_v45  ;;  %v12897_v14 = vunpack.c.h.bf16 %v12174_v45 }
 0x712   : > { %v7307_v17 = vadd.f32 %v12891_v24, %v7275_v40  ;;  %v7308_v3 = vadd.f32 %v12892_v37, %v7276_v63  ;;  %v7309_v62 = vadd.f32 %v12893_v26, %v7277_v56  ;;  %v7310_v27 = vadd.f32 %v12894_v48, %v7278_v57 }
 0x713   : > { %v7311_v30 = vadd.f32 %v12895_v4, %v7279_v44  ;;  %v12285_v34 = vadd.f32 %v12896_v55, %v7280_v1  ;;  %v12289_v31 = vadd.f32 %v12897_v14, %v7281_v18  ;;  %v7322_v40 = vmax.f32 %v7290_v12, 0.0 }
 0x714   : > { %v7323_v51 = vmax.f32 %v7291_v61, 0.0  ;;  %v7324_v63 = vmax.f32 %v7292_v32, 0.0  ;;  %v7325_v53 = vmax.f32 %v7293_v33, 0.0  ;;  %v7326_v35 = vmax.f32 %v7294_v39, 0.0 }
 0x715   : > { %v7327_v56 = vmax.f32 %v7295_v50, 0.0  ;;  %v7328_v36 = vmax.f32 %v7296_v25, 0.0  ;;  %v7329_v2 = vmax.f32 %v7297_v52, 0.0  ;;  %v12898_v57 = vunpack.c.l.bf16 %v12180_v43 }
 0x716   : > { %v12899_v44 = vunpack.c.h.bf16 %v12180_v43  ;;  %v7330_v1 = vmax.f32 %v7298_v22, 0.0  ;;  %v7331_v10 = vmax.f32 %v7299_v21, 0.0  ;;  %v12900_v45 = vunpack.c.l.bf16 %v12183_v13 }
 0x717   : > { %v7314_v23 = vadd.f32 %v12898_v57, %v7282_v0  ;;  %v12901_v12 = vunpack.c.h.bf16 %v12183_v13  ;;  %v7332_v32 = vmax.f32 %v7300_v38, 0.0  ;;  %v7333_v33 = vmax.f32 %v7301_v42, 0.0 }
 0x718   : > { %v7315_v60 = vadd.f32 %v12899_v44, %v7283_v59  ;;  %v7316_v18 = vadd.f32 %v12900_v45, %v7284_v49  ;;  %v7334_v39 = vmax.f32 %v7302_v11, 0.0  ;;  %v7335_v50 = vmax.f32 %v7303_v19, 0.0 }
 0x719   : > { %v7317_v61 = vadd.f32 %v12901_v12, %v7285_v9  ;;  %v7336_v25 = vmax.f32 %v7304_v16, 0.0  ;;  %v9008_v52 = vpack.c.bf16 %v7323_v51, %v7322_v40  ;;  %v7337_v47 = vmax.f32 %v7305_v29, 0.0 }
 0x71a   : > { %v9013_v0 = vpack.c.bf16 %v7325_v53, %v7324_v63  ;;  %v9018_v7 = vpack.c.bf16 %v7327_v56, %v7326_v35  ;;  %v9023_v43 = vpack.c.bf16 %v7329_v2, %v7328_v36  ;;  %v12902_v59 = vunpack.c.l.bf16 %v12188_v6 }
 0x71b   : > { %v7338_v21 = vmax.f32 %v7306_v41, 0.0  ;;  %v7339_v15 = vmax.f32 %v7307_v17, 0.0  ;;  %9009 = vst [vmem:[%s12303_s26] sm:$0xff] %v9008_v52   ;;  %v9028_v13 = vpack.c.bf16 %v7331_v10, %v7330_v1  ;;  %v7319_v49 = vadd.f32 %v9000_v54, %v7287_v46 }
 0x71c   : > { %v7318_v22 = vadd.f32 %v12902_v59, %v7286_v5  ;;  %v7340_v9 = vmax.f32 %v7308_v3, 0.0  ;;  %v7341_v38 = vmax.f32 %v7309_v62, 0.0  ;;  %9100 = vst [vmem:[%s12303_s26 + $0x8] sm:$0xff] %v9013_v0   ;;  %v9033_v5 = vpack.c.bf16 %v7333_v33, %v7332_v32 }
 0x71d   : > { %v12903_v42 = vunpack.c.l.bf16 %v12194_v28  ;;  %v7342_v19 = vmax.f32 %v7310_v27, 0.0  ;;  %v7343_v16 = vmax.f32 %v7311_v30, 0.0  ;;  %9101 = vst [vmem:[%s12303_s26 + $0x10] sm:$0xff] %v9018_v7   ;;  %v9038_v29 = vpack.c.bf16 %v7335_v50, %v7334_v39 }
 0x71e   : > { %v12904_v8 = vunpack.c.h.bf16 %v12194_v28  ;;  %v7344_v54 = vmax.f32 %v12285_v34, 0.0  ;;  %v7345_v6 = vmax.f32 %v12289_v31, 0.0  ;;  %9102 = vst [vmem:[%s12303_s26 + $0x18] sm:$0xff] %v9023_v43   ;;  %v9043_v46 = vpack.c.bf16 %v7337_v47, %v7336_v25 }
 0x71f   : > { %v7320_v11 = vadd.f32 %v12903_v42, %v7288_v58  ;;  %v7346_v24 = vmax.f32 %v7314_v23, 0.0  ;;  %v7347_v58 = vmax.f32 %v7315_v60, 0.0  ;;  %9103 = vst [vmem:[%s12303_s26 + $0x20] sm:$0xff] %v9028_v13   ;;  %v9048_v17 = vpack.c.bf16 %v7339_v15, %v7338_v21 }
 0x720   : > { %v7321_v41 = vadd.f32 %v12904_v8, %v12237_v20  ;;  %v7348_v37 = vmax.f32 %v7316_v18, 0.0  ;;  %v7349_v3 = vmax.f32 %v7317_v61, 0.0  ;;  %9104 = vst [vmem:[%s12303_s26 + $0x28] sm:$0xff] %v9033_v5   ;;  %v9053_v28 = vpack.c.bf16 %v7341_v38, %v7340_v9 }
 0x721   : > { %v7350_v20 = vmax.f32 %v7318_v22, 0.0  ;;  %v7351_v26 = vmax.f32 %v7319_v49, 0.0  ;;  %9105 = vst [vmem:[%s12303_s26 + $0x30] sm:$0xff] %v9038_v29   ;;  %v9058_v62 = vpack.c.bf16 %v7343_v16, %v7342_v19  ;;  %v7352_v48 = vmax.f32 %v7320_v11, 0.0 }
 0x722   : > { %v7353_v27 = vmax.f32 %v7321_v41, 0.0  ;;  %9106 = vst [vmem:[%s12303_s26 + $0x38] sm:$0xff] %v9043_v46   ;;  %v9063_v4 = vpack.c.bf16 %v7345_v6, %v7344_v54  ;;  %v9068_v30 = vpack.c.bf16 %v7347_v58, %v7346_v24  ;;  %v9073_v55 = vpack.c.bf16 %v7349_v3, %v7348_v37 }
 0x723   : > { %9107 = vst [vmem:[%s12303_s26 + $0x40] sm:$0xff] %v9048_v17   ;;  %v9078_v34 = vpack.c.bf16 %v7351_v26, %v7350_v20 }
 0x724   : > { %9108 = vst [vmem:[%s12303_s26 + $0x48] sm:$0xff] %v9053_v28   ;;  %v9083_v14 = vpack.c.bf16 %v7353_v27, %v7352_v48 }
 0x725   : > { %9109 = vst [vmem:[%s12303_s26 + $0x50] sm:$0xff] %v9058_v62  }
 0x726   : > { %9110 = vst [vmem:[%s12303_s26 + $0x58] sm:$0xff] %v9063_v4  }
 0x727   : > { %9111 = vst [vmem:[%s12303_s26 + $0x60] sm:$0xff] %v9068_v30  }
 0x728   : > { %9112 = vst [vmem:[%s12303_s26 + $0x68] sm:$0xff] %v9073_v55  }
 0x729   : > { %9113 = vst [vmem:[%s12303_s26 + $0x70] sm:$0xff] %v9078_v34  }
 0x72a   : > { %9114 = vst [vmem:[%s12303_s26 + $0x78] sm:$0xff] %v9083_v14  }
 0x72b   : > { %9383 = shalt.err (!%p9380_p10)
}
 0x72c   : > { %s9439_s16 = smov 64   ;;  %s9440_s26 = smov 4  }
 0x72d   : > { %9153 = dma.vmem_to_hbm [thread:$0]  (%p9589_p3), %s7433_s22, 2048, %s7435_s23, %s7419_s30, %s9439_s16, %s9439_s16, %s9440_s26  }
 0x72e PF: > { %s7449_s19 = sand.u32 1, %s9418_s17   ;;  %p12905_p12 = scmp.ge.s32.totalorder %s9430_s20, 2 }
 0x72f   : > { %s7450_s6 = scalar_lea.sflag [#allocation6], %s7449_s19 }
 0x730   : > { %p9170_p13 = pnand %p12905_p12, %p9536_p6 }
 0x732   : > { %p9171_p0 = pneg %p9170_p13 }
 0x734   : > { %9413 = dma.done.wait (%p9171_p0), %s7450_s6, 2048  }
 0x735   : > { %9415 = vsyncadd (%p9171_p0), %s7450_s6, 4294965248  ;;  %s12906_s21 = sld [smem:[#allocation17_spill]]  ;;  %p26_p5 = scmp.ge.s32.totalorder %s9574_s3, 4  }
 0x736   : > { %s12907_s19 = sld [smem:[#allocation18_spill]]  ;;  %s12908_s17 = smov %s9422_s18 }
 0x737   : > { %s12910_s20 = smov %s9574_s3  ;;  %28 = sbr.rel (!%p26_p5) target bundleno = 11 (0xb), region = 124 }
 0x73b   : > { %s12909_s18 = smov %s12906_s21 }
 0x73c   :  { %7456 = vsyncpa [#allocation5], 1 }
 0x73d   :  { %7458 = vsyncpa [#allocation5 + $0x1], 1 }
 0x73e   :  { %7459 = vsyncpa [#allocation8], 1 }
 0x73f   :  { %7460 = vsyncpa [#allocation11], 1 }
 0x740   :  { %7461 = vsyncpa [#allocation6], 1 }
 0x741   :  { %7463 = vsyncpa [#allocation6 + $0x1], 1 }

</bundles_post_ra>
